<compile_context>
chip_gen: v7x
topology: tpu7x:2x2x1
jax: 0.10.0
libtpu: 0.0.40
codegen_flags: <defaults>
</compile_context>

<pallas_src>
import math

import numpy as np

import jax
import jax.numpy as jnp
from jax.experimental import pallas as pl
from jax.experimental.pallas import tpu as pltpu

NEG_SLOPE = 0.01  # torch.nn.LeakyReLU default negative_slope


def _leaky(x):
    return jnp.where(x >= 0, x, NEG_SLOPE * x)


def _vmem_spec():
    return pl.BlockSpec(memory_space=pltpu.MemorySpace.VMEM)


# ----------------------------------------------------------------------------
# Fused conv (stride 2, valid) + LeakyReLU + MaxPool2d(2,2) kernel.
#
# Input is passed as four W-phase arrays: phase[p][b, c, h, t] = x[b, c, h, 4t+p].
# For pooled output (pr, pc) the conv taps are x[c, 4pr+2dh+kh, 4pc+2dw+kw],
# and 4pc + 2dw + kw = 4*(pc + a) + p with q = kw + 2dw, p = q % 4, a = q // 4,
# so every patch row is the contiguous slice phase[p][c, 4pr+2dh : +K, a : a+PW].
# Patch rows are stacked in (c, kw, kh) order; the weight matrix is permuted to
# match on the host side.
# ----------------------------------------------------------------------------
def _make_conv_pool_kernel(C, K, PW, OC, rows_per_block):
    def kernel(p0_ref, p1_ref, p2_ref, p3_ref, w_ref, b_ref, o_ref):
        phases = (p0_ref, p1_ref, p2_ref, p3_ref)
        wmat = w_ref[...]          # [OCp, C*K*K]
        bias = b_ref[...]          # [OCp, 1]
        rblk = pl.program_id(1)
        for j in range(rows_per_block):
            pr = rows_per_block * rblk + j            # pooled output row
            acc = None
            for dh in (0, 1):                         # conv row inside 2x2 pool window
                row0 = pl.multiple_of(4 * pr + 2 * dh, 2)
                for dw in (0, 1):                     # conv col parity inside window
                    cols = []
                    for c in range(C):
                        for kw in range(K):
                            q = kw + 2 * dw
                            p, a = q % 4, q // 4
                            # [K, PW] block: sublanes are kh, lanes are pooled cols.
                            cols.append(
                                phases[p][0, c, pl.ds(row0, K), pl.ds(a, PW)]
                            )
                    p_t = jnp.concatenate(cols, axis=0)          # [C*K*K, PW]
                    s = jnp.dot(wmat, p_t, preferred_element_type=jnp.float32)
                    acc = s if acc is None else jnp.maximum(acc, s)  # fused 2x2 max
            out = acc + bias                           # bias after max (constant shift)
            out = jnp.where(out >= 0.0, out, NEG_SLOPE * out)        # LeakyReLU
            o_ref[0, j, :, :] = out[:OC, :]
    return kernel


def conv_leaky_pool(x, weight, bias, rows_per_block):
    """Fused Conv2d(k=8, s=2, valid) + LeakyReLU + MaxPool2d(2,2).

    x: [B, C, H, W] (NCHW), weight: [OC, C, K, K], bias: [OC]
    returns pooled activations laid out as [B, PH, OC, PW].
    """
    B, C, H, W = x.shape
    OC, _, K, _ = weight.shape
    OH = (H - K) // 2 + 1
    OW = (W - K) // 2 + 1
    PH, PW = OH // 2, OW // 2
    assert W % 4 == 0 and PH % rows_per_block == 0
    WP = W // 4
    OCp = ((OC + 7) // 8) * 8
    ckk = C * K * K

    # 4-way phase split along W (cheap: total bytes == input bytes, no blow-up).
    phases = tuple(x[:, :, :, p::4] for p in range(4))

    # Kernel builds patch rows in (c, kw, kh) order -> permute weights to match;
    # pad OC up to a sublane multiple.
    wmat = weight.transpose(0, 1, 3, 2).reshape(OC, ckk)
    wmat = jnp.pad(wmat, ((0, OCp - OC), (0, 0)))
    bcol = jnp.pad(bias, (0, OCp - OC)).reshape(OCp, 1)

    kernel = _make_conv_pool_kernel(C, K, PW, OC, rows_per_block)
    grid = (B, PH // rows_per_block)
    phase_spec = pl.BlockSpec((1, C, H, WP), lambda b, r: (b, 0, 0, 0))

    flops = 2 * B * PH * PW * 4 * OCp * ckk
    bytes_accessed = 4 * (x.size + wmat.size + OCp + B * PH * OC * PW)

    return pl.pallas_call(
        kernel,
        out_shape=jax.ShapeDtypeStruct((B, PH, OC, PW), jnp.float32),
        grid=grid,
        in_specs=[phase_spec] * 4
        + [
            pl.BlockSpec((OCp, ckk), lambda b, r: (0, 0)),
            pl.BlockSpec((OCp, 1), lambda b, r: (0, 0)),
        ],
        out_specs=pl.BlockSpec(
            (1, rows_per_block, OC, PW), lambda b, r: (b, r, 0, 0)
        ),
        compiler_params=pltpu.CompilerParams(
            dimension_semantics=("parallel", "parallel"),
            vmem_limit_bytes=32 * 1024 * 1024,
        ),
        cost_estimate=pl.CostEstimate(
            flops=flops, transcendentals=0, bytes_accessed=bytes_accessed
        ),
    )(*phases, wmat, bcol)


# ----------------------------------------------------------------------------
# Fused MLP head: fc1 + LeakyReLU -> fc2 + LeakyReLU -> fc3.
# Hidden/output widths zero-padded to 128 so every matmul result is lane-dense.
# ----------------------------------------------------------------------------
def _mlp_kernel(x_ref, w1_ref, b1_ref, w2_ref, b2_ref, w3_ref, b3_ref, o_ref):
    h = _leaky(
        jnp.dot(x_ref[...], w1_ref[...], preferred_element_type=jnp.float32)
        + b1_ref[...]
    )
    h = _leaky(
        jnp.dot(h, w2_ref[...], preferred_element_type=jnp.float32) + b2_ref[...]
    )
    o_ref[...] = (
        jnp.dot(h, w3_ref[...], preferred_element_type=jnp.float32) + b3_ref[...]
    )


def mlp_head(x, w1, b1, w2, b2, w3, b3):
    PAD = 128
    n_out = w3.shape[1]
    w1p = jnp.pad(w1, ((0, 0), (0, PAD - w1.shape[1])))
    b1p = jnp.pad(b1, (0, PAD - b1.shape[0])).reshape(1, PAD)
    w2p = jnp.pad(w2, ((0, PAD - w2.shape[0]), (0, PAD - w2.shape[1])))
    b2p = jnp.pad(b2, (0, PAD - b2.shape[0])).reshape(1, PAD)
    w3p = jnp.pad(w3, ((0, PAD - w3.shape[0]), (0, PAD - w3.shape[1])))
    b3p = jnp.pad(b3, (0, PAD - b3.shape[0])).reshape(1, PAD)
    out = pl.pallas_call(
        _mlp_kernel,
        out_shape=jax.ShapeDtypeStruct((x.shape[0], PAD), jnp.float32),
        in_specs=[_vmem_spec()] * 7,
        out_specs=_vmem_spec(),
    )(x, w1p, b1p, w2p, b2p, w3p, b3p)
    return out[:, :n_out]


# ----------------------------------------------------------------------------
# Parameters (deterministic, PyTorch-default-like uniform init).
# fc weights stored [in, out] (transpose of torch.nn.Linear's [out, in]).
# ----------------------------------------------------------------------------
def init_params(key):
    def uniform(key, shape, fan_in):
        bound = 1.0 / math.sqrt(fan_in)
        return jax.random.uniform(
            key, shape, jnp.float32, minval=-bound, maxval=bound
        )

    ks = jax.random.split(key, 10)
    w4 = 5  # spatial size after the conv/pool stack for a 120x120 input
    return {
        "conv1_w": uniform(ks[0], (6, 3, 8, 8), 3 * 8 * 8),
        "conv1_b": uniform(ks[1], (6,), 3 * 8 * 8),
        "conv2_w": uniform(ks[2], (16, 6, 8, 8), 6 * 8 * 8),
        "conv2_b": uniform(ks[3], (16,), 6 * 8 * 8),
        "fc1_w": uniform(ks[4], (16 * w4 * w4, 120), 16 * w4 * w4),
        "fc1_b": uniform(ks[5], (120,), 16 * w4 * w4),
        "fc2_w": uniform(ks[6], (120, 60), 120),
        "fc2_b": uniform(ks[7], (60,), 120),
        "fc3_w": uniform(ks[8], (60, 3), 60),
        "fc3_b": uniform(ks[9], (3,), 60),
    }


# ----------------------------------------------------------------------------
# Full forward pass (mirrors Classifyer_CNN.forward)
# ----------------------------------------------------------------------------
def classifyer_cnn_forward(params, x):
    # x: [B, 3, 120, 120] float32 (NCHW)
    a1 = conv_leaky_pool(
        x, params["conv1_w"], params["conv1_b"], rows_per_block=4
    )  # [B, 28, 6, 28]
    a2 = conv_leaky_pool(
        a1.transpose(0, 2, 1, 3),  # -> NCHW [B, 6, 28, 28] (tiny, ~19 KB)
        params["conv2_w"],
        params["conv2_b"],
        rows_per_block=1,
    )  # [B, 5, 16, 5]
    B = x.shape[0]
    # NCHW flatten order (c, h, w) matches torch's x.view(-1, 16*5*5)
    flat = a2.transpose(0, 2, 1, 3).reshape(B, -1)  # [B, 400]
    return mlp_head(
        flat,
        params["fc1_w"], params["fc1_b"],
        params["fc2_w"], params["fc2_b"],
        params["fc3_w"], params["fc3_b"],
    )


# ----------------------------------------------------------------------------
# Pure-JAX reference (for in-script correctness check)
# ----------------------------------------------------------------------------
def reference_forward(params, x):
    hp = jax.lax.Precision.HIGHEST

    def conv(v, w, b):
        y = jax.lax.conv_general_dilated(
            v, w, window_strides=(2, 2), padding="VALID",
            dimension_numbers=("NCHW", "OIHW", "NCHW"), precision=hp,
        )
        return y + b.reshape(1, -1, 1, 1)

    def pool(v):
        return jax.lax.reduce_window(
            v, jnp.array(-jnp.inf, dtype=v.dtype), jax.lax.max,
            (1, 1, 2, 2), (1, 1, 2, 2), "VALID",
        )

    h = pool(_leaky(conv(x, params["conv1_w"], params["conv1_b"])))
    h = pool(_leaky(conv(h, params["conv2_w"], params["conv2_b"])))
    h = h.reshape(x.shape[0], -1)
    h = _leaky(jnp.dot(h, params["fc1_w"], precision=hp) + params["fc1_b"])
    h = _leaky(jnp.dot(h, params["fc2_w"], precision=hp) + params["fc2_b"])
    return jnp.dot(h, params["fc3_w"], precision=hp) + params["fc3_b"]


if __name__ == "__main__":
    key = jax.random.PRNGKey(0)
    pkey, xkey = jax.random.split(key)
    params = init_params(pkey)
    x = jax.random.normal(xkey, (2, 3, 120, 120), dtype=jnp.float32)

    out = jax.jit(classifyer_cnn_forward)(params, x)
    out = jax.block_until_ready(out)
    assert out.shape == (2, 3), out.shape
    assert out.dtype == jnp.float32

    ref = jax.block_until_ready(jax.jit(reference_forward)(params, x))
    np.testing.assert_allclose(np.asarray(out), np.asarray(ref), rtol=2e-2, atol=2e-2)

    print("KERNEL_OK")
</pallas_src>

<mosaic_0001>
module attributes {stable_mosaic.version = 11 : i64} {
  func.func @kernel(%arg0: i32, %arg1: i32, %arg2: memref<1x3x120x30xf32, #tpu.memory_space<vmem>>, %arg3: memref<1x3x120x30xf32, #tpu.memory_space<vmem>>, %arg4: memref<1x3x120x30xf32, #tpu.memory_space<vmem>>, %arg5: memref<1x3x120x30xf32, #tpu.memory_space<vmem>>, %arg6: memref<8x192xf32, #tpu.memory_space<vmem>>, %arg7: memref<8x1xf32, #tpu.memory_space<vmem>>, %arg8: memref<1x4x6x28xf32, #tpu.memory_space<vmem>>) attributes {dimension_semantics = [#tpu.dimension_semantics<parallel>, #tpu.dimension_semantics<parallel>], iteration_bounds = array<i64: 2, 7>, scalar_prefetch = 0 : i64, scratch_operands = 0 : i64, tpu.core_type = #tpu.core_type<tc>, window_params = [{transform_indices = @transform_0, window_bounds = array<i64: 1, 3, 120, 30>}, {transform_indices = @transform_1, window_bounds = array<i64: 1, 3, 120, 30>}, {transform_indices = @transform_2, window_bounds = array<i64: 1, 3, 120, 30>}, {transform_indices = @transform_3, window_bounds = array<i64: 1, 3, 120, 30>}, {pipeline_mode = #tpu.pipeline_mode<synchronous>, transform_indices = @transform_4, window_bounds = array<i64: 8, 192>}, {pipeline_mode = #tpu.pipeline_mode<synchronous>, transform_indices = @transform_5, window_bounds = array<i64: 8, 1>}, {transform_indices = @transform_6, window_bounds = array<i64: 1, 4, 6, 28>}]} {
    %c0 = arith.constant 0 : index
    %c0_0 = arith.constant 0 : index
    %0 = vector.load %arg6[%c0, %c0_0] : memref<8x192xf32, #tpu.memory_space<vmem>>, vector<8x192xf32>
    %c0_1 = arith.constant 0 : index
    %c0_2 = arith.constant 0 : index
    %1 = vector.load %arg7[%c0_1, %c0_2] : memref<8x1xf32, #tpu.memory_space<vmem>>, vector<8x1xf32>
    %c4_i32 = arith.constant 4 : i32
    %2 = arith.muli %c4_i32, %arg1 : i32
    %c0_i32 = arith.constant 0 : i32
    %3 = arith.addi %2, %c0_i32 : i32
    %c4_i32_3 = arith.constant 4 : i32
    %4 = arith.muli %c4_i32_3, %3 : i32
    %c0_i32_4 = arith.constant 0 : i32
    %5 = arith.addi %4, %c0_i32_4 : i32
    %6 = tpu.assume_multiple %5, 2 : i32
    %c0_5 = arith.constant 0 : index
    %c0_6 = arith.constant 0 : index
    %7 = arith.index_cast %6 : i32 to index
    %c0_7 = arith.constant 0 : index
    %8 = vector.load %arg2[%c0_5, %c0_6, %7, %c0_7] : memref<1x3x120x30xf32, #tpu.memory_space<vmem>>, vector<1x1x8x28xf32>
    %9 = vector.shape_cast %8 : vector<1x1x8x28xf32> to vector<8x28xf32>
    %c0_8 = arith.constant 0 : index
    %c0_9 = arith.constant 0 : index
    %10 = arith.index_cast %6 : i32 to index
    %c0_10 = arith.constant 0 : index
    %11 = vector.load %arg3[%c0_8, %c0_9, %10, %c0_10] : memref<1x3x120x30xf32, #tpu.memory_space<vmem>>, vector<1x1x8x28xf32>
    %12 = vector.shape_cast %11 : vector<1x1x8x28xf32> to vector<8x28xf32>
    %c0_11 = arith.constant 0 : index
    %c0_12 = arith.constant 0 : index
    %13 = arith.index_cast %6 : i32 to index
    %c0_13 = arith.constant 0 : index
    %14 = vector.load %arg4[%c0_11, %c0_12, %13, %c0_13] : memref<1x3x120x30xf32, #tpu.memory_space<vmem>>, vector<1x1x8x28xf32>
    %15 = vector.shape_cast %14 : vector<1x1x8x28xf32> to vector<8x28xf32>
    %c0_14 = arith.constant 0 : index
    %c0_15 = arith.constant 0 : index
    %16 = arith.index_cast %6 : i32 to index
    %c0_16 = arith.constant 0 : index
    %17 = vector.load %arg5[%c0_14, %c0_15, %16, %c0_16] : memref<1x3x120x30xf32, #tpu.memory_space<vmem>>, vector<1x1x8x28xf32>
    %18 = vector.shape_cast %17 : vector<1x1x8x28xf32> to vector<8x28xf32>
    %c0_17 = arith.constant 0 : index
    %c0_18 = arith.constant 0 : index
    %19 = arith.index_cast %6 : i32 to index
    %c1 = arith.constant 1 : index
    %20 = vector.load %arg2[%c0_17, %c0_18, %19, %c1] : memref<1x3x120x30xf32, #tpu.memory_space<vmem>>, vector<1x1x8x28xf32>
    %21 = vector.shape_cast %20 : vector<1x1x8x28xf32> to vector<8x28xf32>
    %c0_19 = arith.constant 0 : index
    %c0_20 = arith.constant 0 : index
    %22 = arith.index_cast %6 : i32 to index
    %c1_21 = arith.constant 1 : index
    %23 = vector.load %arg3[%c0_19, %c0_20, %22, %c1_21] : memref<1x3x120x30xf32, #tpu.memory_space<vmem>>, vector<1x1x8x28xf32>
    %24 = vector.shape_cast %23 : vector<1x1x8x28xf32> to vector<8x28xf32>
    %c0_22 = arith.constant 0 : index
    %c0_23 = arith.constant 0 : index
    %25 = arith.index_cast %6 : i32 to index
    %c1_24 = arith.constant 1 : index
    %26 = vector.load %arg4[%c0_22, %c0_23, %25, %c1_24] : memref<1x3x120x30xf32, #tpu.memory_space<vmem>>, vector<1x1x8x28xf32>
    %27 = vector.shape_cast %26 : vector<1x1x8x28xf32> to vector<8x28xf32>
    %c0_25 = arith.constant 0 : index
    %c0_26 = arith.constant 0 : index
    %28 = arith.index_cast %6 : i32 to index
    %c1_27 = arith.constant 1 : index
    %29 = vector.load %arg5[%c0_25, %c0_26, %28, %c1_27] : memref<1x3x120x30xf32, #tpu.memory_space<vmem>>, vector<1x1x8x28xf32>
    %30 = vector.shape_cast %29 : vector<1x1x8x28xf32> to vector<8x28xf32>
    %c0_28 = arith.constant 0 : index
    %c1_29 = arith.constant 1 : index
    %31 = arith.index_cast %6 : i32 to index
    %c0_30 = arith.constant 0 : index
    %32 = vector.load %arg2[%c0_28, %c1_29, %31, %c0_30] : memref<1x3x120x30xf32, #tpu.memory_space<vmem>>, vector<1x1x8x28xf32>
    %33 = vector.shape_cast %32 : vector<1x1x8x28xf32> to vector<8x28xf32>
    %c0_31 = arith.constant 0 : index
    %c1_32 = arith.constant 1 : index
    %34 = arith.index_cast %6 : i32 to index
    %c0_33 = arith.constant 0 : index
    %35 = vector.load %arg3[%c0_31, %c1_32, %34, %c0_33] : memref<1x3x120x30xf32, #tpu.memory_space<vmem>>, vector<1x1x8x28xf32>
    %36 = vector.shape_cast %35 : vector<1x1x8x28xf32> to vector<8x28xf32>
    %c0_34 = arith.constant 0 : index
    %c1_35 = arith.constant 1 : index
    %37 = arith.index_cast %6 : i32 to index
    %c0_36 = arith.constant 0 : index
    %38 = vector.load %arg4[%c0_34, %c1_35, %37, %c0_36] : memref<1x3x120x30xf32, #tpu.memory_space<vmem>>, vector<1x1x8x28xf32>
    %39 = vector.shape_cast %38 : vector<1x1x8x28xf32> to vector<8x28xf32>
    %c0_37 = arith.constant 0 : index
    %c1_38 = arith.constant 1 : index
    %40 = arith.index_cast %6 : i32 to index
    %c0_39 = arith.constant 0 : index
    %41 = vector.load %arg5[%c0_37, %c1_38, %40, %c0_39] : memref<1x3x120x30xf32, #tpu.memory_space<vmem>>, vector<1x1x8x28xf32>
    %42 = vector.shape_cast %41 : vector<1x1x8x28xf32> to vector<8x28xf32>
    %c0_40 = arith.constant 0 : index
    %c1_41 = arith.constant 1 : index
    %43 = arith.index_cast %6 : i32 to index
    %c1_42 = arith.constant 1 : index
    %44 = vector.load %arg2[%c0_40, %c1_41, %43, %c1_42] : memref<1x3x120x30xf32, #tpu.memory_space<vmem>>, vector<1x1x8x28xf32>
    %45 = vector.shape_cast %44 : vector<1x1x8x28xf32> to vector<8x28xf32>
    %c0_43 = arith.constant 0 : index
    %c1_44 = arith.constant 1 : index
    %46 = arith.index_cast %6 : i32 to index
    %c1_45 = arith.constant 1 : index
    %47 = vector.load %arg3[%c0_43, %c1_44, %46, %c1_45] : memref<1x3x120x30xf32, #tpu.memory_space<vmem>>, vector<1x1x8x28xf32>
    %48 = vector.shape_cast %47 : vector<1x1x8x28xf32> to vector<8x28xf32>
    %c0_46 = arith.constant 0 : index
    %c1_47 = arith.constant 1 : index
    %49 = arith.index_cast %6 : i32 to index
    %c1_48 = arith.constant 1 : index
    %50 = vector.load %arg4[%c0_46, %c1_47, %49, %c1_48] : memref<1x3x120x30xf32, #tpu.memory_space<vmem>>, vector<1x1x8x28xf32>
    %51 = vector.shape_cast %50 : vector<1x1x8x28xf32> to vector<8x28xf32>
    %c0_49 = arith.constant 0 : index
    %c1_50 = arith.constant 1 : index
    %52 = arith.index_cast %6 : i32 to index
    %c1_51 = arith.constant 1 : index
    %53 = vector.load %arg5[%c0_49, %c1_50, %52, %c1_51] : memref<1x3x120x30xf32, #tpu.memory_space<vmem>>, vector<1x1x8x28xf32>
    %54 = vector.shape_cast %53 : vector<1x1x8x28xf32> to vector<8x28xf32>
    %c0_52 = arith.constant 0 : index
    %c2 = arith.constant 2 : index
    %55 = arith.index_cast %6 : i32 to index
    %c0_53 = arith.constant 0 : index
    %56 = vector.load %arg2[%c0_52, %c2, %55, %c0_53] : memref<1x3x120x30xf32, #tpu.memory_space<vmem>>, vector<1x1x8x28xf32>
    %57 = vector.shape_cast %56 : vector<1x1x8x28xf32> to vector<8x28xf32>
    %c0_54 = arith.constant 0 : index
    %c2_55 = arith.constant 2 : index
    %58 = arith.index_cast %6 : i32 to index
    %c0_56 = arith.constant 0 : index
    %59 = vector.load %arg3[%c0_54, %c2_55, %58, %c0_56] : memref<1x3x120x30xf32, #tpu.memory_space<vmem>>, vector<1x1x8x28xf32>
    %60 = vector.shape_cast %59 : vector<1x1x8x28xf32> to vector<8x28xf32>
    %c0_57 = arith.constant 0 : index
    %c2_58 = arith.constant 2 : index
    %61 = arith.index_cast %6 : i32 to index
    %c0_59 = arith.constant 0 : index
    %62 = vector.load %arg4[%c0_57, %c2_58, %61, %c0_59] : memref<1x3x120x30xf32, #tpu.memory_space<vmem>>, vector<1x1x8x28xf32>
    %63 = vector.shape_cast %62 : vector<1x1x8x28xf32> to vector<8x28xf32>
    %c0_60 = arith.constant 0 : index
    %c2_61 = arith.constant 2 : index
    %64 = arith.index_cast %6 : i32 to index
    %c0_62 = arith.constant 0 : index
    %65 = vector.load %arg5[%c0_60, %c2_61, %64, %c0_62] : memref<1x3x120x30xf32, #tpu.memory_space<vmem>>, vector<1x1x8x28xf32>
    %66 = vector.shape_cast %65 : vector<1x1x8x28xf32> to vector<8x28xf32>
    %c0_63 = arith.constant 0 : index
    %c2_64 = arith.constant 2 : index
    %67 = arith.index_cast %6 : i32 to index
    %c1_65 = arith.constant 1 : index
    %68 = vector.load %arg2[%c0_63, %c2_64, %67, %c1_65] : memref<1x3x120x30xf32, #tpu.memory_space<vmem>>, vector<1x1x8x28xf32>
    %69 = vector.shape_cast %68 : vector<1x1x8x28xf32> to vector<8x28xf32>
    %c0_66 = arith.constant 0 : index
    %c2_67 = arith.constant 2 : index
    %70 = arith.index_cast %6 : i32 to index
    %c1_68 = arith.constant 1 : index
    %71 = vector.load %arg3[%c0_66, %c2_67, %70, %c1_68] : memref<1x3x120x30xf32, #tpu.memory_space<vmem>>, vector<1x1x8x28xf32>
    %72 = vector.shape_cast %71 : vector<1x1x8x28xf32> to vector<8x28xf32>
    %c0_69 = arith.constant 0 : index
    %c2_70 = arith.constant 2 : index
    %73 = arith.index_cast %6 : i32 to index
    %c1_71 = arith.constant 1 : index
    %74 = vector.load %arg4[%c0_69, %c2_70, %73, %c1_71] : memref<1x3x120x30xf32, #tpu.memory_space<vmem>>, vector<1x1x8x28xf32>
    %75 = vector.shape_cast %74 : vector<1x1x8x28xf32> to vector<8x28xf32>
    %c0_72 = arith.constant 0 : index
    %c2_73 = arith.constant 2 : index
    %76 = arith.index_cast %6 : i32 to index
    %c1_74 = arith.constant 1 : index
    %77 = vector.load %arg5[%c0_72, %c2_73, %76, %c1_74] : memref<1x3x120x30xf32, #tpu.memory_space<vmem>>, vector<1x1x8x28xf32>
    %78 = vector.shape_cast %77 : vector<1x1x8x28xf32> to vector<8x28xf32>
    %79 = tpu.concatenate %9, %12, %15, %18, %21, %24, %27, %30, %33, %36, %39, %42, %45, %48, %51, %54 in 0 : vector<8x28xf32>, vector<8x28xf32>, vector<8x28xf32>, vector<8x28xf32>, vector<8x28xf32>, vector<8x28xf32>, vector<8x28xf32>, vector<8x28xf32>, vector<8x28xf32>, vector<8x28xf32>, vector<8x28xf32>, vector<8x28xf32>, vector<8x28xf32>, vector<8x28xf32>, vector<8x28xf32>, vector<8x28xf32> -> vector<128x28xf32>
    %80 = tpu.concatenate %57, %60, %63, %66, %69, %72, %75, %78 in 0 : vector<8x28xf32>, vector<8x28xf32>, vector<8x28xf32>, vector<8x28xf32>, vector<8x28xf32>, vector<8x28xf32>, vector<8x28xf32>, vector<8x28xf32> -> vector<64x28xf32>
    %81 = tpu.concatenate %79, %80 in 0 : vector<128x28xf32>, vector<64x28xf32> -> vector<192x28xf32>
    %cst = arith.constant dense<0.000000e+00> : vector<8x28xf32>
    %82 = tpu.matmul %0, %81, %cst {dimension_numbers = #tpu.dot_dimension_numbers<[1], [0], [0], [1], [0, 0, 1, 1], [], []>} : vector<8x192xf32>, vector<192x28xf32>, vector<8x28xf32> -> vector<8x28xf32>
    %c0_75 = arith.constant 0 : index
    %c0_76 = arith.constant 0 : index
    %83 = arith.index_cast %6 : i32 to index
    %c0_77 = arith.constant 0 : index
    %84 = vector.load %arg4[%c0_75, %c0_76, %83, %c0_77] : memref<1x3x120x30xf32, #tpu.memory_space<vmem>>, vector<1x1x8x28xf32>
    %85 = vector.shape_cast %84 : vector<1x1x8x28xf32> to vector<8x28xf32>
    %c0_78 = arith.constant 0 : index
    %c0_79 = arith.constant 0 : index
    %86 = arith.index_cast %6 : i32 to index
    %c0_80 = arith.constant 0 : index
    %87 = vector.load %arg5[%c0_78, %c0_79, %86, %c0_80] : memref<1x3x120x30xf32, #tpu.memory_space<vmem>>, vector<1x1x8x28xf32>
    %88 = vector.shape_cast %87 : vector<1x1x8x28xf32> to vector<8x28xf32>
    %c0_81 = arith.constant 0 : index
    %c0_82 = arith.constant 0 : index
    %89 = arith.index_cast %6 : i32 to index
    %c1_83 = arith.constant 1 : index
    %90 = vector.load %arg2[%c0_81, %c0_82, %89, %c1_83] : memref<1x3x120x30xf32, #tpu.memory_space<vmem>>, vector<1x1x8x28xf32>
    %91 = vector.shape_cast %90 : vector<1x1x8x28xf32> to vector<8x28xf32>
    %c0_84 = arith.constant 0 : index
    %c0_85 = arith.constant 0 : index
    %92 = arith.index_cast %6 : i32 to index
    %c1_86 = arith.constant 1 : index
    %93 = vector.load %arg3[%c0_84, %c0_85, %92, %c1_86] : memref<1x3x120x30xf32, #tpu.memory_space<vmem>>, vector<1x1x8x28xf32>
    %94 = vector.shape_cast %93 : vector<1x1x8x28xf32> to vector<8x28xf32>
    %c0_87 = arith.constant 0 : index
    %c0_88 = arith.constant 0 : index
    %95 = arith.index_cast %6 : i32 to index
    %c1_89 = arith.constant 1 : index
    %96 = vector.load %arg4[%c0_87, %c0_88, %95, %c1_89] : memref<1x3x120x30xf32, #tpu.memory_space<vmem>>, vector<1x1x8x28xf32>
    %97 = vector.shape_cast %96 : vector<1x1x8x28xf32> to vector<8x28xf32>
    %c0_90 = arith.constant 0 : index
    %c0_91 = arith.constant 0 : index
    %98 = arith.index_cast %6 : i32 to index
    %c1_92 = arith.constant 1 : index
    %99 = vector.load %arg5[%c0_90, %c0_91, %98, %c1_92] : memref<1x3x120x30xf32, #tpu.memory_space<vmem>>, vector<1x1x8x28xf32>
    %100 = vector.shape_cast %99 : vector<1x1x8x28xf32> to vector<8x28xf32>
    %c0_93 = arith.constant 0 : index
    %c0_94 = arith.constant 0 : index
    %101 = arith.index_cast %6 : i32 to index
    %c2_95 = arith.constant 2 : index
    %102 = vector.load %arg2[%c0_93, %c0_94, %101, %c2_95] : memref<1x3x120x30xf32, #tpu.memory_space<vmem>>, vector<1x1x8x28xf32>
    %103 = vector.shape_cast %102 : vector<1x1x8x28xf32> to vector<8x28xf32>
    %c0_96 = arith.constant 0 : index
    %c0_97 = arith.constant 0 : index
    %104 = arith.index_cast %6 : i32 to index
    %c2_98 = arith.constant 2 : index
    %105 = vector.load %arg3[%c0_96, %c0_97, %104, %c2_98] : memref<1x3x120x30xf32, #tpu.memory_space<vmem>>, vector<1x1x8x28xf32>
    %106 = vector.shape_cast %105 : vector<1x1x8x28xf32> to vector<8x28xf32>
    %c0_99 = arith.constant 0 : index
    %c1_100 = arith.constant 1 : index
    %107 = arith.index_cast %6 : i32 to index
    %c0_101 = arith.constant 0 : index
    %108 = vector.load %arg4[%c0_99, %c1_100, %107, %c0_101] : memref<1x3x120x30xf32, #tpu.memory_space<vmem>>, vector<1x1x8x28xf32>
    %109 = vector.shape_cast %108 : vector<1x1x8x28xf32> to vector<8x28xf32>
    %c0_102 = arith.constant 0 : index
    %c1_103 = arith.constant 1 : index
    %110 = arith.index_cast %6 : i32 to index
    %c0_104 = arith.constant 0 : index
    %111 = vector.load %arg5[%c0_102, %c1_103, %110, %c0_104] : memref<1x3x120x30xf32, #tpu.memory_space<vmem>>, vector<1x1x8x28xf32>
    %112 = vector.shape_cast %111 : vector<1x1x8x28xf32> to vector<8x28xf32>
    %c0_105 = arith.constant 0 : index
    %c1_106 = arith.constant 1 : index
    %113 = arith.index_cast %6 : i32 to index
    %c1_107 = arith.constant 1 : index
    %114 = vector.load %arg2[%c0_105, %c1_106, %113, %c1_107] : memref<1x3x120x30xf32, #tpu.memory_space<vmem>>, vector<1x1x8x28xf32>
    %115 = vector.shape_cast %114 : vector<1x1x8x28xf32> to vector<8x28xf32>
    %c0_108 = arith.constant 0 : index
    %c1_109 = arith.constant 1 : index
    %116 = arith.index_cast %6 : i32 to index
    %c1_110 = arith.constant 1 : index
    %117 = vector.load %arg3[%c0_108, %c1_109, %116, %c1_110] : memref<1x3x120x30xf32, #tpu.memory_space<vmem>>, vector<1x1x8x28xf32>
    %118 = vector.shape_cast %117 : vector<1x1x8x28xf32> to vector<8x28xf32>
    %c0_111 = arith.constant 0 : index
    %c1_112 = arith.constant 1 : index
    %119 = arith.index_cast %6 : i32 to index
    %c1_113 = arith.constant 1 : index
    %120 = vector.load %arg4[%c0_111, %c1_112, %119, %c1_113] : memref<1x3x120x30xf32, #tpu.memory_space<vmem>>, vector<1x1x8x28xf32>
    %121 = vector.shape_cast %120 : vector<1x1x8x28xf32> to vector<8x28xf32>
    %c0_114 = arith.constant 0 : index
    %c1_115 = arith.constant 1 : index
    %122 = arith.index_cast %6 : i32 to index
    %c1_116 = arith.constant 1 : index
    %123 = vector.load %arg5[%c0_114, %c1_115, %122, %c1_116] : memref<1x3x120x30xf32, #tpu.memory_space<vmem>>, vector<1x1x8x28xf32>
    %124 = vector.shape_cast %123 : vector<1x1x8x28xf32> to vector<8x28xf32>
    %c0_117 = arith.constant 0 : index
    %c1_118 = arith.constant 1 : index
    %125 = arith.index_cast %6 : i32 to index
    %c2_119 = arith.constant 2 : index
    %126 = vector.load %arg2[%c0_117, %c1_118, %125, %c2_119] : memref<1x3x120x30xf32, #tpu.memory_space<vmem>>, vector<1x1x8x28xf32>
    %127 = vector.shape_cast %126 : vector<1x1x8x28xf32> to vector<8x28xf32>
    %c0_120 = arith.constant 0 : index
    %c1_121 = arith.constant 1 : index
    %128 = arith.index_cast %6 : i32 to index
    %c2_122 = arith.constant 2 : index
    %129 = vector.load %arg3[%c0_120, %c1_121, %128, %c2_122] : memref<1x3x120x30xf32, #tpu.memory_space<vmem>>, vector<1x1x8x28xf32>
    %130 = vector.shape_cast %129 : vector<1x1x8x28xf32> to vector<8x28xf32>
    %c0_123 = arith.constant 0 : index
    %c2_124 = arith.constant 2 : index
    %131 = arith.index_cast %6 : i32 to index
    %c0_125 = arith.constant 0 : index
    %132 = vector.load %arg4[%c0_123, %c2_124, %131, %c0_125] : memref<1x3x120x30xf32, #tpu.memory_space<vmem>>, vector<1x1x8x28xf32>
    %133 = vector.shape_cast %132 : vector<1x1x8x28xf32> to vector<8x28xf32>
    %c0_126 = arith.constant 0 : index
    %c2_127 = arith.constant 2 : index
    %134 = arith.index_cast %6 : i32 to index
    %c0_128 = arith.constant 0 : index
    %135 = vector.load %arg5[%c0_126, %c2_127, %134, %c0_128] : memref<1x3x120x30xf32, #tpu.memory_space<vmem>>, vector<1x1x8x28xf32>
    %136 = vector.shape_cast %135 : vector<1x1x8x28xf32> to vector<8x28xf32>
    %c0_129 = arith.constant 0 : index
    %c2_130 = arith.constant 2 : index
    %137 = arith.index_cast %6 : i32 to index
    %c1_131 = arith.constant 1 : index
    %138 = vector.load %arg2[%c0_129, %c2_130, %137, %c1_131] : memref<1x3x120x30xf32, #tpu.memory_space<vmem>>, vector<1x1x8x28xf32>
    %139 = vector.shape_cast %138 : vector<1x1x8x28xf32> to vector<8x28xf32>
    %c0_132 = arith.constant 0 : index
    %c2_133 = arith.constant 2 : index
    %140 = arith.index_cast %6 : i32 to index
    %c1_134 = arith.constant 1 : index
    %141 = vector.load %arg3[%c0_132, %c2_133, %140, %c1_134] : memref<1x3x120x30xf32, #tpu.memory_space<vmem>>, vector<1x1x8x28xf32>
    %142 = vector.shape_cast %141 : vector<1x1x8x28xf32> to vector<8x28xf32>
    %c0_135 = arith.constant 0 : index
    %c2_136 = arith.constant 2 : index
    %143 = arith.index_cast %6 : i32 to index
    %c1_137 = arith.constant 1 : index
    %144 = vector.load %arg4[%c0_135, %c2_136, %143, %c1_137] : memref<1x3x120x30xf32, #tpu.memory_space<vmem>>, vector<1x1x8x28xf32>
    %145 = vector.shape_cast %144 : vector<1x1x8x28xf32> to vector<8x28xf32>
    %c0_138 = arith.constant 0 : index
    %c2_139 = arith.constant 2 : index
    %146 = arith.index_cast %6 : i32 to index
    %c1_140 = arith.constant 1 : index
    %147 = vector.load %arg5[%c0_138, %c2_139, %146, %c1_140] : memref<1x3x120x30xf32, #tpu.memory_space<vmem>>, vector<1x1x8x28xf32>
    %148 = vector.shape_cast %147 : vector<1x1x8x28xf32> to vector<8x28xf32>
    %c0_141 = arith.constant 0 : index
    %c2_142 = arith.constant 2 : index
    %149 = arith.index_cast %6 : i32 to index
    %c2_143 = arith.constant 2 : index
    %150 = vector.load %arg2[%c0_141, %c2_142, %149, %c2_143] : memref<1x3x120x30xf32, #tpu.memory_space<vmem>>, vector<1x1x8x28xf32>
    %151 = vector.shape_cast %150 : vector<1x1x8x28xf32> to vector<8x28xf32>
    %c0_144 = arith.constant 0 : index
    %c2_145 = arith.constant 2 : index
    %152 = arith.index_cast %6 : i32 to index
    %c2_146 = arith.constant 2 : index
    %153 = vector.load %arg3[%c0_144, %c2_145, %152, %c2_146] : memref<1x3x120x30xf32, #tpu.memory_space<vmem>>, vector<1x1x8x28xf32>
    %154 = vector.shape_cast %153 : vector<1x1x8x28xf32> to vector<8x28xf32>
    %155 = tpu.concatenate %85, %88, %91, %94, %97, %100, %103, %106, %109, %112, %115, %118, %121, %124, %127, %130 in 0 : vector<8x28xf32>, vector<8x28xf32>, vector<8x28xf32>, vector<8x28xf32>, vector<8x28xf32>, vector<8x28xf32>, vector<8x28xf32>, vector<8x28xf32>, vector<8x28xf32>, vector<8x28xf32>, vector<8x28xf32>, vector<8x28xf32>, vector<8x28xf32>, vector<8x28xf32>, vector<8x28xf32>, vector<8x28xf32> -> vector<128x28xf32>
    %156 = tpu.concatenate %133, %136, %139, %142, %145, %148, %151, %154 in 0 : vector<8x28xf32>, vector<8x28xf32>, vector<8x28xf32>, vector<8x28xf32>, vector<8x28xf32>, vector<8x28xf32>, vector<8x28xf32>, vector<8x28xf32> -> vector<64x28xf32>
    %157 = tpu.concatenate %155, %156 in 0 : vector<128x28xf32>, vector<64x28xf32> -> vector<192x28xf32>
    %cst_147 = arith.constant dense<0.000000e+00> : vector<8x28xf32>
    %158 = tpu.matmul %0, %157, %cst_147 {dimension_numbers = #tpu.dot_dimension_numbers<[1], [0], [0], [1], [0, 0, 1, 1], [], []>} : vector<8x192xf32>, vector<192x28xf32>, vector<8x28xf32> -> vector<8x28xf32>
    %159 = arith.maximumf %82, %158 : vector<8x28xf32>
    %c4_i32_148 = arith.constant 4 : i32
    %160 = arith.muli %c4_i32_148, %3 : i32
    %c2_i32 = arith.constant 2 : i32
    %161 = arith.addi %160, %c2_i32 : i32
    %162 = tpu.assume_multiple %161, 2 : i32
    %c0_149 = arith.constant 0 : index
    %c0_150 = arith.constant 0 : index
    %163 = arith.index_cast %162 : i32 to index
    %c0_151 = arith.constant 0 : index
    %164 = vector.load %arg2[%c0_149, %c0_150, %163, %c0_151] : memref<1x3x120x30xf32, #tpu.memory_space<vmem>>, vector<1x1x8x28xf32>
    %165 = vector.shape_cast %164 : vector<1x1x8x28xf32> to vector<8x28xf32>
    %c0_152 = arith.constant 0 : index
    %c0_153 = arith.constant 0 : index
    %166 = arith.index_cast %162 : i32 to index
    %c0_154 = arith.constant 0 : index
    %167 = vector.load %arg3[%c0_152, %c0_153, %166, %c0_154] : memref<1x3x120x30xf32, #tpu.memory_space<vmem>>, vector<1x1x8x28xf32>
    %168 = vector.shape_cast %167 : vector<1x1x8x28xf32> to vector<8x28xf32>
    %c0_155 = arith.constant 0 : index
    %c0_156 = arith.constant 0 : index
    %169 = arith.index_cast %162 : i32 to index
    %c0_157 = arith.constant 0 : index
    %170 = vector.load %arg4[%c0_155, %c0_156, %169, %c0_157] : memref<1x3x120x30xf32, #tpu.memory_space<vmem>>, vector<1x1x8x28xf32>
    %171 = vector.shape_cast %170 : vector<1x1x8x28xf32> to vector<8x28xf32>
    %c0_158 = arith.constant 0 : index
    %c0_159 = arith.constant 0 : index
    %172 = arith.index_cast %162 : i32 to index
    %c0_160 = arith.constant 0 : index
    %173 = vector.load %arg5[%c0_158, %c0_159, %172, %c0_160] : memref<1x3x120x30xf32, #tpu.memory_space<vmem>>, vector<1x1x8x28xf32>
    %174 = vector.shape_cast %173 : vector<1x1x8x28xf32> to vector<8x28xf32>
    %c0_161 = arith.constant 0 : index
    %c0_162 = arith.constant 0 : index
    %175 = arith.index_cast %162 : i32 to index
    %c1_163 = arith.constant 1 : index
    %176 = vector.load %arg2[%c0_161, %c0_162, %175, %c1_163] : memref<1x3x120x30xf32, #tpu.memory_space<vmem>>, vector<1x1x8x28xf32>
    %177 = vector.shape_cast %176 : vector<1x1x8x28xf32> to vector<8x28xf32>
    %c0_164 = arith.constant 0 : index
    %c0_165 = arith.constant 0 : index
    %178 = arith.index_cast %162 : i32 to index
    %c1_166 = arith.constant 1 : index
    %179 = vector.load %arg3[%c0_164, %c0_165, %178, %c1_166] : memref<1x3x120x30xf32, #tpu.memory_space<vmem>>, vector<1x1x8x28xf32>
    %180 = vector.shape_cast %179 : vector<1x1x8x28xf32> to vector<8x28xf32>
    %c0_167 = arith.constant 0 : index
    %c0_168 = arith.constant 0 : index
    %181 = arith.index_cast %162 : i32 to index
    %c1_169 = arith.constant 1 : index
    %182 = vector.load %arg4[%c0_167, %c0_168, %181, %c1_169] : memref<1x3x120x30xf32, #tpu.memory_space<vmem>>, vector<1x1x8x28xf32>
    %183 = vector.shape_cast %182 : vector<1x1x8x28xf32> to vector<8x28xf32>
    %c0_170 = arith.constant 0 : index
    %c0_171 = arith.constant 0 : index
    %184 = arith.index_cast %162 : i32 to index
    %c1_172 = arith.constant 1 : index
    %185 = vector.load %arg5[%c0_170, %c0_171, %184, %c1_172] : memref<1x3x120x30xf32, #tpu.memory_space<vmem>>, vector<1x1x8x28xf32>
    %186 = vector.shape_cast %185 : vector<1x1x8x28xf32> to vector<8x28xf32>
    %c0_173 = arith.constant 0 : index
    %c1_174 = arith.constant 1 : index
    %187 = arith.index_cast %162 : i32 to index
    %c0_175 = arith.constant 0 : index
    %188 = vector.load %arg2[%c0_173, %c1_174, %187, %c0_175] : memref<1x3x120x30xf32, #tpu.memory_space<vmem>>, vector<1x1x8x28xf32>
    %189 = vector.shape_cast %188 : vector<1x1x8x28xf32> to vector<8x28xf32>
    %c0_176 = arith.constant 0 : index
    %c1_177 = arith.constant 1 : index
    %190 = arith.index_cast %162 : i32 to index
    %c0_178 = arith.constant 0 : index
    %191 = vector.load %arg3[%c0_176, %c1_177, %190, %c0_178] : memref<1x3x120x30xf32, #tpu.memory_space<vmem>>, vector<1x1x8x28xf32>
    %192 = vector.shape_cast %191 : vector<1x1x8x28xf32> to vector<8x28xf32>
    %c0_179 = arith.constant 0 : index
    %c1_180 = arith.constant 1 : index
    %193 = arith.index_cast %162 : i32 to index
    %c0_181 = arith.constant 0 : index
    %194 = vector.load %arg4[%c0_179, %c1_180, %193, %c0_181] : memref<1x3x120x30xf32, #tpu.memory_space<vmem>>, vector<1x1x8x28xf32>
    %195 = vector.shape_cast %194 : vector<1x1x8x28xf32> to vector<8x28xf32>
    %c0_182 = arith.constant 0 : index
    %c1_183 = arith.constant 1 : index
    %196 = arith.index_cast %162 : i32 to index
    %c0_184 = arith.constant 0 : index
    %197 = vector.load %arg5[%c0_182, %c1_183, %196, %c0_184] : memref<1x3x120x30xf32, #tpu.memory_space<vmem>>, vector<1x1x8x28xf32>
    %198 = vector.shape_cast %197 : vector<1x1x8x28xf32> to vector<8x28xf32>
    %c0_185 = arith.constant 0 : index
    %c1_186 = arith.constant 1 : index
    %199 = arith.index_cast %162 : i32 to index
    %c1_187 = arith.constant 1 : index
    %200 = vector.load %arg2[%c0_185, %c1_186, %199, %c1_187] : memref<1x3x120x30xf32, #tpu.memory_space<vmem>>, vector<1x1x8x28xf32>
    %201 = vector.shape_cast %200 : vector<1x1x8x28xf32> to vector<8x28xf32>
    %c0_188 = arith.constant 0 : index
    %c1_189 = arith.constant 1 : index
    %202 = arith.index_cast %162 : i32 to index
    %c1_190 = arith.constant 1 : index
    %203 = vector.load %arg3[%c0_188, %c1_189, %202, %c1_190] : memref<1x3x120x30xf32, #tpu.memory_space<vmem>>, vector<1x1x8x28xf32>
    %204 = vector.shape_cast %203 : vector<1x1x8x28xf32> to vector<8x28xf32>
    %c0_191 = arith.constant 0 : index
    %c1_192 = arith.constant 1 : index
    %205 = arith.index_cast %162 : i32 to index
    %c1_193 = arith.constant 1 : index
    %206 = vector.load %arg4[%c0_191, %c1_192, %205, %c1_193] : memref<1x3x120x30xf32, #tpu.memory_space<vmem>>, vector<1x1x8x28xf32>
    %207 = vector.shape_cast %206 : vector<1x1x8x28xf32> to vector<8x28xf32>
    %c0_194 = arith.constant 0 : index
    %c1_195 = arith.constant 1 : index
    %208 = arith.index_cast %162 : i32 to index
    %c1_196 = arith.constant 1 : index
    %209 = vector.load %arg5[%c0_194, %c1_195, %208, %c1_196] : memref<1x3x120x30xf32, #tpu.memory_space<vmem>>, vector<1x1x8x28xf32>
    %210 = vector.shape_cast %209 : vector<1x1x8x28xf32> to vector<8x28xf32>
    %c0_197 = arith.constant 0 : index
    %c2_198 = arith.constant 2 : index
    %211 = arith.index_cast %162 : i32 to index
    %c0_199 = arith.constant 0 : index
    %212 = vector.load %arg2[%c0_197, %c2_198, %211, %c0_199] : memref<1x3x120x30xf32, #tpu.memory_space<vmem>>, vector<1x1x8x28xf32>
    %213 = vector.shape_cast %212 : vector<1x1x8x28xf32> to vector<8x28xf32>
    %c0_200 = arith.constant 0 : index
    %c2_201 = arith.constant 2 : index
    %214 = arith.index_cast %162 : i32 to index
    %c0_202 = arith.constant 0 : index
    %215 = vector.load %arg3[%c0_200, %c2_201, %214, %c0_202] : memref<1x3x120x30xf32, #tpu.memory_space<vmem>>, vector<1x1x8x28xf32>
    %216 = vector.shape_cast %215 : vector<1x1x8x28xf32> to vector<8x28xf32>
    %c0_203 = arith.constant 0 : index
    %c2_204 = arith.constant 2 : index
    %217 = arith.index_cast %162 : i32 to index
    %c0_205 = arith.constant 0 : index
    %218 = vector.load %arg4[%c0_203, %c2_204, %217, %c0_205] : memref<1x3x120x30xf32, #tpu.memory_space<vmem>>, vector<1x1x8x28xf32>
    %219 = vector.shape_cast %218 : vector<1x1x8x28xf32> to vector<8x28xf32>
    %c0_206 = arith.constant 0 : index
    %c2_207 = arith.constant 2 : index
    %220 = arith.index_cast %162 : i32 to index
    %c0_208 = arith.constant 0 : index
    %221 = vector.load %arg5[%c0_206, %c2_207, %220, %c0_208] : memref<1x3x120x30xf32, #tpu.memory_space<vmem>>, vector<1x1x8x28xf32>
    %222 = vector.shape_cast %221 : vector<1x1x8x28xf32> to vector<8x28xf32>
    %c0_209 = arith.constant 0 : index
    %c2_210 = arith.constant 2 : index
    %223 = arith.index_cast %162 : i32 to index
    %c1_211 = arith.constant 1 : index
    %224 = vector.load %arg2[%c0_209, %c2_210, %223, %c1_211] : memref<1x3x120x30xf32, #tpu.memory_space<vmem>>, vector<1x1x8x28xf32>
    %225 = vector.shape_cast %224 : vector<1x1x8x28xf32> to vector<8x28xf32>
    %c0_212 = arith.constant 0 : index
    %c2_213 = arith.constant 2 : index
    %226 = arith.index_cast %162 : i32 to index
    %c1_214 = arith.constant 1 : index
    %227 = vector.load %arg3[%c0_212, %c2_213, %226, %c1_214] : memref<1x3x120x30xf32, #tpu.memory_space<vmem>>, vector<1x1x8x28xf32>
    %228 = vector.shape_cast %227 : vector<1x1x8x28xf32> to vector<8x28xf32>
    %c0_215 = arith.constant 0 : index
    %c2_216 = arith.constant 2 : index
    %229 = arith.index_cast %162 : i32 to index
    %c1_217 = arith.constant 1 : index
    %230 = vector.load %arg4[%c0_215, %c2_216, %229, %c1_217] : memref<1x3x120x30xf32, #tpu.memory_space<vmem>>, vector<1x1x8x28xf32>
    %231 = vector.shape_cast %230 : vector<1x1x8x28xf32> to vector<8x28xf32>
    %c0_218 = arith.constant 0 : index
    %c2_219 = arith.constant 2 : index
    %232 = arith.index_cast %162 : i32 to index
    %c1_220 = arith.constant 1 : index
    %233 = vector.load %arg5[%c0_218, %c2_219, %232, %c1_220] : memref<1x3x120x30xf32, #tpu.memory_space<vmem>>, vector<1x1x8x28xf32>
    %234 = vector.shape_cast %233 : vector<1x1x8x28xf32> to vector<8x28xf32>
    %235 = tpu.concatenate %165, %168, %171, %174, %177, %180, %183, %186, %189, %192, %195, %198, %201, %204, %207, %210 in 0 : vector<8x28xf32>, vector<8x28xf32>, vector<8x28xf32>, vector<8x28xf32>, vector<8x28xf32>, vector<8x28xf32>, vector<8x28xf32>, vector<8x28xf32>, vector<8x28xf32>, vector<8x28xf32>, vector<8x28xf32>, vector<8x28xf32>, vector<8x28xf32>, vector<8x28xf32>, vector<8x28xf32>, vector<8x28xf32> -> vector<128x28xf32>
    %236 = tpu.concatenate %213, %216, %219, %222, %225, %228, %231, %234 in 0 : vector<8x28xf32>, vector<8x28xf32>, vector<8x28xf32>, vector<8x28xf32>, vector<8x28xf32>, vector<8x28xf32>, vector<8x28xf32>, vector<8x28xf32> -> vector<64x28xf32>
    %237 = tpu.concatenate %235, %236 in 0 : vector<128x28xf32>, vector<64x28xf32> -> vector<192x28xf32>
    %cst_221 = arith.constant dense<0.000000e+00> : vector<8x28xf32>
    %238 = tpu.matmul %0, %237, %cst_221 {dimension_numbers = #tpu.dot_dimension_numbers<[1], [0], [0], [1], [0, 0, 1, 1], [], []>} : vector<8x192xf32>, vector<192x28xf32>, vector<8x28xf32> -> vector<8x28xf32>
    %239 = arith.maximumf %159, %238 : vector<8x28xf32>
    %c0_222 = arith.constant 0 : index
    %c0_223 = arith.constant 0 : index
    %240 = arith.index_cast %162 : i32 to index
    %c0_224 = arith.constant 0 : index
    %241 = vector.load %arg4[%c0_222, %c0_223, %240, %c0_224] : memref<1x3x120x30xf32, #tpu.memory_space<vmem>>, vector<1x1x8x28xf32>
    %242 = vector.shape_cast %241 : vector<1x1x8x28xf32> to vector<8x28xf32>
    %c0_225 = arith.constant 0 : index
    %c0_226 = arith.constant 0 : index
    %243 = arith.index_cast %162 : i32 to index
    %c0_227 = arith.constant 0 : index
    %244 = vector.load %arg5[%c0_225, %c0_226, %243, %c0_227] : memref<1x3x120x30xf32, #tpu.memory_space<vmem>>, vector<1x1x8x28xf32>
    %245 = vector.shape_cast %244 : vector<1x1x8x28xf32> to vector<8x28xf32>
    %c0_228 = arith.constant 0 : index
    %c0_229 = arith.constant 0 : index
    %246 = arith.index_cast %162 : i32 to index
    %c1_230 = arith.constant 1 : index
    %247 = vector.load %arg2[%c0_228, %c0_229, %246, %c1_230] : memref<1x3x120x30xf32, #tpu.memory_space<vmem>>, vector<1x1x8x28xf32>
    %248 = vector.shape_cast %247 : vector<1x1x8x28xf32> to vector<8x28xf32>
    %c0_231 = arith.constant 0 : index
    %c0_232 = arith.constant 0 : index
    %249 = arith.index_cast %162 : i32 to index
    %c1_233 = arith.constant 1 : index
    %250 = vector.load %arg3[%c0_231, %c0_232, %249, %c1_233] : memref<1x3x120x30xf32, #tpu.memory_space<vmem>>, vector<1x1x8x28xf32>
    %251 = vector.shape_cast %250 : vector<1x1x8x28xf32> to vector<8x28xf32>
    %c0_234 = arith.constant 0 : index
    %c0_235 = arith.constant 0 : index
    %252 = arith.index_cast %162 : i32 to index
    %c1_236 = arith.constant 1 : index
    %253 = vector.load %arg4[%c0_234, %c0_235, %252, %c1_236] : memref<1x3x120x30xf32, #tpu.memory_space<vmem>>, vector<1x1x8x28xf32>
    %254 = vector.shape_cast %253 : vector<1x1x8x28xf32> to vector<8x28xf32>
    %c0_237 = arith.constant 0 : index
    %c0_238 = arith.constant 0 : index
    %255 = arith.index_cast %162 : i32 to index
    %c1_239 = arith.constant 1 : index
    %256 = vector.load %arg5[%c0_237, %c0_238, %255, %c1_239] : memref<1x3x120x30xf32, #tpu.memory_space<vmem>>, vector<1x1x8x28xf32>
    %257 = vector.shape_cast %256 : vector<1x1x8x28xf32> to vector<8x28xf32>
    %c0_240 = arith.constant 0 : index
    %c0_241 = arith.constant 0 : index
    %258 = arith.index_cast %162 : i32 to index
    %c2_242 = arith.constant 2 : index
    %259 = vector.load %arg2[%c0_240, %c0_241, %258, %c2_242] : memref<1x3x120x30xf32, #tpu.memory_space<vmem>>, vector<1x1x8x28xf32>
    %260 = vector.shape_cast %259 : vector<1x1x8x28xf32> to vector<8x28xf32>
    %c0_243 = arith.constant 0 : index
    %c0_244 = arith.constant 0 : index
    %261 = arith.index_cast %162 : i32 to index
    %c2_245 = arith.constant 2 : index
    %262 = vector.load %arg3[%c0_243, %c0_244, %261, %c2_245] : memref<1x3x120x30xf32, #tpu.memory_space<vmem>>, vector<1x1x8x28xf32>
    %263 = vector.shape_cast %262 : vector<1x1x8x28xf32> to vector<8x28xf32>
    %c0_246 = arith.constant 0 : index
    %c1_247 = arith.constant 1 : index
    %264 = arith.index_cast %162 : i32 to index
    %c0_248 = arith.constant 0 : index
    %265 = vector.load %arg4[%c0_246, %c1_247, %264, %c0_248] : memref<1x3x120x30xf32, #tpu.memory_space<vmem>>, vector<1x1x8x28xf32>
    %266 = vector.shape_cast %265 : vector<1x1x8x28xf32> to vector<8x28xf32>
    %c0_249 = arith.constant 0 : index
    %c1_250 = arith.constant 1 : index
    %267 = arith.index_cast %162 : i32 to index
    %c0_251 = arith.constant 0 : index
    %268 = vector.load %arg5[%c0_249, %c1_250, %267, %c0_251] : memref<1x3x120x30xf32, #tpu.memory_space<vmem>>, vector<1x1x8x28xf32>
    %269 = vector.shape_cast %268 : vector<1x1x8x28xf32> to vector<8x28xf32>
    %c0_252 = arith.constant 0 : index
    %c1_253 = arith.constant 1 : index
    %270 = arith.index_cast %162 : i32 to index
    %c1_254 = arith.constant 1 : index
    %271 = vector.load %arg2[%c0_252, %c1_253, %270, %c1_254] : memref<1x3x120x30xf32, #tpu.memory_space<vmem>>, vector<1x1x8x28xf32>
    %272 = vector.shape_cast %271 : vector<1x1x8x28xf32> to vector<8x28xf32>
    %c0_255 = arith.constant 0 : index
    %c1_256 = arith.constant 1 : index
    %273 = arith.index_cast %162 : i32 to index
    %c1_257 = arith.constant 1 : index
    %274 = vector.load %arg3[%c0_255, %c1_256, %273, %c1_257] : memref<1x3x120x30xf32, #tpu.memory_space<vmem>>, vector<1x1x8x28xf32>
    %275 = vector.shape_cast %274 : vector<1x1x8x28xf32> to vector<8x28xf32>
    %c0_258 = arith.constant 0 : index
    %c1_259 = arith.constant 1 : index
    %276 = arith.index_cast %162 : i32 to index
    %c1_260 = arith.constant 1 : index
    %277 = vector.load %arg4[%c0_258, %c1_259, %276, %c1_260] : memref<1x3x120x30xf32, #tpu.memory_space<vmem>>, vector<1x1x8x28xf32>
    %278 = vector.shape_cast %277 : vector<1x1x8x28xf32> to vector<8x28xf32>
    %c0_261 = arith.constant 0 : index
    %c1_262 = arith.constant 1 : index
    %279 = arith.index_cast %162 : i32 to index
    %c1_263 = arith.constant 1 : index
    %280 = vector.load %arg5[%c0_261, %c1_262, %279, %c1_263] : memref<1x3x120x30xf32, #tpu.memory_space<vmem>>, vector<1x1x8x28xf32>
    %281 = vector.shape_cast %280 : vector<1x1x8x28xf32> to vector<8x28xf32>
    %c0_264 = arith.constant 0 : index
    %c1_265 = arith.constant 1 : index
    %282 = arith.index_cast %162 : i32 to index
    %c2_266 = arith.constant 2 : index
    %283 = vector.load %arg2[%c0_264, %c1_265, %282, %c2_266] : memref<1x3x120x30xf32, #tpu.memory_space<vmem>>, vector<1x1x8x28xf32>
    %284 = vector.shape_cast %283 : vector<1x1x8x28xf32> to vector<8x28xf32>
    %c0_267 = arith.constant 0 : index
    %c1_268 = arith.constant 1 : index
    %285 = arith.index_cast %162 : i32 to index
    %c2_269 = arith.constant 2 : index
    %286 = vector.load %arg3[%c0_267, %c1_268, %285, %c2_269] : memref<1x3x120x30xf32, #tpu.memory_space<vmem>>, vector<1x1x8x28xf32>
    %287 = vector.shape_cast %286 : vector<1x1x8x28xf32> to vector<8x28xf32>
    %c0_270 = arith.constant 0 : index
    %c2_271 = arith.constant 2 : index
    %288 = arith.index_cast %162 : i32 to index
    %c0_272 = arith.constant 0 : index
    %289 = vector.load %arg4[%c0_270, %c2_271, %288, %c0_272] : memref<1x3x120x30xf32, #tpu.memory_space<vmem>>, vector<1x1x8x28xf32>
    %290 = vector.shape_cast %289 : vector<1x1x8x28xf32> to vector<8x28xf32>
    %c0_273 = arith.constant 0 : index
    %c2_274 = arith.constant 2 : index
    %291 = arith.index_cast %162 : i32 to index
    %c0_275 = arith.constant 0 : index
    %292 = vector.load %arg5[%c0_273, %c2_274, %291, %c0_275] : memref<1x3x120x30xf32, #tpu.memory_space<vmem>>, vector<1x1x8x28xf32>
    %293 = vector.shape_cast %292 : vector<1x1x8x28xf32> to vector<8x28xf32>
    %c0_276 = arith.constant 0 : index
    %c2_277 = arith.constant 2 : index
    %294 = arith.index_cast %162 : i32 to index
    %c1_278 = arith.constant 1 : index
    %295 = vector.load %arg2[%c0_276, %c2_277, %294, %c1_278] : memref<1x3x120x30xf32, #tpu.memory_space<vmem>>, vector<1x1x8x28xf32>
    %296 = vector.shape_cast %295 : vector<1x1x8x28xf32> to vector<8x28xf32>
    %c0_279 = arith.constant 0 : index
    %c2_280 = arith.constant 2 : index
    %297 = arith.index_cast %162 : i32 to index
    %c1_281 = arith.constant 1 : index
    %298 = vector.load %arg3[%c0_279, %c2_280, %297, %c1_281] : memref<1x3x120x30xf32, #tpu.memory_space<vmem>>, vector<1x1x8x28xf32>
    %299 = vector.shape_cast %298 : vector<1x1x8x28xf32> to vector<8x28xf32>
    %c0_282 = arith.constant 0 : index
    %c2_283 = arith.constant 2 : index
    %300 = arith.index_cast %162 : i32 to index
    %c1_284 = arith.constant 1 : index
    %301 = vector.load %arg4[%c0_282, %c2_283, %300, %c1_284] : memref<1x3x120x30xf32, #tpu.memory_space<vmem>>, vector<1x1x8x28xf32>
    %302 = vector.shape_cast %301 : vector<1x1x8x28xf32> to vector<8x28xf32>
    %c0_285 = arith.constant 0 : index
    %c2_286 = arith.constant 2 : index
    %303 = arith.index_cast %162 : i32 to index
    %c1_287 = arith.constant 1 : index
    %304 = vector.load %arg5[%c0_285, %c2_286, %303, %c1_287] : memref<1x3x120x30xf32, #tpu.memory_space<vmem>>, vector<1x1x8x28xf32>
    %305 = vector.shape_cast %304 : vector<1x1x8x28xf32> to vector<8x28xf32>
    %c0_288 = arith.constant 0 : index
    %c2_289 = arith.constant 2 : index
    %306 = arith.index_cast %162 : i32 to index
    %c2_290 = arith.constant 2 : index
    %307 = vector.load %arg2[%c0_288, %c2_289, %306, %c2_290] : memref<1x3x120x30xf32, #tpu.memory_space<vmem>>, vector<1x1x8x28xf32>
    %308 = vector.shape_cast %307 : vector<1x1x8x28xf32> to vector<8x28xf32>
    %c0_291 = arith.constant 0 : index
    %c2_292 = arith.constant 2 : index
    %309 = arith.index_cast %162 : i32 to index
    %c2_293 = arith.constant 2 : index
    %310 = vector.load %arg3[%c0_291, %c2_292, %309, %c2_293] : memref<1x3x120x30xf32, #tpu.memory_space<vmem>>, vector<1x1x8x28xf32>
    %311 = vector.shape_cast %310 : vector<1x1x8x28xf32> to vector<8x28xf32>
    %312 = tpu.concatenate %242, %245, %248, %251, %254, %257, %260, %263, %266, %269, %272, %275, %278, %281, %284, %287 in 0 : vector<8x28xf32>, vector<8x28xf32>, vector<8x28xf32>, vector<8x28xf32>, vector<8x28xf32>, vector<8x28xf32>, vector<8x28xf32>, vector<8x28xf32>, vector<8x28xf32>, vector<8x28xf32>, vector<8x28xf32>, vector<8x28xf32>, vector<8x28xf32>, vector<8x28xf32>, vector<8x28xf32>, vector<8x28xf32> -> vector<128x28xf32>
    %313 = tpu.concatenate %290, %293, %296, %299, %302, %305, %308, %311 in 0 : vector<8x28xf32>, vector<8x28xf32>, vector<8x28xf32>, vector<8x28xf32>, vector<8x28xf32>, vector<8x28xf32>, vector<8x28xf32>, vector<8x28xf32> -> vector<64x28xf32>
    %314 = tpu.concatenate %312, %313 in 0 : vector<128x28xf32>, vector<64x28xf32> -> vector<192x28xf32>
    %cst_294 = arith.constant dense<0.000000e+00> : vector<8x28xf32>
    %315 = tpu.matmul %0, %314, %cst_294 {dimension_numbers = #tpu.dot_dimension_numbers<[1], [0], [0], [1], [0, 0, 1, 1], [], []>} : vector<8x192xf32>, vector<192x28xf32>, vector<8x28xf32> -> vector<8x28xf32>
    %316 = arith.maximumf %239, %315 : vector<8x28xf32>
    %317 = vector.broadcast %1 : vector<8x1xf32> to vector<8x28xf32>
    %318 = arith.addf %316, %317 : vector<8x28xf32>
    %cst_295 = arith.constant 0.000000e+00 : f32
    %319 = vector.broadcast %cst_295 : f32 to vector<8x28xf32>
    %320 = arith.cmpf oge, %318, %319 : vector<8x28xf32>
    %cst_296 = arith.constant 0.00999999977 : f32
    %321 = vector.broadcast %cst_296 : f32 to vector<8x28xf32>
    %322 = arith.mulf %321, %318 : vector<8x28xf32>
    %323 = arith.select %320, %318, %322 : vector<8x28xi1>, vector<8x28xf32>
    %324 = vector.extract_strided_slice %323 {offsets = [0, 0], sizes = [6, 28], strides = [1, 1]} : vector<8x28xf32> to vector<6x28xf32>
    %c0_297 = arith.constant 0 : index
    %c0_298 = arith.constant 0 : index
    %c0_299 = arith.constant 0 : index
    %c0_300 = arith.constant 0 : index
    %325 = vector.load %arg8[%c0_297, %c0_298, %c0_299, %c0_300] : memref<1x4x6x28xf32, #tpu.memory_space<vmem>>, vector<1x1x6x28xf32>
    %326 = vector.shape_cast %325 : vector<1x1x6x28xf32> to vector<6x28xf32>
    %327 = vector.shape_cast %324 : vector<6x28xf32> to vector<1x1x6x28xf32>
    tpu.vector_store %arg8[%c0_297, %c0_298, %c0_299, %c0_300], %327 {strides = array<i32>} : memref<1x4x6x28xf32, #tpu.memory_space<vmem>>, vector<1x1x6x28xf32>,
    %c4_i32_301 = arith.constant 4 : i32
    %328 = arith.muli %c4_i32_301, %arg1 : i32
    %c1_i32 = arith.constant 1 : i32
    %329 = arith.addi %328, %c1_i32 : i32
    %c4_i32_302 = arith.constant 4 : i32
    %330 = arith.muli %c4_i32_302, %329 : i32
    %c0_i32_303 = arith.constant 0 : i32
    %331 = arith.addi %330, %c0_i32_303 : i32
    %332 = tpu.assume_multiple %331, 2 : i32
    %c0_304 = arith.constant 0 : index
    %c0_305 = arith.constant 0 : index
    %333 = arith.index_cast %332 : i32 to index
    %c0_306 = arith.constant 0 : index
    %334 = vector.load %arg2[%c0_304, %c0_305, %333, %c0_306] : memref<1x3x120x30xf32, #tpu.memory_space<vmem>>, vector<1x1x8x28xf32>
    %335 = vector.shape_cast %334 : vector<1x1x8x28xf32> to vector<8x28xf32>
    %c0_307 = arith.constant 0 : index
    %c0_308 = arith.constant 0 : index
    %336 = arith.index_cast %332 : i32 to index
    %c0_309 = arith.constant 0 : index
    %337 = vector.load %arg3[%c0_307, %c0_308, %336, %c0_309] : memref<1x3x120x30xf32, #tpu.memory_space<vmem>>, vector<1x1x8x28xf32>
    %338 = vector.shape_cast %337 : vector<1x1x8x28xf32> to vector<8x28xf32>
    %c0_310 = arith.constant 0 : index
    %c0_311 = arith.constant 0 : index
    %339 = arith.index_cast %332 : i32 to index
    %c0_312 = arith.constant 0 : index
    %340 = vector.load %arg4[%c0_310, %c0_311, %339, %c0_312] : memref<1x3x120x30xf32, #tpu.memory_space<vmem>>, vector<1x1x8x28xf32>
    %341 = vector.shape_cast %340 : vector<1x1x8x28xf32> to vector<8x28xf32>
    %c0_313 = arith.constant 0 : index
    %c0_314 = arith.constant 0 : index
    %342 = arith.index_cast %332 : i32 to index
    %c0_315 = arith.constant 0 : index
    %343 = vector.load %arg5[%c0_313, %c0_314, %342, %c0_315] : memref<1x3x120x30xf32, #tpu.memory_space<vmem>>, vector<1x1x8x28xf32>
    %344 = vector.shape_cast %343 : vector<1x1x8x28xf32> to vector<8x28xf32>
    %c0_316 = arith.constant 0 : index
    %c0_317 = arith.constant 0 : index
    %345 = arith.index_cast %332 : i32 to index
    %c1_318 = arith.constant 1 : index
    %346 = vector.load %arg2[%c0_316, %c0_317, %345, %c1_318] : memref<1x3x120x30xf32, #tpu.memory_space<vmem>>, vector<1x1x8x28xf32>
    %347 = vector.shape_cast %346 : vector<1x1x8x28xf32> to vector<8x28xf32>
    %c0_319 = arith.constant 0 : index
    %c0_320 = arith.constant 0 : index
    %348 = arith.index_cast %332 : i32 to index
    %c1_321 = arith.constant 1 : index
    %349 = vector.load %arg3[%c0_319, %c0_320, %348, %c1_321] : memref<1x3x120x30xf32, #tpu.memory_space<vmem>>, vector<1x1x8x28xf32>
    %350 = vector.shape_cast %349 : vector<1x1x8x28xf32> to vector<8x28xf32>
    %c0_322 = arith.constant 0 : index
    %c0_323 = arith.constant 0 : index
    %351 = arith.index_cast %332 : i32 to index
    %c1_324 = arith.constant 1 : index
    %352 = vector.load %arg4[%c0_322, %c0_323, %351, %c1_324] : memref<1x3x120x30xf32, #tpu.memory_space<vmem>>, vector<1x1x8x28xf32>
    %353 = vector.shape_cast %352 : vector<1x1x8x28xf32> to vector<8x28xf32>
    %c0_325 = arith.constant 0 : index
    %c0_326 = arith.constant 0 : index
    %354 = arith.index_cast %332 : i32 to index
    %c1_327 = arith.constant 1 : index
    %355 = vector.load %arg5[%c0_325, %c0_326, %354, %c1_327] : memref<1x3x120x30xf32, #tpu.memory_space<vmem>>, vector<1x1x8x28xf32>
    %356 = vector.shape_cast %355 : vector<1x1x8x28xf32> to vector<8x28xf32>
    %c0_328 = arith.constant 0 : index
    %c1_329 = arith.constant 1 : index
    %357 = arith.index_cast %332 : i32 to index
    %c0_330 = arith.constant 0 : index
    %358 = vector.load %arg2[%c0_328, %c1_329, %357, %c0_330] : memref<1x3x120x30xf32, #tpu.memory_space<vmem>>, vector<1x1x8x28xf32>
    %359 = vector.shape_cast %358 : vector<1x1x8x28xf32> to vector<8x28xf32>
    %c0_331 = arith.constant 0 : index
    %c1_332 = arith.constant 1 : index
    %360 = arith.index_cast %332 : i32 to index
    %c0_333 = arith.constant 0 : index
    %361 = vector.load %arg3[%c0_331, %c1_332, %360, %c0_333] : memref<1x3x120x30xf32, #tpu.memory_space<vmem>>, vector<1x1x8x28xf32>
    %362 = vector.shape_cast %361 : vector<1x1x8x28xf32> to vector<8x28xf32>
    %c0_334 = arith.constant 0 : index
    %c1_335 = arith.constant 1 : index
    %363 = arith.index_cast %332 : i32 to index
    %c0_336 = arith.constant 0 : index
    %364 = vector.load %arg4[%c0_334, %c1_335, %363, %c0_336] : memref<1x3x120x30xf32, #tpu.memory_space<vmem>>, vector<1x1x8x28xf32>
    %365 = vector.shape_cast %364 : vector<1x1x8x28xf32> to vector<8x28xf32>
    %c0_337 = arith.constant 0 : index
    %c1_338 = arith.constant 1 : index
    %366 = arith.index_cast %332 : i32 to index
    %c0_339 = arith.constant 0 : index
    %367 = vector.load %arg5[%c0_337, %c1_338, %366, %c0_339] : memref<1x3x120x30xf32, #tpu.memory_space<vmem>>, vector<1x1x8x28xf32>
    %368 = vector.shape_cast %367 : vector<1x1x8x28xf32> to vector<8x28xf32>
    %c0_340 = arith.constant 0 : index
    %c1_341 = arith.constant 1 : index
    %369 = arith.index_cast %332 : i32 to index
    %c1_342 = arith.constant 1 : index
    %370 = vector.load %arg2[%c0_340, %c1_341, %369, %c1_342] : memref<1x3x120x30xf32, #tpu.memory_space<vmem>>, vector<1x1x8x28xf32>
    %371 = vector.shape_cast %370 : vector<1x1x8x28xf32> to vector<8x28xf32>
    %c0_343 = arith.constant 0 : index
    %c1_344 = arith.constant 1 : index
    %372 = arith.index_cast %332 : i32 to index
    %c1_345 = arith.constant 1 : index
    %373 = vector.load %arg3[%c0_343, %c1_344, %372, %c1_345] : memref<1x3x120x30xf32, #tpu.memory_space<vmem>>, vector<1x1x8x28xf32>
    %374 = vector.shape_cast %373 : vector<1x1x8x28xf32> to vector<8x28xf32>
    %c0_346 = arith.constant 0 : index
    %c1_347 = arith.constant 1 : index
    %375 = arith.index_cast %332 : i32 to index
    %c1_348 = arith.constant 1 : index
    %376 = vector.load %arg4[%c0_346, %c1_347, %375, %c1_348] : memref<1x3x120x30xf32, #tpu.memory_space<vmem>>, vector<1x1x8x28xf32>
    %377 = vector.shape_cast %376 : vector<1x1x8x28xf32> to vector<8x28xf32>
    %c0_349 = arith.constant 0 : index
    %c1_350 = arith.constant 1 : index
    %378 = arith.index_cast %332 : i32 to index
    %c1_351 = arith.constant 1 : index
    %379 = vector.load %arg5[%c0_349, %c1_350, %378, %c1_351] : memref<1x3x120x30xf32, #tpu.memory_space<vmem>>, vector<1x1x8x28xf32>
    %380 = vector.shape_cast %379 : vector<1x1x8x28xf32> to vector<8x28xf32>
    %c0_352 = arith.constant 0 : index
    %c2_353 = arith.constant 2 : index
    %381 = arith.index_cast %332 : i32 to index
    %c0_354 = arith.constant 0 : index
    %382 = vector.load %arg2[%c0_352, %c2_353, %381, %c0_354] : memref<1x3x120x30xf32, #tpu.memory_space<vmem>>, vector<1x1x8x28xf32>
    %383 = vector.shape_cast %382 : vector<1x1x8x28xf32> to vector<8x28xf32>
    %c0_355 = arith.constant 0 : index
    %c2_356 = arith.constant 2 : index
    %384 = arith.index_cast %332 : i32 to index
    %c0_357 = arith.constant 0 : index
    %385 = vector.load %arg3[%c0_355, %c2_356, %384, %c0_357] : memref<1x3x120x30xf32, #tpu.memory_space<vmem>>, vector<1x1x8x28xf32>
    %386 = vector.shape_cast %385 : vector<1x1x8x28xf32> to vector<8x28xf32>
    %c0_358 = arith.constant 0 : index
    %c2_359 = arith.constant 2 : index
    %387 = arith.index_cast %332 : i32 to index
    %c0_360 = arith.constant 0 : index
    %388 = vector.load %arg4[%c0_358, %c2_359, %387, %c0_360] : memref<1x3x120x30xf32, #tpu.memory_space<vmem>>, vector<1x1x8x28xf32>
    %389 = vector.shape_cast %388 : vector<1x1x8x28xf32> to vector<8x28xf32>
    %c0_361 = arith.constant 0 : index
    %c2_362 = arith.constant 2 : index
    %390 = arith.index_cast %332 : i32 to index
    %c0_363 = arith.constant 0 : index
    %391 = vector.load %arg5[%c0_361, %c2_362, %390, %c0_363] : memref<1x3x120x30xf32, #tpu.memory_space<vmem>>, vector<1x1x8x28xf32>
    %392 = vector.shape_cast %391 : vector<1x1x8x28xf32> to vector<8x28xf32>
    %c0_364 = arith.constant 0 : index
    %c2_365 = arith.constant 2 : index
    %393 = arith.index_cast %332 : i32 to index
    %c1_366 = arith.constant 1 : index
    %394 = vector.load %arg2[%c0_364, %c2_365, %393, %c1_366] : memref<1x3x120x30xf32, #tpu.memory_space<vmem>>, vector<1x1x8x28xf32>
    %395 = vector.shape_cast %394 : vector<1x1x8x28xf32> to vector<8x28xf32>
    %c0_367 = arith.constant 0 : index
    %c2_368 = arith.constant 2 : index
    %396 = arith.index_cast %332 : i32 to index
    %c1_369 = arith.constant 1 : index
    %397 = vector.load %arg3[%c0_367, %c2_368, %396, %c1_369] : memref<1x3x120x30xf32, #tpu.memory_space<vmem>>, vector<1x1x8x28xf32>
    %398 = vector.shape_cast %397 : vector<1x1x8x28xf32> to vector<8x28xf32>
    %c0_370 = arith.constant 0 : index
    %c2_371 = arith.constant 2 : index
    %399 = arith.index_cast %332 : i32 to index
    %c1_372 = arith.constant 1 : index
    %400 = vector.load %arg4[%c0_370, %c2_371, %399, %c1_372] : memref<1x3x120x30xf32, #tpu.memory_space<vmem>>, vector<1x1x8x28xf32>
    %401 = vector.shape_cast %400 : vector<1x1x8x28xf32> to vector<8x28xf32>
    %c0_373 = arith.constant 0 : index
    %c2_374 = arith.constant 2 : index
    %402 = arith.index_cast %332 : i32 to index
    %c1_375 = arith.constant 1 : index
    %403 = vector.load %arg5[%c0_373, %c2_374, %402, %c1_375] : memref<1x3x120x30xf32, #tpu.memory_space<vmem>>, vector<1x1x8x28xf32>
    %404 = vector.shape_cast %403 : vector<1x1x8x28xf32> to vector<8x28xf32>
    %405 = tpu.concatenate %335, %338, %341, %344, %347, %350, %353, %356, %359, %362, %365, %368, %371, %374, %377, %380 in 0 : vector<8x28xf32>, vector<8x28xf32>, vector<8x28xf32>, vector<8x28xf32>, vector<8x28xf32>, vector<8x28xf32>, vector<8x28xf32>, vector<8x28xf32>, vector<8x28xf32>, vector<8x28xf32>, vector<8x28xf32>, vector<8x28xf32>, vector<8x28xf32>, vector<8x28xf32>, vector<8x28xf32>, vector<8x28xf32> -> vector<128x28xf32>
    %406 = tpu.concatenate %383, %386, %389, %392, %395, %398, %401, %404 in 0 : vector<8x28xf32>, vector<8x28xf32>, vector<8x28xf32>, vector<8x28xf32>, vector<8x28xf32>, vector<8x28xf32>, vector<8x28xf32>, vector<8x28xf32> -> vector<64x28xf32>
    %407 = tpu.concatenate %405, %406 in 0 : vector<128x28xf32>, vector<64x28xf32> -> vector<192x28xf32>
    %cst_376 = arith.constant dense<0.000000e+00> : vector<8x28xf32>
    %408 = tpu.matmul %0, %407, %cst_376 {dimension_numbers = #tpu.dot_dimension_numbers<[1], [0], [0], [1], [0, 0, 1, 1], [], []>} : vector<8x192xf32>, vector<192x28xf32>, vector<8x28xf32> -> vector<8x28xf32>
    %c0_377 = arith.constant 0 : index
    %c0_378 = arith.constant 0 : index
    %409 = arith.index_cast %332 : i32 to index
    %c0_379 = arith.constant 0 : index
    %410 = vector.load %arg4[%c0_377, %c0_378, %409, %c0_379] : memref<1x3x120x30xf32, #tpu.memory_space<vmem>>, vector<1x1x8x28xf32>
    %411 = vector.shape_cast %410 : vector<1x1x8x28xf32> to vector<8x28xf32>
    %c0_380 = arith.constant 0 : index
    %c0_381 = arith.constant 0 : index
    %412 = arith.index_cast %332 : i32 to index
    %c0_382 = arith.constant 0 : index
    %413 = vector.load %arg5[%c0_380, %c0_381, %412, %c0_382] : memref<1x3x120x30xf32, #tpu.memory_space<vmem>>, vector<1x1x8x28xf32>
    %414 = vector.shape_cast %413 : vector<1x1x8x28xf32> to vector<8x28xf32>
    %c0_383 = arith.constant 0 : index
    %c0_384 = arith.constant 0 : index
    %415 = arith.index_cast %332 : i32 to index
    %c1_385 = arith.constant 1 : index
    %416 = vector.load %arg2[%c0_383, %c0_384, %415, %c1_385] : memref<1x3x120x30xf32, #tpu.memory_space<vmem>>, vector<1x1x8x28xf32>
    %417 = vector.shape_cast %416 : vector<1x1x8x28xf32> to vector<8x28xf32>
    %c0_386 = arith.constant 0 : index
    %c0_387 = arith.constant 0 : index
    %418 = arith.index_cast %332 : i32 to index
    %c1_388 = arith.constant 1 : index
    %419 = vector.load %arg3[%c0_386, %c0_387, %418, %c1_388] : memref<1x3x120x30xf32, #tpu.memory_space<vmem>>, vector<1x1x8x28xf32>
    %420 = vector.shape_cast %419 : vector<1x1x8x28xf32> to vector<8x28xf32>
    %c0_389 = arith.constant 0 : index
    %c0_390 = arith.constant 0 : index
    %421 = arith.index_cast %332 : i32 to index
    %c1_391 = arith.constant 1 : index
    %422 = vector.load %arg4[%c0_389, %c0_390, %421, %c1_391] : memref<1x3x120x30xf32, #tpu.memory_space<vmem>>, vector<1x1x8x28xf32>
    %423 = vector.shape_cast %422 : vector<1x1x8x28xf32> to vector<8x28xf32>
    %c0_392 = arith.constant 0 : index
    %c0_393 = arith.constant 0 : index
    %424 = arith.index_cast %332 : i32 to index
    %c1_394 = arith.constant 1 : index
    %425 = vector.load %arg5[%c0_392, %c0_393, %424, %c1_394] : memref<1x3x120x30xf32, #tpu.memory_space<vmem>>, vector<1x1x8x28xf32>
    %426 = vector.shape_cast %425 : vector<1x1x8x28xf32> to vector<8x28xf32>
    %c0_395 = arith.constant 0 : index
    %c0_396 = arith.constant 0 : index
    %427 = arith.index_cast %332 : i32 to index
    %c2_397 = arith.constant 2 : index
    %428 = vector.load %arg2[%c0_395, %c0_396, %427, %c2_397] : memref<1x3x120x30xf32, #tpu.memory_space<vmem>>, vector<1x1x8x28xf32>
    %429 = vector.shape_cast %428 : vector<1x1x8x28xf32> to vector<8x28xf32>
    %c0_398 = arith.constant 0 : index
    %c0_399 = arith.constant 0 : index
    %430 = arith.index_cast %332 : i32 to index
    %c2_400 = arith.constant 2 : index
    %431 = vector.load %arg3[%c0_398, %c0_399, %430, %c2_400] : memref<1x3x120x30xf32, #tpu.memory_space<vmem>>, vector<1x1x8x28xf32>
    %432 = vector.shape_cast %431 : vector<1x1x8x28xf32> to vector<8x28xf32>
    %c0_401 = arith.constant 0 : index
    %c1_402 = arith.constant 1 : index
    %433 = arith.index_cast %332 : i32 to index
    %c0_403 = arith.constant 0 : index
    %434 = vector.load %arg4[%c0_401, %c1_402, %433, %c0_403] : memref<1x3x120x30xf32, #tpu.memory_space<vmem>>, vector<1x1x8x28xf32>
    %435 = vector.shape_cast %434 : vector<1x1x8x28xf32> to vector<8x28xf32>
    %c0_404 = arith.constant 0 : index
    %c1_405 = arith.constant 1 : index
    %436 = arith.index_cast %332 : i32 to index
    %c0_406 = arith.constant 0 : index
    %437 = vector.load %arg5[%c0_404, %c1_405, %436, %c0_406] : memref<1x3x120x30xf32, #tpu.memory_space<vmem>>, vector<1x1x8x28xf32>
    %438 = vector.shape_cast %437 : vector<1x1x8x28xf32> to vector<8x28xf32>
    %c0_407 = arith.constant 0 : index
    %c1_408 = arith.constant 1 : index
    %439 = arith.index_cast %332 : i32 to index
    %c1_409 = arith.constant 1 : index
    %440 = vector.load %arg2[%c0_407, %c1_408, %439, %c1_409] : memref<1x3x120x30xf32, #tpu.memory_space<vmem>>, vector<1x1x8x28xf32>
    %441 = vector.shape_cast %440 : vector<1x1x8x28xf32> to vector<8x28xf32>
    %c0_410 = arith.constant 0 : index
    %c1_411 = arith.constant 1 : index
    %442 = arith.index_cast %332 : i32 to index
    %c1_412 = arith.constant 1 : index
    %443 = vector.load %arg3[%c0_410, %c1_411, %442, %c1_412] : memref<1x3x120x30xf32, #tpu.memory_space<vmem>>, vector<1x1x8x28xf32>
    %444 = vector.shape_cast %443 : vector<1x1x8x28xf32> to vector<8x28xf32>
    %c0_413 = arith.constant 0 : index
    %c1_414 = arith.constant 1 : index
    %445 = arith.index_cast %332 : i32 to index
    %c1_415 = arith.constant 1 : index
    %446 = vector.load %arg4[%c0_413, %c1_414, %445, %c1_415] : memref<1x3x120x30xf32, #tpu.memory_space<vmem>>, vector<1x1x8x28xf32>
    %447 = vector.shape_cast %446 : vector<1x1x8x28xf32> to vector<8x28xf32>
    %c0_416 = arith.constant 0 : index
    %c1_417 = arith.constant 1 : index
    %448 = arith.index_cast %332 : i32 to index
    %c1_418 = arith.constant 1 : index
    %449 = vector.load %arg5[%c0_416, %c1_417, %448, %c1_418] : memref<1x3x120x30xf32, #tpu.memory_space<vmem>>, vector<1x1x8x28xf32>
    %450 = vector.shape_cast %449 : vector<1x1x8x28xf32> to vector<8x28xf32>
    %c0_419 = arith.constant 0 : index
    %c1_420 = arith.constant 1 : index
    %451 = arith.index_cast %332 : i32 to index
    %c2_421 = arith.constant 2 : index
    %452 = vector.load %arg2[%c0_419, %c1_420, %451, %c2_421] : memref<1x3x120x30xf32, #tpu.memory_space<vmem>>, vector<1x1x8x28xf32>
    %453 = vector.shape_cast %452 : vector<1x1x8x28xf32> to vector<8x28xf32>
    %c0_422 = arith.constant 0 : index
    %c1_423 = arith.constant 1 : index
    %454 = arith.index_cast %332 : i32 to index
    %c2_424 = arith.constant 2 : index
    %455 = vector.load %arg3[%c0_422, %c1_423, %454, %c2_424] : memref<1x3x120x30xf32, #tpu.memory_space<vmem>>, vector<1x1x8x28xf32>
    %456 = vector.shape_cast %455 : vector<1x1x8x28xf32> to vector<8x28xf32>
    %c0_425 = arith.constant 0 : index
    %c2_426 = arith.constant 2 : index
    %457 = arith.index_cast %332 : i32 to index
    %c0_427 = arith.constant 0 : index
    %458 = vector.load %arg4[%c0_425, %c2_426, %457, %c0_427] : memref<1x3x120x30xf32, #tpu.memory_space<vmem>>, vector<1x1x8x28xf32>
    %459 = vector.shape_cast %458 : vector<1x1x8x28xf32> to vector<8x28xf32>
    %c0_428 = arith.constant 0 : index
    %c2_429 = arith.constant 2 : index
    %460 = arith.index_cast %332 : i32 to index
    %c0_430 = arith.constant 0 : index
    %461 = vector.load %arg5[%c0_428, %c2_429, %460, %c0_430] : memref<1x3x120x30xf32, #tpu.memory_space<vmem>>, vector<1x1x8x28xf32>
    %462 = vector.shape_cast %461 : vector<1x1x8x28xf32> to vector<8x28xf32>
    %c0_431 = arith.constant 0 : index
    %c2_432 = arith.constant 2 : index
    %463 = arith.index_cast %332 : i32 to index
    %c1_433 = arith.constant 1 : index
    %464 = vector.load %arg2[%c0_431, %c2_432, %463, %c1_433] : memref<1x3x120x30xf32, #tpu.memory_space<vmem>>, vector<1x1x8x28xf32>
    %465 = vector.shape_cast %464 : vector<1x1x8x28xf32> to vector<8x28xf32>
    %c0_434 = arith.constant 0 : index
    %c2_435 = arith.constant 2 : index
    %466 = arith.index_cast %332 : i32 to index
    %c1_436 = arith.constant 1 : index
    %467 = vector.load %arg3[%c0_434, %c2_435, %466, %c1_436] : memref<1x3x120x30xf32, #tpu.memory_space<vmem>>, vector<1x1x8x28xf32>
    %468 = vector.shape_cast %467 : vector<1x1x8x28xf32> to vector<8x28xf32>
    %c0_437 = arith.constant 0 : index
    %c2_438 = arith.constant 2 : index
    %469 = arith.index_cast %332 : i32 to index
    %c1_439 = arith.constant 1 : index
    %470 = vector.load %arg4[%c0_437, %c2_438, %469, %c1_439] : memref<1x3x120x30xf32, #tpu.memory_space<vmem>>, vector<1x1x8x28xf32>
    %471 = vector.shape_cast %470 : vector<1x1x8x28xf32> to vector<8x28xf32>
    %c0_440 = arith.constant 0 : index
    %c2_441 = arith.constant 2 : index
    %472 = arith.index_cast %332 : i32 to index
    %c1_442 = arith.constant 1 : index
    %473 = vector.load %arg5[%c0_440, %c2_441, %472, %c1_442] : memref<1x3x120x30xf32, #tpu.memory_space<vmem>>, vector<1x1x8x28xf32>
    %474 = vector.shape_cast %473 : vector<1x1x8x28xf32> to vector<8x28xf32>
    %c0_443 = arith.constant 0 : index
    %c2_444 = arith.constant 2 : index
    %475 = arith.index_cast %332 : i32 to index
    %c2_445 = arith.constant 2 : index
    %476 = vector.load %arg2[%c0_443, %c2_444, %475, %c2_445] : memref<1x3x120x30xf32, #tpu.memory_space<vmem>>, vector<1x1x8x28xf32>
    %477 = vector.shape_cast %476 : vector<1x1x8x28xf32> to vector<8x28xf32>
    %c0_446 = arith.constant 0 : index
    %c2_447 = arith.constant 2 : index
    %478 = arith.index_cast %332 : i32 to index
    %c2_448 = arith.constant 2 : index
    %479 = vector.load %arg3[%c0_446, %c2_447, %478, %c2_448] : memref<1x3x120x30xf32, #tpu.memory_space<vmem>>, vector<1x1x8x28xf32>
    %480 = vector.shape_cast %479 : vector<1x1x8x28xf32> to vector<8x28xf32>
    %481 = tpu.concatenate %411, %414, %417, %420, %423, %426, %429, %432, %435, %438, %441, %444, %447, %450, %453, %456 in 0 : vector<8x28xf32>, vector<8x28xf32>, vector<8x28xf32>, vector<8x28xf32>, vector<8x28xf32>, vector<8x28xf32>, vector<8x28xf32>, vector<8x28xf32>, vector<8x28xf32>, vector<8x28xf32>, vector<8x28xf32>, vector<8x28xf32>, vector<8x28xf32>, vector<8x28xf32>, vector<8x28xf32>, vector<8x28xf32> -> vector<128x28xf32>
    %482 = tpu.concatenate %459, %462, %465, %468, %471, %474, %477, %480 in 0 : vector<8x28xf32>, vector<8x28xf32>, vector<8x28xf32>, vector<8x28xf32>, vector<8x28xf32>, vector<8x28xf32>, vector<8x28xf32>, vector<8x28xf32> -> vector<64x28xf32>
    %483 = tpu.concatenate %481, %482 in 0 : vector<128x28xf32>, vector<64x28xf32> -> vector<192x28xf32>
    %cst_449 = arith.constant dense<0.000000e+00> : vector<8x28xf32>
    %484 = tpu.matmul %0, %483, %cst_449 {dimension_numbers = #tpu.dot_dimension_numbers<[1], [0], [0], [1], [0, 0, 1, 1], [], []>} : vector<8x192xf32>, vector<192x28xf32>, vector<8x28xf32> -> vector<8x28xf32>
    %485 = arith.maximumf %408, %484 : vector<8x28xf32>
    %c4_i32_450 = arith.constant 4 : i32
    %486 = arith.muli %c4_i32_450, %329 : i32
    %c2_i32_451 = arith.constant 2 : i32
    %487 = arith.addi %486, %c2_i32_451 : i32
    %488 = tpu.assume_multiple %487, 2 : i32
    %c0_452 = arith.constant 0 : index
    %c0_453 = arith.constant 0 : index
    %489 = arith.index_cast %488 : i32 to index
    %c0_454 = arith.constant 0 : index
    %490 = vector.load %arg2[%c0_452, %c0_453, %489, %c0_454] : memref<1x3x120x30xf32, #tpu.memory_space<vmem>>, vector<1x1x8x28xf32>
    %491 = vector.shape_cast %490 : vector<1x1x8x28xf32> to vector<8x28xf32>
    %c0_455 = arith.constant 0 : index
    %c0_456 = arith.constant 0 : index
    %492 = arith.index_cast %488 : i32 to index
    %c0_457 = arith.constant 0 : index
    %493 = vector.load %arg3[%c0_455, %c0_456, %492, %c0_457] : memref<1x3x120x30xf32, #tpu.memory_space<vmem>>, vector<1x1x8x28xf32>
    %494 = vector.shape_cast %493 : vector<1x1x8x28xf32> to vector<8x28xf32>
    %c0_458 = arith.constant 0 : index
    %c0_459 = arith.constant 0 : index
    %495 = arith.index_cast %488 : i32 to index
    %c0_460 = arith.constant 0 : index
    %496 = vector.load %arg4[%c0_458, %c0_459, %495, %c0_460] : memref<1x3x120x30xf32, #tpu.memory_space<vmem>>, vector<1x1x8x28xf32>
    %497 = vector.shape_cast %496 : vector<1x1x8x28xf32> to vector<8x28xf32>
    %c0_461 = arith.constant 0 : index
    %c0_462 = arith.constant 0 : index
    %498 = arith.index_cast %488 : i32 to index
    %c0_463 = arith.constant 0 : index
    %499 = vector.load %arg5[%c0_461, %c0_462, %498, %c0_463] : memref<1x3x120x30xf32, #tpu.memory_space<vmem>>, vector<1x1x8x28xf32>
    %500 = vector.shape_cast %499 : vector<1x1x8x28xf32> to vector<8x28xf32>
    %c0_464 = arith.constant 0 : index
    %c0_465 = arith.constant 0 : index
    %501 = arith.index_cast %488 : i32 to index
    %c1_466 = arith.constant 1 : index
    %502 = vector.load %arg2[%c0_464, %c0_465, %501, %c1_466] : memref<1x3x120x30xf32, #tpu.memory_space<vmem>>, vector<1x1x8x28xf32>
    %503 = vector.shape_cast %502 : vector<1x1x8x28xf32> to vector<8x28xf32>
    %c0_467 = arith.constant 0 : index
    %c0_468 = arith.constant 0 : index
    %504 = arith.index_cast %488 : i32 to index
    %c1_469 = arith.constant 1 : index
    %505 = vector.load %arg3[%c0_467, %c0_468, %504, %c1_469] : memref<1x3x120x30xf32, #tpu.memory_space<vmem>>, vector<1x1x8x28xf32>
    %506 = vector.shape_cast %505 : vector<1x1x8x28xf32> to vector<8x28xf32>
    %c0_470 = arith.constant 0 : index
    %c0_471 = arith.constant 0 : index
    %507 = arith.index_cast %488 : i32 to index
    %c1_472 = arith.constant 1 : index
    %508 = vector.load %arg4[%c0_470, %c0_471, %507, %c1_472] : memref<1x3x120x30xf32, #tpu.memory_space<vmem>>, vector<1x1x8x28xf32>
    %509 = vector.shape_cast %508 : vector<1x1x8x28xf32> to vector<8x28xf32>
    %c0_473 = arith.constant 0 : index
    %c0_474 = arith.constant 0 : index
    %510 = arith.index_cast %488 : i32 to index
    %c1_475 = arith.constant 1 : index
    %511 = vector.load %arg5[%c0_473, %c0_474, %510, %c1_475] : memref<1x3x120x30xf32, #tpu.memory_space<vmem>>, vector<1x1x8x28xf32>
    %512 = vector.shape_cast %511 : vector<1x1x8x28xf32> to vector<8x28xf32>
    %c0_476 = arith.constant 0 : index
    %c1_477 = arith.constant 1 : index
    %513 = arith.index_cast %488 : i32 to index
    %c0_478 = arith.constant 0 : index
    %514 = vector.load %arg2[%c0_476, %c1_477, %513, %c0_478] : memref<1x3x120x30xf32, #tpu.memory_space<vmem>>, vector<1x1x8x28xf32>
    %515 = vector.shape_cast %514 : vector<1x1x8x28xf32> to vector<8x28xf32>
    %c0_479 = arith.constant 0 : index
    %c1_480 = arith.constant 1 : index
    %516 = arith.index_cast %488 : i32 to index
    %c0_481 = arith.constant 0 : index
    %517 = vector.load %arg3[%c0_479, %c1_480, %516, %c0_481] : memref<1x3x120x30xf32, #tpu.memory_space<vmem>>, vector<1x1x8x28xf32>
    %518 = vector.shape_cast %517 : vector<1x1x8x28xf32> to vector<8x28xf32>
    %c0_482 = arith.constant 0 : index
    %c1_483 = arith.constant 1 : index
    %519 = arith.index_cast %488 : i32 to index
    %c0_484 = arith.constant 0 : index
    %520 = vector.load %arg4[%c0_482, %c1_483, %519, %c0_484] : memref<1x3x120x30xf32, #tpu.memory_space<vmem>>, vector<1x1x8x28xf32>
    %521 = vector.shape_cast %520 : vector<1x1x8x28xf32> to vector<8x28xf32>
    %c0_485 = arith.constant 0 : index
    %c1_486 = arith.constant 1 : index
    %522 = arith.index_cast %488 : i32 to index
    %c0_487 = arith.constant 0 : index
    %523 = vector.load %arg5[%c0_485, %c1_486, %522, %c0_487] : memref<1x3x120x30xf32, #tpu.memory_space<vmem>>, vector<1x1x8x28xf32>
    %524 = vector.shape_cast %523 : vector<1x1x8x28xf32> to vector<8x28xf32>
    %c0_488 = arith.constant 0 : index
    %c1_489 = arith.constant 1 : index
    %525 = arith.index_cast %488 : i32 to index
    %c1_490 = arith.constant 1 : index
    %526 = vector.load %arg2[%c0_488, %c1_489, %525, %c1_490] : memref<1x3x120x30xf32, #tpu.memory_space<vmem>>, vector<1x1x8x28xf32>
    %527 = vector.shape_cast %526 : vector<1x1x8x28xf32> to vector<8x28xf32>
    %c0_491 = arith.constant 0 : index
    %c1_492 = arith.constant 1 : index
    %528 = arith.index_cast %488 : i32 to index
    %c1_493 = arith.constant 1 : index
    %529 = vector.load %arg3[%c0_491, %c1_492, %528, %c1_493] : memref<1x3x120x30xf32, #tpu.memory_space<vmem>>, vector<1x1x8x28xf32>
    %530 = vector.shape_cast %529 : vector<1x1x8x28xf32> to vector<8x28xf32>
    %c0_494 = arith.constant 0 : index
    %c1_495 = arith.constant 1 : index
    %531 = arith.index_cast %488 : i32 to index
    %c1_496 = arith.constant 1 : index
    %532 = vector.load %arg4[%c0_494, %c1_495, %531, %c1_496] : memref<1x3x120x30xf32, #tpu.memory_space<vmem>>, vector<1x1x8x28xf32>
    %533 = vector.shape_cast %532 : vector<1x1x8x28xf32> to vector<8x28xf32>
    %c0_497 = arith.constant 0 : index
    %c1_498 = arith.constant 1 : index
    %534 = arith.index_cast %488 : i32 to index
    %c1_499 = arith.constant 1 : index
    %535 = vector.load %arg5[%c0_497, %c1_498, %534, %c1_499] : memref<1x3x120x30xf32, #tpu.memory_space<vmem>>, vector<1x1x8x28xf32>
    %536 = vector.shape_cast %535 : vector<1x1x8x28xf32> to vector<8x28xf32>
    %c0_500 = arith.constant 0 : index
    %c2_501 = arith.constant 2 : index
    %537 = arith.index_cast %488 : i32 to index
    %c0_502 = arith.constant 0 : index
    %538 = vector.load %arg2[%c0_500, %c2_501, %537, %c0_502] : memref<1x3x120x30xf32, #tpu.memory_space<vmem>>, vector<1x1x8x28xf32>
    %539 = vector.shape_cast %538 : vector<1x1x8x28xf32> to vector<8x28xf32>
    %c0_503 = arith.constant 0 : index
    %c2_504 = arith.constant 2 : index
    %540 = arith.index_cast %488 : i32 to index
    %c0_505 = arith.constant 0 : index
    %541 = vector.load %arg3[%c0_503, %c2_504, %540, %c0_505] : memref<1x3x120x30xf32, #tpu.memory_space<vmem>>, vector<1x1x8x28xf32>
    %542 = vector.shape_cast %541 : vector<1x1x8x28xf32> to vector<8x28xf32>
    %c0_506 = arith.constant 0 : index
    %c2_507 = arith.constant 2 : index
    %543 = arith.index_cast %488 : i32 to index
    %c0_508 = arith.constant 0 : index
    %544 = vector.load %arg4[%c0_506, %c2_507, %543, %c0_508] : memref<1x3x120x30xf32, #tpu.memory_space<vmem>>, vector<1x1x8x28xf32>
    %545 = vector.shape_cast %544 : vector<1x1x8x28xf32> to vector<8x28xf32>
    %c0_509 = arith.constant 0 : index
    %c2_510 = arith.constant 2 : index
    %546 = arith.index_cast %488 : i32 to index
    %c0_511 = arith.constant 0 : index
    %547 = vector.load %arg5[%c0_509, %c2_510, %546, %c0_511] : memref<1x3x120x30xf32, #tpu.memory_space<vmem>>, vector<1x1x8x28xf32>
    %548 = vector.shape_cast %547 : vector<1x1x8x28xf32> to vector<8x28xf32>
    %c0_512 = arith.constant 0 : index
    %c2_513 = arith.constant 2 : index
    %549 = arith.index_cast %488 : i32 to index
    %c1_514 = arith.constant 1 : index
    %550 = vector.load %arg2[%c0_512, %c2_513, %549, %c1_514] : memref<1x3x120x30xf32, #tpu.memory_space<vmem>>, vector<1x1x8x28xf32>
    %551 = vector.shape_cast %550 : vector<1x1x8x28xf32> to vector<8x28xf32>
    %c0_515 = arith.constant 0 : index
    %c2_516 = arith.constant 2 : index
    %552 = arith.index_cast %488 : i32 to index
    %c1_517 = arith.constant 1 : index
    %553 = vector.load %arg3[%c0_515, %c2_516, %552, %c1_517] : memref<1x3x120x30xf32, #tpu.memory_space<vmem>>, vector<1x1x8x28xf32>
    %554 = vector.shape_cast %553 : vector<1x1x8x28xf32> to vector<8x28xf32>
    %c0_518 = arith.constant 0 : index
    %c2_519 = arith.constant 2 : index
    %555 = arith.index_cast %488 : i32 to index
    %c1_520 = arith.constant 1 : index
    %556 = vector.load %arg4[%c0_518, %c2_519, %555, %c1_520] : memref<1x3x120x30xf32, #tpu.memory_space<vmem>>, vector<1x1x8x28xf32>
    %557 = vector.shape_cast %556 : vector<1x1x8x28xf32> to vector<8x28xf32>
    %c0_521 = arith.constant 0 : index
    %c2_522 = arith.constant 2 : index
    %558 = arith.index_cast %488 : i32 to index
    %c1_523 = arith.constant 1 : index
    %559 = vector.load %arg5[%c0_521, %c2_522, %558, %c1_523] : memref<1x3x120x30xf32, #tpu.memory_space<vmem>>, vector<1x1x8x28xf32>
    %560 = vector.shape_cast %559 : vector<1x1x8x28xf32> to vector<8x28xf32>
    %561 = tpu.concatenate %491, %494, %497, %500, %503, %506, %509, %512, %515, %518, %521, %524, %527, %530, %533, %536 in 0 : vector<8x28xf32>, vector<8x28xf32>, vector<8x28xf32>, vector<8x28xf32>, vector<8x28xf32>, vector<8x28xf32>, vector<8x28xf32>, vector<8x28xf32>, vector<8x28xf32>, vector<8x28xf32>, vector<8x28xf32>, vector<8x28xf32>, vector<8x28xf32>, vector<8x28xf32>, vector<8x28xf32>, vector<8x28xf32> -> vector<128x28xf32>
    %562 = tpu.concatenate %539, %542, %545, %548, %551, %554, %557, %560 in 0 : vector<8x28xf32>, vector<8x28xf32>, vector<8x28xf32>, vector<8x28xf32>, vector<8x28xf32>, vector<8x28xf32>, vector<8x28xf32>, vector<8x28xf32> -> vector<64x28xf32>
    %563 = tpu.concatenate %561, %562 in 0 : vector<128x28xf32>, vector<64x28xf32> -> vector<192x28xf32>
    %cst_524 = arith.constant dense<0.000000e+00> : vector<8x28xf32>
    %564 = tpu.matmul %0, %563, %cst_524 {dimension_numbers = #tpu.dot_dimension_numbers<[1], [0], [0], [1], [0, 0, 1, 1], [], []>} : vector<8x192xf32>, vector<192x28xf32>, vector<8x28xf32> -> vector<8x28xf32>
    %565 = arith.maximumf %485, %564 : vector<8x28xf32>
    %c0_525 = arith.constant 0 : index
    %c0_526 = arith.constant 0 : index
    %566 = arith.index_cast %488 : i32 to index
    %c0_527 = arith.constant 0 : index
    %567 = vector.load %arg4[%c0_525, %c0_526, %566, %c0_527] : memref<1x3x120x30xf32, #tpu.memory_space<vmem>>, vector<1x1x8x28xf32>
    %568 = vector.shape_cast %567 : vector<1x1x8x28xf32> to vector<8x28xf32>
    %c0_528 = arith.constant 0 : index
    %c0_529 = arith.constant 0 : index
    %569 = arith.index_cast %488 : i32 to index
    %c0_530 = arith.constant 0 : index
    %570 = vector.load %arg5[%c0_528, %c0_529, %569, %c0_530] : memref<1x3x120x30xf32, #tpu.memory_space<vmem>>, vector<1x1x8x28xf32>
    %571 = vector.shape_cast %570 : vector<1x1x8x28xf32> to vector<8x28xf32>
    %c0_531 = arith.constant 0 : index
    %c0_532 = arith.constant 0 : index
    %572 = arith.index_cast %488 : i32 to index
    %c1_533 = arith.constant 1 : index
    %573 = vector.load %arg2[%c0_531, %c0_532, %572, %c1_533] : memref<1x3x120x30xf32, #tpu.memory_space<vmem>>, vector<1x1x8x28xf32>
    %574 = vector.shape_cast %573 : vector<1x1x8x28xf32> to vector<8x28xf32>
    %c0_534 = arith.constant 0 : index
    %c0_535 = arith.constant 0 : index
    %575 = arith.index_cast %488 : i32 to index
    %c1_536 = arith.constant 1 : index
    %576 = vector.load %arg3[%c0_534, %c0_535, %575, %c1_536] : memref<1x3x120x30xf32, #tpu.memory_space<vmem>>, vector<1x1x8x28xf32>
    %577 = vector.shape_cast %576 : vector<1x1x8x28xf32> to vector<8x28xf32>
    %c0_537 = arith.constant 0 : index
    %c0_538 = arith.constant 0 : index
    %578 = arith.index_cast %488 : i32 to index
    %c1_539 = arith.constant 1 : index
    %579 = vector.load %arg4[%c0_537, %c0_538, %578, %c1_539] : memref<1x3x120x30xf32, #tpu.memory_space<vmem>>, vector<1x1x8x28xf32>
    %580 = vector.shape_cast %579 : vector<1x1x8x28xf32> to vector<8x28xf32>
    %c0_540 = arith.constant 0 : index
    %c0_541 = arith.constant 0 : index
    %581 = arith.index_cast %488 : i32 to index
    %c1_542 = arith.constant 1 : index
    %582 = vector.load %arg5[%c0_540, %c0_541, %581, %c1_542] : memref<1x3x120x30xf32, #tpu.memory_space<vmem>>, vector<1x1x8x28xf32>
    %583 = vector.shape_cast %582 : vector<1x1x8x28xf32> to vector<8x28xf32>
    %c0_543 = arith.constant 0 : index
    %c0_544 = arith.constant 0 : index
    %584 = arith.index_cast %488 : i32 to index
    %c2_545 = arith.constant 2 : index
    %585 = vector.load %arg2[%c0_543, %c0_544, %584, %c2_545] : memref<1x3x120x30xf32, #tpu.memory_space<vmem>>, vector<1x1x8x28xf32>
    %586 = vector.shape_cast %585 : vector<1x1x8x28xf32> to vector<8x28xf32>
    %c0_546 = arith.constant 0 : index
    %c0_547 = arith.constant 0 : index
    %587 = arith.index_cast %488 : i32 to index
    %c2_548 = arith.constant 2 : index
    %588 = vector.load %arg3[%c0_546, %c0_547, %587, %c2_548] : memref<1x3x120x30xf32, #tpu.memory_space<vmem>>, vector<1x1x8x28xf32>
    %589 = vector.shape_cast %588 : vector<1x1x8x28xf32> to vector<8x28xf32>
    %c0_549 = arith.constant 0 : index
    %c1_550 = arith.constant 1 : index
    %590 = arith.index_cast %488 : i32 to index
    %c0_551 = arith.constant 0 : index
    %591 = vector.load %arg4[%c0_549, %c1_550, %590, %c0_551] : memref<1x3x120x30xf32, #tpu.memory_space<vmem>>, vector<1x1x8x28xf32>
    %592 = vector.shape_cast %591 : vector<1x1x8x28xf32> to vector<8x28xf32>
    %c0_552 = arith.constant 0 : index
    %c1_553 = arith.constant 1 : index
    %593 = arith.index_cast %488 : i32 to index
    %c0_554 = arith.constant 0 : index
    %594 = vector.load %arg5[%c0_552, %c1_553, %593, %c0_554] : memref<1x3x120x30xf32, #tpu.memory_space<vmem>>, vector<1x1x8x28xf32>
    %595 = vector.shape_cast %594 : vector<1x1x8x28xf32> to vector<8x28xf32>
    %c0_555 = arith.constant 0 : index
    %c1_556 = arith.constant 1 : index
    %596 = arith.index_cast %488 : i32 to index
    %c1_557 = arith.constant 1 : index
    %597 = vector.load %arg2[%c0_555, %c1_556, %596, %c1_557] : memref<1x3x120x30xf32, #tpu.memory_space<vmem>>, vector<1x1x8x28xf32>
    %598 = vector.shape_cast %597 : vector<1x1x8x28xf32> to vector<8x28xf32>
    %c0_558 = arith.constant 0 : index
    %c1_559 = arith.constant 1 : index
    %599 = arith.index_cast %488 : i32 to index
    %c1_560 = arith.constant 1 : index
    %600 = vector.load %arg3[%c0_558, %c1_559, %599, %c1_560] : memref<1x3x120x30xf32, #tpu.memory_space<vmem>>, vector<1x1x8x28xf32>
    %601 = vector.shape_cast %600 : vector<1x1x8x28xf32> to vector<8x28xf32>
    %c0_561 = arith.constant 0 : index
    %c1_562 = arith.constant 1 : index
    %602 = arith.index_cast %488 : i32 to index
    %c1_563 = arith.constant 1 : index
    %603 = vector.load %arg4[%c0_561, %c1_562, %602, %c1_563] : memref<1x3x120x30xf32, #tpu.memory_space<vmem>>, vector<1x1x8x28xf32>
    %604 = vector.shape_cast %603 : vector<1x1x8x28xf32> to vector<8x28xf32>
    %c0_564 = arith.constant 0 : index
    %c1_565 = arith.constant 1 : index
    %605 = arith.index_cast %488 : i32 to index
    %c1_566 = arith.constant 1 : index
    %606 = vector.load %arg5[%c0_564, %c1_565, %605, %c1_566] : memref<1x3x120x30xf32, #tpu.memory_space<vmem>>, vector<1x1x8x28xf32>
    %607 = vector.shape_cast %606 : vector<1x1x8x28xf32> to vector<8x28xf32>
    %c0_567 = arith.constant 0 : index
    %c1_568 = arith.constant 1 : index
    %608 = arith.index_cast %488 : i32 to index
    %c2_569 = arith.constant 2 : index
    %609 = vector.load %arg2[%c0_567, %c1_568, %608, %c2_569] : memref<1x3x120x30xf32, #tpu.memory_space<vmem>>, vector<1x1x8x28xf32>
    %610 = vector.shape_cast %609 : vector<1x1x8x28xf32> to vector<8x28xf32>
    %c0_570 = arith.constant 0 : index
    %c1_571 = arith.constant 1 : index
    %611 = arith.index_cast %488 : i32 to index
    %c2_572 = arith.constant 2 : index
    %612 = vector.load %arg3[%c0_570, %c1_571, %611, %c2_572] : memref<1x3x120x30xf32, #tpu.memory_space<vmem>>, vector<1x1x8x28xf32>
    %613 = vector.shape_cast %612 : vector<1x1x8x28xf32> to vector<8x28xf32>
    %c0_573 = arith.constant 0 : index
    %c2_574 = arith.constant 2 : index
    %614 = arith.index_cast %488 : i32 to index
    %c0_575 = arith.constant 0 : index
    %615 = vector.load %arg4[%c0_573, %c2_574, %614, %c0_575] : memref<1x3x120x30xf32, #tpu.memory_space<vmem>>, vector<1x1x8x28xf32>
    %616 = vector.shape_cast %615 : vector<1x1x8x28xf32> to vector<8x28xf32>
    %c0_576 = arith.constant 0 : index
    %c2_577 = arith.constant 2 : index
    %617 = arith.index_cast %488 : i32 to index
    %c0_578 = arith.constant 0 : index
    %618 = vector.load %arg5[%c0_576, %c2_577, %617, %c0_578] : memref<1x3x120x30xf32, #tpu.memory_space<vmem>>, vector<1x1x8x28xf32>
    %619 = vector.shape_cast %618 : vector<1x1x8x28xf32> to vector<8x28xf32>
    %c0_579 = arith.constant 0 : index
    %c2_580 = arith.constant 2 : index
    %620 = arith.index_cast %488 : i32 to index
    %c1_581 = arith.constant 1 : index
    %621 = vector.load %arg2[%c0_579, %c2_580, %620, %c1_581] : memref<1x3x120x30xf32, #tpu.memory_space<vmem>>, vector<1x1x8x28xf32>
    %622 = vector.shape_cast %621 : vector<1x1x8x28xf32> to vector<8x28xf32>
    %c0_582 = arith.constant 0 : index
    %c2_583 = arith.constant 2 : index
    %623 = arith.index_cast %488 : i32 to index
    %c1_584 = arith.constant 1 : index
    %624 = vector.load %arg3[%c0_582, %c2_583, %623, %c1_584] : memref<1x3x120x30xf32, #tpu.memory_space<vmem>>, vector<1x1x8x28xf32>
    %625 = vector.shape_cast %624 : vector<1x1x8x28xf32> to vector<8x28xf32>
    %c0_585 = arith.constant 0 : index
    %c2_586 = arith.constant 2 : index
    %626 = arith.index_cast %488 : i32 to index
    %c1_587 = arith.constant 1 : index
    %627 = vector.load %arg4[%c0_585, %c2_586, %626, %c1_587] : memref<1x3x120x30xf32, #tpu.memory_space<vmem>>, vector<1x1x8x28xf32>
    %628 = vector.shape_cast %627 : vector<1x1x8x28xf32> to vector<8x28xf32>
    %c0_588 = arith.constant 0 : index
    %c2_589 = arith.constant 2 : index
    %629 = arith.index_cast %488 : i32 to index
    %c1_590 = arith.constant 1 : index
    %630 = vector.load %arg5[%c0_588, %c2_589, %629, %c1_590] : memref<1x3x120x30xf32, #tpu.memory_space<vmem>>, vector<1x1x8x28xf32>
    %631 = vector.shape_cast %630 : vector<1x1x8x28xf32> to vector<8x28xf32>
    %c0_591 = arith.constant 0 : index
    %c2_592 = arith.constant 2 : index
    %632 = arith.index_cast %488 : i32 to index
    %c2_593 = arith.constant 2 : index
    %633 = vector.load %arg2[%c0_591, %c2_592, %632, %c2_593] : memref<1x3x120x30xf32, #tpu.memory_space<vmem>>, vector<1x1x8x28xf32>
    %634 = vector.shape_cast %633 : vector<1x1x8x28xf32> to vector<8x28xf32>
    %c0_594 = arith.constant 0 : index
    %c2_595 = arith.constant 2 : index
    %635 = arith.index_cast %488 : i32 to index
    %c2_596 = arith.constant 2 : index
    %636 = vector.load %arg3[%c0_594, %c2_595, %635, %c2_596] : memref<1x3x120x30xf32, #tpu.memory_space<vmem>>, vector<1x1x8x28xf32>
    %637 = vector.shape_cast %636 : vector<1x1x8x28xf32> to vector<8x28xf32>
    %638 = tpu.concatenate %568, %571, %574, %577, %580, %583, %586, %589, %592, %595, %598, %601, %604, %607, %610, %613 in 0 : vector<8x28xf32>, vector<8x28xf32>, vector<8x28xf32>, vector<8x28xf32>, vector<8x28xf32>, vector<8x28xf32>, vector<8x28xf32>, vector<8x28xf32>, vector<8x28xf32>, vector<8x28xf32>, vector<8x28xf32>, vector<8x28xf32>, vector<8x28xf32>, vector<8x28xf32>, vector<8x28xf32>, vector<8x28xf32> -> vector<128x28xf32>
    %639 = tpu.concatenate %616, %619, %622, %625, %628, %631, %634, %637 in 0 : vector<8x28xf32>, vector<8x28xf32>, vector<8x28xf32>, vector<8x28xf32>, vector<8x28xf32>, vector<8x28xf32>, vector<8x28xf32>, vector<8x28xf32> -> vector<64x28xf32>
    %640 = tpu.concatenate %638, %639 in 0 : vector<128x28xf32>, vector<64x28xf32> -> vector<192x28xf32>
    %cst_597 = arith.constant dense<0.000000e+00> : vector<8x28xf32>
    %641 = tpu.matmul %0, %640, %cst_597 {dimension_numbers = #tpu.dot_dimension_numbers<[1], [0], [0], [1], [0, 0, 1, 1], [], []>} : vector<8x192xf32>, vector<192x28xf32>, vector<8x28xf32> -> vector<8x28xf32>
    %642 = arith.maximumf %565, %641 : vector<8x28xf32>
    %643 = vector.broadcast %1 : vector<8x1xf32> to vector<8x28xf32>
    %644 = arith.addf %642, %643 : vector<8x28xf32>
    %cst_598 = arith.constant 0.000000e+00 : f32
    %645 = vector.broadcast %cst_598 : f32 to vector<8x28xf32>
    %646 = arith.cmpf oge, %644, %645 : vector<8x28xf32>
    %cst_599 = arith.constant 0.00999999977 : f32
    %647 = vector.broadcast %cst_599 : f32 to vector<8x28xf32>
    %648 = arith.mulf %647, %644 : vector<8x28xf32>
    %649 = arith.select %646, %644, %648 : vector<8x28xi1>, vector<8x28xf32>
    %650 = vector.extract_strided_slice %649 {offsets = [0, 0], sizes = [6, 28], strides = [1, 1]} : vector<8x28xf32> to vector<6x28xf32>
    %c0_600 = arith.constant 0 : index
    %c1_601 = arith.constant 1 : index
    %c0_602 = arith.constant 0 : index
    %c0_603 = arith.constant 0 : index
    %651 = vector.load %arg8[%c0_600, %c1_601, %c0_602, %c0_603] : memref<1x4x6x28xf32, #tpu.memory_space<vmem>>, vector<1x1x6x28xf32>
    %652 = vector.shape_cast %651 : vector<1x1x6x28xf32> to vector<6x28xf32>
    %653 = vector.shape_cast %650 : vector<6x28xf32> to vector<1x1x6x28xf32>
    tpu.vector_store %arg8[%c0_600, %c1_601, %c0_602, %c0_603], %653 {strides = array<i32>} : memref<1x4x6x28xf32, #tpu.memory_space<vmem>>, vector<1x1x6x28xf32>,
    %c4_i32_604 = arith.constant 4 : i32
    %654 = arith.muli %c4_i32_604, %arg1 : i32
    %c2_i32_605 = arith.constant 2 : i32
    %655 = arith.addi %654, %c2_i32_605 : i32
    %c4_i32_606 = arith.constant 4 : i32
    %656 = arith.muli %c4_i32_606, %655 : i32
    %c0_i32_607 = arith.constant 0 : i32
    %657 = arith.addi %656, %c0_i32_607 : i32
    %658 = tpu.assume_multiple %657, 2 : i32
    %c0_608 = arith.constant 0 : index
    %c0_609 = arith.constant 0 : index
    %659 = arith.index_cast %658 : i32 to index
    %c0_610 = arith.constant 0 : index
    %660 = vector.load %arg2[%c0_608, %c0_609, %659, %c0_610] : memref<1x3x120x30xf32, #tpu.memory_space<vmem>>, vector<1x1x8x28xf32>
    %661 = vector.shape_cast %660 : vector<1x1x8x28xf32> to vector<8x28xf32>
    %c0_611 = arith.constant 0 : index
    %c0_612 = arith.constant 0 : index
    %662 = arith.index_cast %658 : i32 to index
    %c0_613 = arith.constant 0 : index
    %663 = vector.load %arg3[%c0_611, %c0_612, %662, %c0_613] : memref<1x3x120x30xf32, #tpu.memory_space<vmem>>, vector<1x1x8x28xf32>
    %664 = vector.shape_cast %663 : vector<1x1x8x28xf32> to vector<8x28xf32>
    %c0_614 = arith.constant 0 : index
    %c0_615 = arith.constant 0 : index
    %665 = arith.index_cast %658 : i32 to index
    %c0_616 = arith.constant 0 : index
    %666 = vector.load %arg4[%c0_614, %c0_615, %665, %c0_616] : memref<1x3x120x30xf32, #tpu.memory_space<vmem>>, vector<1x1x8x28xf32>
    %667 = vector.shape_cast %666 : vector<1x1x8x28xf32> to vector<8x28xf32>
    %c0_617 = arith.constant 0 : index
    %c0_618 = arith.constant 0 : index
    %668 = arith.index_cast %658 : i32 to index
    %c0_619 = arith.constant 0 : index
    %669 = vector.load %arg5[%c0_617, %c0_618, %668, %c0_619] : memref<1x3x120x30xf32, #tpu.memory_space<vmem>>, vector<1x1x8x28xf32>
    %670 = vector.shape_cast %669 : vector<1x1x8x28xf32> to vector<8x28xf32>
    %c0_620 = arith.constant 0 : index
    %c0_621 = arith.constant 0 : index
    %671 = arith.index_cast %658 : i32 to index
    %c1_622 = arith.constant 1 : index
    %672 = vector.load %arg2[%c0_620, %c0_621, %671, %c1_622] : memref<1x3x120x30xf32, #tpu.memory_space<vmem>>, vector<1x1x8x28xf32>
    %673 = vector.shape_cast %672 : vector<1x1x8x28xf32> to vector<8x28xf32>
    %c0_623 = arith.constant 0 : index
    %c0_624 = arith.constant 0 : index
    %674 = arith.index_cast %658 : i32 to index
    %c1_625 = arith.constant 1 : index
    %675 = vector.load %arg3[%c0_623, %c0_624, %674, %c1_625] : memref<1x3x120x30xf32, #tpu.memory_space<vmem>>, vector<1x1x8x28xf32>
    %676 = vector.shape_cast %675 : vector<1x1x8x28xf32> to vector<8x28xf32>
    %c0_626 = arith.constant 0 : index
    %c0_627 = arith.constant 0 : index
    %677 = arith.index_cast %658 : i32 to index
    %c1_628 = arith.constant 1 : index
    %678 = vector.load %arg4[%c0_626, %c0_627, %677, %c1_628] : memref<1x3x120x30xf32, #tpu.memory_space<vmem>>, vector<1x1x8x28xf32>
    %679 = vector.shape_cast %678 : vector<1x1x8x28xf32> to vector<8x28xf32>
    %c0_629 = arith.constant 0 : index
    %c0_630 = arith.constant 0 : index
    %680 = arith.index_cast %658 : i32 to index
    %c1_631 = arith.constant 1 : index
    %681 = vector.load %arg5[%c0_629, %c0_630, %680, %c1_631] : memref<1x3x120x30xf32, #tpu.memory_space<vmem>>, vector<1x1x8x28xf32>
    %682 = vector.shape_cast %681 : vector<1x1x8x28xf32> to vector<8x28xf32>
    %c0_632 = arith.constant 0 : index
    %c1_633 = arith.constant 1 : index
    %683 = arith.index_cast %658 : i32 to index
    %c0_634 = arith.constant 0 : index
    %684 = vector.load %arg2[%c0_632, %c1_633, %683, %c0_634] : memref<1x3x120x30xf32, #tpu.memory_space<vmem>>, vector<1x1x8x28xf32>
    %685 = vector.shape_cast %684 : vector<1x1x8x28xf32> to vector<8x28xf32>
    %c0_635 = arith.constant 0 : index
    %c1_636 = arith.constant 1 : index
    %686 = arith.index_cast %658 : i32 to index
    %c0_637 = arith.constant 0 : index
    %687 = vector.load %arg3[%c0_635, %c1_636, %686, %c0_637] : memref<1x3x120x30xf32, #tpu.memory_space<vmem>>, vector<1x1x8x28xf32>
    %688 = vector.shape_cast %687 : vector<1x1x8x28xf32> to vector<8x28xf32>
    %c0_638 = arith.constant 0 : index
    %c1_639 = arith.constant 1 : index
    %689 = arith.index_cast %658 : i32 to index
    %c0_640 = arith.constant 0 : index
    %690 = vector.load %arg4[%c0_638, %c1_639, %689, %c0_640] : memref<1x3x120x30xf32, #tpu.memory_space<vmem>>, vector<1x1x8x28xf32>
    %691 = vector.shape_cast %690 : vector<1x1x8x28xf32> to vector<8x28xf32>
    %c0_641 = arith.constant 0 : index
    %c1_642 = arith.constant 1 : index
    %692 = arith.index_cast %658 : i32 to index
    %c0_643 = arith.constant 0 : index
    %693 = vector.load %arg5[%c0_641, %c1_642, %692, %c0_643] : memref<1x3x120x30xf32, #tpu.memory_space<vmem>>, vector<1x1x8x28xf32>
    %694 = vector.shape_cast %693 : vector<1x1x8x28xf32> to vector<8x28xf32>
    %c0_644 = arith.constant 0 : index
    %c1_645 = arith.constant 1 : index
    %695 = arith.index_cast %658 : i32 to index
    %c1_646 = arith.constant 1 : index
    %696 = vector.load %arg2[%c0_644, %c1_645, %695, %c1_646] : memref<1x3x120x30xf32, #tpu.memory_space<vmem>>, vector<1x1x8x28xf32>
    %697 = vector.shape_cast %696 : vector<1x1x8x28xf32> to vector<8x28xf32>
    %c0_647 = arith.constant 0 : index
    %c1_648 = arith.constant 1 : index
    %698 = arith.index_cast %658 : i32 to index
    %c1_649 = arith.constant 1 : index
    %699 = vector.load %arg3[%c0_647, %c1_648, %698, %c1_649] : memref<1x3x120x30xf32, #tpu.memory_space<vmem>>, vector<1x1x8x28xf32>
    %700 = vector.shape_cast %699 : vector<1x1x8x28xf32> to vector<8x28xf32>
    %c0_650 = arith.constant 0 : index
    %c1_651 = arith.constant 1 : index
    %701 = arith.index_cast %658 : i32 to index
    %c1_652 = arith.constant 1 : index
    %702 = vector.load %arg4[%c0_650, %c1_651, %701, %c1_652] : memref<1x3x120x30xf32, #tpu.memory_space<vmem>>, vector<1x1x8x28xf32>
    %703 = vector.shape_cast %702 : vector<1x1x8x28xf32> to vector<8x28xf32>
    %c0_653 = arith.constant 0 : index
    %c1_654 = arith.constant 1 : index
    %704 = arith.index_cast %658 : i32 to index
    %c1_655 = arith.constant 1 : index
    %705 = vector.load %arg5[%c0_653, %c1_654, %704, %c1_655] : memref<1x3x120x30xf32, #tpu.memory_space<vmem>>, vector<1x1x8x28xf32>
    %706 = vector.shape_cast %705 : vector<1x1x8x28xf32> to vector<8x28xf32>
    %c0_656 = arith.constant 0 : index
    %c2_657 = arith.constant 2 : index
    %707 = arith.index_cast %658 : i32 to index
    %c0_658 = arith.constant 0 : index
    %708 = vector.load %arg2[%c0_656, %c2_657, %707, %c0_658] : memref<1x3x120x30xf32, #tpu.memory_space<vmem>>, vector<1x1x8x28xf32>
    %709 = vector.shape_cast %708 : vector<1x1x8x28xf32> to vector<8x28xf32>
    %c0_659 = arith.constant 0 : index
    %c2_660 = arith.constant 2 : index
    %710 = arith.index_cast %658 : i32 to index
    %c0_661 = arith.constant 0 : index
    %711 = vector.load %arg3[%c0_659, %c2_660, %710, %c0_661] : memref<1x3x120x30xf32, #tpu.memory_space<vmem>>, vector<1x1x8x28xf32>
    %712 = vector.shape_cast %711 : vector<1x1x8x28xf32> to vector<8x28xf32>
    %c0_662 = arith.constant 0 : index
    %c2_663 = arith.constant 2 : index
    %713 = arith.index_cast %658 : i32 to index
    %c0_664 = arith.constant 0 : index
    %714 = vector.load %arg4[%c0_662, %c2_663, %713, %c0_664] : memref<1x3x120x30xf32, #tpu.memory_space<vmem>>, vector<1x1x8x28xf32>
    %715 = vector.shape_cast %714 : vector<1x1x8x28xf32> to vector<8x28xf32>
    %c0_665 = arith.constant 0 : index
    %c2_666 = arith.constant 2 : index
    %716 = arith.index_cast %658 : i32 to index
    %c0_667 = arith.constant 0 : index
    %717 = vector.load %arg5[%c0_665, %c2_666, %716, %c0_667] : memref<1x3x120x30xf32, #tpu.memory_space<vmem>>, vector<1x1x8x28xf32>
    %718 = vector.shape_cast %717 : vector<1x1x8x28xf32> to vector<8x28xf32>
    %c0_668 = arith.constant 0 : index
    %c2_669 = arith.constant 2 : index
    %719 = arith.index_cast %658 : i32 to index
    %c1_670 = arith.constant 1 : index
    %720 = vector.load %arg2[%c0_668, %c2_669, %719, %c1_670] : memref<1x3x120x30xf32, #tpu.memory_space<vmem>>, vector<1x1x8x28xf32>
    %721 = vector.shape_cast %720 : vector<1x1x8x28xf32> to vector<8x28xf32>
    %c0_671 = arith.constant 0 : index
    %c2_672 = arith.constant 2 : index
    %722 = arith.index_cast %658 : i32 to index
    %c1_673 = arith.constant 1 : index
    %723 = vector.load %arg3[%c0_671, %c2_672, %722, %c1_673] : memref<1x3x120x30xf32, #tpu.memory_space<vmem>>, vector<1x1x8x28xf32>
    %724 = vector.shape_cast %723 : vector<1x1x8x28xf32> to vector<8x28xf32>
    %c0_674 = arith.constant 0 : index
    %c2_675 = arith.constant 2 : index
    %725 = arith.index_cast %658 : i32 to index
    %c1_676 = arith.constant 1 : index
    %726 = vector.load %arg4[%c0_674, %c2_675, %725, %c1_676] : memref<1x3x120x30xf32, #tpu.memory_space<vmem>>, vector<1x1x8x28xf32>
    %727 = vector.shape_cast %726 : vector<1x1x8x28xf32> to vector<8x28xf32>
    %c0_677 = arith.constant 0 : index
    %c2_678 = arith.constant 2 : index
    %728 = arith.index_cast %658 : i32 to index
    %c1_679 = arith.constant 1 : index
    %729 = vector.load %arg5[%c0_677, %c2_678, %728, %c1_679] : memref<1x3x120x30xf32, #tpu.memory_space<vmem>>, vector<1x1x8x28xf32>
    %730 = vector.shape_cast %729 : vector<1x1x8x28xf32> to vector<8x28xf32>
    %731 = tpu.concatenate %661, %664, %667, %670, %673, %676, %679, %682, %685, %688, %691, %694, %697, %700, %703, %706 in 0 : vector<8x28xf32>, vector<8x28xf32>, vector<8x28xf32>, vector<8x28xf32>, vector<8x28xf32>, vector<8x28xf32>, vector<8x28xf32>, vector<8x28xf32>, vector<8x28xf32>, vector<8x28xf32>, vector<8x28xf32>, vector<8x28xf32>, vector<8x28xf32>, vector<8x28xf32>, vector<8x28xf32>, vector<8x28xf32> -> vector<128x28xf32>
    %732 = tpu.concatenate %709, %712, %715, %718, %721, %724, %727, %730 in 0 : vector<8x28xf32>, vector<8x28xf32>, vector<8x28xf32>, vector<8x28xf32>, vector<8x28xf32>, vector<8x28xf32>, vector<8x28xf32>, vector<8x28xf32> -> vector<64x28xf32>
    %733 = tpu.concatenate %731, %732 in 0 : vector<128x28xf32>, vector<64x28xf32> -> vector<192x28xf32>
    %cst_680 = arith.constant dense<0.000000e+00> : vector<8x28xf32>
    %734 = tpu.matmul %0, %733, %cst_680 {dimension_numbers = #tpu.dot_dimension_numbers<[1], [0], [0], [1], [0, 0, 1, 1], [], []>} : vector<8x192xf32>, vector<192x28xf32>, vector<8x28xf32> -> vector<8x28xf32>
    %c0_681 = arith.constant 0 : index
    %c0_682 = arith.constant 0 : index
    %735 = arith.index_cast %658 : i32 to index
    %c0_683 = arith.constant 0 : index
    %736 = vector.load %arg4[%c0_681, %c0_682, %735, %c0_683] : memref<1x3x120x30xf32, #tpu.memory_space<vmem>>, vector<1x1x8x28xf32>
    %737 = vector.shape_cast %736 : vector<1x1x8x28xf32> to vector<8x28xf32>
    %c0_684 = arith.constant 0 : index
    %c0_685 = arith.constant 0 : index
    %738 = arith.index_cast %658 : i32 to index
    %c0_686 = arith.constant 0 : index
    %739 = vector.load %arg5[%c0_684, %c0_685, %738, %c0_686] : memref<1x3x120x30xf32, #tpu.memory_space<vmem>>, vector<1x1x8x28xf32>
    %740 = vector.shape_cast %739 : vector<1x1x8x28xf32> to vector<8x28xf32>
    %c0_687 = arith.constant 0 : index
    %c0_688 = arith.constant 0 : index
    %741 = arith.index_cast %658 : i32 to index
    %c1_689 = arith.constant 1 : index
    %742 = vector.load %arg2[%c0_687, %c0_688, %741, %c1_689] : memref<1x3x120x30xf32, #tpu.memory_space<vmem>>, vector<1x1x8x28xf32>
    %743 = vector.shape_cast %742 : vector<1x1x8x28xf32> to vector<8x28xf32>
    %c0_690 = arith.constant 0 : index
    %c0_691 = arith.constant 0 : index
    %744 = arith.index_cast %658 : i32 to index
    %c1_692 = arith.constant 1 : index
    %745 = vector.load %arg3[%c0_690, %c0_691, %744, %c1_692] : memref<1x3x120x30xf32, #tpu.memory_space<vmem>>, vector<1x1x8x28xf32>
    %746 = vector.shape_cast %745 : vector<1x1x8x28xf32> to vector<8x28xf32>
    %c0_693 = arith.constant 0 : index
    %c0_694 = arith.constant 0 : index
    %747 = arith.index_cast %658 : i32 to index
    %c1_695 = arith.constant 1 : index
    %748 = vector.load %arg4[%c0_693, %c0_694, %747, %c1_695] : memref<1x3x120x30xf32, #tpu.memory_space<vmem>>, vector<1x1x8x28xf32>
    %749 = vector.shape_cast %748 : vector<1x1x8x28xf32> to vector<8x28xf32>
    %c0_696 = arith.constant 0 : index
    %c0_697 = arith.constant 0 : index
    %750 = arith.index_cast %658 : i32 to index
    %c1_698 = arith.constant 1 : index
    %751 = vector.load %arg5[%c0_696, %c0_697, %750, %c1_698] : memref<1x3x120x30xf32, #tpu.memory_space<vmem>>, vector<1x1x8x28xf32>
    %752 = vector.shape_cast %751 : vector<1x1x8x28xf32> to vector<8x28xf32>
    %c0_699 = arith.constant 0 : index
    %c0_700 = arith.constant 0 : index
    %753 = arith.index_cast %658 : i32 to index
    %c2_701 = arith.constant 2 : index
    %754 = vector.load %arg2[%c0_699, %c0_700, %753, %c2_701] : memref<1x3x120x30xf32, #tpu.memory_space<vmem>>, vector<1x1x8x28xf32>
    %755 = vector.shape_cast %754 : vector<1x1x8x28xf32> to vector<8x28xf32>
    %c0_702 = arith.constant 0 : index
    %c0_703 = arith.constant 0 : index
    %756 = arith.index_cast %658 : i32 to index
    %c2_704 = arith.constant 2 : index
    %757 = vector.load %arg3[%c0_702, %c0_703, %756, %c2_704] : memref<1x3x120x30xf32, #tpu.memory_space<vmem>>, vector<1x1x8x28xf32>
    %758 = vector.shape_cast %757 : vector<1x1x8x28xf32> to vector<8x28xf32>
    %c0_705 = arith.constant 0 : index
    %c1_706 = arith.constant 1 : index
    %759 = arith.index_cast %658 : i32 to index
    %c0_707 = arith.constant 0 : index
    %760 = vector.load %arg4[%c0_705, %c1_706, %759, %c0_707] : memref<1x3x120x30xf32, #tpu.memory_space<vmem>>, vector<1x1x8x28xf32>
    %761 = vector.shape_cast %760 : vector<1x1x8x28xf32> to vector<8x28xf32>
    %c0_708 = arith.constant 0 : index
    %c1_709 = arith.constant 1 : index
    %762 = arith.index_cast %658 : i32 to index
    %c0_710 = arith.constant 0 : index
    %763 = vector.load %arg5[%c0_708, %c1_709, %762, %c0_710] : memref<1x3x120x30xf32, #tpu.memory_space<vmem>>, vector<1x1x8x28xf32>
    %764 = vector.shape_cast %763 : vector<1x1x8x28xf32> to vector<8x28xf32>
    %c0_711 = arith.constant 0 : index
    %c1_712 = arith.constant 1 : index
    %765 = arith.index_cast %658 : i32 to index
    %c1_713 = arith.constant 1 : index
    %766 = vector.load %arg2[%c0_711, %c1_712, %765, %c1_713] : memref<1x3x120x30xf32, #tpu.memory_space<vmem>>, vector<1x1x8x28xf32>
    %767 = vector.shape_cast %766 : vector<1x1x8x28xf32> to vector<8x28xf32>
    %c0_714 = arith.constant 0 : index
    %c1_715 = arith.constant 1 : index
    %768 = arith.index_cast %658 : i32 to index
    %c1_716 = arith.constant 1 : index
    %769 = vector.load %arg3[%c0_714, %c1_715, %768, %c1_716] : memref<1x3x120x30xf32, #tpu.memory_space<vmem>>, vector<1x1x8x28xf32>
    %770 = vector.shape_cast %769 : vector<1x1x8x28xf32> to vector<8x28xf32>
    %c0_717 = arith.constant 0 : index
    %c1_718 = arith.constant 1 : index
    %771 = arith.index_cast %658 : i32 to index
    %c1_719 = arith.constant 1 : index
    %772 = vector.load %arg4[%c0_717, %c1_718, %771, %c1_719] : memref<1x3x120x30xf32, #tpu.memory_space<vmem>>, vector<1x1x8x28xf32>
    %773 = vector.shape_cast %772 : vector<1x1x8x28xf32> to vector<8x28xf32>
    %c0_720 = arith.constant 0 : index
    %c1_721 = arith.constant 1 : index
    %774 = arith.index_cast %658 : i32 to index
    %c1_722 = arith.constant 1 : index
    %775 = vector.load %arg5[%c0_720, %c1_721, %774, %c1_722] : memref<1x3x120x30xf32, #tpu.memory_space<vmem>>, vector<1x1x8x28xf32>
    %776 = vector.shape_cast %775 : vector<1x1x8x28xf32> to vector<8x28xf32>
    %c0_723 = arith.constant 0 : index
    %c1_724 = arith.constant 1 : index
    %777 = arith.index_cast %658 : i32 to index
    %c2_725 = arith.constant 2 : index
    %778 = vector.load %arg2[%c0_723, %c1_724, %777, %c2_725] : memref<1x3x120x30xf32, #tpu.memory_space<vmem>>, vector<1x1x8x28xf32>
    %779 = vector.shape_cast %778 : vector<1x1x8x28xf32> to vector<8x28xf32>
    %c0_726 = arith.constant 0 : index
    %c1_727 = arith.constant 1 : index
    %780 = arith.index_cast %658 : i32 to index
    %c2_728 = arith.constant 2 : index
    %781 = vector.load %arg3[%c0_726, %c1_727, %780, %c2_728] : memref<1x3x120x30xf32, #tpu.memory_space<vmem>>, vector<1x1x8x28xf32>
    %782 = vector.shape_cast %781 : vector<1x1x8x28xf32> to vector<8x28xf32>
    %c0_729 = arith.constant 0 : index
    %c2_730 = arith.constant 2 : index
    %783 = arith.index_cast %658 : i32 to index
    %c0_731 = arith.constant 0 : index
    %784 = vector.load %arg4[%c0_729, %c2_730, %783, %c0_731] : memref<1x3x120x30xf32, #tpu.memory_space<vmem>>, vector<1x1x8x28xf32>
    %785 = vector.shape_cast %784 : vector<1x1x8x28xf32> to vector<8x28xf32>
    %c0_732 = arith.constant 0 : index
    %c2_733 = arith.constant 2 : index
    %786 = arith.index_cast %658 : i32 to index
    %c0_734 = arith.constant 0 : index
    %787 = vector.load %arg5[%c0_732, %c2_733, %786, %c0_734] : memref<1x3x120x30xf32, #tpu.memory_space<vmem>>, vector<1x1x8x28xf32>
    %788 = vector.shape_cast %787 : vector<1x1x8x28xf32> to vector<8x28xf32>
    %c0_735 = arith.constant 0 : index
    %c2_736 = arith.constant 2 : index
    %789 = arith.index_cast %658 : i32 to index
    %c1_737 = arith.constant 1 : index
    %790 = vector.load %arg2[%c0_735, %c2_736, %789, %c1_737] : memref<1x3x120x30xf32, #tpu.memory_space<vmem>>, vector<1x1x8x28xf32>
    %791 = vector.shape_cast %790 : vector<1x1x8x28xf32> to vector<8x28xf32>
    %c0_738 = arith.constant 0 : index
    %c2_739 = arith.constant 2 : index
    %792 = arith.index_cast %658 : i32 to index
    %c1_740 = arith.constant 1 : index
    %793 = vector.load %arg3[%c0_738, %c2_739, %792, %c1_740] : memref<1x3x120x30xf32, #tpu.memory_space<vmem>>, vector<1x1x8x28xf32>
    %794 = vector.shape_cast %793 : vector<1x1x8x28xf32> to vector<8x28xf32>
    %c0_741 = arith.constant 0 : index
    %c2_742 = arith.constant 2 : index
    %795 = arith.index_cast %658 : i32 to index
    %c1_743 = arith.constant 1 : index
    %796 = vector.load %arg4[%c0_741, %c2_742, %795, %c1_743] : memref<1x3x120x30xf32, #tpu.memory_space<vmem>>, vector<1x1x8x28xf32>
    %797 = vector.shape_cast %796 : vector<1x1x8x28xf32> to vector<8x28xf32>
    %c0_744 = arith.constant 0 : index
    %c2_745 = arith.constant 2 : index
    %798 = arith.index_cast %658 : i32 to index
    %c1_746 = arith.constant 1 : index
    %799 = vector.load %arg5[%c0_744, %c2_745, %798, %c1_746] : memref<1x3x120x30xf32, #tpu.memory_space<vmem>>, vector<1x1x8x28xf32>
    %800 = vector.shape_cast %799 : vector<1x1x8x28xf32> to vector<8x28xf32>
    %c0_747 = arith.constant 0 : index
    %c2_748 = arith.constant 2 : index
    %801 = arith.index_cast %658 : i32 to index
    %c2_749 = arith.constant 2 : index
    %802 = vector.load %arg2[%c0_747, %c2_748, %801, %c2_749] : memref<1x3x120x30xf32, #tpu.memory_space<vmem>>, vector<1x1x8x28xf32>
    %803 = vector.shape_cast %802 : vector<1x1x8x28xf32> to vector<8x28xf32>
    %c0_750 = arith.constant 0 : index
    %c2_751 = arith.constant 2 : index
    %804 = arith.index_cast %658 : i32 to index
    %c2_752 = arith.constant 2 : index
    %805 = vector.load %arg3[%c0_750, %c2_751, %804, %c2_752] : memref<1x3x120x30xf32, #tpu.memory_space<vmem>>, vector<1x1x8x28xf32>
    %806 = vector.shape_cast %805 : vector<1x1x8x28xf32> to vector<8x28xf32>
    %807 = tpu.concatenate %737, %740, %743, %746, %749, %752, %755, %758, %761, %764, %767, %770, %773, %776, %779, %782 in 0 : vector<8x28xf32>, vector<8x28xf32>, vector<8x28xf32>, vector<8x28xf32>, vector<8x28xf32>, vector<8x28xf32>, vector<8x28xf32>, vector<8x28xf32>, vector<8x28xf32>, vector<8x28xf32>, vector<8x28xf32>, vector<8x28xf32>, vector<8x28xf32>, vector<8x28xf32>, vector<8x28xf32>, vector<8x28xf32> -> vector<128x28xf32>
    %808 = tpu.concatenate %785, %788, %791, %794, %797, %800, %803, %806 in 0 : vector<8x28xf32>, vector<8x28xf32>, vector<8x28xf32>, vector<8x28xf32>, vector<8x28xf32>, vector<8x28xf32>, vector<8x28xf32>, vector<8x28xf32> -> vector<64x28xf32>
    %809 = tpu.concatenate %807, %808 in 0 : vector<128x28xf32>, vector<64x28xf32> -> vector<192x28xf32>
    %cst_753 = arith.constant dense<0.000000e+00> : vector<8x28xf32>
    %810 = tpu.matmul %0, %809, %cst_753 {dimension_numbers = #tpu.dot_dimension_numbers<[1], [0], [0], [1], [0, 0, 1, 1], [], []>} : vector<8x192xf32>, vector<192x28xf32>, vector<8x28xf32> -> vector<8x28xf32>
    %811 = arith.maximumf %734, %810 : vector<8x28xf32>
    %c4_i32_754 = arith.constant 4 : i32
    %812 = arith.muli %c4_i32_754, %655 : i32
    %c2_i32_755 = arith.constant 2 : i32
    %813 = arith.addi %812, %c2_i32_755 : i32
    %814 = tpu.assume_multiple %813, 2 : i32
    %c0_756 = arith.constant 0 : index
    %c0_757 = arith.constant 0 : index
    %815 = arith.index_cast %814 : i32 to index
    %c0_758 = arith.constant 0 : index
    %816 = vector.load %arg2[%c0_756, %c0_757, %815, %c0_758] : memref<1x3x120x30xf32, #tpu.memory_space<vmem>>, vector<1x1x8x28xf32>
    %817 = vector.shape_cast %816 : vector<1x1x8x28xf32> to vector<8x28xf32>
    %c0_759 = arith.constant 0 : index
    %c0_760 = arith.constant 0 : index
    %818 = arith.index_cast %814 : i32 to index
    %c0_761 = arith.constant 0 : index
    %819 = vector.load %arg3[%c0_759, %c0_760, %818, %c0_761] : memref<1x3x120x30xf32, #tpu.memory_space<vmem>>, vector<1x1x8x28xf32>
    %820 = vector.shape_cast %819 : vector<1x1x8x28xf32> to vector<8x28xf32>
    %c0_762 = arith.constant 0 : index
    %c0_763 = arith.constant 0 : index
    %821 = arith.index_cast %814 : i32 to index
    %c0_764 = arith.constant 0 : index
    %822 = vector.load %arg4[%c0_762, %c0_763, %821, %c0_764] : memref<1x3x120x30xf32, #tpu.memory_space<vmem>>, vector<1x1x8x28xf32>
    %823 = vector.shape_cast %822 : vector<1x1x8x28xf32> to vector<8x28xf32>
    %c0_765 = arith.constant 0 : index
    %c0_766 = arith.constant 0 : index
    %824 = arith.index_cast %814 : i32 to index
    %c0_767 = arith.constant 0 : index
    %825 = vector.load %arg5[%c0_765, %c0_766, %824, %c0_767] : memref<1x3x120x30xf32, #tpu.memory_space<vmem>>, vector<1x1x8x28xf32>
    %826 = vector.shape_cast %825 : vector<1x1x8x28xf32> to vector<8x28xf32>
    %c0_768 = arith.constant 0 : index
    %c0_769 = arith.constant 0 : index
    %827 = arith.index_cast %814 : i32 to index
    %c1_770 = arith.constant 1 : index
    %828 = vector.load %arg2[%c0_768, %c0_769, %827, %c1_770] : memref<1x3x120x30xf32, #tpu.memory_space<vmem>>, vector<1x1x8x28xf32>
    %829 = vector.shape_cast %828 : vector<1x1x8x28xf32> to vector<8x28xf32>
    %c0_771 = arith.constant 0 : index
    %c0_772 = arith.constant 0 : index
    %830 = arith.index_cast %814 : i32 to index
    %c1_773 = arith.constant 1 : index
    %831 = vector.load %arg3[%c0_771, %c0_772, %830, %c1_773] : memref<1x3x120x30xf32, #tpu.memory_space<vmem>>, vector<1x1x8x28xf32>
    %832 = vector.shape_cast %831 : vector<1x1x8x28xf32> to vector<8x28xf32>
    %c0_774 = arith.constant 0 : index
    %c0_775 = arith.constant 0 : index
    %833 = arith.index_cast %814 : i32 to index
    %c1_776 = arith.constant 1 : index
    %834 = vector.load %arg4[%c0_774, %c0_775, %833, %c1_776] : memref<1x3x120x30xf32, #tpu.memory_space<vmem>>, vector<1x1x8x28xf32>
    %835 = vector.shape_cast %834 : vector<1x1x8x28xf32> to vector<8x28xf32>
    %c0_777 = arith.constant 0 : index
    %c0_778 = arith.constant 0 : index
    %836 = arith.index_cast %814 : i32 to index
    %c1_779 = arith.constant 1 : index
    %837 = vector.load %arg5[%c0_777, %c0_778, %836, %c1_779] : memref<1x3x120x30xf32, #tpu.memory_space<vmem>>, vector<1x1x8x28xf32>
    %838 = vector.shape_cast %837 : vector<1x1x8x28xf32> to vector<8x28xf32>
    %c0_780 = arith.constant 0 : index
    %c1_781 = arith.constant 1 : index
    %839 = arith.index_cast %814 : i32 to index
    %c0_782 = arith.constant 0 : index
    %840 = vector.load %arg2[%c0_780, %c1_781, %839, %c0_782] : memref<1x3x120x30xf32, #tpu.memory_space<vmem>>, vector<1x1x8x28xf32>
    %841 = vector.shape_cast %840 : vector<1x1x8x28xf32> to vector<8x28xf32>
    %c0_783 = arith.constant 0 : index
    %c1_784 = arith.constant 1 : index
    %842 = arith.index_cast %814 : i32 to index
    %c0_785 = arith.constant 0 : index
    %843 = vector.load %arg3[%c0_783, %c1_784, %842, %c0_785] : memref<1x3x120x30xf32, #tpu.memory_space<vmem>>, vector<1x1x8x28xf32>
    %844 = vector.shape_cast %843 : vector<1x1x8x28xf32> to vector<8x28xf32>
    %c0_786 = arith.constant 0 : index
    %c1_787 = arith.constant 1 : index
    %845 = arith.index_cast %814 : i32 to index
    %c0_788 = arith.constant 0 : index
    %846 = vector.load %arg4[%c0_786, %c1_787, %845, %c0_788] : memref<1x3x120x30xf32, #tpu.memory_space<vmem>>, vector<1x1x8x28xf32>
    %847 = vector.shape_cast %846 : vector<1x1x8x28xf32> to vector<8x28xf32>
    %c0_789 = arith.constant 0 : index
    %c1_790 = arith.constant 1 : index
    %848 = arith.index_cast %814 : i32 to index
    %c0_791 = arith.constant 0 : index
    %849 = vector.load %arg5[%c0_789, %c1_790, %848, %c0_791] : memref<1x3x120x30xf32, #tpu.memory_space<vmem>>, vector<1x1x8x28xf32>
    %850 = vector.shape_cast %849 : vector<1x1x8x28xf32> to vector<8x28xf32>
    %c0_792 = arith.constant 0 : index
    %c1_793 = arith.constant 1 : index
    %851 = arith.index_cast %814 : i32 to index
    %c1_794 = arith.constant 1 : index
    %852 = vector.load %arg2[%c0_792, %c1_793, %851, %c1_794] : memref<1x3x120x30xf32, #tpu.memory_space<vmem>>, vector<1x1x8x28xf32>
    %853 = vector.shape_cast %852 : vector<1x1x8x28xf32> to vector<8x28xf32>
    %c0_795 = arith.constant 0 : index
    %c1_796 = arith.constant 1 : index
    %854 = arith.index_cast %814 : i32 to index
    %c1_797 = arith.constant 1 : index
    %855 = vector.load %arg3[%c0_795, %c1_796, %854, %c1_797] : memref<1x3x120x30xf32, #tpu.memory_space<vmem>>, vector<1x1x8x28xf32>
    %856 = vector.shape_cast %855 : vector<1x1x8x28xf32> to vector<8x28xf32>
    %c0_798 = arith.constant 0 : index
    %c1_799 = arith.constant 1 : index
    %857 = arith.index_cast %814 : i32 to index
    %c1_800 = arith.constant 1 : index
    %858 = vector.load %arg4[%c0_798, %c1_799, %857, %c1_800] : memref<1x3x120x30xf32, #tpu.memory_space<vmem>>, vector<1x1x8x28xf32>
    %859 = vector.shape_cast %858 : vector<1x1x8x28xf32> to vector<8x28xf32>
    %c0_801 = arith.constant 0 : index
    %c1_802 = arith.constant 1 : index
    %860 = arith.index_cast %814 : i32 to index
    %c1_803 = arith.constant 1 : index
    %861 = vector.load %arg5[%c0_801, %c1_802, %860, %c1_803] : memref<1x3x120x30xf32, #tpu.memory_space<vmem>>, vector<1x1x8x28xf32>
    %862 = vector.shape_cast %861 : vector<1x1x8x28xf32> to vector<8x28xf32>
    %c0_804 = arith.constant 0 : index
    %c2_805 = arith.constant 2 : index
    %863 = arith.index_cast %814 : i32 to index
    %c0_806 = arith.constant 0 : index
    %864 = vector.load %arg2[%c0_804, %c2_805, %863, %c0_806] : memref<1x3x120x30xf32, #tpu.memory_space<vmem>>, vector<1x1x8x28xf32>
    %865 = vector.shape_cast %864 : vector<1x1x8x28xf32> to vector<8x28xf32>
    %c0_807 = arith.constant 0 : index
    %c2_808 = arith.constant 2 : index
    %866 = arith.index_cast %814 : i32 to index
    %c0_809 = arith.constant 0 : index
    %867 = vector.load %arg3[%c0_807, %c2_808, %866, %c0_809] : memref<1x3x120x30xf32, #tpu.memory_space<vmem>>, vector<1x1x8x28xf32>
    %868 = vector.shape_cast %867 : vector<1x1x8x28xf32> to vector<8x28xf32>
    %c0_810 = arith.constant 0 : index
    %c2_811 = arith.constant 2 : index
    %869 = arith.index_cast %814 : i32 to index
    %c0_812 = arith.constant 0 : index
    %870 = vector.load %arg4[%c0_810, %c2_811, %869, %c0_812] : memref<1x3x120x30xf32, #tpu.memory_space<vmem>>, vector<1x1x8x28xf32>
    %871 = vector.shape_cast %870 : vector<1x1x8x28xf32> to vector<8x28xf32>
    %c0_813 = arith.constant 0 : index
    %c2_814 = arith.constant 2 : index
    %872 = arith.index_cast %814 : i32 to index
    %c0_815 = arith.constant 0 : index
    %873 = vector.load %arg5[%c0_813, %c2_814, %872, %c0_815] : memref<1x3x120x30xf32, #tpu.memory_space<vmem>>, vector<1x1x8x28xf32>
    %874 = vector.shape_cast %873 : vector<1x1x8x28xf32> to vector<8x28xf32>
    %c0_816 = arith.constant 0 : index
    %c2_817 = arith.constant 2 : index
    %875 = arith.index_cast %814 : i32 to index
    %c1_818 = arith.constant 1 : index
    %876 = vector.load %arg2[%c0_816, %c2_817, %875, %c1_818] : memref<1x3x120x30xf32, #tpu.memory_space<vmem>>, vector<1x1x8x28xf32>
    %877 = vector.shape_cast %876 : vector<1x1x8x28xf32> to vector<8x28xf32>
    %c0_819 = arith.constant 0 : index
    %c2_820 = arith.constant 2 : index
    %878 = arith.index_cast %814 : i32 to index
    %c1_821 = arith.constant 1 : index
    %879 = vector.load %arg3[%c0_819, %c2_820, %878, %c1_821] : memref<1x3x120x30xf32, #tpu.memory_space<vmem>>, vector<1x1x8x28xf32>
    %880 = vector.shape_cast %879 : vector<1x1x8x28xf32> to vector<8x28xf32>
    %c0_822 = arith.constant 0 : index
    %c2_823 = arith.constant 2 : index
    %881 = arith.index_cast %814 : i32 to index
    %c1_824 = arith.constant 1 : index
    %882 = vector.load %arg4[%c0_822, %c2_823, %881, %c1_824] : memref<1x3x120x30xf32, #tpu.memory_space<vmem>>, vector<1x1x8x28xf32>
    %883 = vector.shape_cast %882 : vector<1x1x8x28xf32> to vector<8x28xf32>
    %c0_825 = arith.constant 0 : index
    %c2_826 = arith.constant 2 : index
    %884 = arith.index_cast %814 : i32 to index
    %c1_827 = arith.constant 1 : index
    %885 = vector.load %arg5[%c0_825, %c2_826, %884, %c1_827] : memref<1x3x120x30xf32, #tpu.memory_space<vmem>>, vector<1x1x8x28xf32>
    %886 = vector.shape_cast %885 : vector<1x1x8x28xf32> to vector<8x28xf32>
    %887 = tpu.concatenate %817, %820, %823, %826, %829, %832, %835, %838, %841, %844, %847, %850, %853, %856, %859, %862 in 0 : vector<8x28xf32>, vector<8x28xf32>, vector<8x28xf32>, vector<8x28xf32>, vector<8x28xf32>, vector<8x28xf32>, vector<8x28xf32>, vector<8x28xf32>, vector<8x28xf32>, vector<8x28xf32>, vector<8x28xf32>, vector<8x28xf32>, vector<8x28xf32>, vector<8x28xf32>, vector<8x28xf32>, vector<8x28xf32> -> vector<128x28xf32>
    %888 = tpu.concatenate %865, %868, %871, %874, %877, %880, %883, %886 in 0 : vector<8x28xf32>, vector<8x28xf32>, vector<8x28xf32>, vector<8x28xf32>, vector<8x28xf32>, vector<8x28xf32>, vector<8x28xf32>, vector<8x28xf32> -> vector<64x28xf32>
    %889 = tpu.concatenate %887, %888 in 0 : vector<128x28xf32>, vector<64x28xf32> -> vector<192x28xf32>
    %cst_828 = arith.constant dense<0.000000e+00> : vector<8x28xf32>
    %890 = tpu.matmul %0, %889, %cst_828 {dimension_numbers = #tpu.dot_dimension_numbers<[1], [0], [0], [1], [0, 0, 1, 1], [], []>} : vector<8x192xf32>, vector<192x28xf32>, vector<8x28xf32> -> vector<8x28xf32>
    %891 = arith.maximumf %811, %890 : vector<8x28xf32>
    %c0_829 = arith.constant 0 : index
    %c0_830 = arith.constant 0 : index
    %892 = arith.index_cast %814 : i32 to index
    %c0_831 = arith.constant 0 : index
    %893 = vector.load %arg4[%c0_829, %c0_830, %892, %c0_831] : memref<1x3x120x30xf32, #tpu.memory_space<vmem>>, vector<1x1x8x28xf32>
    %894 = vector.shape_cast %893 : vector<1x1x8x28xf32> to vector<8x28xf32>
    %c0_832 = arith.constant 0 : index
    %c0_833 = arith.constant 0 : index
    %895 = arith.index_cast %814 : i32 to index
    %c0_834 = arith.constant 0 : index
    %896 = vector.load %arg5[%c0_832, %c0_833, %895, %c0_834] : memref<1x3x120x30xf32, #tpu.memory_space<vmem>>, vector<1x1x8x28xf32>
    %897 = vector.shape_cast %896 : vector<1x1x8x28xf32> to vector<8x28xf32>
    %c0_835 = arith.constant 0 : index
    %c0_836 = arith.constant 0 : index
    %898 = arith.index_cast %814 : i32 to index
    %c1_837 = arith.constant 1 : index
    %899 = vector.load %arg2[%c0_835, %c0_836, %898, %c1_837] : memref<1x3x120x30xf32, #tpu.memory_space<vmem>>, vector<1x1x8x28xf32>
    %900 = vector.shape_cast %899 : vector<1x1x8x28xf32> to vector<8x28xf32>
    %c0_838 = arith.constant 0 : index
    %c0_839 = arith.constant 0 : index
    %901 = arith.index_cast %814 : i32 to index
    %c1_840 = arith.constant 1 : index
    %902 = vector.load %arg3[%c0_838, %c0_839, %901, %c1_840] : memref<1x3x120x30xf32, #tpu.memory_space<vmem>>, vector<1x1x8x28xf32>
    %903 = vector.shape_cast %902 : vector<1x1x8x28xf32> to vector<8x28xf32>
    %c0_841 = arith.constant 0 : index
    %c0_842 = arith.constant 0 : index
    %904 = arith.index_cast %814 : i32 to index
    %c1_843 = arith.constant 1 : index
    %905 = vector.load %arg4[%c0_841, %c0_842, %904, %c1_843] : memref<1x3x120x30xf32, #tpu.memory_space<vmem>>, vector<1x1x8x28xf32>
    %906 = vector.shape_cast %905 : vector<1x1x8x28xf32> to vector<8x28xf32>
    %c0_844 = arith.constant 0 : index
    %c0_845 = arith.constant 0 : index
    %907 = arith.index_cast %814 : i32 to index
    %c1_846 = arith.constant 1 : index
    %908 = vector.load %arg5[%c0_844, %c0_845, %907, %c1_846] : memref<1x3x120x30xf32, #tpu.memory_space<vmem>>, vector<1x1x8x28xf32>
    %909 = vector.shape_cast %908 : vector<1x1x8x28xf32> to vector<8x28xf32>
    %c0_847 = arith.constant 0 : index
    %c0_848 = arith.constant 0 : index
    %910 = arith.index_cast %814 : i32 to index
    %c2_849 = arith.constant 2 : index
    %911 = vector.load %arg2[%c0_847, %c0_848, %910, %c2_849] : memref<1x3x120x30xf32, #tpu.memory_space<vmem>>, vector<1x1x8x28xf32>
    %912 = vector.shape_cast %911 : vector<1x1x8x28xf32> to vector<8x28xf32>
    %c0_850 = arith.constant 0 : index
    %c0_851 = arith.constant 0 : index
    %913 = arith.index_cast %814 : i32 to index
    %c2_852 = arith.constant 2 : index
    %914 = vector.load %arg3[%c0_850, %c0_851, %913, %c2_852] : memref<1x3x120x30xf32, #tpu.memory_space<vmem>>, vector<1x1x8x28xf32>
    %915 = vector.shape_cast %914 : vector<1x1x8x28xf32> to vector<8x28xf32>
    %c0_853 = arith.constant 0 : index
    %c1_854 = arith.constant 1 : index
    %916 = arith.index_cast %814 : i32 to index
    %c0_855 = arith.constant 0 : index
    %917 = vector.load %arg4[%c0_853, %c1_854, %916, %c0_855] : memref<1x3x120x30xf32, #tpu.memory_space<vmem>>, vector<1x1x8x28xf32>
    %918 = vector.shape_cast %917 : vector<1x1x8x28xf32> to vector<8x28xf32>
    %c0_856 = arith.constant 0 : index
    %c1_857 = arith.constant 1 : index
    %919 = arith.index_cast %814 : i32 to index
    %c0_858 = arith.constant 0 : index
    %920 = vector.load %arg5[%c0_856, %c1_857, %919, %c0_858] : memref<1x3x120x30xf32, #tpu.memory_space<vmem>>, vector<1x1x8x28xf32>
    %921 = vector.shape_cast %920 : vector<1x1x8x28xf32> to vector<8x28xf32>
    %c0_859 = arith.constant 0 : index
    %c1_860 = arith.constant 1 : index
    %922 = arith.index_cast %814 : i32 to index
    %c1_861 = arith.constant 1 : index
    %923 = vector.load %arg2[%c0_859, %c1_860, %922, %c1_861] : memref<1x3x120x30xf32, #tpu.memory_space<vmem>>, vector<1x1x8x28xf32>
    %924 = vector.shape_cast %923 : vector<1x1x8x28xf32> to vector<8x28xf32>
    %c0_862 = arith.constant 0 : index
    %c1_863 = arith.constant 1 : index
    %925 = arith.index_cast %814 : i32 to index
    %c1_864 = arith.constant 1 : index
    %926 = vector.load %arg3[%c0_862, %c1_863, %925, %c1_864] : memref<1x3x120x30xf32, #tpu.memory_space<vmem>>, vector<1x1x8x28xf32>
    %927 = vector.shape_cast %926 : vector<1x1x8x28xf32> to vector<8x28xf32>
    %c0_865 = arith.constant 0 : index
    %c1_866 = arith.constant 1 : index
    %928 = arith.index_cast %814 : i32 to index
    %c1_867 = arith.constant 1 : index
    %929 = vector.load %arg4[%c0_865, %c1_866, %928, %c1_867] : memref<1x3x120x30xf32, #tpu.memory_space<vmem>>, vector<1x1x8x28xf32>
    %930 = vector.shape_cast %929 : vector<1x1x8x28xf32> to vector<8x28xf32>
    %c0_868 = arith.constant 0 : index
    %c1_869 = arith.constant 1 : index
    %931 = arith.index_cast %814 : i32 to index
    %c1_870 = arith.constant 1 : index
    %932 = vector.load %arg5[%c0_868, %c1_869, %931, %c1_870] : memref<1x3x120x30xf32, #tpu.memory_space<vmem>>, vector<1x1x8x28xf32>
    %933 = vector.shape_cast %932 : vector<1x1x8x28xf32> to vector<8x28xf32>
    %c0_871 = arith.constant 0 : index
    %c1_872 = arith.constant 1 : index
    %934 = arith.index_cast %814 : i32 to index
    %c2_873 = arith.constant 2 : index
    %935 = vector.load %arg2[%c0_871, %c1_872, %934, %c2_873] : memref<1x3x120x30xf32, #tpu.memory_space<vmem>>, vector<1x1x8x28xf32>
    %936 = vector.shape_cast %935 : vector<1x1x8x28xf32> to vector<8x28xf32>
    %c0_874 = arith.constant 0 : index
    %c1_875 = arith.constant 1 : index
    %937 = arith.index_cast %814 : i32 to index
    %c2_876 = arith.constant 2 : index
    %938 = vector.load %arg3[%c0_874, %c1_875, %937, %c2_876] : memref<1x3x120x30xf32, #tpu.memory_space<vmem>>, vector<1x1x8x28xf32>
    %939 = vector.shape_cast %938 : vector<1x1x8x28xf32> to vector<8x28xf32>
    %c0_877 = arith.constant 0 : index
    %c2_878 = arith.constant 2 : index
    %940 = arith.index_cast %814 : i32 to index
    %c0_879 = arith.constant 0 : index
    %941 = vector.load %arg4[%c0_877, %c2_878, %940, %c0_879] : memref<1x3x120x30xf32, #tpu.memory_space<vmem>>, vector<1x1x8x28xf32>
    %942 = vector.shape_cast %941 : vector<1x1x8x28xf32> to vector<8x28xf32>
    %c0_880 = arith.constant 0 : index
    %c2_881 = arith.constant 2 : index
    %943 = arith.index_cast %814 : i32 to index
    %c0_882 = arith.constant 0 : index
    %944 = vector.load %arg5[%c0_880, %c2_881, %943, %c0_882] : memref<1x3x120x30xf32, #tpu.memory_space<vmem>>, vector<1x1x8x28xf32>
    %945 = vector.shape_cast %944 : vector<1x1x8x28xf32> to vector<8x28xf32>
    %c0_883 = arith.constant 0 : index
    %c2_884 = arith.constant 2 : index
    %946 = arith.index_cast %814 : i32 to index
    %c1_885 = arith.constant 1 : index
    %947 = vector.load %arg2[%c0_883, %c2_884, %946, %c1_885] : memref<1x3x120x30xf32, #tpu.memory_space<vmem>>, vector<1x1x8x28xf32>
    %948 = vector.shape_cast %947 : vector<1x1x8x28xf32> to vector<8x28xf32>
    %c0_886 = arith.constant 0 : index
    %c2_887 = arith.constant 2 : index
    %949 = arith.index_cast %814 : i32 to index
    %c1_888 = arith.constant 1 : index
    %950 = vector.load %arg3[%c0_886, %c2_887, %949, %c1_888] : memref<1x3x120x30xf32, #tpu.memory_space<vmem>>, vector<1x1x8x28xf32>
    %951 = vector.shape_cast %950 : vector<1x1x8x28xf32> to vector<8x28xf32>
    %c0_889 = arith.constant 0 : index
    %c2_890 = arith.constant 2 : index
    %952 = arith.index_cast %814 : i32 to index
    %c1_891 = arith.constant 1 : index
    %953 = vector.load %arg4[%c0_889, %c2_890, %952, %c1_891] : memref<1x3x120x30xf32, #tpu.memory_space<vmem>>, vector<1x1x8x28xf32>
    %954 = vector.shape_cast %953 : vector<1x1x8x28xf32> to vector<8x28xf32>
    %c0_892 = arith.constant 0 : index
    %c2_893 = arith.constant 2 : index
    %955 = arith.index_cast %814 : i32 to index
    %c1_894 = arith.constant 1 : index
    %956 = vector.load %arg5[%c0_892, %c2_893, %955, %c1_894] : memref<1x3x120x30xf32, #tpu.memory_space<vmem>>, vector<1x1x8x28xf32>
    %957 = vector.shape_cast %956 : vector<1x1x8x28xf32> to vector<8x28xf32>
    %c0_895 = arith.constant 0 : index
    %c2_896 = arith.constant 2 : index
    %958 = arith.index_cast %814 : i32 to index
    %c2_897 = arith.constant 2 : index
    %959 = vector.load %arg2[%c0_895, %c2_896, %958, %c2_897] : memref<1x3x120x30xf32, #tpu.memory_space<vmem>>, vector<1x1x8x28xf32>
    %960 = vector.shape_cast %959 : vector<1x1x8x28xf32> to vector<8x28xf32>
    %c0_898 = arith.constant 0 : index
    %c2_899 = arith.constant 2 : index
    %961 = arith.index_cast %814 : i32 to index
    %c2_900 = arith.constant 2 : index
    %962 = vector.load %arg3[%c0_898, %c2_899, %961, %c2_900] : memref<1x3x120x30xf32, #tpu.memory_space<vmem>>, vector<1x1x8x28xf32>
    %963 = vector.shape_cast %962 : vector<1x1x8x28xf32> to vector<8x28xf32>
    %964 = tpu.concatenate %894, %897, %900, %903, %906, %909, %912, %915, %918, %921, %924, %927, %930, %933, %936, %939 in 0 : vector<8x28xf32>, vector<8x28xf32>, vector<8x28xf32>, vector<8x28xf32>, vector<8x28xf32>, vector<8x28xf32>, vector<8x28xf32>, vector<8x28xf32>, vector<8x28xf32>, vector<8x28xf32>, vector<8x28xf32>, vector<8x28xf32>, vector<8x28xf32>, vector<8x28xf32>, vector<8x28xf32>, vector<8x28xf32> -> vector<128x28xf32>
    %965 = tpu.concatenate %942, %945, %948, %951, %954, %957, %960, %963 in 0 : vector<8x28xf32>, vector<8x28xf32>, vector<8x28xf32>, vector<8x28xf32>, vector<8x28xf32>, vector<8x28xf32>, vector<8x28xf32>, vector<8x28xf32> -> vector<64x28xf32>
    %966 = tpu.concatenate %964, %965 in 0 : vector<128x28xf32>, vector<64x28xf32> -> vector<192x28xf32>
    %cst_901 = arith.constant dense<0.000000e+00> : vector<8x28xf32>
    %967 = tpu.matmul %0, %966, %cst_901 {dimension_numbers = #tpu.dot_dimension_numbers<[1], [0], [0], [1], [0, 0, 1, 1], [], []>} : vector<8x192xf32>, vector<192x28xf32>, vector<8x28xf32> -> vector<8x28xf32>
    %968 = arith.maximumf %891, %967 : vector<8x28xf32>
    %969 = vector.broadcast %1 : vector<8x1xf32> to vector<8x28xf32>
    %970 = arith.addf %968, %969 : vector<8x28xf32>
    %cst_902 = arith.constant 0.000000e+00 : f32
    %971 = vector.broadcast %cst_902 : f32 to vector<8x28xf32>
    %972 = arith.cmpf oge, %970, %971 : vector<8x28xf32>
    %cst_903 = arith.constant 0.00999999977 : f32
    %973 = vector.broadcast %cst_903 : f32 to vector<8x28xf32>
    %974 = arith.mulf %973, %970 : vector<8x28xf32>
    %975 = arith.select %972, %970, %974 : vector<8x28xi1>, vector<8x28xf32>
    %976 = vector.extract_strided_slice %975 {offsets = [0, 0], sizes = [6, 28], strides = [1, 1]} : vector<8x28xf32> to vector<6x28xf32>
    %c0_904 = arith.constant 0 : index
    %c2_905 = arith.constant 2 : index
    %c0_906 = arith.constant 0 : index
    %c0_907 = arith.constant 0 : index
    %977 = vector.load %arg8[%c0_904, %c2_905, %c0_906, %c0_907] : memref<1x4x6x28xf32, #tpu.memory_space<vmem>>, vector<1x1x6x28xf32>
    %978 = vector.shape_cast %977 : vector<1x1x6x28xf32> to vector<6x28xf32>
    %979 = vector.shape_cast %976 : vector<6x28xf32> to vector<1x1x6x28xf32>
    tpu.vector_store %arg8[%c0_904, %c2_905, %c0_906, %c0_907], %979 {strides = array<i32>} : memref<1x4x6x28xf32, #tpu.memory_space<vmem>>, vector<1x1x6x28xf32>,
    %c4_i32_908 = arith.constant 4 : i32
    %980 = arith.muli %c4_i32_908, %arg1 : i32
    %c3_i32 = arith.constant 3 : i32
    %981 = arith.addi %980, %c3_i32 : i32
    %c4_i32_909 = arith.constant 4 : i32
    %982 = arith.muli %c4_i32_909, %981 : i32
    %c0_i32_910 = arith.constant 0 : i32
    %983 = arith.addi %982, %c0_i32_910 : i32
    %984 = tpu.assume_multiple %983, 2 : i32
    %c0_911 = arith.constant 0 : index
    %c0_912 = arith.constant 0 : index
    %985 = arith.index_cast %984 : i32 to index
    %c0_913 = arith.constant 0 : index
    %986 = vector.load %arg2[%c0_911, %c0_912, %985, %c0_913] : memref<1x3x120x30xf32, #tpu.memory_space<vmem>>, vector<1x1x8x28xf32>
    %987 = vector.shape_cast %986 : vector<1x1x8x28xf32> to vector<8x28xf32>
    %c0_914 = arith.constant 0 : index
    %c0_915 = arith.constant 0 : index
    %988 = arith.index_cast %984 : i32 to index
    %c0_916 = arith.constant 0 : index
    %989 = vector.load %arg3[%c0_914, %c0_915, %988, %c0_916] : memref<1x3x120x30xf32, #tpu.memory_space<vmem>>, vector<1x1x8x28xf32>
    %990 = vector.shape_cast %989 : vector<1x1x8x28xf32> to vector<8x28xf32>
    %c0_917 = arith.constant 0 : index
    %c0_918 = arith.constant 0 : index
    %991 = arith.index_cast %984 : i32 to index
    %c0_919 = arith.constant 0 : index
    %992 = vector.load %arg4[%c0_917, %c0_918, %991, %c0_919] : memref<1x3x120x30xf32, #tpu.memory_space<vmem>>, vector<1x1x8x28xf32>
    %993 = vector.shape_cast %992 : vector<1x1x8x28xf32> to vector<8x28xf32>
    %c0_920 = arith.constant 0 : index
    %c0_921 = arith.constant 0 : index
    %994 = arith.index_cast %984 : i32 to index
    %c0_922 = arith.constant 0 : index
    %995 = vector.load %arg5[%c0_920, %c0_921, %994, %c0_922] : memref<1x3x120x30xf32, #tpu.memory_space<vmem>>, vector<1x1x8x28xf32>
    %996 = vector.shape_cast %995 : vector<1x1x8x28xf32> to vector<8x28xf32>
    %c0_923 = arith.constant 0 : index
    %c0_924 = arith.constant 0 : index
    %997 = arith.index_cast %984 : i32 to index
    %c1_925 = arith.constant 1 : index
    %998 = vector.load %arg2[%c0_923, %c0_924, %997, %c1_925] : memref<1x3x120x30xf32, #tpu.memory_space<vmem>>, vector<1x1x8x28xf32>
    %999 = vector.shape_cast %998 : vector<1x1x8x28xf32> to vector<8x28xf32>
    %c0_926 = arith.constant 0 : index
    %c0_927 = arith.constant 0 : index
    %1000 = arith.index_cast %984 : i32 to index
    %c1_928 = arith.constant 1 : index
    %1001 = vector.load %arg3[%c0_926, %c0_927, %1000, %c1_928] : memref<1x3x120x30xf32, #tpu.memory_space<vmem>>, vector<1x1x8x28xf32>
    %1002 = vector.shape_cast %1001 : vector<1x1x8x28xf32> to vector<8x28xf32>
    %c0_929 = arith.constant 0 : index
    %c0_930 = arith.constant 0 : index
    %1003 = arith.index_cast %984 : i32 to index
    %c1_931 = arith.constant 1 : index
    %1004 = vector.load %arg4[%c0_929, %c0_930, %1003, %c1_931] : memref<1x3x120x30xf32, #tpu.memory_space<vmem>>, vector<1x1x8x28xf32>
    %1005 = vector.shape_cast %1004 : vector<1x1x8x28xf32> to vector<8x28xf32>
    %c0_932 = arith.constant 0 : index
    %c0_933 = arith.constant 0 : index
    %1006 = arith.index_cast %984 : i32 to index
    %c1_934 = arith.constant 1 : index
    %1007 = vector.load %arg5[%c0_932, %c0_933, %1006, %c1_934] : memref<1x3x120x30xf32, #tpu.memory_space<vmem>>, vector<1x1x8x28xf32>
    %1008 = vector.shape_cast %1007 : vector<1x1x8x28xf32> to vector<8x28xf32>
    %c0_935 = arith.constant 0 : index
    %c1_936 = arith.constant 1 : index
    %1009 = arith.index_cast %984 : i32 to index
    %c0_937 = arith.constant 0 : index
    %1010 = vector.load %arg2[%c0_935, %c1_936, %1009, %c0_937] : memref<1x3x120x30xf32, #tpu.memory_space<vmem>>, vector<1x1x8x28xf32>
    %1011 = vector.shape_cast %1010 : vector<1x1x8x28xf32> to vector<8x28xf32>
    %c0_938 = arith.constant 0 : index
    %c1_939 = arith.constant 1 : index
    %1012 = arith.index_cast %984 : i32 to index
    %c0_940 = arith.constant 0 : index
    %1013 = vector.load %arg3[%c0_938, %c1_939, %1012, %c0_940] : memref<1x3x120x30xf32, #tpu.memory_space<vmem>>, vector<1x1x8x28xf32>
    %1014 = vector.shape_cast %1013 : vector<1x1x8x28xf32> to vector<8x28xf32>
    %c0_941 = arith.constant 0 : index
    %c1_942 = arith.constant 1 : index
    %1015 = arith.index_cast %984 : i32 to index
    %c0_943 = arith.constant 0 : index
    %1016 = vector.load %arg4[%c0_941, %c1_942, %1015, %c0_943] : memref<1x3x120x30xf32, #tpu.memory_space<vmem>>, vector<1x1x8x28xf32>
    %1017 = vector.shape_cast %1016 : vector<1x1x8x28xf32> to vector<8x28xf32>
    %c0_944 = arith.constant 0 : index
    %c1_945 = arith.constant 1 : index
    %1018 = arith.index_cast %984 : i32 to index
    %c0_946 = arith.constant 0 : index
    %1019 = vector.load %arg5[%c0_944, %c1_945, %1018, %c0_946] : memref<1x3x120x30xf32, #tpu.memory_space<vmem>>, vector<1x1x8x28xf32>
    %1020 = vector.shape_cast %1019 : vector<1x1x8x28xf32> to vector<8x28xf32>
    %c0_947 = arith.constant 0 : index
    %c1_948 = arith.constant 1 : index
    %1021 = arith.index_cast %984 : i32 to index
    %c1_949 = arith.constant 1 : index
    %1022 = vector.load %arg2[%c0_947, %c1_948, %1021, %c1_949] : memref<1x3x120x30xf32, #tpu.memory_space<vmem>>, vector<1x1x8x28xf32>
    %1023 = vector.shape_cast %1022 : vector<1x1x8x28xf32> to vector<8x28xf32>
    %c0_950 = arith.constant 0 : index
    %c1_951 = arith.constant 1 : index
    %1024 = arith.index_cast %984 : i32 to index
    %c1_952 = arith.constant 1 : index
    %1025 = vector.load %arg3[%c0_950, %c1_951, %1024, %c1_952] : memref<1x3x120x30xf32, #tpu.memory_space<vmem>>, vector<1x1x8x28xf32>
    %1026 = vector.shape_cast %1025 : vector<1x1x8x28xf32> to vector<8x28xf32>
    %c0_953 = arith.constant 0 : index
    %c1_954 = arith.constant 1 : index
    %1027 = arith.index_cast %984 : i32 to index
    %c1_955 = arith.constant 1 : index
    %1028 = vector.load %arg4[%c0_953, %c1_954, %1027, %c1_955] : memref<1x3x120x30xf32, #tpu.memory_space<vmem>>, vector<1x1x8x28xf32>
    %1029 = vector.shape_cast %1028 : vector<1x1x8x28xf32> to vector<8x28xf32>
    %c0_956 = arith.constant 0 : index
    %c1_957 = arith.constant 1 : index
    %1030 = arith.index_cast %984 : i32 to index
    %c1_958 = arith.constant 1 : index
    %1031 = vector.load %arg5[%c0_956, %c1_957, %1030, %c1_958] : memref<1x3x120x30xf32, #tpu.memory_space<vmem>>, vector<1x1x8x28xf32>
    %1032 = vector.shape_cast %1031 : vector<1x1x8x28xf32> to vector<8x28xf32>
    %c0_959 = arith.constant 0 : index
    %c2_960 = arith.constant 2 : index
    %1033 = arith.index_cast %984 : i32 to index
    %c0_961 = arith.constant 0 : index
    %1034 = vector.load %arg2[%c0_959, %c2_960, %1033, %c0_961] : memref<1x3x120x30xf32, #tpu.memory_space<vmem>>, vector<1x1x8x28xf32>
    %1035 = vector.shape_cast %1034 : vector<1x1x8x28xf32> to vector<8x28xf32>
    %c0_962 = arith.constant 0 : index
    %c2_963 = arith.constant 2 : index
    %1036 = arith.index_cast %984 : i32 to index
    %c0_964 = arith.constant 0 : index
    %1037 = vector.load %arg3[%c0_962, %c2_963, %1036, %c0_964] : memref<1x3x120x30xf32, #tpu.memory_space<vmem>>, vector<1x1x8x28xf32>
    %1038 = vector.shape_cast %1037 : vector<1x1x8x28xf32> to vector<8x28xf32>
    %c0_965 = arith.constant 0 : index
    %c2_966 = arith.constant 2 : index
    %1039 = arith.index_cast %984 : i32 to index
    %c0_967 = arith.constant 0 : index
    %1040 = vector.load %arg4[%c0_965, %c2_966, %1039, %c0_967] : memref<1x3x120x30xf32, #tpu.memory_space<vmem>>, vector<1x1x8x28xf32>
    %1041 = vector.shape_cast %1040 : vector<1x1x8x28xf32> to vector<8x28xf32>
    %c0_968 = arith.constant 0 : index
    %c2_969 = arith.constant 2 : index
    %1042 = arith.index_cast %984 : i32 to index
    %c0_970 = arith.constant 0 : index
    %1043 = vector.load %arg5[%c0_968, %c2_969, %1042, %c0_970] : memref<1x3x120x30xf32, #tpu.memory_space<vmem>>, vector<1x1x8x28xf32>
    %1044 = vector.shape_cast %1043 : vector<1x1x8x28xf32> to vector<8x28xf32>
    %c0_971 = arith.constant 0 : index
    %c2_972 = arith.constant 2 : index
    %1045 = arith.index_cast %984 : i32 to index
    %c1_973 = arith.constant 1 : index
    %1046 = vector.load %arg2[%c0_971, %c2_972, %1045, %c1_973] : memref<1x3x120x30xf32, #tpu.memory_space<vmem>>, vector<1x1x8x28xf32>
    %1047 = vector.shape_cast %1046 : vector<1x1x8x28xf32> to vector<8x28xf32>
    %c0_974 = arith.constant 0 : index
    %c2_975 = arith.constant 2 : index
    %1048 = arith.index_cast %984 : i32 to index
    %c1_976 = arith.constant 1 : index
    %1049 = vector.load %arg3[%c0_974, %c2_975, %1048, %c1_976] : memref<1x3x120x30xf32, #tpu.memory_space<vmem>>, vector<1x1x8x28xf32>
    %1050 = vector.shape_cast %1049 : vector<1x1x8x28xf32> to vector<8x28xf32>
    %c0_977 = arith.constant 0 : index
    %c2_978 = arith.constant 2 : index
    %1051 = arith.index_cast %984 : i32 to index
    %c1_979 = arith.constant 1 : index
    %1052 = vector.load %arg4[%c0_977, %c2_978, %1051, %c1_979] : memref<1x3x120x30xf32, #tpu.memory_space<vmem>>, vector<1x1x8x28xf32>
    %1053 = vector.shape_cast %1052 : vector<1x1x8x28xf32> to vector<8x28xf32>
    %c0_980 = arith.constant 0 : index
    %c2_981 = arith.constant 2 : index
    %1054 = arith.index_cast %984 : i32 to index
    %c1_982 = arith.constant 1 : index
    %1055 = vector.load %arg5[%c0_980, %c2_981, %1054, %c1_982] : memref<1x3x120x30xf32, #tpu.memory_space<vmem>>, vector<1x1x8x28xf32>
    %1056 = vector.shape_cast %1055 : vector<1x1x8x28xf32> to vector<8x28xf32>
    %1057 = tpu.concatenate %987, %990, %993, %996, %999, %1002, %1005, %1008, %1011, %1014, %1017, %1020, %1023, %1026, %1029, %1032 in 0 : vector<8x28xf32>, vector<8x28xf32>, vector<8x28xf32>, vector<8x28xf32>, vector<8x28xf32>, vector<8x28xf32>, vector<8x28xf32>, vector<8x28xf32>, vector<8x28xf32>, vector<8x28xf32>, vector<8x28xf32>, vector<8x28xf32>, vector<8x28xf32>, vector<8x28xf32>, vector<8x28xf32>, vector<8x28xf32> -> vector<128x28xf32>
    %1058 = tpu.concatenate %1035, %1038, %1041, %1044, %1047, %1050, %1053, %1056 in 0 : vector<8x28xf32>, vector<8x28xf32>, vector<8x28xf32>, vector<8x28xf32>, vector<8x28xf32>, vector<8x28xf32>, vector<8x28xf32>, vector<8x28xf32> -> vector<64x28xf32>
    %1059 = tpu.concatenate %1057, %1058 in 0 : vector<128x28xf32>, vector<64x28xf32> -> vector<192x28xf32>
    %cst_983 = arith.constant dense<0.000000e+00> : vector<8x28xf32>
    %1060 = tpu.matmul %0, %1059, %cst_983 {dimension_numbers = #tpu.dot_dimension_numbers<[1], [0], [0], [1], [0, 0, 1, 1], [], []>} : vector<8x192xf32>, vector<192x28xf32>, vector<8x28xf32> -> vector<8x28xf32>
    %c0_984 = arith.constant 0 : index
    %c0_985 = arith.constant 0 : index
    %1061 = arith.index_cast %984 : i32 to index
    %c0_986 = arith.constant 0 : index
    %1062 = vector.load %arg4[%c0_984, %c0_985, %1061, %c0_986] : memref<1x3x120x30xf32, #tpu.memory_space<vmem>>, vector<1x1x8x28xf32>
    %1063 = vector.shape_cast %1062 : vector<1x1x8x28xf32> to vector<8x28xf32>
    %c0_987 = arith.constant 0 : index
    %c0_988 = arith.constant 0 : index
    %1064 = arith.index_cast %984 : i32 to index
    %c0_989 = arith.constant 0 : index
    %1065 = vector.load %arg5[%c0_987, %c0_988, %1064, %c0_989] : memref<1x3x120x30xf32, #tpu.memory_space<vmem>>, vector<1x1x8x28xf32>
    %1066 = vector.shape_cast %1065 : vector<1x1x8x28xf32> to vector<8x28xf32>
    %c0_990 = arith.constant 0 : index
    %c0_991 = arith.constant 0 : index
    %1067 = arith.index_cast %984 : i32 to index
    %c1_992 = arith.constant 1 : index
    %1068 = vector.load %arg2[%c0_990, %c0_991, %1067, %c1_992] : memref<1x3x120x30xf32, #tpu.memory_space<vmem>>, vector<1x1x8x28xf32>
    %1069 = vector.shape_cast %1068 : vector<1x1x8x28xf32> to vector<8x28xf32>
    %c0_993 = arith.constant 0 : index
    %c0_994 = arith.constant 0 : index
    %1070 = arith.index_cast %984 : i32 to index
    %c1_995 = arith.constant 1 : index
    %1071 = vector.load %arg3[%c0_993, %c0_994, %1070, %c1_995] : memref<1x3x120x30xf32, #tpu.memory_space<vmem>>, vector<1x1x8x28xf32>
    %1072 = vector.shape_cast %1071 : vector<1x1x8x28xf32> to vector<8x28xf32>
    %c0_996 = arith.constant 0 : index
    %c0_997 = arith.constant 0 : index
    %1073 = arith.index_cast %984 : i32 to index
    %c1_998 = arith.constant 1 : index
    %1074 = vector.load %arg4[%c0_996, %c0_997, %1073, %c1_998] : memref<1x3x120x30xf32, #tpu.memory_space<vmem>>, vector<1x1x8x28xf32>
    %1075 = vector.shape_cast %1074 : vector<1x1x8x28xf32> to vector<8x28xf32>
    %c0_999 = arith.constant 0 : index
    %c0_1000 = arith.constant 0 : index
    %1076 = arith.index_cast %984 : i32 to index
    %c1_1001 = arith.constant 1 : index
    %1077 = vector.load %arg5[%c0_999, %c0_1000, %1076, %c1_1001] : memref<1x3x120x30xf32, #tpu.memory_space<vmem>>, vector<1x1x8x28xf32>
    %1078 = vector.shape_cast %1077 : vector<1x1x8x28xf32> to vector<8x28xf32>
    %c0_1002 = arith.constant 0 : index
    %c0_1003 = arith.constant 0 : index
    %1079 = arith.index_cast %984 : i32 to index
    %c2_1004 = arith.constant 2 : index
    %1080 = vector.load %arg2[%c0_1002, %c0_1003, %1079, %c2_1004] : memref<1x3x120x30xf32, #tpu.memory_space<vmem>>, vector<1x1x8x28xf32>
    %1081 = vector.shape_cast %1080 : vector<1x1x8x28xf32> to vector<8x28xf32>
    %c0_1005 = arith.constant 0 : index
    %c0_1006 = arith.constant 0 : index
    %1082 = arith.index_cast %984 : i32 to index
    %c2_1007 = arith.constant 2 : index
    %1083 = vector.load %arg3[%c0_1005, %c0_1006, %1082, %c2_1007] : memref<1x3x120x30xf32, #tpu.memory_space<vmem>>, vector<1x1x8x28xf32>
    %1084 = vector.shape_cast %1083 : vector<1x1x8x28xf32> to vector<8x28xf32>
    %c0_1008 = arith.constant 0 : index
    %c1_1009 = arith.constant 1 : index
    %1085 = arith.index_cast %984 : i32 to index
    %c0_1010 = arith.constant 0 : index
    %1086 = vector.load %arg4[%c0_1008, %c1_1009, %1085, %c0_1010] : memref<1x3x120x30xf32, #tpu.memory_space<vmem>>, vector<1x1x8x28xf32>
    %1087 = vector.shape_cast %1086 : vector<1x1x8x28xf32> to vector<8x28xf32>
    %c0_1011 = arith.constant 0 : index
    %c1_1012 = arith.constant 1 : index
    %1088 = arith.index_cast %984 : i32 to index
    %c0_1013 = arith.constant 0 : index
    %1089 = vector.load %arg5[%c0_1011, %c1_1012, %1088, %c0_1013] : memref<1x3x120x30xf32, #tpu.memory_space<vmem>>, vector<1x1x8x28xf32>
    %1090 = vector.shape_cast %1089 : vector<1x1x8x28xf32> to vector<8x28xf32>
    %c0_1014 = arith.constant 0 : index
    %c1_1015 = arith.constant 1 : index
    %1091 = arith.index_cast %984 : i32 to index
    %c1_1016 = arith.constant 1 : index
    %1092 = vector.load %arg2[%c0_1014, %c1_1015, %1091, %c1_1016] : memref<1x3x120x30xf32, #tpu.memory_space<vmem>>, vector<1x1x8x28xf32>
    %1093 = vector.shape_cast %1092 : vector<1x1x8x28xf32> to vector<8x28xf32>
    %c0_1017 = arith.constant 0 : index
    %c1_1018 = arith.constant 1 : index
    %1094 = arith.index_cast %984 : i32 to index
    %c1_1019 = arith.constant 1 : index
    %1095 = vector.load %arg3[%c0_1017, %c1_1018, %1094, %c1_1019] : memref<1x3x120x30xf32, #tpu.memory_space<vmem>>, vector<1x1x8x28xf32>
    %1096 = vector.shape_cast %1095 : vector<1x1x8x28xf32> to vector<8x28xf32>
    %c0_1020 = arith.constant 0 : index
    %c1_1021 = arith.constant 1 : index
    %1097 = arith.index_cast %984 : i32 to index
    %c1_1022 = arith.constant 1 : index
    %1098 = vector.load %arg4[%c0_1020, %c1_1021, %1097, %c1_1022] : memref<1x3x120x30xf32, #tpu.memory_space<vmem>>, vector<1x1x8x28xf32>
    %1099 = vector.shape_cast %1098 : vector<1x1x8x28xf32> to vector<8x28xf32>
    %c0_1023 = arith.constant 0 : index
    %c1_1024 = arith.constant 1 : index
    %1100 = arith.index_cast %984 : i32 to index
    %c1_1025 = arith.constant 1 : index
    %1101 = vector.load %arg5[%c0_1023, %c1_1024, %1100, %c1_1025] : memref<1x3x120x30xf32, #tpu.memory_space<vmem>>, vector<1x1x8x28xf32>
    %1102 = vector.shape_cast %1101 : vector<1x1x8x28xf32> to vector<8x28xf32>
    %c0_1026 = arith.constant 0 : index
    %c1_1027 = arith.constant 1 : index
    %1103 = arith.index_cast %984 : i32 to index
    %c2_1028 = arith.constant 2 : index
    %1104 = vector.load %arg2[%c0_1026, %c1_1027, %1103, %c2_1028] : memref<1x3x120x30xf32, #tpu.memory_space<vmem>>, vector<1x1x8x28xf32>
    %1105 = vector.shape_cast %1104 : vector<1x1x8x28xf32> to vector<8x28xf32>
    %c0_1029 = arith.constant 0 : index
    %c1_1030 = arith.constant 1 : index
    %1106 = arith.index_cast %984 : i32 to index
    %c2_1031 = arith.constant 2 : index
    %1107 = vector.load %arg3[%c0_1029, %c1_1030, %1106, %c2_1031] : memref<1x3x120x30xf32, #tpu.memory_space<vmem>>, vector<1x1x8x28xf32>
    %1108 = vector.shape_cast %1107 : vector<1x1x8x28xf32> to vector<8x28xf32>
    %c0_1032 = arith.constant 0 : index
    %c2_1033 = arith.constant 2 : index
    %1109 = arith.index_cast %984 : i32 to index
    %c0_1034 = arith.constant 0 : index
    %1110 = vector.load %arg4[%c0_1032, %c2_1033, %1109, %c0_1034] : memref<1x3x120x30xf32, #tpu.memory_space<vmem>>, vector<1x1x8x28xf32>
    %1111 = vector.shape_cast %1110 : vector<1x1x8x28xf32> to vector<8x28xf32>
    %c0_1035 = arith.constant 0 : index
    %c2_1036 = arith.constant 2 : index
    %1112 = arith.index_cast %984 : i32 to index
    %c0_1037 = arith.constant 0 : index
    %1113 = vector.load %arg5[%c0_1035, %c2_1036, %1112, %c0_1037] : memref<1x3x120x30xf32, #tpu.memory_space<vmem>>, vector<1x1x8x28xf32>
    %1114 = vector.shape_cast %1113 : vector<1x1x8x28xf32> to vector<8x28xf32>
    %c0_1038 = arith.constant 0 : index
    %c2_1039 = arith.constant 2 : index
    %1115 = arith.index_cast %984 : i32 to index
    %c1_1040 = arith.constant 1 : index
    %1116 = vector.load %arg2[%c0_1038, %c2_1039, %1115, %c1_1040] : memref<1x3x120x30xf32, #tpu.memory_space<vmem>>, vector<1x1x8x28xf32>
    %1117 = vector.shape_cast %1116 : vector<1x1x8x28xf32> to vector<8x28xf32>
    %c0_1041 = arith.constant 0 : index
    %c2_1042 = arith.constant 2 : index
    %1118 = arith.index_cast %984 : i32 to index
    %c1_1043 = arith.constant 1 : index
    %1119 = vector.load %arg3[%c0_1041, %c2_1042, %1118, %c1_1043] : memref<1x3x120x30xf32, #tpu.memory_space<vmem>>, vector<1x1x8x28xf32>
    %1120 = vector.shape_cast %1119 : vector<1x1x8x28xf32> to vector<8x28xf32>
    %c0_1044 = arith.constant 0 : index
    %c2_1045 = arith.constant 2 : index
    %1121 = arith.index_cast %984 : i32 to index
    %c1_1046 = arith.constant 1 : index
    %1122 = vector.load %arg4[%c0_1044, %c2_1045, %1121, %c1_1046] : memref<1x3x120x30xf32, #tpu.memory_space<vmem>>, vector<1x1x8x28xf32>
    %1123 = vector.shape_cast %1122 : vector<1x1x8x28xf32> to vector<8x28xf32>
    %c0_1047 = arith.constant 0 : index
    %c2_1048 = arith.constant 2 : index
    %1124 = arith.index_cast %984 : i32 to index
    %c1_1049 = arith.constant 1 : index
    %1125 = vector.load %arg5[%c0_1047, %c2_1048, %1124, %c1_1049] : memref<1x3x120x30xf32, #tpu.memory_space<vmem>>, vector<1x1x8x28xf32>
    %1126 = vector.shape_cast %1125 : vector<1x1x8x28xf32> to vector<8x28xf32>
    %c0_1050 = arith.constant 0 : index
    %c2_1051 = arith.constant 2 : index
    %1127 = arith.index_cast %984 : i32 to index
    %c2_1052 = arith.constant 2 : index
    %1128 = vector.load %arg2[%c0_1050, %c2_1051, %1127, %c2_1052] : memref<1x3x120x30xf32, #tpu.memory_space<vmem>>, vector<1x1x8x28xf32>
    %1129 = vector.shape_cast %1128 : vector<1x1x8x28xf32> to vector<8x28xf32>
    %c0_1053 = arith.constant 0 : index
    %c2_1054 = arith.constant 2 : index
    %1130 = arith.index_cast %984 : i32 to index
    %c2_1055 = arith.constant 2 : index
    %1131 = vector.load %arg3[%c0_1053, %c2_1054, %1130, %c2_1055] : memref<1x3x120x30xf32, #tpu.memory_space<vmem>>, vector<1x1x8x28xf32>
    %1132 = vector.shape_cast %1131 : vector<1x1x8x28xf32> to vector<8x28xf32>
    %1133 = tpu.concatenate %1063, %1066, %1069, %1072, %1075, %1078, %1081, %1084, %1087, %1090, %1093, %1096, %1099, %1102, %1105, %1108 in 0 : vector<8x28xf32>, vector<8x28xf32>, vector<8x28xf32>, vector<8x28xf32>, vector<8x28xf32>, vector<8x28xf32>, vector<8x28xf32>, vector<8x28xf32>, vector<8x28xf32>, vector<8x28xf32>, vector<8x28xf32>, vector<8x28xf32>, vector<8x28xf32>, vector<8x28xf32>, vector<8x28xf32>, vector<8x28xf32> -> vector<128x28xf32>
    %1134 = tpu.concatenate %1111, %1114, %1117, %1120, %1123, %1126, %1129, %1132 in 0 : vector<8x28xf32>, vector<8x28xf32>, vector<8x28xf32>, vector<8x28xf32>, vector<8x28xf32>, vector<8x28xf32>, vector<8x28xf32>, vector<8x28xf32> -> vector<64x28xf32>
    %1135 = tpu.concatenate %1133, %1134 in 0 : vector<128x28xf32>, vector<64x28xf32> -> vector<192x28xf32>
    %cst_1056 = arith.constant dense<0.000000e+00> : vector<8x28xf32>
    %1136 = tpu.matmul %0, %1135, %cst_1056 {dimension_numbers = #tpu.dot_dimension_numbers<[1], [0], [0], [1], [0, 0, 1, 1], [], []>} : vector<8x192xf32>, vector<192x28xf32>, vector<8x28xf32> -> vector<8x28xf32>
    %1137 = arith.maximumf %1060, %1136 : vector<8x28xf32>
    %c4_i32_1057 = arith.constant 4 : i32
    %1138 = arith.muli %c4_i32_1057, %981 : i32
    %c2_i32_1058 = arith.constant 2 : i32
    %1139 = arith.addi %1138, %c2_i32_1058 : i32
    %1140 = tpu.assume_multiple %1139, 2 : i32
    %c0_1059 = arith.constant 0 : index
    %c0_1060 = arith.constant 0 : index
    %1141 = arith.index_cast %1140 : i32 to index
    %c0_1061 = arith.constant 0 : index
    %1142 = vector.load %arg2[%c0_1059, %c0_1060, %1141, %c0_1061] : memref<1x3x120x30xf32, #tpu.memory_space<vmem>>, vector<1x1x8x28xf32>
    %1143 = vector.shape_cast %1142 : vector<1x1x8x28xf32> to vector<8x28xf32>
    %c0_1062 = arith.constant 0 : index
    %c0_1063 = arith.constant 0 : index
    %1144 = arith.index_cast %1140 : i32 to index
    %c0_1064 = arith.constant 0 : index
    %1145 = vector.load %arg3[%c0_1062, %c0_1063, %1144, %c0_1064] : memref<1x3x120x30xf32, #tpu.memory_space<vmem>>, vector<1x1x8x28xf32>
    %1146 = vector.shape_cast %1145 : vector<1x1x8x28xf32> to vector<8x28xf32>
    %c0_1065 = arith.constant 0 : index
    %c0_1066 = arith.constant 0 : index
    %1147 = arith.index_cast %1140 : i32 to index
    %c0_1067 = arith.constant 0 : index
    %1148 = vector.load %arg4[%c0_1065, %c0_1066, %1147, %c0_1067] : memref<1x3x120x30xf32, #tpu.memory_space<vmem>>, vector<1x1x8x28xf32>
    %1149 = vector.shape_cast %1148 : vector<1x1x8x28xf32> to vector<8x28xf32>
    %c0_1068 = arith.constant 0 : index
    %c0_1069 = arith.constant 0 : index
    %1150 = arith.index_cast %1140 : i32 to index
    %c0_1070 = arith.constant 0 : index
    %1151 = vector.load %arg5[%c0_1068, %c0_1069, %1150, %c0_1070] : memref<1x3x120x30xf32, #tpu.memory_space<vmem>>, vector<1x1x8x28xf32>
    %1152 = vector.shape_cast %1151 : vector<1x1x8x28xf32> to vector<8x28xf32>
    %c0_1071 = arith.constant 0 : index
    %c0_1072 = arith.constant 0 : index
    %1153 = arith.index_cast %1140 : i32 to index
    %c1_1073 = arith.constant 1 : index
    %1154 = vector.load %arg2[%c0_1071, %c0_1072, %1153, %c1_1073] : memref<1x3x120x30xf32, #tpu.memory_space<vmem>>, vector<1x1x8x28xf32>
    %1155 = vector.shape_cast %1154 : vector<1x1x8x28xf32> to vector<8x28xf32>
    %c0_1074 = arith.constant 0 : index
    %c0_1075 = arith.constant 0 : index
    %1156 = arith.index_cast %1140 : i32 to index
    %c1_1076 = arith.constant 1 : index
    %1157 = vector.load %arg3[%c0_1074, %c0_1075, %1156, %c1_1076] : memref<1x3x120x30xf32, #tpu.memory_space<vmem>>, vector<1x1x8x28xf32>
    %1158 = vector.shape_cast %1157 : vector<1x1x8x28xf32> to vector<8x28xf32>
    %c0_1077 = arith.constant 0 : index
    %c0_1078 = arith.constant 0 : index
    %1159 = arith.index_cast %1140 : i32 to index
    %c1_1079 = arith.constant 1 : index
    %1160 = vector.load %arg4[%c0_1077, %c0_1078, %1159, %c1_1079] : memref<1x3x120x30xf32, #tpu.memory_space<vmem>>, vector<1x1x8x28xf32>
    %1161 = vector.shape_cast %1160 : vector<1x1x8x28xf32> to vector<8x28xf32>
    %c0_1080 = arith.constant 0 : index
    %c0_1081 = arith.constant 0 : index
    %1162 = arith.index_cast %1140 : i32 to index
    %c1_1082 = arith.constant 1 : index
    %1163 = vector.load %arg5[%c0_1080, %c0_1081, %1162, %c1_1082] : memref<1x3x120x30xf32, #tpu.memory_space<vmem>>, vector<1x1x8x28xf32>
    %1164 = vector.shape_cast %1163 : vector<1x1x8x28xf32> to vector<8x28xf32>
    %c0_1083 = arith.constant 0 : index
    %c1_1084 = arith.constant 1 : index
    %1165 = arith.index_cast %1140 : i32 to index
    %c0_1085 = arith.constant 0 : index
    %1166 = vector.load %arg2[%c0_1083, %c1_1084, %1165, %c0_1085] : memref<1x3x120x30xf32, #tpu.memory_space<vmem>>, vector<1x1x8x28xf32>
    %1167 = vector.shape_cast %1166 : vector<1x1x8x28xf32> to vector<8x28xf32>
    %c0_1086 = arith.constant 0 : index
    %c1_1087 = arith.constant 1 : index
    %1168 = arith.index_cast %1140 : i32 to index
    %c0_1088 = arith.constant 0 : index
    %1169 = vector.load %arg3[%c0_1086, %c1_1087, %1168, %c0_1088] : memref<1x3x120x30xf32, #tpu.memory_space<vmem>>, vector<1x1x8x28xf32>
    %1170 = vector.shape_cast %1169 : vector<1x1x8x28xf32> to vector<8x28xf32>
    %c0_1089 = arith.constant 0 : index
    %c1_1090 = arith.constant 1 : index
    %1171 = arith.index_cast %1140 : i32 to index
    %c0_1091 = arith.constant 0 : index
    %1172 = vector.load %arg4[%c0_1089, %c1_1090, %1171, %c0_1091] : memref<1x3x120x30xf32, #tpu.memory_space<vmem>>, vector<1x1x8x28xf32>
    %1173 = vector.shape_cast %1172 : vector<1x1x8x28xf32> to vector<8x28xf32>
    %c0_1092 = arith.constant 0 : index
    %c1_1093 = arith.constant 1 : index
    %1174 = arith.index_cast %1140 : i32 to index
    %c0_1094 = arith.constant 0 : index
    %1175 = vector.load %arg5[%c0_1092, %c1_1093, %1174, %c0_1094] : memref<1x3x120x30xf32, #tpu.memory_space<vmem>>, vector<1x1x8x28xf32>
    %1176 = vector.shape_cast %1175 : vector<1x1x8x28xf32> to vector<8x28xf32>
    %c0_1095 = arith.constant 0 : index
    %c1_1096 = arith.constant 1 : index
    %1177 = arith.index_cast %1140 : i32 to index
    %c1_1097 = arith.constant 1 : index
    %1178 = vector.load %arg2[%c0_1095, %c1_1096, %1177, %c1_1097] : memref<1x3x120x30xf32, #tpu.memory_space<vmem>>, vector<1x1x8x28xf32>
    %1179 = vector.shape_cast %1178 : vector<1x1x8x28xf32> to vector<8x28xf32>
    %c0_1098 = arith.constant 0 : index
    %c1_1099 = arith.constant 1 : index
    %1180 = arith.index_cast %1140 : i32 to index
    %c1_1100 = arith.constant 1 : index
    %1181 = vector.load %arg3[%c0_1098, %c1_1099, %1180, %c1_1100] : memref<1x3x120x30xf32, #tpu.memory_space<vmem>>, vector<1x1x8x28xf32>
    %1182 = vector.shape_cast %1181 : vector<1x1x8x28xf32> to vector<8x28xf32>
    %c0_1101 = arith.constant 0 : index
    %c1_1102 = arith.constant 1 : index
    %1183 = arith.index_cast %1140 : i32 to index
    %c1_1103 = arith.constant 1 : index
    %1184 = vector.load %arg4[%c0_1101, %c1_1102, %1183, %c1_1103] : memref<1x3x120x30xf32, #tpu.memory_space<vmem>>, vector<1x1x8x28xf32>
    %1185 = vector.shape_cast %1184 : vector<1x1x8x28xf32> to vector<8x28xf32>
    %c0_1104 = arith.constant 0 : index
    %c1_1105 = arith.constant 1 : index
    %1186 = arith.index_cast %1140 : i32 to index
    %c1_1106 = arith.constant 1 : index
    %1187 = vector.load %arg5[%c0_1104, %c1_1105, %1186, %c1_1106] : memref<1x3x120x30xf32, #tpu.memory_space<vmem>>, vector<1x1x8x28xf32>
    %1188 = vector.shape_cast %1187 : vector<1x1x8x28xf32> to vector<8x28xf32>
    %c0_1107 = arith.constant 0 : index
    %c2_1108 = arith.constant 2 : index
    %1189 = arith.index_cast %1140 : i32 to index
    %c0_1109 = arith.constant 0 : index
    %1190 = vector.load %arg2[%c0_1107, %c2_1108, %1189, %c0_1109] : memref<1x3x120x30xf32, #tpu.memory_space<vmem>>, vector<1x1x8x28xf32>
    %1191 = vector.shape_cast %1190 : vector<1x1x8x28xf32> to vector<8x28xf32>
    %c0_1110 = arith.constant 0 : index
    %c2_1111 = arith.constant 2 : index
    %1192 = arith.index_cast %1140 : i32 to index
    %c0_1112 = arith.constant 0 : index
    %1193 = vector.load %arg3[%c0_1110, %c2_1111, %1192, %c0_1112] : memref<1x3x120x30xf32, #tpu.memory_space<vmem>>, vector<1x1x8x28xf32>
    %1194 = vector.shape_cast %1193 : vector<1x1x8x28xf32> to vector<8x28xf32>
    %c0_1113 = arith.constant 0 : index
    %c2_1114 = arith.constant 2 : index
    %1195 = arith.index_cast %1140 : i32 to index
    %c0_1115 = arith.constant 0 : index
    %1196 = vector.load %arg4[%c0_1113, %c2_1114, %1195, %c0_1115] : memref<1x3x120x30xf32, #tpu.memory_space<vmem>>, vector<1x1x8x28xf32>
    %1197 = vector.shape_cast %1196 : vector<1x1x8x28xf32> to vector<8x28xf32>
    %c0_1116 = arith.constant 0 : index
    %c2_1117 = arith.constant 2 : index
    %1198 = arith.index_cast %1140 : i32 to index
    %c0_1118 = arith.constant 0 : index
    %1199 = vector.load %arg5[%c0_1116, %c2_1117, %1198, %c0_1118] : memref<1x3x120x30xf32, #tpu.memory_space<vmem>>, vector<1x1x8x28xf32>
    %1200 = vector.shape_cast %1199 : vector<1x1x8x28xf32> to vector<8x28xf32>
    %c0_1119 = arith.constant 0 : index
    %c2_1120 = arith.constant 2 : index
    %1201 = arith.index_cast %1140 : i32 to index
    %c1_1121 = arith.constant 1 : index
    %1202 = vector.load %arg2[%c0_1119, %c2_1120, %1201, %c1_1121] : memref<1x3x120x30xf32, #tpu.memory_space<vmem>>, vector<1x1x8x28xf32>
    %1203 = vector.shape_cast %1202 : vector<1x1x8x28xf32> to vector<8x28xf32>
    %c0_1122 = arith.constant 0 : index
    %c2_1123 = arith.constant 2 : index
    %1204 = arith.index_cast %1140 : i32 to index
    %c1_1124 = arith.constant 1 : index
    %1205 = vector.load %arg3[%c0_1122, %c2_1123, %1204, %c1_1124] : memref<1x3x120x30xf32, #tpu.memory_space<vmem>>, vector<1x1x8x28xf32>
    %1206 = vector.shape_cast %1205 : vector<1x1x8x28xf32> to vector<8x28xf32>
    %c0_1125 = arith.constant 0 : index
    %c2_1126 = arith.constant 2 : index
    %1207 = arith.index_cast %1140 : i32 to index
    %c1_1127 = arith.constant 1 : index
    %1208 = vector.load %arg4[%c0_1125, %c2_1126, %1207, %c1_1127] : memref<1x3x120x30xf32, #tpu.memory_space<vmem>>, vector<1x1x8x28xf32>
    %1209 = vector.shape_cast %1208 : vector<1x1x8x28xf32> to vector<8x28xf32>
    %c0_1128 = arith.constant 0 : index
    %c2_1129 = arith.constant 2 : index
    %1210 = arith.index_cast %1140 : i32 to index
    %c1_1130 = arith.constant 1 : index
    %1211 = vector.load %arg5[%c0_1128, %c2_1129, %1210, %c1_1130] : memref<1x3x120x30xf32, #tpu.memory_space<vmem>>, vector<1x1x8x28xf32>
    %1212 = vector.shape_cast %1211 : vector<1x1x8x28xf32> to vector<8x28xf32>
    %1213 = tpu.concatenate %1143, %1146, %1149, %1152, %1155, %1158, %1161, %1164, %1167, %1170, %1173, %1176, %1179, %1182, %1185, %1188 in 0 : vector<8x28xf32>, vector<8x28xf32>, vector<8x28xf32>, vector<8x28xf32>, vector<8x28xf32>, vector<8x28xf32>, vector<8x28xf32>, vector<8x28xf32>, vector<8x28xf32>, vector<8x28xf32>, vector<8x28xf32>, vector<8x28xf32>, vector<8x28xf32>, vector<8x28xf32>, vector<8x28xf32>, vector<8x28xf32> -> vector<128x28xf32>
    %1214 = tpu.concatenate %1191, %1194, %1197, %1200, %1203, %1206, %1209, %1212 in 0 : vector<8x28xf32>, vector<8x28xf32>, vector<8x28xf32>, vector<8x28xf32>, vector<8x28xf32>, vector<8x28xf32>, vector<8x28xf32>, vector<8x28xf32> -> vector<64x28xf32>
    %1215 = tpu.concatenate %1213, %1214 in 0 : vector<128x28xf32>, vector<64x28xf32> -> vector<192x28xf32>
    %cst_1131 = arith.constant dense<0.000000e+00> : vector<8x28xf32>
    %1216 = tpu.matmul %0, %1215, %cst_1131 {dimension_numbers = #tpu.dot_dimension_numbers<[1], [0], [0], [1], [0, 0, 1, 1], [], []>} : vector<8x192xf32>, vector<192x28xf32>, vector<8x28xf32> -> vector<8x28xf32>
    %1217 = arith.maximumf %1137, %1216 : vector<8x28xf32>
    %c0_1132 = arith.constant 0 : index
    %c0_1133 = arith.constant 0 : index
    %1218 = arith.index_cast %1140 : i32 to index
    %c0_1134 = arith.constant 0 : index
    %1219 = vector.load %arg4[%c0_1132, %c0_1133, %1218, %c0_1134] : memref<1x3x120x30xf32, #tpu.memory_space<vmem>>, vector<1x1x8x28xf32>
    %1220 = vector.shape_cast %1219 : vector<1x1x8x28xf32> to vector<8x28xf32>
    %c0_1135 = arith.constant 0 : index
    %c0_1136 = arith.constant 0 : index
    %1221 = arith.index_cast %1140 : i32 to index
    %c0_1137 = arith.constant 0 : index
    %1222 = vector.load %arg5[%c0_1135, %c0_1136, %1221, %c0_1137] : memref<1x3x120x30xf32, #tpu.memory_space<vmem>>, vector<1x1x8x28xf32>
    %1223 = vector.shape_cast %1222 : vector<1x1x8x28xf32> to vector<8x28xf32>
    %c0_1138 = arith.constant 0 : index
    %c0_1139 = arith.constant 0 : index
    %1224 = arith.index_cast %1140 : i32 to index
    %c1_1140 = arith.constant 1 : index
    %1225 = vector.load %arg2[%c0_1138, %c0_1139, %1224, %c1_1140] : memref<1x3x120x30xf32, #tpu.memory_space<vmem>>, vector<1x1x8x28xf32>
    %1226 = vector.shape_cast %1225 : vector<1x1x8x28xf32> to vector<8x28xf32>
    %c0_1141 = arith.constant 0 : index
    %c0_1142 = arith.constant 0 : index
    %1227 = arith.index_cast %1140 : i32 to index
    %c1_1143 = arith.constant 1 : index
    %1228 = vector.load %arg3[%c0_1141, %c0_1142, %1227, %c1_1143] : memref<1x3x120x30xf32, #tpu.memory_space<vmem>>, vector<1x1x8x28xf32>
    %1229 = vector.shape_cast %1228 : vector<1x1x8x28xf32> to vector<8x28xf32>
    %c0_1144 = arith.constant 0 : index
    %c0_1145 = arith.constant 0 : index
    %1230 = arith.index_cast %1140 : i32 to index
    %c1_1146 = arith.constant 1 : index
    %1231 = vector.load %arg4[%c0_1144, %c0_1145, %1230, %c1_1146] : memref<1x3x120x30xf32, #tpu.memory_space<vmem>>, vector<1x1x8x28xf32>
    %1232 = vector.shape_cast %1231 : vector<1x1x8x28xf32> to vector<8x28xf32>
    %c0_1147 = arith.constant 0 : index
    %c0_1148 = arith.constant 0 : index
    %1233 = arith.index_cast %1140 : i32 to index
    %c1_1149 = arith.constant 1 : index
    %1234 = vector.load %arg5[%c0_1147, %c0_1148, %1233, %c1_1149] : memref<1x3x120x30xf32, #tpu.memory_space<vmem>>, vector<1x1x8x28xf32>
    %1235 = vector.shape_cast %1234 : vector<1x1x8x28xf32> to vector<8x28xf32>
    %c0_1150 = arith.constant 0 : index
    %c0_1151 = arith.constant 0 : index
    %1236 = arith.index_cast %1140 : i32 to index
    %c2_1152 = arith.constant 2 : index
    %1237 = vector.load %arg2[%c0_1150, %c0_1151, %1236, %c2_1152] : memref<1x3x120x30xf32, #tpu.memory_space<vmem>>, vector<1x1x8x28xf32>
    %1238 = vector.shape_cast %1237 : vector<1x1x8x28xf32> to vector<8x28xf32>
    %c0_1153 = arith.constant 0 : index
    %c0_1154 = arith.constant 0 : index
    %1239 = arith.index_cast %1140 : i32 to index
    %c2_1155 = arith.constant 2 : index
    %1240 = vector.load %arg3[%c0_1153, %c0_1154, %1239, %c2_1155] : memref<1x3x120x30xf32, #tpu.memory_space<vmem>>, vector<1x1x8x28xf32>
    %1241 = vector.shape_cast %1240 : vector<1x1x8x28xf32> to vector<8x28xf32>
    %c0_1156 = arith.constant 0 : index
    %c1_1157 = arith.constant 1 : index
    %1242 = arith.index_cast %1140 : i32 to index
    %c0_1158 = arith.constant 0 : index
    %1243 = vector.load %arg4[%c0_1156, %c1_1157, %1242, %c0_1158] : memref<1x3x120x30xf32, #tpu.memory_space<vmem>>, vector<1x1x8x28xf32>
    %1244 = vector.shape_cast %1243 : vector<1x1x8x28xf32> to vector<8x28xf32>
    %c0_1159 = arith.constant 0 : index
    %c1_1160 = arith.constant 1 : index
    %1245 = arith.index_cast %1140 : i32 to index
    %c0_1161 = arith.constant 0 : index
    %1246 = vector.load %arg5[%c0_1159, %c1_1160, %1245, %c0_1161] : memref<1x3x120x30xf32, #tpu.memory_space<vmem>>, vector<1x1x8x28xf32>
    %1247 = vector.shape_cast %1246 : vector<1x1x8x28xf32> to vector<8x28xf32>
    %c0_1162 = arith.constant 0 : index
    %c1_1163 = arith.constant 1 : index
    %1248 = arith.index_cast %1140 : i32 to index
    %c1_1164 = arith.constant 1 : index
    %1249 = vector.load %arg2[%c0_1162, %c1_1163, %1248, %c1_1164] : memref<1x3x120x30xf32, #tpu.memory_space<vmem>>, vector<1x1x8x28xf32>
    %1250 = vector.shape_cast %1249 : vector<1x1x8x28xf32> to vector<8x28xf32>
    %c0_1165 = arith.constant 0 : index
    %c1_1166 = arith.constant 1 : index
    %1251 = arith.index_cast %1140 : i32 to index
    %c1_1167 = arith.constant 1 : index
    %1252 = vector.load %arg3[%c0_1165, %c1_1166, %1251, %c1_1167] : memref<1x3x120x30xf32, #tpu.memory_space<vmem>>, vector<1x1x8x28xf32>
    %1253 = vector.shape_cast %1252 : vector<1x1x8x28xf32> to vector<8x28xf32>
    %c0_1168 = arith.constant 0 : index
    %c1_1169 = arith.constant 1 : index
    %1254 = arith.index_cast %1140 : i32 to index
    %c1_1170 = arith.constant 1 : index
    %1255 = vector.load %arg4[%c0_1168, %c1_1169, %1254, %c1_1170] : memref<1x3x120x30xf32, #tpu.memory_space<vmem>>, vector<1x1x8x28xf32>
    %1256 = vector.shape_cast %1255 : vector<1x1x8x28xf32> to vector<8x28xf32>
    %c0_1171 = arith.constant 0 : index
    %c1_1172 = arith.constant 1 : index
    %1257 = arith.index_cast %1140 : i32 to index
    %c1_1173 = arith.constant 1 : index
    %1258 = vector.load %arg5[%c0_1171, %c1_1172, %1257, %c1_1173] : memref<1x3x120x30xf32, #tpu.memory_space<vmem>>, vector<1x1x8x28xf32>
    %1259 = vector.shape_cast %1258 : vector<1x1x8x28xf32> to vector<8x28xf32>
    %c0_1174 = arith.constant 0 : index
    %c1_1175 = arith.constant 1 : index
    %1260 = arith.index_cast %1140 : i32 to index
    %c2_1176 = arith.constant 2 : index
    %1261 = vector.load %arg2[%c0_1174, %c1_1175, %1260, %c2_1176] : memref<1x3x120x30xf32, #tpu.memory_space<vmem>>, vector<1x1x8x28xf32>
    %1262 = vector.shape_cast %1261 : vector<1x1x8x28xf32> to vector<8x28xf32>
    %c0_1177 = arith.constant 0 : index
    %c1_1178 = arith.constant 1 : index
    %1263 = arith.index_cast %1140 : i32 to index
    %c2_1179 = arith.constant 2 : index
    %1264 = vector.load %arg3[%c0_1177, %c1_1178, %1263, %c2_1179] : memref<1x3x120x30xf32, #tpu.memory_space<vmem>>, vector<1x1x8x28xf32>
    %1265 = vector.shape_cast %1264 : vector<1x1x8x28xf32> to vector<8x28xf32>
    %c0_1180 = arith.constant 0 : index
    %c2_1181 = arith.constant 2 : index
    %1266 = arith.index_cast %1140 : i32 to index
    %c0_1182 = arith.constant 0 : index
    %1267 = vector.load %arg4[%c0_1180, %c2_1181, %1266, %c0_1182] : memref<1x3x120x30xf32, #tpu.memory_space<vmem>>, vector<1x1x8x28xf32>
    %1268 = vector.shape_cast %1267 : vector<1x1x8x28xf32> to vector<8x28xf32>
    %c0_1183 = arith.constant 0 : index
    %c2_1184 = arith.constant 2 : index
    %1269 = arith.index_cast %1140 : i32 to index
    %c0_1185 = arith.constant 0 : index
    %1270 = vector.load %arg5[%c0_1183, %c2_1184, %1269, %c0_1185] : memref<1x3x120x30xf32, #tpu.memory_space<vmem>>, vector<1x1x8x28xf32>
    %1271 = vector.shape_cast %1270 : vector<1x1x8x28xf32> to vector<8x28xf32>
    %c0_1186 = arith.constant 0 : index
    %c2_1187 = arith.constant 2 : index
    %1272 = arith.index_cast %1140 : i32 to index
    %c1_1188 = arith.constant 1 : index
    %1273 = vector.load %arg2[%c0_1186, %c2_1187, %1272, %c1_1188] : memref<1x3x120x30xf32, #tpu.memory_space<vmem>>, vector<1x1x8x28xf32>
    %1274 = vector.shape_cast %1273 : vector<1x1x8x28xf32> to vector<8x28xf32>
    %c0_1189 = arith.constant 0 : index
    %c2_1190 = arith.constant 2 : index
    %1275 = arith.index_cast %1140 : i32 to index
    %c1_1191 = arith.constant 1 : index
    %1276 = vector.load %arg3[%c0_1189, %c2_1190, %1275, %c1_1191] : memref<1x3x120x30xf32, #tpu.memory_space<vmem>>, vector<1x1x8x28xf32>
    %1277 = vector.shape_cast %1276 : vector<1x1x8x28xf32> to vector<8x28xf32>
    %c0_1192 = arith.constant 0 : index
    %c2_1193 = arith.constant 2 : index
    %1278 = arith.index_cast %1140 : i32 to index
    %c1_1194 = arith.constant 1 : index
    %1279 = vector.load %arg4[%c0_1192, %c2_1193, %1278, %c1_1194] : memref<1x3x120x30xf32, #tpu.memory_space<vmem>>, vector<1x1x8x28xf32>
    %1280 = vector.shape_cast %1279 : vector<1x1x8x28xf32> to vector<8x28xf32>
    %c0_1195 = arith.constant 0 : index
    %c2_1196 = arith.constant 2 : index
    %1281 = arith.index_cast %1140 : i32 to index
    %c1_1197 = arith.constant 1 : index
    %1282 = vector.load %arg5[%c0_1195, %c2_1196, %1281, %c1_1197] : memref<1x3x120x30xf32, #tpu.memory_space<vmem>>, vector<1x1x8x28xf32>
    %1283 = vector.shape_cast %1282 : vector<1x1x8x28xf32> to vector<8x28xf32>
    %c0_1198 = arith.constant 0 : index
    %c2_1199 = arith.constant 2 : index
    %1284 = arith.index_cast %1140 : i32 to index
    %c2_1200 = arith.constant 2 : index
    %1285 = vector.load %arg2[%c0_1198, %c2_1199, %1284, %c2_1200] : memref<1x3x120x30xf32, #tpu.memory_space<vmem>>, vector<1x1x8x28xf32>
    %1286 = vector.shape_cast %1285 : vector<1x1x8x28xf32> to vector<8x28xf32>
    %c0_1201 = arith.constant 0 : index
    %c2_1202 = arith.constant 2 : index
    %1287 = arith.index_cast %1140 : i32 to index
    %c2_1203 = arith.constant 2 : index
    %1288 = vector.load %arg3[%c0_1201, %c2_1202, %1287, %c2_1203] : memref<1x3x120x30xf32, #tpu.memory_space<vmem>>, vector<1x1x8x28xf32>
    %1289 = vector.shape_cast %1288 : vector<1x1x8x28xf32> to vector<8x28xf32>
    %1290 = tpu.concatenate %1220, %1223, %1226, %1229, %1232, %1235, %1238, %1241, %1244, %1247, %1250, %1253, %1256, %1259, %1262, %1265 in 0 : vector<8x28xf32>, vector<8x28xf32>, vector<8x28xf32>, vector<8x28xf32>, vector<8x28xf32>, vector<8x28xf32>, vector<8x28xf32>, vector<8x28xf32>, vector<8x28xf32>, vector<8x28xf32>, vector<8x28xf32>, vector<8x28xf32>, vector<8x28xf32>, vector<8x28xf32>, vector<8x28xf32>, vector<8x28xf32> -> vector<128x28xf32>
    %1291 = tpu.concatenate %1268, %1271, %1274, %1277, %1280, %1283, %1286, %1289 in 0 : vector<8x28xf32>, vector<8x28xf32>, vector<8x28xf32>, vector<8x28xf32>, vector<8x28xf32>, vector<8x28xf32>, vector<8x28xf32>, vector<8x28xf32> -> vector<64x28xf32>
    %1292 = tpu.concatenate %1290, %1291 in 0 : vector<128x28xf32>, vector<64x28xf32> -> vector<192x28xf32>
    %cst_1204 = arith.constant dense<0.000000e+00> : vector<8x28xf32>
    %1293 = tpu.matmul %0, %1292, %cst_1204 {dimension_numbers = #tpu.dot_dimension_numbers<[1], [0], [0], [1], [0, 0, 1, 1], [], []>} : vector<8x192xf32>, vector<192x28xf32>, vector<8x28xf32> -> vector<8x28xf32>
    %1294 = arith.maximumf %1217, %1293 : vector<8x28xf32>
    %1295 = vector.broadcast %1 : vector<8x1xf32> to vector<8x28xf32>
    %1296 = arith.addf %1294, %1295 : vector<8x28xf32>
    %cst_1205 = arith.constant 0.000000e+00 : f32
    %1297 = vector.broadcast %cst_1205 : f32 to vector<8x28xf32>
    %1298 = arith.cmpf oge, %1296, %1297 : vector<8x28xf32>
    %cst_1206 = arith.constant 0.00999999977 : f32
    %1299 = vector.broadcast %cst_1206 : f32 to vector<8x28xf32>
    %1300 = arith.mulf %1299, %1296 : vector<8x28xf32>
    %1301 = arith.select %1298, %1296, %1300 : vector<8x28xi1>, vector<8x28xf32>
    %1302 = vector.extract_strided_slice %1301 {offsets = [0, 0], sizes = [6, 28], strides = [1, 1]} : vector<8x28xf32> to vector<6x28xf32>
    %c0_1207 = arith.constant 0 : index
    %c3 = arith.constant 3 : index
    %c0_1208 = arith.constant 0 : index
    %c0_1209 = arith.constant 0 : index
    %1303 = vector.load %arg8[%c0_1207, %c3, %c0_1208, %c0_1209] : memref<1x4x6x28xf32, #tpu.memory_space<vmem>>, vector<1x1x6x28xf32>
    %1304 = vector.shape_cast %1303 : vector<1x1x6x28xf32> to vector<6x28xf32>
    %1305 = vector.shape_cast %1302 : vector<6x28xf32> to vector<1x1x6x28xf32>
    tpu.vector_store %arg8[%c0_1207, %c3, %c0_1208, %c0_1209], %1305 {strides = array<i32>} : memref<1x4x6x28xf32, #tpu.memory_space<vmem>>, vector<1x1x6x28xf32>,
    return
  }
  func.func @transform_0(%arg0: i32, %arg1: i32) -> (i32, i32, i32, i32) {
    %c0_i32 = arith.constant 0 : i32
    %c0_i32_0 = arith.constant 0 : i32
    %c0_i32_1 = arith.constant 0 : i32
    %c0_i32_2 = arith.constant 0 : i32
    return %arg0, %c0_i32, %c0_i32_0, %c0_i32_1 : i32, i32, i32, i32
  }
  func.func @transform_1(%arg0: i32, %arg1: i32) -> (i32, i32, i32, i32) {
    %c0_i32 = arith.constant 0 : i32
    %c0_i32_0 = arith.constant 0 : i32
    %c0_i32_1 = arith.constant 0 : i32
    %c0_i32_2 = arith.constant 0 : i32
    return %arg0, %c0_i32, %c0_i32_0, %c0_i32_1 : i32, i32, i32, i32
  }
  func.func @transform_2(%arg0: i32, %arg1: i32) -> (i32, i32, i32, i32) {
    %c0_i32 = arith.constant 0 : i32
    %c0_i32_0 = arith.constant 0 : i32
    %c0_i32_1 = arith.constant 0 : i32
    %c0_i32_2 = arith.constant 0 : i32
    return %arg0, %c0_i32, %c0_i32_0, %c0_i32_1 : i32, i32, i32, i32
  }
  func.func @transform_3(%arg0: i32, %arg1: i32) -> (i32, i32, i32, i32) {
    %c0_i32 = arith.constant 0 : i32
    %c0_i32_0 = arith.constant 0 : i32
    %c0_i32_1 = arith.constant 0 : i32
    %c0_i32_2 = arith.constant 0 : i32
    return %arg0, %c0_i32, %c0_i32_0, %c0_i32_1 : i32, i32, i32, i32
  }
  func.func @transform_4(%arg0: i32, %arg1: i32) -> (i32, i32) {
    %c0_i32 = arith.constant 0 : i32
    %c0_i32_0 = arith.constant 0 : i32
    %c0_i32_1 = arith.constant 0 : i32
    return %c0_i32, %c0_i32_0 : i32, i32
  }
  func.func @transform_5(%arg0: i32, %arg1: i32) -> (i32, i32) {
    %c0_i32 = arith.constant 0 : i32
    %c0_i32_0 = arith.constant 0 : i32
    %c0_i32_1 = arith.constant 0 : i32
    return %c0_i32, %c0_i32_0 : i32, i32
  }
  func.func @transform_6(%arg0: i32, %arg1: i32) -> (i32, i32, i32, i32) {
    %c0_i32 = arith.constant 0 : i32
    %c0_i32_0 = arith.constant 0 : i32
    %c0_i32_1 = arith.constant 0 : i32
    return %arg0, %arg1, %c0_i32, %c0_i32_0 : i32, i32, i32, i32
  }
}

module attributes {stable_mosaic.version = 11 : i64} {
  func.func @_mlp_kernel(%arg0: memref<2x400xf32, #tpu.memory_space<vmem>>, %arg1: memref<400x128xf32, #tpu.memory_space<vmem>>, %arg2: memref<1x128xf32, #tpu.memory_space<vmem>>, %arg3: memref<128x128xf32, #tpu.memory_space<vmem>>, %arg4: memref<1x128xf32, #tpu.memory_space<vmem>>, %arg5: memref<128x128xf32, #tpu.memory_space<vmem>>, %arg6: memref<1x128xf32, #tpu.memory_space<vmem>>, %arg7: memref<2x128xf32, #tpu.memory_space<vmem>>) attributes {dimension_semantics = [], scalar_prefetch = 0 : i64, scratch_operands = 0 : i64, tpu.core_type = #tpu.core_type<tc>} {
    %c0 = arith.constant 0 : index
    %c0_0 = arith.constant 0 : index
    %0 = vector.load %arg0[%c0, %c0_0] : memref<2x400xf32, #tpu.memory_space<vmem>>, vector<2x400xf32>
    %c0_1 = arith.constant 0 : index
    %c0_2 = arith.constant 0 : index
    %1 = vector.load %arg1[%c0_1, %c0_2] : memref<400x128xf32, #tpu.memory_space<vmem>>, vector<400x128xf32>
    %cst = arith.constant dense<0.000000e+00> : vector<2x128xf32>
    %2 = tpu.matmul %0, %1, %cst {dimension_numbers = #tpu.dot_dimension_numbers<[1], [0], [0], [1], [0, 0, 1, 1], [], []>} : vector<2x400xf32>, vector<400x128xf32>, vector<2x128xf32> -> vector<2x128xf32>
    %c0_3 = arith.constant 0 : index
    %c0_4 = arith.constant 0 : index
    %3 = vector.load %arg2[%c0_3, %c0_4] : memref<1x128xf32, #tpu.memory_space<vmem>>, vector<1x128xf32>
    %4 = vector.broadcast %3 : vector<1x128xf32> to vector<2x128xf32>
    %5 = arith.addf %2, %4 : vector<2x128xf32>
    %cst_5 = arith.constant 0.000000e+00 : f32
    %6 = vector.broadcast %cst_5 : f32 to vector<2x128xf32>
    %7 = arith.cmpf oge, %5, %6 : vector<2x128xf32>
    %cst_6 = arith.constant 0.00999999977 : f32
    %8 = vector.broadcast %cst_6 : f32 to vector<2x128xf32>
    %9 = arith.mulf %8, %5 : vector<2x128xf32>
    %10 = arith.select %7, %5, %9 : vector<2x128xi1>, vector<2x128xf32>
    %c0_7 = arith.constant 0 : index
    %c0_8 = arith.constant 0 : index
    %11 = vector.load %arg3[%c0_7, %c0_8] : memref<128x128xf32, #tpu.memory_space<vmem>>, vector<128x128xf32>
    %cst_9 = arith.constant dense<0.000000e+00> : vector<2x128xf32>
    %12 = tpu.matmul %10, %11, %cst_9 {dimension_numbers = #tpu.dot_dimension_numbers<[1], [0], [0], [1], [0, 0, 1, 1], [], []>} : vector<2x128xf32>, vector<128x128xf32>, vector<2x128xf32> -> vector<2x128xf32>
    %c0_10 = arith.constant 0 : index
    %c0_11 = arith.constant 0 : index
    %13 = vector.load %arg4[%c0_10, %c0_11] : memref<1x128xf32, #tpu.memory_space<vmem>>, vector<1x128xf32>
    %14 = vector.broadcast %13 : vector<1x128xf32> to vector<2x128xf32>
    %15 = arith.addf %12, %14 : vector<2x128xf32>
    %cst_12 = arith.constant 0.000000e+00 : f32
    %16 = vector.broadcast %cst_12 : f32 to vector<2x128xf32>
    %17 = arith.cmpf oge, %15, %16 : vector<2x128xf32>
    %cst_13 = arith.constant 0.00999999977 : f32
    %18 = vector.broadcast %cst_13 : f32 to vector<2x128xf32>
    %19 = arith.mulf %18, %15 : vector<2x128xf32>
    %20 = arith.select %17, %15, %19 : vector<2x128xi1>, vector<2x128xf32>
    %c0_14 = arith.constant 0 : index
    %c0_15 = arith.constant 0 : index
    %21 = vector.load %arg5[%c0_14, %c0_15] : memref<128x128xf32, #tpu.memory_space<vmem>>, vector<128x128xf32>
    %cst_16 = arith.constant dense<0.000000e+00> : vector<2x128xf32>
    %22 = tpu.matmul %20, %21, %cst_16 {dimension_numbers = #tpu.dot_dimension_numbers<[1], [0], [0], [1], [0, 0, 1, 1], [], []>} : vector<2x128xf32>, vector<128x128xf32>, vector<2x128xf32> -> vector<2x128xf32>
    %c0_17 = arith.constant 0 : index
    %c0_18 = arith.constant 0 : index
    %23 = vector.load %arg6[%c0_17, %c0_18] : memref<1x128xf32, #tpu.memory_space<vmem>>, vector<1x128xf32>
    %24 = vector.broadcast %23 : vector<1x128xf32> to vector<2x128xf32>
    %25 = arith.addf %22, %24 : vector<2x128xf32>
    %c0_19 = arith.constant 0 : index
    %c0_20 = arith.constant 0 : index
    %26 = vector.load %arg7[%c0_19, %c0_20] : memref<2x128xf32, #tpu.memory_space<vmem>>, vector<2x128xf32>
    tpu.vector_store %arg7[%c0_19, %c0_20], %25 {strides = array<i32>} : memref<2x128xf32, #tpu.memory_space<vmem>>, vector<2x128xf32>,
    return
  }
}

module attributes {stable_mosaic.version = 11 : i64} {
  func.func @kernel(%arg0: i32, %arg1: i32, %arg2: memref<1x6x28x7xf32, #tpu.memory_space<vmem>>, %arg3: memref<1x6x28x7xf32, #tpu.memory_space<vmem>>, %arg4: memref<1x6x28x7xf32, #tpu.memory_space<vmem>>, %arg5: memref<1x6x28x7xf32, #tpu.memory_space<vmem>>, %arg6: memref<16x384xf32, #tpu.memory_space<vmem>>, %arg7: memref<16x1xf32, #tpu.memory_space<vmem>>, %arg8: memref<1x1x16x5xf32, #tpu.memory_space<vmem>>) attributes {dimension_semantics = [#tpu.dimension_semantics<parallel>, #tpu.dimension_semantics<parallel>], iteration_bounds = array<i64: 2, 5>, scalar_prefetch = 0 : i64, scratch_operands = 0 : i64, tpu.core_type = #tpu.core_type<tc>, window_params = [{transform_indices = @transform_0, window_bounds = array<i64: 1, 6, 28, 7>}, {transform_indices = @transform_1, window_bounds = array<i64: 1, 6, 28, 7>}, {transform_indices = @transform_2, window_bounds = array<i64: 1, 6, 28, 7>}, {transform_indices = @transform_3, window_bounds = array<i64: 1, 6, 28, 7>}, {pipeline_mode = #tpu.pipeline_mode<synchronous>, transform_indices = @transform_4, window_bounds = array<i64: 16, 384>}, {pipeline_mode = #tpu.pipeline_mode<synchronous>, transform_indices = @transform_5, window_bounds = array<i64: 16, 1>}, {transform_indices = @transform_6, window_bounds = array<i64: 1, 1, 16, 5>}]} {
    %c0 = arith.constant 0 : index
    %c0_0 = arith.constant 0 : index
    %0 = vector.load %arg6[%c0, %c0_0] : memref<16x384xf32, #tpu.memory_space<vmem>>, vector<16x384xf32>
    %c0_1 = arith.constant 0 : index
    %c0_2 = arith.constant 0 : index
    %1 = vector.load %arg7[%c0_1, %c0_2] : memref<16x1xf32, #tpu.memory_space<vmem>>, vector<16x1xf32>
    %c1_i32 = arith.constant 1 : i32
    %2 = arith.muli %c1_i32, %arg1 : i32
    %c0_i32 = arith.constant 0 : i32
    %3 = arith.addi %2, %c0_i32 : i32
    %c4_i32 = arith.constant 4 : i32
    %4 = arith.muli %c4_i32, %3 : i32
    %c0_i32_3 = arith.constant 0 : i32
    %5 = arith.addi %4, %c0_i32_3 : i32
    %6 = tpu.assume_multiple %5, 2 : i32
    %c0_4 = arith.constant 0 : index
    %c0_5 = arith.constant 0 : index
    %7 = arith.index_cast %6 : i32 to index
    %c0_6 = arith.constant 0 : index
    %8 = vector.load %arg2[%c0_4, %c0_5, %7, %c0_6] : memref<1x6x28x7xf32, #tpu.memory_space<vmem>>, vector<1x1x8x5xf32>
    %9 = vector.shape_cast %8 : vector<1x1x8x5xf32> to vector<8x5xf32>
    %c0_7 = arith.constant 0 : index
    %c0_8 = arith.constant 0 : index
    %10 = arith.index_cast %6 : i32 to index
    %c0_9 = arith.constant 0 : index
    %11 = vector.load %arg3[%c0_7, %c0_8, %10, %c0_9] : memref<1x6x28x7xf32, #tpu.memory_space<vmem>>, vector<1x1x8x5xf32>
    %12 = vector.shape_cast %11 : vector<1x1x8x5xf32> to vector<8x5xf32>
    %c0_10 = arith.constant 0 : index
    %c0_11 = arith.constant 0 : index
    %13 = arith.index_cast %6 : i32 to index
    %c0_12 = arith.constant 0 : index
    %14 = vector.load %arg4[%c0_10, %c0_11, %13, %c0_12] : memref<1x6x28x7xf32, #tpu.memory_space<vmem>>, vector<1x1x8x5xf32>
    %15 = vector.shape_cast %14 : vector<1x1x8x5xf32> to vector<8x5xf32>
    %c0_13 = arith.constant 0 : index
    %c0_14 = arith.constant 0 : index
    %16 = arith.index_cast %6 : i32 to index
    %c0_15 = arith.constant 0 : index
    %17 = vector.load %arg5[%c0_13, %c0_14, %16, %c0_15] : memref<1x6x28x7xf32, #tpu.memory_space<vmem>>, vector<1x1x8x5xf32>
    %18 = vector.shape_cast %17 : vector<1x1x8x5xf32> to vector<8x5xf32>
    %c0_16 = arith.constant 0 : index
    %c0_17 = arith.constant 0 : index
    %19 = arith.index_cast %6 : i32 to index
    %c1 = arith.constant 1 : index
    %20 = vector.load %arg2[%c0_16, %c0_17, %19, %c1] : memref<1x6x28x7xf32, #tpu.memory_space<vmem>>, vector<1x1x8x5xf32>
    %21 = vector.shape_cast %20 : vector<1x1x8x5xf32> to vector<8x5xf32>
    %c0_18 = arith.constant 0 : index
    %c0_19 = arith.constant 0 : index
    %22 = arith.index_cast %6 : i32 to index
    %c1_20 = arith.constant 1 : index
    %23 = vector.load %arg3[%c0_18, %c0_19, %22, %c1_20] : memref<1x6x28x7xf32, #tpu.memory_space<vmem>>, vector<1x1x8x5xf32>
    %24 = vector.shape_cast %23 : vector<1x1x8x5xf32> to vector<8x5xf32>
    %c0_21 = arith.constant 0 : index
    %c0_22 = arith.constant 0 : index
    %25 = arith.index_cast %6 : i32 to index
    %c1_23 = arith.constant 1 : index
    %26 = vector.load %arg4[%c0_21, %c0_22, %25, %c1_23] : memref<1x6x28x7xf32, #tpu.memory_space<vmem>>, vector<1x1x8x5xf32>
    %27 = vector.shape_cast %26 : vector<1x1x8x5xf32> to vector<8x5xf32>
    %c0_24 = arith.constant 0 : index
    %c0_25 = arith.constant 0 : index
    %28 = arith.index_cast %6 : i32 to index
    %c1_26 = arith.constant 1 : index
    %29 = vector.load %arg5[%c0_24, %c0_25, %28, %c1_26] : memref<1x6x28x7xf32, #tpu.memory_space<vmem>>, vector<1x1x8x5xf32>
    %30 = vector.shape_cast %29 : vector<1x1x8x5xf32> to vector<8x5xf32>
    %c0_27 = arith.constant 0 : index
    %c1_28 = arith.constant 1 : index
    %31 = arith.index_cast %6 : i32 to index
    %c0_29 = arith.constant 0 : index
    %32 = vector.load %arg2[%c0_27, %c1_28, %31, %c0_29] : memref<1x6x28x7xf32, #tpu.memory_space<vmem>>, vector<1x1x8x5xf32>
    %33 = vector.shape_cast %32 : vector<1x1x8x5xf32> to vector<8x5xf32>
    %c0_30 = arith.constant 0 : index
    %c1_31 = arith.constant 1 : index
    %34 = arith.index_cast %6 : i32 to index
    %c0_32 = arith.constant 0 : index
    %35 = vector.load %arg3[%c0_30, %c1_31, %34, %c0_32] : memref<1x6x28x7xf32, #tpu.memory_space<vmem>>, vector<1x1x8x5xf32>
    %36 = vector.shape_cast %35 : vector<1x1x8x5xf32> to vector<8x5xf32>
    %c0_33 = arith.constant 0 : index
    %c1_34 = arith.constant 1 : index
    %37 = arith.index_cast %6 : i32 to index
    %c0_35 = arith.constant 0 : index
    %38 = vector.load %arg4[%c0_33, %c1_34, %37, %c0_35] : memref<1x6x28x7xf32, #tpu.memory_space<vmem>>, vector<1x1x8x5xf32>
    %39 = vector.shape_cast %38 : vector<1x1x8x5xf32> to vector<8x5xf32>
    %c0_36 = arith.constant 0 : index
    %c1_37 = arith.constant 1 : index
    %40 = arith.index_cast %6 : i32 to index
    %c0_38 = arith.constant 0 : index
    %41 = vector.load %arg5[%c0_36, %c1_37, %40, %c0_38] : memref<1x6x28x7xf32, #tpu.memory_space<vmem>>, vector<1x1x8x5xf32>
    %42 = vector.shape_cast %41 : vector<1x1x8x5xf32> to vector<8x5xf32>
    %c0_39 = arith.constant 0 : index
    %c1_40 = arith.constant 1 : index
    %43 = arith.index_cast %6 : i32 to index
    %c1_41 = arith.constant 1 : index
    %44 = vector.load %arg2[%c0_39, %c1_40, %43, %c1_41] : memref<1x6x28x7xf32, #tpu.memory_space<vmem>>, vector<1x1x8x5xf32>
    %45 = vector.shape_cast %44 : vector<1x1x8x5xf32> to vector<8x5xf32>
    %c0_42 = arith.constant 0 : index
    %c1_43 = arith.constant 1 : index
    %46 = arith.index_cast %6 : i32 to index
    %c1_44 = arith.constant 1 : index
    %47 = vector.load %arg3[%c0_42, %c1_43, %46, %c1_44] : memref<1x6x28x7xf32, #tpu.memory_space<vmem>>, vector<1x1x8x5xf32>
    %48 = vector.shape_cast %47 : vector<1x1x8x5xf32> to vector<8x5xf32>
    %c0_45 = arith.constant 0 : index
    %c1_46 = arith.constant 1 : index
    %49 = arith.index_cast %6 : i32 to index
    %c1_47 = arith.constant 1 : index
    %50 = vector.load %arg4[%c0_45, %c1_46, %49, %c1_47] : memref<1x6x28x7xf32, #tpu.memory_space<vmem>>, vector<1x1x8x5xf32>
    %51 = vector.shape_cast %50 : vector<1x1x8x5xf32> to vector<8x5xf32>
    %c0_48 = arith.constant 0 : index
    %c1_49 = arith.constant 1 : index
    %52 = arith.index_cast %6 : i32 to index
    %c1_50 = arith.constant 1 : index
    %53 = vector.load %arg5[%c0_48, %c1_49, %52, %c1_50] : memref<1x6x28x7xf32, #tpu.memory_space<vmem>>, vector<1x1x8x5xf32>
    %54 = vector.shape_cast %53 : vector<1x1x8x5xf32> to vector<8x5xf32>
    %c0_51 = arith.constant 0 : index
    %c2 = arith.constant 2 : index
    %55 = arith.index_cast %6 : i32 to index
    %c0_52 = arith.constant 0 : index
    %56 = vector.load %arg2[%c0_51, %c2, %55, %c0_52] : memref<1x6x28x7xf32, #tpu.memory_space<vmem>>, vector<1x1x8x5xf32>
    %57 = vector.shape_cast %56 : vector<1x1x8x5xf32> to vector<8x5xf32>
    %c0_53 = arith.constant 0 : index
    %c2_54 = arith.constant 2 : index
    %58 = arith.index_cast %6 : i32 to index
    %c0_55 = arith.constant 0 : index
    %59 = vector.load %arg3[%c0_53, %c2_54, %58, %c0_55] : memref<1x6x28x7xf32, #tpu.memory_space<vmem>>, vector<1x1x8x5xf32>
    %60 = vector.shape_cast %59 : vector<1x1x8x5xf32> to vector<8x5xf32>
    %c0_56 = arith.constant 0 : index
    %c2_57 = arith.constant 2 : index
    %61 = arith.index_cast %6 : i32 to index
    %c0_58 = arith.constant 0 : index
    %62 = vector.load %arg4[%c0_56, %c2_57, %61, %c0_58] : memref<1x6x28x7xf32, #tpu.memory_space<vmem>>, vector<1x1x8x5xf32>
    %63 = vector.shape_cast %62 : vector<1x1x8x5xf32> to vector<8x5xf32>
    %c0_59 = arith.constant 0 : index
    %c2_60 = arith.constant 2 : index
    %64 = arith.index_cast %6 : i32 to index
    %c0_61 = arith.constant 0 : index
    %65 = vector.load %arg5[%c0_59, %c2_60, %64, %c0_61] : memref<1x6x28x7xf32, #tpu.memory_space<vmem>>, vector<1x1x8x5xf32>
    %66 = vector.shape_cast %65 : vector<1x1x8x5xf32> to vector<8x5xf32>
    %c0_62 = arith.constant 0 : index
    %c2_63 = arith.constant 2 : index
    %67 = arith.index_cast %6 : i32 to index
    %c1_64 = arith.constant 1 : index
    %68 = vector.load %arg2[%c0_62, %c2_63, %67, %c1_64] : memref<1x6x28x7xf32, #tpu.memory_space<vmem>>, vector<1x1x8x5xf32>
    %69 = vector.shape_cast %68 : vector<1x1x8x5xf32> to vector<8x5xf32>
    %c0_65 = arith.constant 0 : index
    %c2_66 = arith.constant 2 : index
    %70 = arith.index_cast %6 : i32 to index
    %c1_67 = arith.constant 1 : index
    %71 = vector.load %arg3[%c0_65, %c2_66, %70, %c1_67] : memref<1x6x28x7xf32, #tpu.memory_space<vmem>>, vector<1x1x8x5xf32>
    %72 = vector.shape_cast %71 : vector<1x1x8x5xf32> to vector<8x5xf32>
    %c0_68 = arith.constant 0 : index
    %c2_69 = arith.constant 2 : index
    %73 = arith.index_cast %6 : i32 to index
    %c1_70 = arith.constant 1 : index
    %74 = vector.load %arg4[%c0_68, %c2_69, %73, %c1_70] : memref<1x6x28x7xf32, #tpu.memory_space<vmem>>, vector<1x1x8x5xf32>
    %75 = vector.shape_cast %74 : vector<1x1x8x5xf32> to vector<8x5xf32>
    %c0_71 = arith.constant 0 : index
    %c2_72 = arith.constant 2 : index
    %76 = arith.index_cast %6 : i32 to index
    %c1_73 = arith.constant 1 : index
    %77 = vector.load %arg5[%c0_71, %c2_72, %76, %c1_73] : memref<1x6x28x7xf32, #tpu.memory_space<vmem>>, vector<1x1x8x5xf32>
    %78 = vector.shape_cast %77 : vector<1x1x8x5xf32> to vector<8x5xf32>
    %c0_74 = arith.constant 0 : index
    %c3 = arith.constant 3 : index
    %79 = arith.index_cast %6 : i32 to index
    %c0_75 = arith.constant 0 : index
    %80 = vector.load %arg2[%c0_74, %c3, %79, %c0_75] : memref<1x6x28x7xf32, #tpu.memory_space<vmem>>, vector<1x1x8x5xf32>
    %81 = vector.shape_cast %80 : vector<1x1x8x5xf32> to vector<8x5xf32>
    %c0_76 = arith.constant 0 : index
    %c3_77 = arith.constant 3 : index
    %82 = arith.index_cast %6 : i32 to index
    %c0_78 = arith.constant 0 : index
    %83 = vector.load %arg3[%c0_76, %c3_77, %82, %c0_78] : memref<1x6x28x7xf32, #tpu.memory_space<vmem>>, vector<1x1x8x5xf32>
    %84 = vector.shape_cast %83 : vector<1x1x8x5xf32> to vector<8x5xf32>
    %c0_79 = arith.constant 0 : index
    %c3_80 = arith.constant 3 : index
    %85 = arith.index_cast %6 : i32 to index
    %c0_81 = arith.constant 0 : index
    %86 = vector.load %arg4[%c0_79, %c3_80, %85, %c0_81] : memref<1x6x28x7xf32, #tpu.memory_space<vmem>>, vector<1x1x8x5xf32>
    %87 = vector.shape_cast %86 : vector<1x1x8x5xf32> to vector<8x5xf32>
    %c0_82 = arith.constant 0 : index
    %c3_83 = arith.constant 3 : index
    %88 = arith.index_cast %6 : i32 to index
    %c0_84 = arith.constant 0 : index
    %89 = vector.load %arg5[%c0_82, %c3_83, %88, %c0_84] : memref<1x6x28x7xf32, #tpu.memory_space<vmem>>, vector<1x1x8x5xf32>
    %90 = vector.shape_cast %89 : vector<1x1x8x5xf32> to vector<8x5xf32>
    %c0_85 = arith.constant 0 : index
    %c3_86 = arith.constant 3 : index
    %91 = arith.index_cast %6 : i32 to index
    %c1_87 = arith.constant 1 : index
    %92 = vector.load %arg2[%c0_85, %c3_86, %91, %c1_87] : memref<1x6x28x7xf32, #tpu.memory_space<vmem>>, vector<1x1x8x5xf32>
    %93 = vector.shape_cast %92 : vector<1x1x8x5xf32> to vector<8x5xf32>
    %c0_88 = arith.constant 0 : index
    %c3_89 = arith.constant 3 : index
    %94 = arith.index_cast %6 : i32 to index
    %c1_90 = arith.constant 1 : index
    %95 = vector.load %arg3[%c0_88, %c3_89, %94, %c1_90] : memref<1x6x28x7xf32, #tpu.memory_space<vmem>>, vector<1x1x8x5xf32>
    %96 = vector.shape_cast %95 : vector<1x1x8x5xf32> to vector<8x5xf32>
    %c0_91 = arith.constant 0 : index
    %c3_92 = arith.constant 3 : index
    %97 = arith.index_cast %6 : i32 to index
    %c1_93 = arith.constant 1 : index
    %98 = vector.load %arg4[%c0_91, %c3_92, %97, %c1_93] : memref<1x6x28x7xf32, #tpu.memory_space<vmem>>, vector<1x1x8x5xf32>
    %99 = vector.shape_cast %98 : vector<1x1x8x5xf32> to vector<8x5xf32>
    %c0_94 = arith.constant 0 : index
    %c3_95 = arith.constant 3 : index
    %100 = arith.index_cast %6 : i32 to index
    %c1_96 = arith.constant 1 : index
    %101 = vector.load %arg5[%c0_94, %c3_95, %100, %c1_96] : memref<1x6x28x7xf32, #tpu.memory_space<vmem>>, vector<1x1x8x5xf32>
    %102 = vector.shape_cast %101 : vector<1x1x8x5xf32> to vector<8x5xf32>
    %c0_97 = arith.constant 0 : index
    %c4 = arith.constant 4 : index
    %103 = arith.index_cast %6 : i32 to index
    %c0_98 = arith.constant 0 : index
    %104 = vector.load %arg2[%c0_97, %c4, %103, %c0_98] : memref<1x6x28x7xf32, #tpu.memory_space<vmem>>, vector<1x1x8x5xf32>
    %105 = vector.shape_cast %104 : vector<1x1x8x5xf32> to vector<8x5xf32>
    %c0_99 = arith.constant 0 : index
    %c4_100 = arith.constant 4 : index
    %106 = arith.index_cast %6 : i32 to index
    %c0_101 = arith.constant 0 : index
    %107 = vector.load %arg3[%c0_99, %c4_100, %106, %c0_101] : memref<1x6x28x7xf32, #tpu.memory_space<vmem>>, vector<1x1x8x5xf32>
    %108 = vector.shape_cast %107 : vector<1x1x8x5xf32> to vector<8x5xf32>
    %c0_102 = arith.constant 0 : index
    %c4_103 = arith.constant 4 : index
    %109 = arith.index_cast %6 : i32 to index
    %c0_104 = arith.constant 0 : index
    %110 = vector.load %arg4[%c0_102, %c4_103, %109, %c0_104] : memref<1x6x28x7xf32, #tpu.memory_space<vmem>>, vector<1x1x8x5xf32>
    %111 = vector.shape_cast %110 : vector<1x1x8x5xf32> to vector<8x5xf32>
    %c0_105 = arith.constant 0 : index
    %c4_106 = arith.constant 4 : index
    %112 = arith.index_cast %6 : i32 to index
    %c0_107 = arith.constant 0 : index
    %113 = vector.load %arg5[%c0_105, %c4_106, %112, %c0_107] : memref<1x6x28x7xf32, #tpu.memory_space<vmem>>, vector<1x1x8x5xf32>
    %114 = vector.shape_cast %113 : vector<1x1x8x5xf32> to vector<8x5xf32>
    %c0_108 = arith.constant 0 : index
    %c4_109 = arith.constant 4 : index
    %115 = arith.index_cast %6 : i32 to index
    %c1_110 = arith.constant 1 : index
    %116 = vector.load %arg2[%c0_108, %c4_109, %115, %c1_110] : memref<1x6x28x7xf32, #tpu.memory_space<vmem>>, vector<1x1x8x5xf32>
    %117 = vector.shape_cast %116 : vector<1x1x8x5xf32> to vector<8x5xf32>
    %c0_111 = arith.constant 0 : index
    %c4_112 = arith.constant 4 : index
    %118 = arith.index_cast %6 : i32 to index
    %c1_113 = arith.constant 1 : index
    %119 = vector.load %arg3[%c0_111, %c4_112, %118, %c1_113] : memref<1x6x28x7xf32, #tpu.memory_space<vmem>>, vector<1x1x8x5xf32>
    %120 = vector.shape_cast %119 : vector<1x1x8x5xf32> to vector<8x5xf32>
    %c0_114 = arith.constant 0 : index
    %c4_115 = arith.constant 4 : index
    %121 = arith.index_cast %6 : i32 to index
    %c1_116 = arith.constant 1 : index
    %122 = vector.load %arg4[%c0_114, %c4_115, %121, %c1_116] : memref<1x6x28x7xf32, #tpu.memory_space<vmem>>, vector<1x1x8x5xf32>
    %123 = vector.shape_cast %122 : vector<1x1x8x5xf32> to vector<8x5xf32>
    %c0_117 = arith.constant 0 : index
    %c4_118 = arith.constant 4 : index
    %124 = arith.index_cast %6 : i32 to index
    %c1_119 = arith.constant 1 : index
    %125 = vector.load %arg5[%c0_117, %c4_118, %124, %c1_119] : memref<1x6x28x7xf32, #tpu.memory_space<vmem>>, vector<1x1x8x5xf32>
    %126 = vector.shape_cast %125 : vector<1x1x8x5xf32> to vector<8x5xf32>
    %c0_120 = arith.constant 0 : index
    %c5 = arith.constant 5 : index
    %127 = arith.index_cast %6 : i32 to index
    %c0_121 = arith.constant 0 : index
    %128 = vector.load %arg2[%c0_120, %c5, %127, %c0_121] : memref<1x6x28x7xf32, #tpu.memory_space<vmem>>, vector<1x1x8x5xf32>
    %129 = vector.shape_cast %128 : vector<1x1x8x5xf32> to vector<8x5xf32>
    %c0_122 = arith.constant 0 : index
    %c5_123 = arith.constant 5 : index
    %130 = arith.index_cast %6 : i32 to index
    %c0_124 = arith.constant 0 : index
    %131 = vector.load %arg3[%c0_122, %c5_123, %130, %c0_124] : memref<1x6x28x7xf32, #tpu.memory_space<vmem>>, vector<1x1x8x5xf32>
    %132 = vector.shape_cast %131 : vector<1x1x8x5xf32> to vector<8x5xf32>
    %c0_125 = arith.constant 0 : index
    %c5_126 = arith.constant 5 : index
    %133 = arith.index_cast %6 : i32 to index
    %c0_127 = arith.constant 0 : index
    %134 = vector.load %arg4[%c0_125, %c5_126, %133, %c0_127] : memref<1x6x28x7xf32, #tpu.memory_space<vmem>>, vector<1x1x8x5xf32>
    %135 = vector.shape_cast %134 : vector<1x1x8x5xf32> to vector<8x5xf32>
    %c0_128 = arith.constant 0 : index
    %c5_129 = arith.constant 5 : index
    %136 = arith.index_cast %6 : i32 to index
    %c0_130 = arith.constant 0 : index
    %137 = vector.load %arg5[%c0_128, %c5_129, %136, %c0_130] : memref<1x6x28x7xf32, #tpu.memory_space<vmem>>, vector<1x1x8x5xf32>
    %138 = vector.shape_cast %137 : vector<1x1x8x5xf32> to vector<8x5xf32>
    %c0_131 = arith.constant 0 : index
    %c5_132 = arith.constant 5 : index
    %139 = arith.index_cast %6 : i32 to index
    %c1_133 = arith.constant 1 : index
    %140 = vector.load %arg2[%c0_131, %c5_132, %139, %c1_133] : memref<1x6x28x7xf32, #tpu.memory_space<vmem>>, vector<1x1x8x5xf32>
    %141 = vector.shape_cast %140 : vector<1x1x8x5xf32> to vector<8x5xf32>
    %c0_134 = arith.constant 0 : index
    %c5_135 = arith.constant 5 : index
    %142 = arith.index_cast %6 : i32 to index
    %c1_136 = arith.constant 1 : index
    %143 = vector.load %arg3[%c0_134, %c5_135, %142, %c1_136] : memref<1x6x28x7xf32, #tpu.memory_space<vmem>>, vector<1x1x8x5xf32>
    %144 = vector.shape_cast %143 : vector<1x1x8x5xf32> to vector<8x5xf32>
    %c0_137 = arith.constant 0 : index
    %c5_138 = arith.constant 5 : index
    %145 = arith.index_cast %6 : i32 to index
    %c1_139 = arith.constant 1 : index
    %146 = vector.load %arg4[%c0_137, %c5_138, %145, %c1_139] : memref<1x6x28x7xf32, #tpu.memory_space<vmem>>, vector<1x1x8x5xf32>
    %147 = vector.shape_cast %146 : vector<1x1x8x5xf32> to vector<8x5xf32>
    %c0_140 = arith.constant 0 : index
    %c5_141 = arith.constant 5 : index
    %148 = arith.index_cast %6 : i32 to index
    %c1_142 = arith.constant 1 : index
    %149 = vector.load %arg5[%c0_140, %c5_141, %148, %c1_142] : memref<1x6x28x7xf32, #tpu.memory_space<vmem>>, vector<1x1x8x5xf32>
    %150 = vector.shape_cast %149 : vector<1x1x8x5xf32> to vector<8x5xf32>
    %151 = tpu.concatenate %9, %12, %15, %18, %21, %24, %27, %30, %33, %36, %39, %42, %45, %48, %51, %54 in 0 : vector<8x5xf32>, vector<8x5xf32>, vector<8x5xf32>, vector<8x5xf32>, vector<8x5xf32>, vector<8x5xf32>, vector<8x5xf32>, vector<8x5xf32>, vector<8x5xf32>, vector<8x5xf32>, vector<8x5xf32>, vector<8x5xf32>, vector<8x5xf32>, vector<8x5xf32>, vector<8x5xf32>, vector<8x5xf32> -> vector<128x5xf32>
    %152 = tpu.concatenate %57, %60, %63, %66, %69, %72, %75, %78, %81, %84, %87, %90, %93, %96, %99, %102 in 0 : vector<8x5xf32>, vector<8x5xf32>, vector<8x5xf32>, vector<8x5xf32>, vector<8x5xf32>, vector<8x5xf32>, vector<8x5xf32>, vector<8x5xf32>, vector<8x5xf32>, vector<8x5xf32>, vector<8x5xf32>, vector<8x5xf32>, vector<8x5xf32>, vector<8x5xf32>, vector<8x5xf32>, vector<8x5xf32> -> vector<128x5xf32>
    %153 = tpu.concatenate %105, %108, %111, %114, %117, %120, %123, %126, %129, %132, %135, %138, %141, %144, %147, %150 in 0 : vector<8x5xf32>, vector<8x5xf32>, vector<8x5xf32>, vector<8x5xf32>, vector<8x5xf32>, vector<8x5xf32>, vector<8x5xf32>, vector<8x5xf32>, vector<8x5xf32>, vector<8x5xf32>, vector<8x5xf32>, vector<8x5xf32>, vector<8x5xf32>, vector<8x5xf32>, vector<8x5xf32>, vector<8x5xf32> -> vector<128x5xf32>
    %154 = tpu.concatenate %151, %152, %153 in 0 : vector<128x5xf32>, vector<128x5xf32>, vector<128x5xf32> -> vector<384x5xf32>
    %cst = arith.constant dense<0.000000e+00> : vector<16x5xf32>
    %155 = tpu.matmul %0, %154, %cst {dimension_numbers = #tpu.dot_dimension_numbers<[1], [0], [0], [1], [0, 0, 1, 1], [], []>} : vector<16x384xf32>, vector<384x5xf32>, vector<16x5xf32> -> vector<16x5xf32>
    %c0_143 = arith.constant 0 : index
    %c0_144 = arith.constant 0 : index
    %156 = arith.index_cast %6 : i32 to index
    %c0_145 = arith.constant 0 : index
    %157 = vector.load %arg4[%c0_143, %c0_144, %156, %c0_145] : memref<1x6x28x7xf32, #tpu.memory_space<vmem>>, vector<1x1x8x5xf32>
    %158 = vector.shape_cast %157 : vector<1x1x8x5xf32> to vector<8x5xf32>
    %c0_146 = arith.constant 0 : index
    %c0_147 = arith.constant 0 : index
    %159 = arith.index_cast %6 : i32 to index
    %c0_148 = arith.constant 0 : index
    %160 = vector.load %arg5[%c0_146, %c0_147, %159, %c0_148] : memref<1x6x28x7xf32, #tpu.memory_space<vmem>>, vector<1x1x8x5xf32>
    %161 = vector.shape_cast %160 : vector<1x1x8x5xf32> to vector<8x5xf32>
    %c0_149 = arith.constant 0 : index
    %c0_150 = arith.constant 0 : index
    %162 = arith.index_cast %6 : i32 to index
    %c1_151 = arith.constant 1 : index
    %163 = vector.load %arg2[%c0_149, %c0_150, %162, %c1_151] : memref<1x6x28x7xf32, #tpu.memory_space<vmem>>, vector<1x1x8x5xf32>
    %164 = vector.shape_cast %163 : vector<1x1x8x5xf32> to vector<8x5xf32>
    %c0_152 = arith.constant 0 : index
    %c0_153 = arith.constant 0 : index
    %165 = arith.index_cast %6 : i32 to index
    %c1_154 = arith.constant 1 : index
    %166 = vector.load %arg3[%c0_152, %c0_153, %165, %c1_154] : memref<1x6x28x7xf32, #tpu.memory_space<vmem>>, vector<1x1x8x5xf32>
    %167 = vector.shape_cast %166 : vector<1x1x8x5xf32> to vector<8x5xf32>
    %c0_155 = arith.constant 0 : index
    %c0_156 = arith.constant 0 : index
    %168 = arith.index_cast %6 : i32 to index
    %c1_157 = arith.constant 1 : index
    %169 = vector.load %arg4[%c0_155, %c0_156, %168, %c1_157] : memref<1x6x28x7xf32, #tpu.memory_space<vmem>>, vector<1x1x8x5xf32>
    %170 = vector.shape_cast %169 : vector<1x1x8x5xf32> to vector<8x5xf32>
    %c0_158 = arith.constant 0 : index
    %c0_159 = arith.constant 0 : index
    %171 = arith.index_cast %6 : i32 to index
    %c1_160 = arith.constant 1 : index
    %172 = vector.load %arg5[%c0_158, %c0_159, %171, %c1_160] : memref<1x6x28x7xf32, #tpu.memory_space<vmem>>, vector<1x1x8x5xf32>
    %173 = vector.shape_cast %172 : vector<1x1x8x5xf32> to vector<8x5xf32>
    %c0_161 = arith.constant 0 : index
    %c0_162 = arith.constant 0 : index
    %174 = arith.index_cast %6 : i32 to index
    %c2_163 = arith.constant 2 : index
    %175 = vector.load %arg2[%c0_161, %c0_162, %174, %c2_163] : memref<1x6x28x7xf32, #tpu.memory_space<vmem>>, vector<1x1x8x5xf32>
    %176 = vector.shape_cast %175 : vector<1x1x8x5xf32> to vector<8x5xf32>
    %c0_164 = arith.constant 0 : index
    %c0_165 = arith.constant 0 : index
    %177 = arith.index_cast %6 : i32 to index
    %c2_166 = arith.constant 2 : index
    %178 = vector.load %arg3[%c0_164, %c0_165, %177, %c2_166] : memref<1x6x28x7xf32, #tpu.memory_space<vmem>>, vector<1x1x8x5xf32>
    %179 = vector.shape_cast %178 : vector<1x1x8x5xf32> to vector<8x5xf32>
    %c0_167 = arith.constant 0 : index
    %c1_168 = arith.constant 1 : index
    %180 = arith.index_cast %6 : i32 to index
    %c0_169 = arith.constant 0 : index
    %181 = vector.load %arg4[%c0_167, %c1_168, %180, %c0_169] : memref<1x6x28x7xf32, #tpu.memory_space<vmem>>, vector<1x1x8x5xf32>
    %182 = vector.shape_cast %181 : vector<1x1x8x5xf32> to vector<8x5xf32>
    %c0_170 = arith.constant 0 : index
    %c1_171 = arith.constant 1 : index
    %183 = arith.index_cast %6 : i32 to index
    %c0_172 = arith.constant 0 : index
    %184 = vector.load %arg5[%c0_170, %c1_171, %183, %c0_172] : memref<1x6x28x7xf32, #tpu.memory_space<vmem>>, vector<1x1x8x5xf32>
    %185 = vector.shape_cast %184 : vector<1x1x8x5xf32> to vector<8x5xf32>
    %c0_173 = arith.constant 0 : index
    %c1_174 = arith.constant 1 : index
    %186 = arith.index_cast %6 : i32 to index
    %c1_175 = arith.constant 1 : index
    %187 = vector.load %arg2[%c0_173, %c1_174, %186, %c1_175] : memref<1x6x28x7xf32, #tpu.memory_space<vmem>>, vector<1x1x8x5xf32>
    %188 = vector.shape_cast %187 : vector<1x1x8x5xf32> to vector<8x5xf32>
    %c0_176 = arith.constant 0 : index
    %c1_177 = arith.constant 1 : index
    %189 = arith.index_cast %6 : i32 to index
    %c1_178 = arith.constant 1 : index
    %190 = vector.load %arg3[%c0_176, %c1_177, %189, %c1_178] : memref<1x6x28x7xf32, #tpu.memory_space<vmem>>, vector<1x1x8x5xf32>
    %191 = vector.shape_cast %190 : vector<1x1x8x5xf32> to vector<8x5xf32>
    %c0_179 = arith.constant 0 : index
    %c1_180 = arith.constant 1 : index
    %192 = arith.index_cast %6 : i32 to index
    %c1_181 = arith.constant 1 : index
    %193 = vector.load %arg4[%c0_179, %c1_180, %192, %c1_181] : memref<1x6x28x7xf32, #tpu.memory_space<vmem>>, vector<1x1x8x5xf32>
    %194 = vector.shape_cast %193 : vector<1x1x8x5xf32> to vector<8x5xf32>
    %c0_182 = arith.constant 0 : index
    %c1_183 = arith.constant 1 : index
    %195 = arith.index_cast %6 : i32 to index
    %c1_184 = arith.constant 1 : index
    %196 = vector.load %arg5[%c0_182, %c1_183, %195, %c1_184] : memref<1x6x28x7xf32, #tpu.memory_space<vmem>>, vector<1x1x8x5xf32>
    %197 = vector.shape_cast %196 : vector<1x1x8x5xf32> to vector<8x5xf32>
    %c0_185 = arith.constant 0 : index
    %c1_186 = arith.constant 1 : index
    %198 = arith.index_cast %6 : i32 to index
    %c2_187 = arith.constant 2 : index
    %199 = vector.load %arg2[%c0_185, %c1_186, %198, %c2_187] : memref<1x6x28x7xf32, #tpu.memory_space<vmem>>, vector<1x1x8x5xf32>
    %200 = vector.shape_cast %199 : vector<1x1x8x5xf32> to vector<8x5xf32>
    %c0_188 = arith.constant 0 : index
    %c1_189 = arith.constant 1 : index
    %201 = arith.index_cast %6 : i32 to index
    %c2_190 = arith.constant 2 : index
    %202 = vector.load %arg3[%c0_188, %c1_189, %201, %c2_190] : memref<1x6x28x7xf32, #tpu.memory_space<vmem>>, vector<1x1x8x5xf32>
    %203 = vector.shape_cast %202 : vector<1x1x8x5xf32> to vector<8x5xf32>
    %c0_191 = arith.constant 0 : index
    %c2_192 = arith.constant 2 : index
    %204 = arith.index_cast %6 : i32 to index
    %c0_193 = arith.constant 0 : index
    %205 = vector.load %arg4[%c0_191, %c2_192, %204, %c0_193] : memref<1x6x28x7xf32, #tpu.memory_space<vmem>>, vector<1x1x8x5xf32>
    %206 = vector.shape_cast %205 : vector<1x1x8x5xf32> to vector<8x5xf32>
    %c0_194 = arith.constant 0 : index
    %c2_195 = arith.constant 2 : index
    %207 = arith.index_cast %6 : i32 to index
    %c0_196 = arith.constant 0 : index
    %208 = vector.load %arg5[%c0_194, %c2_195, %207, %c0_196] : memref<1x6x28x7xf32, #tpu.memory_space<vmem>>, vector<1x1x8x5xf32>
    %209 = vector.shape_cast %208 : vector<1x1x8x5xf32> to vector<8x5xf32>
    %c0_197 = arith.constant 0 : index
    %c2_198 = arith.constant 2 : index
    %210 = arith.index_cast %6 : i32 to index
    %c1_199 = arith.constant 1 : index
    %211 = vector.load %arg2[%c0_197, %c2_198, %210, %c1_199] : memref<1x6x28x7xf32, #tpu.memory_space<vmem>>, vector<1x1x8x5xf32>
    %212 = vector.shape_cast %211 : vector<1x1x8x5xf32> to vector<8x5xf32>
    %c0_200 = arith.constant 0 : index
    %c2_201 = arith.constant 2 : index
    %213 = arith.index_cast %6 : i32 to index
    %c1_202 = arith.constant 1 : index
    %214 = vector.load %arg3[%c0_200, %c2_201, %213, %c1_202] : memref<1x6x28x7xf32, #tpu.memory_space<vmem>>, vector<1x1x8x5xf32>
    %215 = vector.shape_cast %214 : vector<1x1x8x5xf32> to vector<8x5xf32>
    %c0_203 = arith.constant 0 : index
    %c2_204 = arith.constant 2 : index
    %216 = arith.index_cast %6 : i32 to index
    %c1_205 = arith.constant 1 : index
    %217 = vector.load %arg4[%c0_203, %c2_204, %216, %c1_205] : memref<1x6x28x7xf32, #tpu.memory_space<vmem>>, vector<1x1x8x5xf32>
    %218 = vector.shape_cast %217 : vector<1x1x8x5xf32> to vector<8x5xf32>
    %c0_206 = arith.constant 0 : index
    %c2_207 = arith.constant 2 : index
    %219 = arith.index_cast %6 : i32 to index
    %c1_208 = arith.constant 1 : index
    %220 = vector.load %arg5[%c0_206, %c2_207, %219, %c1_208] : memref<1x6x28x7xf32, #tpu.memory_space<vmem>>, vector<1x1x8x5xf32>
    %221 = vector.shape_cast %220 : vector<1x1x8x5xf32> to vector<8x5xf32>
    %c0_209 = arith.constant 0 : index
    %c2_210 = arith.constant 2 : index
    %222 = arith.index_cast %6 : i32 to index
    %c2_211 = arith.constant 2 : index
    %223 = vector.load %arg2[%c0_209, %c2_210, %222, %c2_211] : memref<1x6x28x7xf32, #tpu.memory_space<vmem>>, vector<1x1x8x5xf32>
    %224 = vector.shape_cast %223 : vector<1x1x8x5xf32> to vector<8x5xf32>
    %c0_212 = arith.constant 0 : index
    %c2_213 = arith.constant 2 : index
    %225 = arith.index_cast %6 : i32 to index
    %c2_214 = arith.constant 2 : index
    %226 = vector.load %arg3[%c0_212, %c2_213, %225, %c2_214] : memref<1x6x28x7xf32, #tpu.memory_space<vmem>>, vector<1x1x8x5xf32>
    %227 = vector.shape_cast %226 : vector<1x1x8x5xf32> to vector<8x5xf32>
    %c0_215 = arith.constant 0 : index
    %c3_216 = arith.constant 3 : index
    %228 = arith.index_cast %6 : i32 to index
    %c0_217 = arith.constant 0 : index
    %229 = vector.load %arg4[%c0_215, %c3_216, %228, %c0_217] : memref<1x6x28x7xf32, #tpu.memory_space<vmem>>, vector<1x1x8x5xf32>
    %230 = vector.shape_cast %229 : vector<1x1x8x5xf32> to vector<8x5xf32>
    %c0_218 = arith.constant 0 : index
    %c3_219 = arith.constant 3 : index
    %231 = arith.index_cast %6 : i32 to index
    %c0_220 = arith.constant 0 : index
    %232 = vector.load %arg5[%c0_218, %c3_219, %231, %c0_220] : memref<1x6x28x7xf32, #tpu.memory_space<vmem>>, vector<1x1x8x5xf32>
    %233 = vector.shape_cast %232 : vector<1x1x8x5xf32> to vector<8x5xf32>
    %c0_221 = arith.constant 0 : index
    %c3_222 = arith.constant 3 : index
    %234 = arith.index_cast %6 : i32 to index
    %c1_223 = arith.constant 1 : index
    %235 = vector.load %arg2[%c0_221, %c3_222, %234, %c1_223] : memref<1x6x28x7xf32, #tpu.memory_space<vmem>>, vector<1x1x8x5xf32>
    %236 = vector.shape_cast %235 : vector<1x1x8x5xf32> to vector<8x5xf32>
    %c0_224 = arith.constant 0 : index
    %c3_225 = arith.constant 3 : index
    %237 = arith.index_cast %6 : i32 to index
    %c1_226 = arith.constant 1 : index
    %238 = vector.load %arg3[%c0_224, %c3_225, %237, %c1_226] : memref<1x6x28x7xf32, #tpu.memory_space<vmem>>, vector<1x1x8x5xf32>
    %239 = vector.shape_cast %238 : vector<1x1x8x5xf32> to vector<8x5xf32>
    %c0_227 = arith.constant 0 : index
    %c3_228 = arith.constant 3 : index
    %240 = arith.index_cast %6 : i32 to index
    %c1_229 = arith.constant 1 : index
    %241 = vector.load %arg4[%c0_227, %c3_228, %240, %c1_229] : memref<1x6x28x7xf32, #tpu.memory_space<vmem>>, vector<1x1x8x5xf32>
    %242 = vector.shape_cast %241 : vector<1x1x8x5xf32> to vector<8x5xf32>
    %c0_230 = arith.constant 0 : index
    %c3_231 = arith.constant 3 : index
    %243 = arith.index_cast %6 : i32 to index
    %c1_232 = arith.constant 1 : index
    %244 = vector.load %arg5[%c0_230, %c3_231, %243, %c1_232] : memref<1x6x28x7xf32, #tpu.memory_space<vmem>>, vector<1x1x8x5xf32>
    %245 = vector.shape_cast %244 : vector<1x1x8x5xf32> to vector<8x5xf32>
    %c0_233 = arith.constant 0 : index
    %c3_234 = arith.constant 3 : index
    %246 = arith.index_cast %6 : i32 to index
    %c2_235 = arith.constant 2 : index
    %247 = vector.load %arg2[%c0_233, %c3_234, %246, %c2_235] : memref<1x6x28x7xf32, #tpu.memory_space<vmem>>, vector<1x1x8x5xf32>
    %248 = vector.shape_cast %247 : vector<1x1x8x5xf32> to vector<8x5xf32>
    %c0_236 = arith.constant 0 : index
    %c3_237 = arith.constant 3 : index
    %249 = arith.index_cast %6 : i32 to index
    %c2_238 = arith.constant 2 : index
    %250 = vector.load %arg3[%c0_236, %c3_237, %249, %c2_238] : memref<1x6x28x7xf32, #tpu.memory_space<vmem>>, vector<1x1x8x5xf32>
    %251 = vector.shape_cast %250 : vector<1x1x8x5xf32> to vector<8x5xf32>
    %c0_239 = arith.constant 0 : index
    %c4_240 = arith.constant 4 : index
    %252 = arith.index_cast %6 : i32 to index
    %c0_241 = arith.constant 0 : index
    %253 = vector.load %arg4[%c0_239, %c4_240, %252, %c0_241] : memref<1x6x28x7xf32, #tpu.memory_space<vmem>>, vector<1x1x8x5xf32>
    %254 = vector.shape_cast %253 : vector<1x1x8x5xf32> to vector<8x5xf32>
    %c0_242 = arith.constant 0 : index
    %c4_243 = arith.constant 4 : index
    %255 = arith.index_cast %6 : i32 to index
    %c0_244 = arith.constant 0 : index
    %256 = vector.load %arg5[%c0_242, %c4_243, %255, %c0_244] : memref<1x6x28x7xf32, #tpu.memory_space<vmem>>, vector<1x1x8x5xf32>
    %257 = vector.shape_cast %256 : vector<1x1x8x5xf32> to vector<8x5xf32>
    %c0_245 = arith.constant 0 : index
    %c4_246 = arith.constant 4 : index
    %258 = arith.index_cast %6 : i32 to index
    %c1_247 = arith.constant 1 : index
    %259 = vector.load %arg2[%c0_245, %c4_246, %258, %c1_247] : memref<1x6x28x7xf32, #tpu.memory_space<vmem>>, vector<1x1x8x5xf32>
    %260 = vector.shape_cast %259 : vector<1x1x8x5xf32> to vector<8x5xf32>
    %c0_248 = arith.constant 0 : index
    %c4_249 = arith.constant 4 : index
    %261 = arith.index_cast %6 : i32 to index
    %c1_250 = arith.constant 1 : index
    %262 = vector.load %arg3[%c0_248, %c4_249, %261, %c1_250] : memref<1x6x28x7xf32, #tpu.memory_space<vmem>>, vector<1x1x8x5xf32>
    %263 = vector.shape_cast %262 : vector<1x1x8x5xf32> to vector<8x5xf32>
    %c0_251 = arith.constant 0 : index
    %c4_252 = arith.constant 4 : index
    %264 = arith.index_cast %6 : i32 to index
    %c1_253 = arith.constant 1 : index
    %265 = vector.load %arg4[%c0_251, %c4_252, %264, %c1_253] : memref<1x6x28x7xf32, #tpu.memory_space<vmem>>, vector<1x1x8x5xf32>
    %266 = vector.shape_cast %265 : vector<1x1x8x5xf32> to vector<8x5xf32>
    %c0_254 = arith.constant 0 : index
    %c4_255 = arith.constant 4 : index
    %267 = arith.index_cast %6 : i32 to index
    %c1_256 = arith.constant 1 : index
    %268 = vector.load %arg5[%c0_254, %c4_255, %267, %c1_256] : memref<1x6x28x7xf32, #tpu.memory_space<vmem>>, vector<1x1x8x5xf32>
    %269 = vector.shape_cast %268 : vector<1x1x8x5xf32> to vector<8x5xf32>
    %c0_257 = arith.constant 0 : index
    %c4_258 = arith.constant 4 : index
    %270 = arith.index_cast %6 : i32 to index
    %c2_259 = arith.constant 2 : index
    %271 = vector.load %arg2[%c0_257, %c4_258, %270, %c2_259] : memref<1x6x28x7xf32, #tpu.memory_space<vmem>>, vector<1x1x8x5xf32>
    %272 = vector.shape_cast %271 : vector<1x1x8x5xf32> to vector<8x5xf32>
    %c0_260 = arith.constant 0 : index
    %c4_261 = arith.constant 4 : index
    %273 = arith.index_cast %6 : i32 to index
    %c2_262 = arith.constant 2 : index
    %274 = vector.load %arg3[%c0_260, %c4_261, %273, %c2_262] : memref<1x6x28x7xf32, #tpu.memory_space<vmem>>, vector<1x1x8x5xf32>
    %275 = vector.shape_cast %274 : vector<1x1x8x5xf32> to vector<8x5xf32>
    %c0_263 = arith.constant 0 : index
    %c5_264 = arith.constant 5 : index
    %276 = arith.index_cast %6 : i32 to index
    %c0_265 = arith.constant 0 : index
    %277 = vector.load %arg4[%c0_263, %c5_264, %276, %c0_265] : memref<1x6x28x7xf32, #tpu.memory_space<vmem>>, vector<1x1x8x5xf32>
    %278 = vector.shape_cast %277 : vector<1x1x8x5xf32> to vector<8x5xf32>
    %c0_266 = arith.constant 0 : index
    %c5_267 = arith.constant 5 : index
    %279 = arith.index_cast %6 : i32 to index
    %c0_268 = arith.constant 0 : index
    %280 = vector.load %arg5[%c0_266, %c5_267, %279, %c0_268] : memref<1x6x28x7xf32, #tpu.memory_space<vmem>>, vector<1x1x8x5xf32>
    %281 = vector.shape_cast %280 : vector<1x1x8x5xf32> to vector<8x5xf32>
    %c0_269 = arith.constant 0 : index
    %c5_270 = arith.constant 5 : index
    %282 = arith.index_cast %6 : i32 to index
    %c1_271 = arith.constant 1 : index
    %283 = vector.load %arg2[%c0_269, %c5_270, %282, %c1_271] : memref<1x6x28x7xf32, #tpu.memory_space<vmem>>, vector<1x1x8x5xf32>
    %284 = vector.shape_cast %283 : vector<1x1x8x5xf32> to vector<8x5xf32>
    %c0_272 = arith.constant 0 : index
    %c5_273 = arith.constant 5 : index
    %285 = arith.index_cast %6 : i32 to index
    %c1_274 = arith.constant 1 : index
    %286 = vector.load %arg3[%c0_272, %c5_273, %285, %c1_274] : memref<1x6x28x7xf32, #tpu.memory_space<vmem>>, vector<1x1x8x5xf32>
    %287 = vector.shape_cast %286 : vector<1x1x8x5xf32> to vector<8x5xf32>
    %c0_275 = arith.constant 0 : index
    %c5_276 = arith.constant 5 : index
    %288 = arith.index_cast %6 : i32 to index
    %c1_277 = arith.constant 1 : index
    %289 = vector.load %arg4[%c0_275, %c5_276, %288, %c1_277] : memref<1x6x28x7xf32, #tpu.memory_space<vmem>>, vector<1x1x8x5xf32>
    %290 = vector.shape_cast %289 : vector<1x1x8x5xf32> to vector<8x5xf32>
    %c0_278 = arith.constant 0 : index
    %c5_279 = arith.constant 5 : index
    %291 = arith.index_cast %6 : i32 to index
    %c1_280 = arith.constant 1 : index
    %292 = vector.load %arg5[%c0_278, %c5_279, %291, %c1_280] : memref<1x6x28x7xf32, #tpu.memory_space<vmem>>, vector<1x1x8x5xf32>
    %293 = vector.shape_cast %292 : vector<1x1x8x5xf32> to vector<8x5xf32>
    %c0_281 = arith.constant 0 : index
    %c5_282 = arith.constant 5 : index
    %294 = arith.index_cast %6 : i32 to index
    %c2_283 = arith.constant 2 : index
    %295 = vector.load %arg2[%c0_281, %c5_282, %294, %c2_283] : memref<1x6x28x7xf32, #tpu.memory_space<vmem>>, vector<1x1x8x5xf32>
    %296 = vector.shape_cast %295 : vector<1x1x8x5xf32> to vector<8x5xf32>
    %c0_284 = arith.constant 0 : index
    %c5_285 = arith.constant 5 : index
    %297 = arith.index_cast %6 : i32 to index
    %c2_286 = arith.constant 2 : index
    %298 = vector.load %arg3[%c0_284, %c5_285, %297, %c2_286] : memref<1x6x28x7xf32, #tpu.memory_space<vmem>>, vector<1x1x8x5xf32>
    %299 = vector.shape_cast %298 : vector<1x1x8x5xf32> to vector<8x5xf32>
    %300 = tpu.concatenate %158, %161, %164, %167, %170, %173, %176, %179, %182, %185, %188, %191, %194, %197, %200, %203 in 0 : vector<8x5xf32>, vector<8x5xf32>, vector<8x5xf32>, vector<8x5xf32>, vector<8x5xf32>, vector<8x5xf32>, vector<8x5xf32>, vector<8x5xf32>, vector<8x5xf32>, vector<8x5xf32>, vector<8x5xf32>, vector<8x5xf32>, vector<8x5xf32>, vector<8x5xf32>, vector<8x5xf32>, vector<8x5xf32> -> vector<128x5xf32>
    %301 = tpu.concatenate %206, %209, %212, %215, %218, %221, %224, %227, %230, %233, %236, %239, %242, %245, %248, %251 in 0 : vector<8x5xf32>, vector<8x5xf32>, vector<8x5xf32>, vector<8x5xf32>, vector<8x5xf32>, vector<8x5xf32>, vector<8x5xf32>, vector<8x5xf32>, vector<8x5xf32>, vector<8x5xf32>, vector<8x5xf32>, vector<8x5xf32>, vector<8x5xf32>, vector<8x5xf32>, vector<8x5xf32>, vector<8x5xf32> -> vector<128x5xf32>
    %302 = tpu.concatenate %254, %257, %260, %263, %266, %269, %272, %275, %278, %281, %284, %287, %290, %293, %296, %299 in 0 : vector<8x5xf32>, vector<8x5xf32>, vector<8x5xf32>, vector<8x5xf32>, vector<8x5xf32>, vector<8x5xf32>, vector<8x5xf32>, vector<8x5xf32>, vector<8x5xf32>, vector<8x5xf32>, vector<8x5xf32>, vector<8x5xf32>, vector<8x5xf32>, vector<8x5xf32>, vector<8x5xf32>, vector<8x5xf32> -> vector<128x5xf32>
    %303 = tpu.concatenate %300, %301, %302 in 0 : vector<128x5xf32>, vector<128x5xf32>, vector<128x5xf32> -> vector<384x5xf32>
    %cst_287 = arith.constant dense<0.000000e+00> : vector<16x5xf32>
    %304 = tpu.matmul %0, %303, %cst_287 {dimension_numbers = #tpu.dot_dimension_numbers<[1], [0], [0], [1], [0, 0, 1, 1], [], []>} : vector<16x384xf32>, vector<384x5xf32>, vector<16x5xf32> -> vector<16x5xf32>
    %305 = arith.maximumf %155, %304 : vector<16x5xf32>
    %c4_i32_288 = arith.constant 4 : i32
    %306 = arith.muli %c4_i32_288, %3 : i32
    %c2_i32 = arith.constant 2 : i32
    %307 = arith.addi %306, %c2_i32 : i32
    %308 = tpu.assume_multiple %307, 2 : i32
    %c0_289 = arith.constant 0 : index
    %c0_290 = arith.constant 0 : index
    %309 = arith.index_cast %308 : i32 to index
    %c0_291 = arith.constant 0 : index
    %310 = vector.load %arg2[%c0_289, %c0_290, %309, %c0_291] : memref<1x6x28x7xf32, #tpu.memory_space<vmem>>, vector<1x1x8x5xf32>
    %311 = vector.shape_cast %310 : vector<1x1x8x5xf32> to vector<8x5xf32>
    %c0_292 = arith.constant 0 : index
    %c0_293 = arith.constant 0 : index
    %312 = arith.index_cast %308 : i32 to index
    %c0_294 = arith.constant 0 : index
    %313 = vector.load %arg3[%c0_292, %c0_293, %312, %c0_294] : memref<1x6x28x7xf32, #tpu.memory_space<vmem>>, vector<1x1x8x5xf32>
    %314 = vector.shape_cast %313 : vector<1x1x8x5xf32> to vector<8x5xf32>
    %c0_295 = arith.constant 0 : index
    %c0_296 = arith.constant 0 : index
    %315 = arith.index_cast %308 : i32 to index
    %c0_297 = arith.constant 0 : index
    %316 = vector.load %arg4[%c0_295, %c0_296, %315, %c0_297] : memref<1x6x28x7xf32, #tpu.memory_space<vmem>>, vector<1x1x8x5xf32>
    %317 = vector.shape_cast %316 : vector<1x1x8x5xf32> to vector<8x5xf32>
    %c0_298 = arith.constant 0 : index
    %c0_299 = arith.constant 0 : index
    %318 = arith.index_cast %308 : i32 to index
    %c0_300 = arith.constant 0 : index
    %319 = vector.load %arg5[%c0_298, %c0_299, %318, %c0_300] : memref<1x6x28x7xf32, #tpu.memory_space<vmem>>, vector<1x1x8x5xf32>
    %320 = vector.shape_cast %319 : vector<1x1x8x5xf32> to vector<8x5xf32>
    %c0_301 = arith.constant 0 : index
    %c0_302 = arith.constant 0 : index
    %321 = arith.index_cast %308 : i32 to index
    %c1_303 = arith.constant 1 : index
    %322 = vector.load %arg2[%c0_301, %c0_302, %321, %c1_303] : memref<1x6x28x7xf32, #tpu.memory_space<vmem>>, vector<1x1x8x5xf32>
    %323 = vector.shape_cast %322 : vector<1x1x8x5xf32> to vector<8x5xf32>
    %c0_304 = arith.constant 0 : index
    %c0_305 = arith.constant 0 : index
    %324 = arith.index_cast %308 : i32 to index
    %c1_306 = arith.constant 1 : index
    %325 = vector.load %arg3[%c0_304, %c0_305, %324, %c1_306] : memref<1x6x28x7xf32, #tpu.memory_space<vmem>>, vector<1x1x8x5xf32>
    %326 = vector.shape_cast %325 : vector<1x1x8x5xf32> to vector<8x5xf32>
    %c0_307 = arith.constant 0 : index
    %c0_308 = arith.constant 0 : index
    %327 = arith.index_cast %308 : i32 to index
    %c1_309 = arith.constant 1 : index
    %328 = vector.load %arg4[%c0_307, %c0_308, %327, %c1_309] : memref<1x6x28x7xf32, #tpu.memory_space<vmem>>, vector<1x1x8x5xf32>
    %329 = vector.shape_cast %328 : vector<1x1x8x5xf32> to vector<8x5xf32>
    %c0_310 = arith.constant 0 : index
    %c0_311 = arith.constant 0 : index
    %330 = arith.index_cast %308 : i32 to index
    %c1_312 = arith.constant 1 : index
    %331 = vector.load %arg5[%c0_310, %c0_311, %330, %c1_312] : memref<1x6x28x7xf32, #tpu.memory_space<vmem>>, vector<1x1x8x5xf32>
    %332 = vector.shape_cast %331 : vector<1x1x8x5xf32> to vector<8x5xf32>
    %c0_313 = arith.constant 0 : index
    %c1_314 = arith.constant 1 : index
    %333 = arith.index_cast %308 : i32 to index
    %c0_315 = arith.constant 0 : index
    %334 = vector.load %arg2[%c0_313, %c1_314, %333, %c0_315] : memref<1x6x28x7xf32, #tpu.memory_space<vmem>>, vector<1x1x8x5xf32>
    %335 = vector.shape_cast %334 : vector<1x1x8x5xf32> to vector<8x5xf32>
    %c0_316 = arith.constant 0 : index
    %c1_317 = arith.constant 1 : index
    %336 = arith.index_cast %308 : i32 to index
    %c0_318 = arith.constant 0 : index
    %337 = vector.load %arg3[%c0_316, %c1_317, %336, %c0_318] : memref<1x6x28x7xf32, #tpu.memory_space<vmem>>, vector<1x1x8x5xf32>
    %338 = vector.shape_cast %337 : vector<1x1x8x5xf32> to vector<8x5xf32>
    %c0_319 = arith.constant 0 : index
    %c1_320 = arith.constant 1 : index
    %339 = arith.index_cast %308 : i32 to index
    %c0_321 = arith.constant 0 : index
    %340 = vector.load %arg4[%c0_319, %c1_320, %339, %c0_321] : memref<1x6x28x7xf32, #tpu.memory_space<vmem>>, vector<1x1x8x5xf32>
    %341 = vector.shape_cast %340 : vector<1x1x8x5xf32> to vector<8x5xf32>
    %c0_322 = arith.constant 0 : index
    %c1_323 = arith.constant 1 : index
    %342 = arith.index_cast %308 : i32 to index
    %c0_324 = arith.constant 0 : index
    %343 = vector.load %arg5[%c0_322, %c1_323, %342, %c0_324] : memref<1x6x28x7xf32, #tpu.memory_space<vmem>>, vector<1x1x8x5xf32>
    %344 = vector.shape_cast %343 : vector<1x1x8x5xf32> to vector<8x5xf32>
    %c0_325 = arith.constant 0 : index
    %c1_326 = arith.constant 1 : index
    %345 = arith.index_cast %308 : i32 to index
    %c1_327 = arith.constant 1 : index
    %346 = vector.load %arg2[%c0_325, %c1_326, %345, %c1_327] : memref<1x6x28x7xf32, #tpu.memory_space<vmem>>, vector<1x1x8x5xf32>
    %347 = vector.shape_cast %346 : vector<1x1x8x5xf32> to vector<8x5xf32>
    %c0_328 = arith.constant 0 : index
    %c1_329 = arith.constant 1 : index
    %348 = arith.index_cast %308 : i32 to index
    %c1_330 = arith.constant 1 : index
    %349 = vector.load %arg3[%c0_328, %c1_329, %348, %c1_330] : memref<1x6x28x7xf32, #tpu.memory_space<vmem>>, vector<1x1x8x5xf32>
    %350 = vector.shape_cast %349 : vector<1x1x8x5xf32> to vector<8x5xf32>
    %c0_331 = arith.constant 0 : index
    %c1_332 = arith.constant 1 : index
    %351 = arith.index_cast %308 : i32 to index
    %c1_333 = arith.constant 1 : index
    %352 = vector.load %arg4[%c0_331, %c1_332, %351, %c1_333] : memref<1x6x28x7xf32, #tpu.memory_space<vmem>>, vector<1x1x8x5xf32>
    %353 = vector.shape_cast %352 : vector<1x1x8x5xf32> to vector<8x5xf32>
    %c0_334 = arith.constant 0 : index
    %c1_335 = arith.constant 1 : index
    %354 = arith.index_cast %308 : i32 to index
    %c1_336 = arith.constant 1 : index
    %355 = vector.load %arg5[%c0_334, %c1_335, %354, %c1_336] : memref<1x6x28x7xf32, #tpu.memory_space<vmem>>, vector<1x1x8x5xf32>
    %356 = vector.shape_cast %355 : vector<1x1x8x5xf32> to vector<8x5xf32>
    %c0_337 = arith.constant 0 : index
    %c2_338 = arith.constant 2 : index
    %357 = arith.index_cast %308 : i32 to index
    %c0_339 = arith.constant 0 : index
    %358 = vector.load %arg2[%c0_337, %c2_338, %357, %c0_339] : memref<1x6x28x7xf32, #tpu.memory_space<vmem>>, vector<1x1x8x5xf32>
    %359 = vector.shape_cast %358 : vector<1x1x8x5xf32> to vector<8x5xf32>
    %c0_340 = arith.constant 0 : index
    %c2_341 = arith.constant 2 : index
    %360 = arith.index_cast %308 : i32 to index
    %c0_342 = arith.constant 0 : index
    %361 = vector.load %arg3[%c0_340, %c2_341, %360, %c0_342] : memref<1x6x28x7xf32, #tpu.memory_space<vmem>>, vector<1x1x8x5xf32>
    %362 = vector.shape_cast %361 : vector<1x1x8x5xf32> to vector<8x5xf32>
    %c0_343 = arith.constant 0 : index
    %c2_344 = arith.constant 2 : index
    %363 = arith.index_cast %308 : i32 to index
    %c0_345 = arith.constant 0 : index
    %364 = vector.load %arg4[%c0_343, %c2_344, %363, %c0_345] : memref<1x6x28x7xf32, #tpu.memory_space<vmem>>, vector<1x1x8x5xf32>
    %365 = vector.shape_cast %364 : vector<1x1x8x5xf32> to vector<8x5xf32>
    %c0_346 = arith.constant 0 : index
    %c2_347 = arith.constant 2 : index
    %366 = arith.index_cast %308 : i32 to index
    %c0_348 = arith.constant 0 : index
    %367 = vector.load %arg5[%c0_346, %c2_347, %366, %c0_348] : memref<1x6x28x7xf32, #tpu.memory_space<vmem>>, vector<1x1x8x5xf32>
    %368 = vector.shape_cast %367 : vector<1x1x8x5xf32> to vector<8x5xf32>
    %c0_349 = arith.constant 0 : index
    %c2_350 = arith.constant 2 : index
    %369 = arith.index_cast %308 : i32 to index
    %c1_351 = arith.constant 1 : index
    %370 = vector.load %arg2[%c0_349, %c2_350, %369, %c1_351] : memref<1x6x28x7xf32, #tpu.memory_space<vmem>>, vector<1x1x8x5xf32>
    %371 = vector.shape_cast %370 : vector<1x1x8x5xf32> to vector<8x5xf32>
    %c0_352 = arith.constant 0 : index
    %c2_353 = arith.constant 2 : index
    %372 = arith.index_cast %308 : i32 to index
    %c1_354 = arith.constant 1 : index
    %373 = vector.load %arg3[%c0_352, %c2_353, %372, %c1_354] : memref<1x6x28x7xf32, #tpu.memory_space<vmem>>, vector<1x1x8x5xf32>
    %374 = vector.shape_cast %373 : vector<1x1x8x5xf32> to vector<8x5xf32>
    %c0_355 = arith.constant 0 : index
    %c2_356 = arith.constant 2 : index
    %375 = arith.index_cast %308 : i32 to index
    %c1_357 = arith.constant 1 : index
    %376 = vector.load %arg4[%c0_355, %c2_356, %375, %c1_357] : memref<1x6x28x7xf32, #tpu.memory_space<vmem>>, vector<1x1x8x5xf32>
    %377 = vector.shape_cast %376 : vector<1x1x8x5xf32> to vector<8x5xf32>
    %c0_358 = arith.constant 0 : index
    %c2_359 = arith.constant 2 : index
    %378 = arith.index_cast %308 : i32 to index
    %c1_360 = arith.constant 1 : index
    %379 = vector.load %arg5[%c0_358, %c2_359, %378, %c1_360] : memref<1x6x28x7xf32, #tpu.memory_space<vmem>>, vector<1x1x8x5xf32>
    %380 = vector.shape_cast %379 : vector<1x1x8x5xf32> to vector<8x5xf32>
    %c0_361 = arith.constant 0 : index
    %c3_362 = arith.constant 3 : index
    %381 = arith.index_cast %308 : i32 to index
    %c0_363 = arith.constant 0 : index
    %382 = vector.load %arg2[%c0_361, %c3_362, %381, %c0_363] : memref<1x6x28x7xf32, #tpu.memory_space<vmem>>, vector<1x1x8x5xf32>
    %383 = vector.shape_cast %382 : vector<1x1x8x5xf32> to vector<8x5xf32>
    %c0_364 = arith.constant 0 : index
    %c3_365 = arith.constant 3 : index
    %384 = arith.index_cast %308 : i32 to index
    %c0_366 = arith.constant 0 : index
    %385 = vector.load %arg3[%c0_364, %c3_365, %384, %c0_366] : memref<1x6x28x7xf32, #tpu.memory_space<vmem>>, vector<1x1x8x5xf32>
    %386 = vector.shape_cast %385 : vector<1x1x8x5xf32> to vector<8x5xf32>
    %c0_367 = arith.constant 0 : index
    %c3_368 = arith.constant 3 : index
    %387 = arith.index_cast %308 : i32 to index
    %c0_369 = arith.constant 0 : index
    %388 = vector.load %arg4[%c0_367, %c3_368, %387, %c0_369] : memref<1x6x28x7xf32, #tpu.memory_space<vmem>>, vector<1x1x8x5xf32>
    %389 = vector.shape_cast %388 : vector<1x1x8x5xf32> to vector<8x5xf32>
    %c0_370 = arith.constant 0 : index
    %c3_371 = arith.constant 3 : index
    %390 = arith.index_cast %308 : i32 to index
    %c0_372 = arith.constant 0 : index
    %391 = vector.load %arg5[%c0_370, %c3_371, %390, %c0_372] : memref<1x6x28x7xf32, #tpu.memory_space<vmem>>, vector<1x1x8x5xf32>
    %392 = vector.shape_cast %391 : vector<1x1x8x5xf32> to vector<8x5xf32>
    %c0_373 = arith.constant 0 : index
    %c3_374 = arith.constant 3 : index
    %393 = arith.index_cast %308 : i32 to index
    %c1_375 = arith.constant 1 : index
    %394 = vector.load %arg2[%c0_373, %c3_374, %393, %c1_375] : memref<1x6x28x7xf32, #tpu.memory_space<vmem>>, vector<1x1x8x5xf32>
    %395 = vector.shape_cast %394 : vector<1x1x8x5xf32> to vector<8x5xf32>
    %c0_376 = arith.constant 0 : index
    %c3_377 = arith.constant 3 : index
    %396 = arith.index_cast %308 : i32 to index
    %c1_378 = arith.constant 1 : index
    %397 = vector.load %arg3[%c0_376, %c3_377, %396, %c1_378] : memref<1x6x28x7xf32, #tpu.memory_space<vmem>>, vector<1x1x8x5xf32>
    %398 = vector.shape_cast %397 : vector<1x1x8x5xf32> to vector<8x5xf32>
    %c0_379 = arith.constant 0 : index
    %c3_380 = arith.constant 3 : index
    %399 = arith.index_cast %308 : i32 to index
    %c1_381 = arith.constant 1 : index
    %400 = vector.load %arg4[%c0_379, %c3_380, %399, %c1_381] : memref<1x6x28x7xf32, #tpu.memory_space<vmem>>, vector<1x1x8x5xf32>
    %401 = vector.shape_cast %400 : vector<1x1x8x5xf32> to vector<8x5xf32>
    %c0_382 = arith.constant 0 : index
    %c3_383 = arith.constant 3 : index
    %402 = arith.index_cast %308 : i32 to index
    %c1_384 = arith.constant 1 : index
    %403 = vector.load %arg5[%c0_382, %c3_383, %402, %c1_384] : memref<1x6x28x7xf32, #tpu.memory_space<vmem>>, vector<1x1x8x5xf32>
    %404 = vector.shape_cast %403 : vector<1x1x8x5xf32> to vector<8x5xf32>
    %c0_385 = arith.constant 0 : index
    %c4_386 = arith.constant 4 : index
    %405 = arith.index_cast %308 : i32 to index
    %c0_387 = arith.constant 0 : index
    %406 = vector.load %arg2[%c0_385, %c4_386, %405, %c0_387] : memref<1x6x28x7xf32, #tpu.memory_space<vmem>>, vector<1x1x8x5xf32>
    %407 = vector.shape_cast %406 : vector<1x1x8x5xf32> to vector<8x5xf32>
    %c0_388 = arith.constant 0 : index
    %c4_389 = arith.constant 4 : index
    %408 = arith.index_cast %308 : i32 to index
    %c0_390 = arith.constant 0 : index
    %409 = vector.load %arg3[%c0_388, %c4_389, %408, %c0_390] : memref<1x6x28x7xf32, #tpu.memory_space<vmem>>, vector<1x1x8x5xf32>
    %410 = vector.shape_cast %409 : vector<1x1x8x5xf32> to vector<8x5xf32>
    %c0_391 = arith.constant 0 : index
    %c4_392 = arith.constant 4 : index
    %411 = arith.index_cast %308 : i32 to index
    %c0_393 = arith.constant 0 : index
    %412 = vector.load %arg4[%c0_391, %c4_392, %411, %c0_393] : memref<1x6x28x7xf32, #tpu.memory_space<vmem>>, vector<1x1x8x5xf32>
    %413 = vector.shape_cast %412 : vector<1x1x8x5xf32> to vector<8x5xf32>
    %c0_394 = arith.constant 0 : index
    %c4_395 = arith.constant 4 : index
    %414 = arith.index_cast %308 : i32 to index
    %c0_396 = arith.constant 0 : index
    %415 = vector.load %arg5[%c0_394, %c4_395, %414, %c0_396] : memref<1x6x28x7xf32, #tpu.memory_space<vmem>>, vector<1x1x8x5xf32>
    %416 = vector.shape_cast %415 : vector<1x1x8x5xf32> to vector<8x5xf32>
    %c0_397 = arith.constant 0 : index
    %c4_398 = arith.constant 4 : index
    %417 = arith.index_cast %308 : i32 to index
    %c1_399 = arith.constant 1 : index
    %418 = vector.load %arg2[%c0_397, %c4_398, %417, %c1_399] : memref<1x6x28x7xf32, #tpu.memory_space<vmem>>, vector<1x1x8x5xf32>
    %419 = vector.shape_cast %418 : vector<1x1x8x5xf32> to vector<8x5xf32>
    %c0_400 = arith.constant 0 : index
    %c4_401 = arith.constant 4 : index
    %420 = arith.index_cast %308 : i32 to index
    %c1_402 = arith.constant 1 : index
    %421 = vector.load %arg3[%c0_400, %c4_401, %420, %c1_402] : memref<1x6x28x7xf32, #tpu.memory_space<vmem>>, vector<1x1x8x5xf32>
    %422 = vector.shape_cast %421 : vector<1x1x8x5xf32> to vector<8x5xf32>
    %c0_403 = arith.constant 0 : index
    %c4_404 = arith.constant 4 : index
    %423 = arith.index_cast %308 : i32 to index
    %c1_405 = arith.constant 1 : index
    %424 = vector.load %arg4[%c0_403, %c4_404, %423, %c1_405] : memref<1x6x28x7xf32, #tpu.memory_space<vmem>>, vector<1x1x8x5xf32>
    %425 = vector.shape_cast %424 : vector<1x1x8x5xf32> to vector<8x5xf32>
    %c0_406 = arith.constant 0 : index
    %c4_407 = arith.constant 4 : index
    %426 = arith.index_cast %308 : i32 to index
    %c1_408 = arith.constant 1 : index
    %427 = vector.load %arg5[%c0_406, %c4_407, %426, %c1_408] : memref<1x6x28x7xf32, #tpu.memory_space<vmem>>, vector<1x1x8x5xf32>
    %428 = vector.shape_cast %427 : vector<1x1x8x5xf32> to vector<8x5xf32>
    %c0_409 = arith.constant 0 : index
    %c5_410 = arith.constant 5 : index
    %429 = arith.index_cast %308 : i32 to index
    %c0_411 = arith.constant 0 : index
    %430 = vector.load %arg2[%c0_409, %c5_410, %429, %c0_411] : memref<1x6x28x7xf32, #tpu.memory_space<vmem>>, vector<1x1x8x5xf32>
    %431 = vector.shape_cast %430 : vector<1x1x8x5xf32> to vector<8x5xf32>
    %c0_412 = arith.constant 0 : index
    %c5_413 = arith.constant 5 : index
    %432 = arith.index_cast %308 : i32 to index
    %c0_414 = arith.constant 0 : index
    %433 = vector.load %arg3[%c0_412, %c5_413, %432, %c0_414] : memref<1x6x28x7xf32, #tpu.memory_space<vmem>>, vector<1x1x8x5xf32>
    %434 = vector.shape_cast %433 : vector<1x1x8x5xf32> to vector<8x5xf32>
    %c0_415 = arith.constant 0 : index
    %c5_416 = arith.constant 5 : index
    %435 = arith.index_cast %308 : i32 to index
    %c0_417 = arith.constant 0 : index
    %436 = vector.load %arg4[%c0_415, %c5_416, %435, %c0_417] : memref<1x6x28x7xf32, #tpu.memory_space<vmem>>, vector<1x1x8x5xf32>
    %437 = vector.shape_cast %436 : vector<1x1x8x5xf32> to vector<8x5xf32>
    %c0_418 = arith.constant 0 : index
    %c5_419 = arith.constant 5 : index
    %438 = arith.index_cast %308 : i32 to index
    %c0_420 = arith.constant 0 : index
    %439 = vector.load %arg5[%c0_418, %c5_419, %438, %c0_420] : memref<1x6x28x7xf32, #tpu.memory_space<vmem>>, vector<1x1x8x5xf32>
    %440 = vector.shape_cast %439 : vector<1x1x8x5xf32> to vector<8x5xf32>
    %c0_421 = arith.constant 0 : index
    %c5_422 = arith.constant 5 : index
    %441 = arith.index_cast %308 : i32 to index
    %c1_423 = arith.constant 1 : index
    %442 = vector.load %arg2[%c0_421, %c5_422, %441, %c1_423] : memref<1x6x28x7xf32, #tpu.memory_space<vmem>>, vector<1x1x8x5xf32>
    %443 = vector.shape_cast %442 : vector<1x1x8x5xf32> to vector<8x5xf32>
    %c0_424 = arith.constant 0 : index
    %c5_425 = arith.constant 5 : index
    %444 = arith.index_cast %308 : i32 to index
    %c1_426 = arith.constant 1 : index
    %445 = vector.load %arg3[%c0_424, %c5_425, %444, %c1_426] : memref<1x6x28x7xf32, #tpu.memory_space<vmem>>, vector<1x1x8x5xf32>
    %446 = vector.shape_cast %445 : vector<1x1x8x5xf32> to vector<8x5xf32>
    %c0_427 = arith.constant 0 : index
    %c5_428 = arith.constant 5 : index
    %447 = arith.index_cast %308 : i32 to index
    %c1_429 = arith.constant 1 : index
    %448 = vector.load %arg4[%c0_427, %c5_428, %447, %c1_429] : memref<1x6x28x7xf32, #tpu.memory_space<vmem>>, vector<1x1x8x5xf32>
    %449 = vector.shape_cast %448 : vector<1x1x8x5xf32> to vector<8x5xf32>
    %c0_430 = arith.constant 0 : index
    %c5_431 = arith.constant 5 : index
    %450 = arith.index_cast %308 : i32 to index
    %c1_432 = arith.constant 1 : index
    %451 = vector.load %arg5[%c0_430, %c5_431, %450, %c1_432] : memref<1x6x28x7xf32, #tpu.memory_space<vmem>>, vector<1x1x8x5xf32>
    %452 = vector.shape_cast %451 : vector<1x1x8x5xf32> to vector<8x5xf32>
    %453 = tpu.concatenate %311, %314, %317, %320, %323, %326, %329, %332, %335, %338, %341, %344, %347, %350, %353, %356 in 0 : vector<8x5xf32>, vector<8x5xf32>, vector<8x5xf32>, vector<8x5xf32>, vector<8x5xf32>, vector<8x5xf32>, vector<8x5xf32>, vector<8x5xf32>, vector<8x5xf32>, vector<8x5xf32>, vector<8x5xf32>, vector<8x5xf32>, vector<8x5xf32>, vector<8x5xf32>, vector<8x5xf32>, vector<8x5xf32> -> vector<128x5xf32>
    %454 = tpu.concatenate %359, %362, %365, %368, %371, %374, %377, %380, %383, %386, %389, %392, %395, %398, %401, %404 in 0 : vector<8x5xf32>, vector<8x5xf32>, vector<8x5xf32>, vector<8x5xf32>, vector<8x5xf32>, vector<8x5xf32>, vector<8x5xf32>, vector<8x5xf32>, vector<8x5xf32>, vector<8x5xf32>, vector<8x5xf32>, vector<8x5xf32>, vector<8x5xf32>, vector<8x5xf32>, vector<8x5xf32>, vector<8x5xf32> -> vector<128x5xf32>
    %455 = tpu.concatenate %407, %410, %413, %416, %419, %422, %425, %428, %431, %434, %437, %440, %443, %446, %449, %452 in 0 : vector<8x5xf32>, vector<8x5xf32>, vector<8x5xf32>, vector<8x5xf32>, vector<8x5xf32>, vector<8x5xf32>, vector<8x5xf32>, vector<8x5xf32>, vector<8x5xf32>, vector<8x5xf32>, vector<8x5xf32>, vector<8x5xf32>, vector<8x5xf32>, vector<8x5xf32>, vector<8x5xf32>, vector<8x5xf32> -> vector<128x5xf32>
    %456 = tpu.concatenate %453, %454, %455 in 0 : vector<128x5xf32>, vector<128x5xf32>, vector<128x5xf32> -> vector<384x5xf32>
    %cst_433 = arith.constant dense<0.000000e+00> : vector<16x5xf32>
    %457 = tpu.matmul %0, %456, %cst_433 {dimension_numbers = #tpu.dot_dimension_numbers<[1], [0], [0], [1], [0, 0, 1, 1], [], []>} : vector<16x384xf32>, vector<384x5xf32>, vector<16x5xf32> -> vector<16x5xf32>
    %458 = arith.maximumf %305, %457 : vector<16x5xf32>
    %c0_434 = arith.constant 0 : index
    %c0_435 = arith.constant 0 : index
    %459 = arith.index_cast %308 : i32 to index
    %c0_436 = arith.constant 0 : index
    %460 = vector.load %arg4[%c0_434, %c0_435, %459, %c0_436] : memref<1x6x28x7xf32, #tpu.memory_space<vmem>>, vector<1x1x8x5xf32>
    %461 = vector.shape_cast %460 : vector<1x1x8x5xf32> to vector<8x5xf32>
    %c0_437 = arith.constant 0 : index
    %c0_438 = arith.constant 0 : index
    %462 = arith.index_cast %308 : i32 to index
    %c0_439 = arith.constant 0 : index
    %463 = vector.load %arg5[%c0_437, %c0_438, %462, %c0_439] : memref<1x6x28x7xf32, #tpu.memory_space<vmem>>, vector<1x1x8x5xf32>
    %464 = vector.shape_cast %463 : vector<1x1x8x5xf32> to vector<8x5xf32>
    %c0_440 = arith.constant 0 : index
    %c0_441 = arith.constant 0 : index
    %465 = arith.index_cast %308 : i32 to index
    %c1_442 = arith.constant 1 : index
    %466 = vector.load %arg2[%c0_440, %c0_441, %465, %c1_442] : memref<1x6x28x7xf32, #tpu.memory_space<vmem>>, vector<1x1x8x5xf32>
    %467 = vector.shape_cast %466 : vector<1x1x8x5xf32> to vector<8x5xf32>
    %c0_443 = arith.constant 0 : index
    %c0_444 = arith.constant 0 : index
    %468 = arith.index_cast %308 : i32 to index
    %c1_445 = arith.constant 1 : index
    %469 = vector.load %arg3[%c0_443, %c0_444, %468, %c1_445] : memref<1x6x28x7xf32, #tpu.memory_space<vmem>>, vector<1x1x8x5xf32>
    %470 = vector.shape_cast %469 : vector<1x1x8x5xf32> to vector<8x5xf32>
    %c0_446 = arith.constant 0 : index
    %c0_447 = arith.constant 0 : index
    %471 = arith.index_cast %308 : i32 to index
    %c1_448 = arith.constant 1 : index
    %472 = vector.load %arg4[%c0_446, %c0_447, %471, %c1_448] : memref<1x6x28x7xf32, #tpu.memory_space<vmem>>, vector<1x1x8x5xf32>
    %473 = vector.shape_cast %472 : vector<1x1x8x5xf32> to vector<8x5xf32>
    %c0_449 = arith.constant 0 : index
    %c0_450 = arith.constant 0 : index
    %474 = arith.index_cast %308 : i32 to index
    %c1_451 = arith.constant 1 : index
    %475 = vector.load %arg5[%c0_449, %c0_450, %474, %c1_451] : memref<1x6x28x7xf32, #tpu.memory_space<vmem>>, vector<1x1x8x5xf32>
    %476 = vector.shape_cast %475 : vector<1x1x8x5xf32> to vector<8x5xf32>
    %c0_452 = arith.constant 0 : index
    %c0_453 = arith.constant 0 : index
    %477 = arith.index_cast %308 : i32 to index
    %c2_454 = arith.constant 2 : index
    %478 = vector.load %arg2[%c0_452, %c0_453, %477, %c2_454] : memref<1x6x28x7xf32, #tpu.memory_space<vmem>>, vector<1x1x8x5xf32>
    %479 = vector.shape_cast %478 : vector<1x1x8x5xf32> to vector<8x5xf32>
    %c0_455 = arith.constant 0 : index
    %c0_456 = arith.constant 0 : index
    %480 = arith.index_cast %308 : i32 to index
    %c2_457 = arith.constant 2 : index
    %481 = vector.load %arg3[%c0_455, %c0_456, %480, %c2_457] : memref<1x6x28x7xf32, #tpu.memory_space<vmem>>, vector<1x1x8x5xf32>
    %482 = vector.shape_cast %481 : vector<1x1x8x5xf32> to vector<8x5xf32>
    %c0_458 = arith.constant 0 : index
    %c1_459 = arith.constant 1 : index
    %483 = arith.index_cast %308 : i32 to index
    %c0_460 = arith.constant 0 : index
    %484 = vector.load %arg4[%c0_458, %c1_459, %483, %c0_460] : memref<1x6x28x7xf32, #tpu.memory_space<vmem>>, vector<1x1x8x5xf32>
    %485 = vector.shape_cast %484 : vector<1x1x8x5xf32> to vector<8x5xf32>
    %c0_461 = arith.constant 0 : index
    %c1_462 = arith.constant 1 : index
    %486 = arith.index_cast %308 : i32 to index
    %c0_463 = arith.constant 0 : index
    %487 = vector.load %arg5[%c0_461, %c1_462, %486, %c0_463] : memref<1x6x28x7xf32, #tpu.memory_space<vmem>>, vector<1x1x8x5xf32>
    %488 = vector.shape_cast %487 : vector<1x1x8x5xf32> to vector<8x5xf32>
    %c0_464 = arith.constant 0 : index
    %c1_465 = arith.constant 1 : index
    %489 = arith.index_cast %308 : i32 to index
    %c1_466 = arith.constant 1 : index
    %490 = vector.load %arg2[%c0_464, %c1_465, %489, %c1_466] : memref<1x6x28x7xf32, #tpu.memory_space<vmem>>, vector<1x1x8x5xf32>
    %491 = vector.shape_cast %490 : vector<1x1x8x5xf32> to vector<8x5xf32>
    %c0_467 = arith.constant 0 : index
    %c1_468 = arith.constant 1 : index
    %492 = arith.index_cast %308 : i32 to index
    %c1_469 = arith.constant 1 : index
    %493 = vector.load %arg3[%c0_467, %c1_468, %492, %c1_469] : memref<1x6x28x7xf32, #tpu.memory_space<vmem>>, vector<1x1x8x5xf32>
    %494 = vector.shape_cast %493 : vector<1x1x8x5xf32> to vector<8x5xf32>
    %c0_470 = arith.constant 0 : index
    %c1_471 = arith.constant 1 : index
    %495 = arith.index_cast %308 : i32 to index
    %c1_472 = arith.constant 1 : index
    %496 = vector.load %arg4[%c0_470, %c1_471, %495, %c1_472] : memref<1x6x28x7xf32, #tpu.memory_space<vmem>>, vector<1x1x8x5xf32>
    %497 = vector.shape_cast %496 : vector<1x1x8x5xf32> to vector<8x5xf32>
    %c0_473 = arith.constant 0 : index
    %c1_474 = arith.constant 1 : index
    %498 = arith.index_cast %308 : i32 to index
    %c1_475 = arith.constant 1 : index
    %499 = vector.load %arg5[%c0_473, %c1_474, %498, %c1_475] : memref<1x6x28x7xf32, #tpu.memory_space<vmem>>, vector<1x1x8x5xf32>
    %500 = vector.shape_cast %499 : vector<1x1x8x5xf32> to vector<8x5xf32>
    %c0_476 = arith.constant 0 : index
    %c1_477 = arith.constant 1 : index
    %501 = arith.index_cast %308 : i32 to index
    %c2_478 = arith.constant 2 : index
    %502 = vector.load %arg2[%c0_476, %c1_477, %501, %c2_478] : memref<1x6x28x7xf32, #tpu.memory_space<vmem>>, vector<1x1x8x5xf32>
    %503 = vector.shape_cast %502 : vector<1x1x8x5xf32> to vector<8x5xf32>
    %c0_479 = arith.constant 0 : index
    %c1_480 = arith.constant 1 : index
    %504 = arith.index_cast %308 : i32 to index
    %c2_481 = arith.constant 2 : index
    %505 = vector.load %arg3[%c0_479, %c1_480, %504, %c2_481] : memref<1x6x28x7xf32, #tpu.memory_space<vmem>>, vector<1x1x8x5xf32>
    %506 = vector.shape_cast %505 : vector<1x1x8x5xf32> to vector<8x5xf32>
    %c0_482 = arith.constant 0 : index
    %c2_483 = arith.constant 2 : index
    %507 = arith.index_cast %308 : i32 to index
    %c0_484 = arith.constant 0 : index
    %508 = vector.load %arg4[%c0_482, %c2_483, %507, %c0_484] : memref<1x6x28x7xf32, #tpu.memory_space<vmem>>, vector<1x1x8x5xf32>
    %509 = vector.shape_cast %508 : vector<1x1x8x5xf32> to vector<8x5xf32>
    %c0_485 = arith.constant 0 : index
    %c2_486 = arith.constant 2 : index
    %510 = arith.index_cast %308 : i32 to index
    %c0_487 = arith.constant 0 : index
    %511 = vector.load %arg5[%c0_485, %c2_486, %510, %c0_487] : memref<1x6x28x7xf32, #tpu.memory_space<vmem>>, vector<1x1x8x5xf32>
    %512 = vector.shape_cast %511 : vector<1x1x8x5xf32> to vector<8x5xf32>
    %c0_488 = arith.constant 0 : index
    %c2_489 = arith.constant 2 : index
    %513 = arith.index_cast %308 : i32 to index
    %c1_490 = arith.constant 1 : index
    %514 = vector.load %arg2[%c0_488, %c2_489, %513, %c1_490] : memref<1x6x28x7xf32, #tpu.memory_space<vmem>>, vector<1x1x8x5xf32>
    %515 = vector.shape_cast %514 : vector<1x1x8x5xf32> to vector<8x5xf32>
    %c0_491 = arith.constant 0 : index
    %c2_492 = arith.constant 2 : index
    %516 = arith.index_cast %308 : i32 to index
    %c1_493 = arith.constant 1 : index
    %517 = vector.load %arg3[%c0_491, %c2_492, %516, %c1_493] : memref<1x6x28x7xf32, #tpu.memory_space<vmem>>, vector<1x1x8x5xf32>
    %518 = vector.shape_cast %517 : vector<1x1x8x5xf32> to vector<8x5xf32>
    %c0_494 = arith.constant 0 : index
    %c2_495 = arith.constant 2 : index
    %519 = arith.index_cast %308 : i32 to index
    %c1_496 = arith.constant 1 : index
    %520 = vector.load %arg4[%c0_494, %c2_495, %519, %c1_496] : memref<1x6x28x7xf32, #tpu.memory_space<vmem>>, vector<1x1x8x5xf32>
    %521 = vector.shape_cast %520 : vector<1x1x8x5xf32> to vector<8x5xf32>
    %c0_497 = arith.constant 0 : index
    %c2_498 = arith.constant 2 : index
    %522 = arith.index_cast %308 : i32 to index
    %c1_499 = arith.constant 1 : index
    %523 = vector.load %arg5[%c0_497, %c2_498, %522, %c1_499] : memref<1x6x28x7xf32, #tpu.memory_space<vmem>>, vector<1x1x8x5xf32>
    %524 = vector.shape_cast %523 : vector<1x1x8x5xf32> to vector<8x5xf32>
    %c0_500 = arith.constant 0 : index
    %c2_501 = arith.constant 2 : index
    %525 = arith.index_cast %308 : i32 to index
    %c2_502 = arith.constant 2 : index
    %526 = vector.load %arg2[%c0_500, %c2_501, %525, %c2_502] : memref<1x6x28x7xf32, #tpu.memory_space<vmem>>, vector<1x1x8x5xf32>
    %527 = vector.shape_cast %526 : vector<1x1x8x5xf32> to vector<8x5xf32>
    %c0_503 = arith.constant 0 : index
    %c2_504 = arith.constant 2 : index
    %528 = arith.index_cast %308 : i32 to index
    %c2_505 = arith.constant 2 : index
    %529 = vector.load %arg3[%c0_503, %c2_504, %528, %c2_505] : memref<1x6x28x7xf32, #tpu.memory_space<vmem>>, vector<1x1x8x5xf32>
    %530 = vector.shape_cast %529 : vector<1x1x8x5xf32> to vector<8x5xf32>
    %c0_506 = arith.constant 0 : index
    %c3_507 = arith.constant 3 : index
    %531 = arith.index_cast %308 : i32 to index
    %c0_508 = arith.constant 0 : index
    %532 = vector.load %arg4[%c0_506, %c3_507, %531, %c0_508] : memref<1x6x28x7xf32, #tpu.memory_space<vmem>>, vector<1x1x8x5xf32>
    %533 = vector.shape_cast %532 : vector<1x1x8x5xf32> to vector<8x5xf32>
    %c0_509 = arith.constant 0 : index
    %c3_510 = arith.constant 3 : index
    %534 = arith.index_cast %308 : i32 to index
    %c0_511 = arith.constant 0 : index
    %535 = vector.load %arg5[%c0_509, %c3_510, %534, %c0_511] : memref<1x6x28x7xf32, #tpu.memory_space<vmem>>, vector<1x1x8x5xf32>
    %536 = vector.shape_cast %535 : vector<1x1x8x5xf32> to vector<8x5xf32>
    %c0_512 = arith.constant 0 : index
    %c3_513 = arith.constant 3 : index
    %537 = arith.index_cast %308 : i32 to index
    %c1_514 = arith.constant 1 : index
    %538 = vector.load %arg2[%c0_512, %c3_513, %537, %c1_514] : memref<1x6x28x7xf32, #tpu.memory_space<vmem>>, vector<1x1x8x5xf32>
    %539 = vector.shape_cast %538 : vector<1x1x8x5xf32> to vector<8x5xf32>
    %c0_515 = arith.constant 0 : index
    %c3_516 = arith.constant 3 : index
    %540 = arith.index_cast %308 : i32 to index
    %c1_517 = arith.constant 1 : index
    %541 = vector.load %arg3[%c0_515, %c3_516, %540, %c1_517] : memref<1x6x28x7xf32, #tpu.memory_space<vmem>>, vector<1x1x8x5xf32>
    %542 = vector.shape_cast %541 : vector<1x1x8x5xf32> to vector<8x5xf32>
    %c0_518 = arith.constant 0 : index
    %c3_519 = arith.constant 3 : index
    %543 = arith.index_cast %308 : i32 to index
    %c1_520 = arith.constant 1 : index
    %544 = vector.load %arg4[%c0_518, %c3_519, %543, %c1_520] : memref<1x6x28x7xf32, #tpu.memory_space<vmem>>, vector<1x1x8x5xf32>
    %545 = vector.shape_cast %544 : vector<1x1x8x5xf32> to vector<8x5xf32>
    %c0_521 = arith.constant 0 : index
    %c3_522 = arith.constant 3 : index
    %546 = arith.index_cast %308 : i32 to index
    %c1_523 = arith.constant 1 : index
    %547 = vector.load %arg5[%c0_521, %c3_522, %546, %c1_523] : memref<1x6x28x7xf32, #tpu.memory_space<vmem>>, vector<1x1x8x5xf32>
    %548 = vector.shape_cast %547 : vector<1x1x8x5xf32> to vector<8x5xf32>
    %c0_524 = arith.constant 0 : index
    %c3_525 = arith.constant 3 : index
    %549 = arith.index_cast %308 : i32 to index
    %c2_526 = arith.constant 2 : index
    %550 = vector.load %arg2[%c0_524, %c3_525, %549, %c2_526] : memref<1x6x28x7xf32, #tpu.memory_space<vmem>>, vector<1x1x8x5xf32>
    %551 = vector.shape_cast %550 : vector<1x1x8x5xf32> to vector<8x5xf32>
    %c0_527 = arith.constant 0 : index
    %c3_528 = arith.constant 3 : index
    %552 = arith.index_cast %308 : i32 to index
    %c2_529 = arith.constant 2 : index
    %553 = vector.load %arg3[%c0_527, %c3_528, %552, %c2_529] : memref<1x6x28x7xf32, #tpu.memory_space<vmem>>, vector<1x1x8x5xf32>
    %554 = vector.shape_cast %553 : vector<1x1x8x5xf32> to vector<8x5xf32>
    %c0_530 = arith.constant 0 : index
    %c4_531 = arith.constant 4 : index
    %555 = arith.index_cast %308 : i32 to index
    %c0_532 = arith.constant 0 : index
    %556 = vector.load %arg4[%c0_530, %c4_531, %555, %c0_532] : memref<1x6x28x7xf32, #tpu.memory_space<vmem>>, vector<1x1x8x5xf32>
    %557 = vector.shape_cast %556 : vector<1x1x8x5xf32> to vector<8x5xf32>
    %c0_533 = arith.constant 0 : index
    %c4_534 = arith.constant 4 : index
    %558 = arith.index_cast %308 : i32 to index
    %c0_535 = arith.constant 0 : index
    %559 = vector.load %arg5[%c0_533, %c4_534, %558, %c0_535] : memref<1x6x28x7xf32, #tpu.memory_space<vmem>>, vector<1x1x8x5xf32>
    %560 = vector.shape_cast %559 : vector<1x1x8x5xf32> to vector<8x5xf32>
    %c0_536 = arith.constant 0 : index
    %c4_537 = arith.constant 4 : index
    %561 = arith.index_cast %308 : i32 to index
    %c1_538 = arith.constant 1 : index
    %562 = vector.load %arg2[%c0_536, %c4_537, %561, %c1_538] : memref<1x6x28x7xf32, #tpu.memory_space<vmem>>, vector<1x1x8x5xf32>
    %563 = vector.shape_cast %562 : vector<1x1x8x5xf32> to vector<8x5xf32>
    %c0_539 = arith.constant 0 : index
    %c4_540 = arith.constant 4 : index
    %564 = arith.index_cast %308 : i32 to index
    %c1_541 = arith.constant 1 : index
    %565 = vector.load %arg3[%c0_539, %c4_540, %564, %c1_541] : memref<1x6x28x7xf32, #tpu.memory_space<vmem>>, vector<1x1x8x5xf32>
    %566 = vector.shape_cast %565 : vector<1x1x8x5xf32> to vector<8x5xf32>
    %c0_542 = arith.constant 0 : index
    %c4_543 = arith.constant 4 : index
    %567 = arith.index_cast %308 : i32 to index
    %c1_544 = arith.constant 1 : index
    %568 = vector.load %arg4[%c0_542, %c4_543, %567, %c1_544] : memref<1x6x28x7xf32, #tpu.memory_space<vmem>>, vector<1x1x8x5xf32>
    %569 = vector.shape_cast %568 : vector<1x1x8x5xf32> to vector<8x5xf32>
    %c0_545 = arith.constant 0 : index
    %c4_546 = arith.constant 4 : index
    %570 = arith.index_cast %308 : i32 to index
    %c1_547 = arith.constant 1 : index
    %571 = vector.load %arg5[%c0_545, %c4_546, %570, %c1_547] : memref<1x6x28x7xf32, #tpu.memory_space<vmem>>, vector<1x1x8x5xf32>
    %572 = vector.shape_cast %571 : vector<1x1x8x5xf32> to vector<8x5xf32>
    %c0_548 = arith.constant 0 : index
    %c4_549 = arith.constant 4 : index
    %573 = arith.index_cast %308 : i32 to index
    %c2_550 = arith.constant 2 : index
    %574 = vector.load %arg2[%c0_548, %c4_549, %573, %c2_550] : memref<1x6x28x7xf32, #tpu.memory_space<vmem>>, vector<1x1x8x5xf32>
    %575 = vector.shape_cast %574 : vector<1x1x8x5xf32> to vector<8x5xf32>
    %c0_551 = arith.constant 0 : index
    %c4_552 = arith.constant 4 : index
    %576 = arith.index_cast %308 : i32 to index
    %c2_553 = arith.constant 2 : index
    %577 = vector.load %arg3[%c0_551, %c4_552, %576, %c2_553] : memref<1x6x28x7xf32, #tpu.memory_space<vmem>>, vector<1x1x8x5xf32>
    %578 = vector.shape_cast %577 : vector<1x1x8x5xf32> to vector<8x5xf32>
    %c0_554 = arith.constant 0 : index
    %c5_555 = arith.constant 5 : index
    %579 = arith.index_cast %308 : i32 to index
    %c0_556 = arith.constant 0 : index
    %580 = vector.load %arg4[%c0_554, %c5_555, %579, %c0_556] : memref<1x6x28x7xf32, #tpu.memory_space<vmem>>, vector<1x1x8x5xf32>
    %581 = vector.shape_cast %580 : vector<1x1x8x5xf32> to vector<8x5xf32>
    %c0_557 = arith.constant 0 : index
    %c5_558 = arith.constant 5 : index
    %582 = arith.index_cast %308 : i32 to index
    %c0_559 = arith.constant 0 : index
    %583 = vector.load %arg5[%c0_557, %c5_558, %582, %c0_559] : memref<1x6x28x7xf32, #tpu.memory_space<vmem>>, vector<1x1x8x5xf32>
    %584 = vector.shape_cast %583 : vector<1x1x8x5xf32> to vector<8x5xf32>
    %c0_560 = arith.constant 0 : index
    %c5_561 = arith.constant 5 : index
    %585 = arith.index_cast %308 : i32 to index
    %c1_562 = arith.constant 1 : index
    %586 = vector.load %arg2[%c0_560, %c5_561, %585, %c1_562] : memref<1x6x28x7xf32, #tpu.memory_space<vmem>>, vector<1x1x8x5xf32>
    %587 = vector.shape_cast %586 : vector<1x1x8x5xf32> to vector<8x5xf32>
    %c0_563 = arith.constant 0 : index
    %c5_564 = arith.constant 5 : index
    %588 = arith.index_cast %308 : i32 to index
    %c1_565 = arith.constant 1 : index
    %589 = vector.load %arg3[%c0_563, %c5_564, %588, %c1_565] : memref<1x6x28x7xf32, #tpu.memory_space<vmem>>, vector<1x1x8x5xf32>
    %590 = vector.shape_cast %589 : vector<1x1x8x5xf32> to vector<8x5xf32>
    %c0_566 = arith.constant 0 : index
    %c5_567 = arith.constant 5 : index
    %591 = arith.index_cast %308 : i32 to index
    %c1_568 = arith.constant 1 : index
    %592 = vector.load %arg4[%c0_566, %c5_567, %591, %c1_568] : memref<1x6x28x7xf32, #tpu.memory_space<vmem>>, vector<1x1x8x5xf32>
    %593 = vector.shape_cast %592 : vector<1x1x8x5xf32> to vector<8x5xf32>
    %c0_569 = arith.constant 0 : index
    %c5_570 = arith.constant 5 : index
    %594 = arith.index_cast %308 : i32 to index
    %c1_571 = arith.constant 1 : index
    %595 = vector.load %arg5[%c0_569, %c5_570, %594, %c1_571] : memref<1x6x28x7xf32, #tpu.memory_space<vmem>>, vector<1x1x8x5xf32>
    %596 = vector.shape_cast %595 : vector<1x1x8x5xf32> to vector<8x5xf32>
    %c0_572 = arith.constant 0 : index
    %c5_573 = arith.constant 5 : index
    %597 = arith.index_cast %308 : i32 to index
    %c2_574 = arith.constant 2 : index
    %598 = vector.load %arg2[%c0_572, %c5_573, %597, %c2_574] : memref<1x6x28x7xf32, #tpu.memory_space<vmem>>, vector<1x1x8x5xf32>
    %599 = vector.shape_cast %598 : vector<1x1x8x5xf32> to vector<8x5xf32>
    %c0_575 = arith.constant 0 : index
    %c5_576 = arith.constant 5 : index
    %600 = arith.index_cast %308 : i32 to index
    %c2_577 = arith.constant 2 : index
    %601 = vector.load %arg3[%c0_575, %c5_576, %600, %c2_577] : memref<1x6x28x7xf32, #tpu.memory_space<vmem>>, vector<1x1x8x5xf32>
    %602 = vector.shape_cast %601 : vector<1x1x8x5xf32> to vector<8x5xf32>
    %603 = tpu.concatenate %461, %464, %467, %470, %473, %476, %479, %482, %485, %488, %491, %494, %497, %500, %503, %506 in 0 : vector<8x5xf32>, vector<8x5xf32>, vector<8x5xf32>, vector<8x5xf32>, vector<8x5xf32>, vector<8x5xf32>, vector<8x5xf32>, vector<8x5xf32>, vector<8x5xf32>, vector<8x5xf32>, vector<8x5xf32>, vector<8x5xf32>, vector<8x5xf32>, vector<8x5xf32>, vector<8x5xf32>, vector<8x5xf32> -> vector<128x5xf32>
    %604 = tpu.concatenate %509, %512, %515, %518, %521, %524, %527, %530, %533, %536, %539, %542, %545, %548, %551, %554 in 0 : vector<8x5xf32>, vector<8x5xf32>, vector<8x5xf32>, vector<8x5xf32>, vector<8x5xf32>, vector<8x5xf32>, vector<8x5xf32>, vector<8x5xf32>, vector<8x5xf32>, vector<8x5xf32>, vector<8x5xf32>, vector<8x5xf32>, vector<8x5xf32>, vector<8x5xf32>, vector<8x5xf32>, vector<8x5xf32> -> vector<128x5xf32>
    %605 = tpu.concatenate %557, %560, %563, %566, %569, %572, %575, %578, %581, %584, %587, %590, %593, %596, %599, %602 in 0 : vector<8x5xf32>, vector<8x5xf32>, vector<8x5xf32>, vector<8x5xf32>, vector<8x5xf32>, vector<8x5xf32>, vector<8x5xf32>, vector<8x5xf32>, vector<8x5xf32>, vector<8x5xf32>, vector<8x5xf32>, vector<8x5xf32>, vector<8x5xf32>, vector<8x5xf32>, vector<8x5xf32>, vector<8x5xf32> -> vector<128x5xf32>
    %606 = tpu.concatenate %603, %604, %605 in 0 : vector<128x5xf32>, vector<128x5xf32>, vector<128x5xf32> -> vector<384x5xf32>
    %cst_578 = arith.constant dense<0.000000e+00> : vector<16x5xf32>
    %607 = tpu.matmul %0, %606, %cst_578 {dimension_numbers = #tpu.dot_dimension_numbers<[1], [0], [0], [1], [0, 0, 1, 1], [], []>} : vector<16x384xf32>, vector<384x5xf32>, vector<16x5xf32> -> vector<16x5xf32>
    %608 = arith.maximumf %458, %607 : vector<16x5xf32>
    %609 = vector.broadcast %1 : vector<16x1xf32> to vector<16x5xf32>
    %610 = arith.addf %608, %609 : vector<16x5xf32>
    %cst_579 = arith.constant 0.000000e+00 : f32
    %611 = vector.broadcast %cst_579 : f32 to vector<16x5xf32>
    %612 = arith.cmpf oge, %610, %611 : vector<16x5xf32>
    %cst_580 = arith.constant 0.00999999977 : f32
    %613 = vector.broadcast %cst_580 : f32 to vector<16x5xf32>
    %614 = arith.mulf %613, %610 : vector<16x5xf32>
    %615 = arith.select %612, %610, %614 : vector<16x5xi1>, vector<16x5xf32>
    %c0_581 = arith.constant 0 : index
    %c0_582 = arith.constant 0 : index
    %c0_583 = arith.constant 0 : index
    %c0_584 = arith.constant 0 : index
    %616 = vector.load %arg8[%c0_581, %c0_582, %c0_583, %c0_584] : memref<1x1x16x5xf32, #tpu.memory_space<vmem>>, vector<1x1x16x5xf32>
    %617 = vector.shape_cast %616 : vector<1x1x16x5xf32> to vector<16x5xf32>
    %618 = vector.shape_cast %615 : vector<16x5xf32> to vector<1x1x16x5xf32>
    tpu.vector_store %arg8[%c0_581, %c0_582, %c0_583, %c0_584], %618 {strides = array<i32>} : memref<1x1x16x5xf32, #tpu.memory_space<vmem>>, vector<1x1x16x5xf32>,
    return
  }
  func.func @transform_0(%arg0: i32, %arg1: i32) -> (i32, i32, i32, i32) {
    %c0_i32 = arith.constant 0 : i32
    %c0_i32_0 = arith.constant 0 : i32
    %c0_i32_1 = arith.constant 0 : i32
    %c0_i32_2 = arith.constant 0 : i32
    return %arg0, %c0_i32, %c0_i32_0, %c0_i32_1 : i32, i32, i32, i32
  }
  func.func @transform_1(%arg0: i32, %arg1: i32) -> (i32, i32, i32, i32) {
    %c0_i32 = arith.constant 0 : i32
    %c0_i32_0 = arith.constant 0 : i32
    %c0_i32_1 = arith.constant 0 : i32
    %c0_i32_2 = arith.constant 0 : i32
    return %arg0, %c0_i32, %c0_i32_0, %c0_i32_1 : i32, i32, i32, i32
  }
  func.func @transform_2(%arg0: i32, %arg1: i32) -> (i32, i32, i32, i32) {
    %c0_i32 = arith.constant 0 : i32
    %c0_i32_0 = arith.constant 0 : i32
    %c0_i32_1 = arith.constant 0 : i32
    %c0_i32_2 = arith.constant 0 : i32
    return %arg0, %c0_i32, %c0_i32_0, %c0_i32_1 : i32, i32, i32, i32
  }
  func.func @transform_3(%arg0: i32, %arg1: i32) -> (i32, i32, i32, i32) {
    %c0_i32 = arith.constant 0 : i32
    %c0_i32_0 = arith.constant 0 : i32
    %c0_i32_1 = arith.constant 0 : i32
    %c0_i32_2 = arith.constant 0 : i32
    return %arg0, %c0_i32, %c0_i32_0, %c0_i32_1 : i32, i32, i32, i32
  }
  func.func @transform_4(%arg0: i32, %arg1: i32) -> (i32, i32) {
    %c0_i32 = arith.constant 0 : i32
    %c0_i32_0 = arith.constant 0 : i32
    %c0_i32_1 = arith.constant 0 : i32
    return %c0_i32, %c0_i32_0 : i32, i32
  }
  func.func @transform_5(%arg0: i32, %arg1: i32) -> (i32, i32) {
    %c0_i32 = arith.constant 0 : i32
    %c0_i32_0 = arith.constant 0 : i32
    %c0_i32_1 = arith.constant 0 : i32
    return %c0_i32, %c0_i32_0 : i32, i32
  }
  func.func @transform_6(%arg0: i32, %arg1: i32) -> (i32, i32, i32, i32) {
    %c0_i32 = arith.constant 0 : i32
    %c0_i32_0 = arith.constant 0 : i32
    %c0_i32_1 = arith.constant 0 : i32
    return %arg0, %arg1, %c0_i32, %c0_i32_0 : i32, i32, i32, i32
  }
}

</mosaic_0001>

<bundles_post_ra>
// kernel: classifyer_cnn_forward.5
= control target key start
LH: loop header
LB: loop body
LE: loop exit
PB: predicated region body
PF: predicated region fallthrough
CT: control target
= control target key end

     0   :  { %v736_v4 = vmov 0.0|0.0   ;;  %v737_v26 = vmov 1983009808   ;;  %v90_v28 = vlaneseq  ;;  %vm106_vm0 = vcmask 130048   ;;  %s1076_s0 = inlined_call_operand.vmem [shape: f32[2,400], index: 0, kind: input, shape index: {}]   ;;  %s1077_s1 = inlined_call_operand.vmem [shape: f32[400,128], index: 1, kind: input, shape index: {}]   ;;  %s1078_s2 = inlined_call_operand.vmem [shape: f32[1,128], index: 2, kind: input, shape index: {}]   ;;  %s1079_s3 = inlined_call_operand.vmem [shape: f32[128,128], index: 3, kind: input, shape index: {}]   ;;  %s1080_s4 = inlined_call_operand.vmem [shape: f32[1,128], index: 4, kind: input, shape index: {}]   ;;  %s1081_s5 = inlined_call_operand.vmem [shape: f32[128,128], index: 5, kind: input, shape index: {}]   ;;  %s1082_s6 = inlined_call_operand.vmem [shape: f32[1,128], index: 6, kind: input, shape index: {}]   ;;  %s1083_s7 = inlined_call_operand.hbm [shape: f32[2,128], index: 7, kind: output, shape index: {}]  }
   0x1   :  { %v44_v0 = vld [vmem:[%s1077_s1 + $0x80] sm:$0xff]  ;;  %v45_v1 = vld [vmem:[%s1077_s1 + $0x88] sm:$0xff]  ;;  %631 = vmatprep.subr.bf16.mxu1 %v736_v4  ;;  %v46_v10 = vld [vmem:[%s1077_s1 + $0x90] sm:$0xff]  ;;  %v88_v27 = vunpack.c.l.s4 %v737_v26 }
   0x2   :  { %v28_v2 = vld [vmem:[%s1077_s1] sm:$0xff]  ;;  %v599_v3 = vpack.c.bf16 %v45_v1, %v44_v0  ;;  %v29_v5 = vld [vmem:[%s1077_s1 + $0x8] sm:$0xff]  ;;  %v47_v11 = vld [vmem:[%s1077_s1 + $0x98] sm:$0xff]  ;;  %v91_v39 = vshrl.u32 %v90_v28, 7 }
   0x3   :  { %v60_v6 = vld [vmem:[%s1077_s1 + $0x100] sm:$0xff]  ;;  %v61_v7 = vld [vmem:[%s1077_s1 + $0x108] sm:$0xff]  ;;  %v601_v8 = vpack.c.bf16 %v29_v5, %v28_v2  ;;  %v30_v12 = vld [vmem:[%s1077_s1 + $0x10] sm:$0xff]  ;;  %v603_v13 = vpack.c.bf16 %v47_v11, %v46_v10  ;;  %v89_v38 = vunpack.c.0.s8 %v88_v27 }
   0x4   :  { %v632_v9 = vpack.c.bf16 %v61_v7, %v60_v6  ;;  %600 = vmatprep.subr.bf16.mxu0 %v599_v3  ;;  %v31_v14 = vld [vmem:[%s1077_s1 + $0x18] sm:$0xff]  ;;  %v62_v15 = vld [vmem:[%s1077_s1 + $0x110] sm:$0xff]  ;;  %v48_v19 = vld [vmem:[%s1077_s1 + $0xa0] sm:$0xff] }
   0x5   :  { %v63_v16 = vld [vmem:[%s1077_s1 + $0x118] sm:$0xff]  ;;  %602 = vmatpush3.bf16.msra.mxu0 %v601_v8  ;;  %v605_v17 = vpack.c.bf16 %v31_v14, %v30_v12  ;;  %v49_v20 = vld [vmem:[%s1077_s1 + $0xa8] sm:$0xff]  ;;  %v32_v21 = vld [vmem:[%s1077_s1 + $0x20] sm:$0xff]  ;;  %v92_v49 = vsub.s32 %v89_v38, %v91_v39 }
   0x6   :  { %633 = vmatpush1.bf16.msra.mxu1 %v632_v9  ;;  %v635_v18 = vpack.c.bf16 %v63_v16, %v62_v15  ;;  %604 = vmatprep.subr.bf16.mxu0 %v603_v13  ;;  %v607_v22 = vpack.c.bf16 %v49_v20, %v48_v19  ;;  %v33_v23 = vld [vmem:[%s1077_s1 + $0x28] sm:$0xff]  ;;  %v64_v24 = vld [vmem:[%s1077_s1 + $0x120] sm:$0xff]  ;;  %v50_v29 = vld [vmem:[%s1077_s1 + $0xb0] sm:$0xff] }
   0x7   :  { %634 = vmatprep.subr.bf16.mxu1 %v736_v4  ;;  %v65_v25 = vld [vmem:[%s1077_s1 + $0x128] sm:$0xff]  ;;  %v51_v30 = vld [vmem:[%s1077_s1 + $0xb8] sm:$0xff]  ;;  %v609_v31 = vpack.c.bf16 %v33_v23, %v32_v21  ;;  %v34_v33 = vld [vmem:[%s1077_s1 + $0x30] sm:$0xff] }
   0x8   :  { %v638_v32 = vpack.c.bf16 %v65_v25, %v64_v24  ;;  %v611_v34 = vpack.c.bf16 %v51_v30, %v50_v29  ;;  %v35_v35 = vld [vmem:[%s1077_s1 + $0x38] sm:$0xff]  ;;  %v66_v36 = vld [vmem:[%s1077_s1 + $0x130] sm:$0xff]  ;;  %v52_v40 = vld [vmem:[%s1077_s1 + $0xc0] sm:$0xff] }
   0x9   :  { %606 = vmatpush3.bf16.msra.mxu0 %v605_v17  ;;  %v67_v37 = vld [vmem:[%s1077_s1 + $0x138] sm:$0xff]  ;;  %v53_v41 = vld [vmem:[%s1077_s1 + $0xc8] sm:$0xff]  ;;  %v613_v42 = vpack.c.bf16 %v35_v35, %v34_v33  ;;  %v36_v44 = vld [vmem:[%s1077_s1 + $0x40] sm:$0xff] }
   0xa   :  { %636 = vmatpush1.bf16.msra.mxu1 %v635_v18  ;;  %608 = vmatprep.subr.bf16.mxu0 %v607_v22  ;;  %v641_v43 = vpack.c.bf16 %v67_v37, %v66_v36  ;;  %v615_v45 = vpack.c.bf16 %v53_v41, %v52_v40  ;;  %v37_v46 = vld [vmem:[%s1077_s1 + $0x48] sm:$0xff]  ;;  %v68_v47 = vld [vmem:[%s1077_s1 + $0x140] sm:$0xff]  ;;  %v54_v50 = vld [vmem:[%s1077_s1 + $0xd0] sm:$0xff] }
   0xb   :  { %637 = vmatprep.subr.bf16.mxu1 %v736_v4  ;;  %v69_v48 = vld [vmem:[%s1077_s1 + $0x148] sm:$0xff]  ;;  %v55_v51 = vld [vmem:[%s1077_s1 + $0xd8] sm:$0xff]  ;;  %v617_v52 = vpack.c.bf16 %v37_v46, %v36_v44  ;;  %v38_v54 = vld [vmem:[%s1077_s1 + $0x50] sm:$0xff] }
   0xc   :  { %v644_v53 = vpack.c.bf16 %v69_v48, %v68_v47  ;;  %v27_v55 = vld [vmem:[%s1076_s0] sm:$0xff]  ;;  %v619_v56 = vpack.c.bf16 %v55_v51, %v54_v50  ;;  %v39_v57 = vld [vmem:[%s1077_s1 + $0x58] sm:$0xff]  ;;  %v70_v58 = vld [vmem:[%s1077_s1 + $0x150] sm:$0xff] }
   0xd   :  { %610 = vmatpush3.bf16.msra.mxu0 %v609_v31  ;;  %v71_v59 = vld [vmem:[%s1077_s1 + $0x158] sm:$0xff]  ;;  %v86_v60 = vcombine.high %v27_v55, %v27_v55  ;;  %v93_v61 = vrot.slane %v27_v55, %v92_v49  ;;  %v56_v62 = vld [vmem:[%s1077_s1 + $0xe0] sm:$0xff]  ;;  %v57_v63 = vld [vmem:[%s1077_s1 + $0xe8] sm:$0xff]  ;;  %v621_v2 = vpack.c.bf16 %v39_v57, %v38_v54 }
   0xe   :  { %639 = vmatpush1.bf16.msra.mxu1 %v638_v32  ;;  %612 = vmatprep.subr.bf16.mxu0 %v611_v34  ;;  %v647_v3 = vpack.c.bf16 %v71_v59, %v70_v58  ;;  %v40_v5 = vld [vmem:[%s1077_s1 + $0x60] sm:$0xff] }
   0xf   :  { %640 = vmatprep.subr.bf16.mxu1 %v736_v4  ;;  %v101_v0 = vcombine.high %v93_v61, %v93_v61  ;;  %v100_v1 = vrot.slane %v86_v60, %v92_v49 }
  0x11   :  { %614 = vmatpush3.bf16.msra.mxu0 %v613_v42 }
  0x12   :  { %642 = vmatpush1.bf16.msra.mxu1 %v641_v43  ;;  %616 = vmatprep.subr.bf16.mxu0 %v615_v45 }
  0x13   :  { %643 = vmatprep.subr.bf16.mxu1 %v736_v4 }
  0x15   :  { %618 = vmatpush3.bf16.msra.mxu0 %v617_v52 }
  0x16   :  { %645 = vmatpush1.bf16.msra.mxu1 %v644_v53 }
  0x17   :  { %12 = vsyncpa [#allocation3], 0  ;;  %620 = vmatprep.subr.bf16.mxu0 %v619_v56  ;;  %646 = vmatprep.subr.bf16.mxu1 %v736_v4  ;;  %v623_v6 = vpack.c.bf16 %v57_v63, %v56_v62  ;;  %v41_v7 = vld [vmem:[%s1077_s1 + $0x68] sm:$0xff]  ;;  %v72_v8 = vld [vmem:[%s1077_s1 + $0x160] sm:$0xff]  ;;  %v102_v10 = vcombine.high %v100_v1, %v100_v1  ;;  %vm738_vm1 = vmmov 0   ;;  %v739_v49 = vmov 0.0  }
  0x18   :  { %v73_v9 = vld [vmem:[%s1077_s1 + $0x168] sm:$0xff]  ;;  %v58_v11 = vld [vmem:[%s1077_s1 + $0xf0] sm:$0xff]  ;;  %v59_v12 = vld [vmem:[%s1077_s1 + $0xf8] sm:$0xff]  ;;  %173 = vmatprep.mubr.f32.mxu0 %v101_v0  ;;  %v625_v13 = vpack.c.bf16 %v41_v7, %v40_v5  ;;  %s740_s25 = smov [#allocation2]  }
  0x19   :  { %457 = vmatprep.mubr.msk.f32.mxu1 %vm106_vm0, %v102_v10  ;;  %622 = vmatpush3.bf16.msra.mxu0 %v621_v2  ;;  %v650_v14 = vpack.c.bf16 %v73_v9, %v72_v8  ;;  %v42_v15 = vld [vmem:[%s1077_s1 + $0x70] sm:$0xff]  ;;  %v627_v16 = vpack.c.bf16 %v59_v12, %v58_v11  ;;  %v43_v17 = vld [vmem:[%s1077_s1 + $0x78] sm:$0xff]  ;;  %v76_v22 = vld [vmem:[%s1077_s1 + $0x180] sm:$0xff]  ;;  %s448_s26 = sshll.u32 %s740_s25, 4  ;;  %s449_s26 = int_to_ptr.vmem [resolvable:$true] %s448_s26 }
  0x1a   :  { %648 = vmatpush1.bf16.msra.mxu1 %v647_v3  ;;  %624 = vmatprep.subr.bf16.mxu0 %v623_v6  ;;  %v74_v18 = vld [vmem:[%s1077_s1 + $0x170] sm:$0xff]  ;;  %v75_v19 = vld [vmem:[%s1077_s1 + $0x178] sm:$0xff]  ;;  %v629_v20 = vpack.c.bf16 %v43_v17, %v42_v15  ;;  %v77_v23 = vld [vmem:[%s1077_s1 + $0x188] sm:$0xff]  ;;  %p717_p1 = scmp.lt.s32.totalorder %s449_s26, %s449_s26 }
  0x1b   :  { %649 = vmatprep.subr.bf16.mxu1 %v736_v4  ;;  %v653_v21 = vpack.c.bf16 %v75_v19, %v74_v18  ;;  %v252_v24 = vld [vmem:[%s1079_s3] sm:$0xff]  ;;  %v253_v25 = vld [vmem:[%s1079_s3 + $0x8] sm:$0xff]  ;;  %v656_v26 = vpack.c.bf16 %v77_v23, %v76_v22  ;;  %v254_v28 = vld [vmem:[%s1079_s3 + $0x10] sm:$0xff] }
  0x1c   :  { %v659_v27 = vpack.c.bf16 %v253_v25, %v252_v24  ;;  %v255_v29 = vld [vmem:[%s1079_s3 + $0x18] sm:$0xff]  ;;  %v256_v31 = vld [vmem:[%s1079_s3 + $0x20] sm:$0xff]  ;;  %v257_v32 = vld [vmem:[%s1079_s3 + $0x28] sm:$0xff] }
  0x1d   :  { %626 = vmatpush3.bf16.msra.mxu0 %v625_v13  ;;  %v662_v30 = vpack.c.bf16 %v255_v29, %v254_v28  ;;  %v665_v33 = vpack.c.bf16 %v257_v32, %v256_v31  ;;  %v258_v34 = vld [vmem:[%s1079_s3 + $0x30] sm:$0xff]  ;;  %v259_v35 = vld [vmem:[%s1079_s3 + $0x38] sm:$0xff]  ;;  %v260_v37 = vld [vmem:[%s1079_s3 + $0x40] sm:$0xff] }
  0x1e   :  { %651 = vmatpush1.bf16.msra.mxu1 %v650_v14  ;;  %628 = vmatprep.subr.bf16.mxu0 %v627_v16  ;;  %v668_v36 = vpack.c.bf16 %v259_v35, %v258_v34  ;;  %v261_v38 = vld [vmem:[%s1079_s3 + $0x48] sm:$0xff]  ;;  %v262_v40 = vld [vmem:[%s1079_s3 + $0x50] sm:$0xff]  ;;  %v263_v41 = vld [vmem:[%s1079_s3 + $0x58] sm:$0xff] }
  0x1f   :  { %652 = vmatprep.subr.bf16.mxu1 %v736_v4  ;;  %v671_v39 = vpack.c.bf16 %v261_v38, %v260_v37  ;;  %v674_v42 = vpack.c.bf16 %v263_v41, %v262_v40  ;;  %v264_v43 = vld [vmem:[%s1079_s3 + $0x60] sm:$0xff]  ;;  %v265_v44 = vld [vmem:[%s1079_s3 + $0x68] sm:$0xff]  ;;  %v266_v46 = vld [vmem:[%s1079_s3 + $0x70] sm:$0xff] }
  0x20   :  { %v677_v45 = vpack.c.bf16 %v265_v44, %v264_v43  ;;  %v267_v47 = vld [vmem:[%s1079_s3 + $0x78] sm:$0xff]  ;;  %v348_v50 = vld [vmem:[%s1081_s5] sm:$0xff]  ;;  %v349_v51 = vld [vmem:[%s1081_s5 + $0x8] sm:$0xff] }
  0x21   :  { %630 = vmatpush3.bf16.msra.mxu0 %v629_v20  ;;  %v680_v48 = vpack.c.bf16 %v267_v47, %v266_v46  ;;  %v350_v52 = vld [vmem:[%s1081_s5 + $0x10] sm:$0xff]  ;;  %v683_v53 = vpack.c.bf16 %v349_v51, %v348_v50  ;;  %v351_v54 = vld [vmem:[%s1081_s5 + $0x18] sm:$0xff]  ;;  %v352_v56 = vld [vmem:[%s1081_s5 + $0x20] sm:$0xff] }
  0x22   :  { %654 = vmatpush1.bf16.msra.mxu1 %v653_v21  ;;  %658 = vmatprep.subr.bf16.mxu0 %v736_v4  ;;  %v686_v55 = vpack.c.bf16 %v351_v54, %v350_v52  ;;  %v353_v57 = vld [vmem:[%s1081_s5 + $0x28] sm:$0xff]  ;;  %v354_v59 = vld [vmem:[%s1081_s5 + $0x30] sm:$0xff]  ;;  %v355_v60 = vld [vmem:[%s1081_s5 + $0x38] sm:$0xff] }
  0x23   :  { %655 = vmatprep.subr.bf16.mxu1 %v736_v4  ;;  %v689_v58 = vpack.c.bf16 %v353_v57, %v352_v56  ;;  %v356_v62 = vld [vmem:[%s1081_s5 + $0x40] sm:$0xff]  ;;  %v357_v63 = vld [vmem:[%s1081_s5 + $0x48] sm:$0xff]  ;;  %v359_v2 = vld [vmem:[%s1081_s5 + $0x58] sm:$0xff] }
  0x24   :  { %174 = vmatmul.mubr.f32.vlgmr.msra.gmra.mrb[0].mxu0 %v93_v61  ;;  %v692_v61 = vpack.c.bf16 %v355_v60, %v354_v59  ;;  %v695_v0 = vpack.c.bf16 %v357_v63, %v356_v62  ;;  %v360_v5 = vld [vmem:[%s1081_s5 + $0x60] sm:$0xff]  ;;  %v361_v6 = vld [vmem:[%s1081_s5 + $0x68] sm:$0xff]  ;;  %v362_v18 = vld [vmem:[%s1081_s5 + $0x70] sm:$0xff] }
  0x25   :  { %660 = vmatpush3.bf16.msra.mxu0 %v659_v27  ;;  %561 = vmatprep.mubr.msk.f32.mxu0 %vm738_vm1, %v739_v49  ;;  %v701_v7 = vpack.c.bf16 %v361_v6, %v360_v5  ;;  %v456_v10 = vld [vmem:[%s1078_s2] ss:$0 sm:$0xff] }
  0x26   :  { %657 = vmatpush1.bf16.msra.mxu1 %v656_v26  ;;  %661 = vmatprep.subr.bf16.mxu0 %v736_v4  ;;  %v458_v20 = vld [vmem:[%s1080_s4] ss:$0 sm:$0xff] }
  0x27   :  { %682 = vmatprep.subr.bf16.mxu1 %v736_v4  ;;  %v459_v26 = vld [vmem:[%s1082_s6] ss:$0 sm:$0xff] }
  0x29   :  { %244 = vmatmul.mubr.f32.vlgmr.msra.gmra.mrb[0].mxu1 %v100_v1  ;;  %663 = vmatpush3.bf16.msra.mxu0 %v662_v30  ;;  %v358_v1 = vld [vmem:[%s1081_s5 + $0x50] sm:$0xff] }
  0x2a   :  { %664 = vmatprep.subr.bf16.mxu0 %v736_v4  ;;  %596 = vmatprep.mubr.msk.f32.mxu1 %vm738_vm1, %v739_v49  ;;  %v698_v3 = vpack.c.bf16 %v359_v2, %v358_v1 }
  0x2b   :  { %684 = vmatpush3.bf16.msra.mxu1 %v683_v53 }
  0x2c   :  { %685 = vmatprep.subr.bf16.mxu1 %v736_v4 }
  0x2d   :  { %666 = vmatpush3.bf16.msra.mxu0 %v665_v33 }
  0x2e   :  { %667 = vmatprep.subr.bf16.mxu0 %v736_v4 }
  0x2f   :  { %687 = vmatpush3.bf16.msra.mxu1 %v686_v55 }
  0x30   :  { %688 = vmatprep.subr.bf16.mxu1 %v736_v4 }
  0x31   :  { %669 = vmatpush3.bf16.msra.mxu0 %v668_v36 }
  0x32   :  { %670 = vmatprep.subr.bf16.mxu0 %v736_v4 }
  0x33   :  { %690 = vmatpush3.bf16.msra.mxu1 %v689_v58 }
  0x34   :  { %691 = vmatprep.subr.bf16.mxu1 %v736_v4 }
  0x35   :  { %672 = vmatpush3.bf16.msra.mxu0 %v671_v39 }
  0x36   :  { %673 = vmatprep.subr.bf16.mxu0 %v736_v4 }
  0x37   :  { %693 = vmatpush3.bf16.msra.mxu1 %v692_v61 }
  0x38   :  { %694 = vmatprep.subr.bf16.mxu1 %v736_v4 }
  0x39   :  { %675 = vmatpush3.bf16.msra.mxu0 %v674_v42 }
  0x3a   :  { %676 = vmatprep.subr.bf16.mxu0 %v736_v4 }
  0x3b   :  { %696 = vmatpush3.bf16.msra.mxu1 %v695_v0 }
  0x3c   :  { %697 = vmatprep.subr.bf16.mxu1 %v736_v4 }
  0x3d   :  { %678 = vmatpush3.bf16.msra.mxu0 %v677_v45 }
  0x3e   :  { %679 = vmatprep.subr.bf16.mxu0 %v736_v4 }
  0x3f   :  { %699 = vmatpush3.bf16.msra.mxu1 %v698_v3 }
  0x40   :  { %700 = vmatprep.subr.bf16.mxu1 %v736_v4 }
  0x41   :  { %681 = vmatpush3.bf16.msra.mxu0 %v680_v48 }
  0x43   :  { %702 = vmatpush3.bf16.msra.mxu1 %v701_v7 }
  0x44   :  { %703 = vmatprep.subr.bf16.mxu1 %v736_v4  ;;  %v363_v4 = vld [vmem:[%s1081_s5 + $0x78] sm:$0xff]  ;;  %s712_s5 = scalar_lea.vmem %s449_s26, 32 }
  0x45   :  { %v704_v19 = vpack.c.bf16 %v363_v4, %v362_v18  ;;  %p713_p0 = scmp.ne.s32.totalorder %s449_s26, %s712_s5  ;;  %p718_p2 = scmp.lt.s32.totalorder %s712_s5, %s712_s5 }
  0x47   :  { %705 = vmatpush3.bf16.msra.mxu1 %v704_v19  ;;  %p719_p3 = por %p718_p2, %p717_p1 }
  0x49   :  { %p720_p4 = pnand %p719_p3, %p713_p0 }
  0xf7   :  { %v492_v8 = vpop.f32.mrb[0].mxu0 }
  0xf8   :  { %v493_v9 = vpop.f32.mrb[1].mxu0 }
  0xf9   :  { %v494_v11 = vadd.f32 %v493_v9, %v492_v8 }
  0xfb   :  { %v176_v12 = vadd.f32 %v494_v11, %v456_v10 }
  0xfc   :  { %v245_v13 = vpop.f32.mrb[0].mxu1 }
  0xfd   :  { %v247_v14 = vpop.f32.mrb[1].mxu1  ;;  %v246_v15 = vadd.f32 %v245_v13, %v176_v12 }
  0xff   :  { %vm249_vm2 = vcmp.ge.f32.partialorder %v246_v15, 0.0  ;;  %v250_v16 = vmul.f32 0.01, %v246_v15 }
 0x101   :  { %v251_v17 = vsel %vm249_vm2, %v246_v15, %v250_v16 }
 0x102   :  { %562 = vmatmul.mubr.f32.vlgmr.msra.gmra.mrb[2].mxu0 %v251_v17 }
 0x1d5   :  { %v341_v21 = vpop.f32.mrb[2].mxu0 }
 0x1d6   :  { %v342_v22 = vadd.f32 %v458_v20, %v341_v21  ;;  %v563_v23 = vpop.f32.mrb[3].mxu0 }
 0x1d8   :  { %vm345_vm3 = vcmp.ge.f32.partialorder %v342_v22, 0.0  ;;  %v346_v24 = vmul.f32 0.01, %v342_v22 }
 0x1da   :  { %v347_v25 = vsel %vm345_vm3, %v342_v22, %v346_v24 }
 0x1db   :  { %597 = vmatmul.mubr.f32.vlgmr.msra.gmra.mrb[2].mxu1 %v347_v25 }
 0x2ae   :  { %v437_v27 = vpop.f32.mrb[2].mxu1 }
 0x2af   :  { %v438_v28 = vadd.f32 %v459_v26, %v437_v27  ;;  %v598_v29 = vpop.f32.mrb[3].mxu1 }
 0x2b1   :  { %441 = vst [vmem:[#allocation2] sm:$0x3] %v438_v28 }
 0x2b2   :  { %723 = shalt.err (!%p720_p4)
}
 0x2b3   :  { %s724_s28 = scalar_lea.hbm %s1083_s7, 32 }
 0x2b4   :  { %p725_p5 = scmp.ne.s32.totalorder %s1083_s7, %s724_s28  ;;  %p728_p6 = scmp.lt.u32.totalorder %s724_s28, %s1083_s7 }
 0x2b6   :  { %p730_p7 = pnand %p728_p6, %p725_p5 }
 0x2b8   :  { %733 = shalt.err (!%p730_p7)
}
 0x2b9   :  { %451 = dma.vmem_to_hbm [thread:$0]  %s449_s26, 32, %s1083_s7, [#allocation3]  }
 0x2ba   :  { %734 = dma.done.wait [#allocation3], 32  }
 0x2bb   :  { %735 = vsyncadd [#allocation3], 4294967264 }
 0x2bc   :  { %455 = vsyncpa [#allocation3], 1 }

// kernel: classifyer_cnn_forward.3
= control target key start
LH: loop header
LB: loop body
LE: loop exit
PB: predicated region body
PF: predicated region fallthrough
CT: control target
= control target key end

     0   :  { %s4166_s21 = smov 0   ;;  %s4168_s22 = smov 0   ;;  %s4987_s0 = inlined_call_operand.vmem [shape: f32[2,3,120,30], index: 0, kind: input, shape index: {}]   ;;  %s4988_s1 = inlined_call_operand.vmem [shape: f32[2,3,120,30], index: 1, kind: input, shape index: {}]   ;;  %s4989_s2 = inlined_call_operand.vmem [shape: f32[2,3,120,30], index: 2, kind: input, shape index: {}]   ;;  %s4990_s3 = inlined_call_operand.vmem [shape: f32[2,3,120,30], index: 3, kind: input, shape index: {}]   ;;  %s4991_s4 = inlined_call_operand.vmem [shape: f32[8,192], index: 4, kind: input, shape index: {}]   ;;  %s4992_s5 = inlined_call_operand.vmem [shape: f32[8,1], index: 5, kind: input, shape index: {}]   ;;  %s4993_s6 = inlined_call_operand.vmem [shape: f32[2,28,6,28], index: 6, kind: output, shape index: {}]  }
   0x1   :  { %s4170_s23 = smov 0   ;;  %s4172_s24 = smov 0  }
   0x2   :  { %s4174_s25 = smov 0  }
   0x3 LB: > { %s25_s26 = sadd.s32 1, %s4117_s23  ;;  %s28_s27 = sadd.s32 1, %s4121_s24  ;;  %s4125_s25 = sphi %s4174_s25, %s16_s25   ;;  %s4121_s24 = sphi %s4172_s24, %s4998_s24   ;;  %s4117_s23 = sphi %s4170_s23, %s4997_s23   ;;  %s4113_s22 = sphi %s4168_s22, %s4996_s22   ;;  %s4109_s21 = sphi %s4166_s21, %s4995_s21  }
   0x4   : > { %p26_p0 = scmp.ge.s32.totalorder %s25_s26, 7  ;;  %p2731_p1 = scmp.ge.s32.totalorder %s4125_s25, 1 }
   0x5   : > { %p256_p2 = scmp.lt.s32.totalorder %s4125_s25, 15 }
   0x6   : > { %s5000_s26 = smov (%p26_p0, %s25_s26), 0  ;;  %s5002_s27 = smov (!%p26_p0, %s28_s27), %s4121_s24 }
   0x7   : > { %p257_p3 = pnand %p2731_p1, %p256_p2  ;;  %p30_p4 = scmp.ge.s32.totalorder %s5002_s27, 2 }
   0x8   : > { %p305_p5 = scmp.lt.s32.totalorder (!%p257_p3), %s4113_s22, 1  ;;  %v4127_v0 = vmov (!%p257_p3), 0.0|0.0   ;;  %s2738_s29 = sshll.u32 (!%p257_p3), %s4109_s21, 4  ;;  %v4328_v57 = vld [vmem:[%s4991_s4 + $0x8] sm:$0xff] (!%p257_p3)  ;;  %vm413_vm0 = vcmask (!%p257_p3), 523264   ;;  %vm820_vm1 = vcmask (!%p257_p3), 226304  }
   0x9   : > { %s5004_s27 = smov (%p30_p4, %s5002_s27), 0  ;;  %260 = sbr.rel (%p257_p3) target bundleno = 743 (0x2e7), region = 44 }
   0xa   : > { %3088 = vmatprep.subr.bf16.mxu0 (!%p257_p3), %v4127_v0  ;;  %3124 = vmatprep.subr.bf16.mxu1 (!%p257_p3), %v4127_v0 }
   0xb   : > { %2755 = vmatprep.mubr.msk.f32.mxu0 (!%p257_p3), %vm413_vm0, %v4328_v57  ;;  %2756 = vmatprep.mubr.msk.f32.mxu1 (!%p257_p3), %vm413_vm0, %v4328_v57 }
  0x10   : > { %s5006_s22 = smov (!%p305_p5, %s4113_s22), 1 }
  0x11   : > { %s3664_s28 = smul.u32 360, %s5006_s22 }
  0x13   : > { %s309_s8 = scalar_lea.vmem %s4987_s0, %s3664_s28  ;;  %s314_s11 = scalar_lea.vmem %s4988_s1, %s3664_s28 }
  0x14   : > { %s4210_s12 = scalar_lea.vmem %s309_s8, %s2738_s29  ;;  %s4212_s13 = scalar_lea.vmem %s314_s11, %s2738_s29 }
  0x15   : > { %v340_v1 = vld [vmem:[%s4210_s12] sm:$0xff]  ;;  %s319_s16 = scalar_lea.vmem %s4989_s2, %s3664_s28  ;;  %s324_s19 = scalar_lea.vmem %s4990_s3, %s3664_s28  ;;  %v4223_v3 = vld [vmem:[%s4210_s12 + $0x78] sm:$0xff]  ;;  %v4248_v18 = vld [vmem:[%s4210_s12 + $0xf0] sm:$0xff] }
  0x16   : > { %v342_v2 = vld [vmem:[%s4212_s13] sm:$0xff]  ;;  %s4225_s20 = scalar_lea.vmem %s319_s16, %s2738_s29  ;;  %s4227_s30 = scalar_lea.vmem %s324_s19, %s2738_s29  ;;  %v4230_v5 = vld [vmem:[%s4212_s13 + $0x78] sm:$0xff]  ;;  %v4258_v23 = vld [vmem:[%s4212_s13 + $0xf0] sm:$0xff] }
  0x17   : > { %v3710_v4 = vpack.i.bf16 %v342_v2, %v340_v1  ;;  %v3089_v6 = vpack.c.bf16 %v342_v2, %v340_v1  ;;  %v344_v7 = vld [vmem:[%s4225_s20] sm:$0xff]  ;;  %v3725_v9 = vpack.i.bf16 %v4230_v5, %v4223_v3  ;;  %s4128_s28 = smov 127   ;;  %s4129_s29 = smov 126   ;;  %v2744_v11 = vld [vmem:[%s4225_s20 + $0x78] sm:$0xff]  ;;  %v3101_v14 = vpack.c.bf16 %v4230_v5, %v4223_v3  ;;  %v2752_v24 = vld [vmem:[%s4225_s20 + $0xf0] sm:$0xff] }
  0x18   : > { %v346_v8 = vld [vmem:[%s4227_s30] sm:$0xff]  ;;  %v2746_v12 = vld [vmem:[%s4227_s30 + $0x78] sm:$0xff]  ;;  %v2754_v26 = vld [vmem:[%s4227_s30 + $0xf0] sm:$0xff]  ;;  %v3740_v34 = vpack.i.bf16 %v4258_v23, %v4248_v18  ;;  %v3113_v44 = vpack.c.bf16 %v4258_v23, %v4248_v18  ;;  %s2736_s19 = sshll.u32 %s4109_s21, 2 }
  0x19   : > { %3711 = vrot.lane.b32.xlu0 %v3710_v4, %s4128_s28  ;;  %v3715_v10 = vpack.i.bf16 %v346_v8, %v344_v7  ;;  %3721 = vrot.lane.b32.xlu1 %v3710_v4, %s4129_s29  ;;  %v3092_v13 = vpack.c.bf16 %v346_v8, %v344_v7  ;;  %v4242_v15 = vpack.c.bf16 %v2746_v12, %v2744_v11  ;;  %v2762_v16 = vld [vmem:[%s4225_s20 + $0x2] sm:$0xff]  ;;  %v2770_v20 = vld [vmem:[%s4225_s20 + $0x7a] sm:$0xff]  ;;  %p328_p6 = scmp.lt.s32.totalorder %s2736_s19, 27 }
  0x1a   : > { %3090 = vmatpush1.bf16.msra.mxu0 %v3089_v6  ;;  %v2764_v17 = vld [vmem:[%s4227_s30 + $0x2] sm:$0xff]  ;;  %v2772_v21 = vld [vmem:[%s4227_s30 + $0x7a] sm:$0xff]  ;;  %v3730_v22 = vpack.i.bf16 %v2746_v12, %v2744_v11  ;;  %v2778_v27 = vld [vmem:[%s4225_s20 + $0xf2] sm:$0xff]  ;;  %v3745_v35 = vpack.i.bf16 %v2754_v26, %v2752_v24  ;;  %v4299_v46 = vpack.c.bf16 %v2754_v26, %v2752_v24 }
  0x1b   : > { %3091 = vmatprep.subr.bf16.mxu0 %v4127_v0  ;;  %3126 = vmatpush1.bf16.msra.mxu1 %v3092_v13  ;;  %v4250_v19 = vpack.c.bf16 %v2764_v17, %v2762_v16  ;;  %v4261_v25 = vpack.c.bf16 %v2772_v21, %v2770_v20  ;;  %v2780_v28 = vld [vmem:[%s4227_s30 + $0xf2] sm:$0xff]  ;;  %v2791_v30 = vld [vmem:[%s4225_s20 + $0x4] sm:$0xff]  ;;  %v2803_v36 = vld [vmem:[%s4225_s20 + $0x7c] sm:$0xff]  ;;  %v3760_v45 = vpack.i.bf16 %v2764_v17, %v2762_v16  ;;  %s5008_s19 = smov (!%p328_p6, %s2736_s19), 27 }
  0x1c   : > { %3127 = vmatprep.subr.bf16.mxu1 %v4127_v0  ;;  %v4266_v29 = vpack.c.bf16 %v2780_v28, %v2778_v27  ;;  %v2794_v31 = vld [vmem:[%s4227_s30 + $0x4] sm:$0xff]  ;;  %v2806_v37 = vld [vmem:[%s4227_s30 + $0x7c] sm:$0xff]  ;;  %v2815_v40 = vld [vmem:[%s4225_s20 + $0xf4] sm:$0xff]  ;;  %v3775_v53 = vpack.i.bf16 %v2772_v21, %v2770_v20  ;;  %v3790_v58 = vpack.i.bf16 %v2780_v28, %v2778_v27 }
  0x1d   : > { %3716 = vrot.lane.b32.xlu0 %v3715_v10, %s4128_s28  ;;  %3726 = vrot.lane.b32.xlu1 %v3725_v9, %s4128_s28  ;;  %v4272_v32 = vld [vmem:[%s4210_s12 + $0x2] sm:$0xff]  ;;  %v4274_v33 = vpack.c.bf16 %v2794_v31, %v2791_v30  ;;  %v4285_v39 = vpack.c.bf16 %v2806_v37, %v2803_v36  ;;  %v2818_v41 = vld [vmem:[%s4227_s30 + $0xf4] sm:$0xff]  ;;  %v3805_v63 = vpack.i.bf16 %v2794_v31, %v2791_v30 }
  0x1e   : > { %3093 = vmatpush1.bf16.msra.mxu0 %v3092_v13  ;;  %v4283_v38 = vld [vmem:[%s4212_s13 + $0x2] sm:$0xff]  ;;  %v4289_v42 = vpack.c.bf16 %v2818_v41, %v2815_v40  ;;  %v4302_v47 = vld [vmem:[%s4210_s12 + $0x7a] sm:$0xff]  ;;  %v4316_v54 = vld [vmem:[%s4210_s12 + $0xf2] sm:$0xff]  ;;  %v3835_v13 = vpack.i.bf16 %v2818_v41, %v2815_v40 }
  0x1f   : > { %3094 = vmatprep.subr.bf16.mxu0 %v4127_v0  ;;  %v3755_v43 = vpack.i.bf16 %v4283_v38, %v4272_v32  ;;  %v4305_v48 = vld [vmem:[%s4212_s13 + $0x7a] sm:$0xff]  ;;  %v2829_v49 = vld [vmem:[%s4225_s20 + $0x6] sm:$0xff]  ;;  %v4319_v55 = vld [vmem:[%s4212_s13 + $0xf2] sm:$0xff]  ;;  %v3161_v61 = vpack.c.bf16 %v4283_v38, %v4272_v32 }
  0x20   : > { %v2832_v50 = vld [vmem:[%s4227_s30 + $0x6] sm:$0xff]  ;;  %v3770_v52 = vpack.i.bf16 %v4305_v48, %v4302_v47  ;;  %v3785_v56 = vpack.i.bf16 %v4319_v55, %v4316_v54  ;;  %v4349_v1 = vld [vmem:[%s4210_s12 + $0x7c] sm:$0xff]  ;;  %v4365_v10 = vld [vmem:[%s4210_s12 + $0xf4] sm:$0xff]  ;;  %v3173_v16 = vpack.c.bf16 %v4305_v48, %v4302_v47 }
  0x21   : > { %3731 = vrot.lane.b32.xlu0 %v3730_v22, %s4128_s28  ;;  %3736 = vrot.lane.b32.xlu1 %v3725_v9, %s4129_s29  ;;  %v4309_v51 = vpack.c.bf16 %v2832_v50, %v2829_v49  ;;  %v4333_v59 = vld [vmem:[%s4210_s12 + $0x4] sm:$0xff]  ;;  %v4352_v2 = vld [vmem:[%s4212_s13 + $0x7c] sm:$0xff]  ;;  %v3820_v9 = vpack.i.bf16 %v2806_v37, %v2803_v36  ;;  %v3850_v27 = vpack.i.bf16 %v2832_v50, %v2829_v49 }
  0x22   : > { %v4336_v60 = vld [vmem:[%s4212_s13 + $0x4] sm:$0xff]  ;;  %v3815_v8 = vpack.i.bf16 %v4352_v2, %v4349_v1  ;;  %v4368_v11 = vld [vmem:[%s4212_s13 + $0xf4] sm:$0xff] }
  0x23   : > { %v3800_v62 = vpack.i.bf16 %v4336_v60, %v4333_v59  ;;  %v2841_v4 = vld [vmem:[%s4225_s20 + $0x7e] sm:$0xff]  ;;  %v3830_v12 = vpack.i.bf16 %v4368_v11, %v4365_v10  ;;  %v4377_v17 = vld [vmem:[%s4210_s12 + $0x6] sm:$0xff]  ;;  %v2853_v22 = vld [vmem:[%s4225_s20 + $0xf6] sm:$0xff] }
  0x24   : > { %v2844_v6 = vld [vmem:[%s4227_s30 + $0x7e] sm:$0xff]  ;;  %v4380_v20 = vld [vmem:[%s4212_s13 + $0x6] sm:$0xff]  ;;  %v2856_v24 = vld [vmem:[%s4227_s30 + $0xf6] sm:$0xff] }
  0x25   : > { %3741 = vrot.lane.b32.xlu0 %v3740_v34, %s4128_s28  ;;  %3746 = vrot.lane.b32.xlu1 %v3745_v35, %s4128_s28  ;;  %v4356_v7 = vpack.c.bf16 %v2844_v6, %v2841_v4  ;;  %v3845_v21 = vpack.i.bf16 %v4380_v20, %v4377_v17  ;;  %v4388_v26 = vpack.c.bf16 %v2856_v24, %v2853_v22  ;;  %v4393_v28 = vld [vmem:[%s4210_s12 + $0x7e] sm:$0xff]  ;;  %v4403_v35 = vld [vmem:[%s4210_s12 + $0xf6] sm:$0xff] }
  0x26   : > { %v4396_v30 = vld [vmem:[%s4212_s13 + $0x7e] sm:$0xff]  ;;  %v4406_v36 = vld [vmem:[%s4212_s13 + $0xf6] sm:$0xff]  ;;  %v3880_v41 = vpack.i.bf16 %v2856_v24, %v2853_v22  ;;  %v2868_v49 = vld [vmem:[%s4225_s20 + $0x8] sm:$0xff] }
  0x27   : > { %v3860_v31 = vpack.i.bf16 %v4396_v30, %v4393_v28  ;;  %v3875_v37 = vpack.i.bf16 %v4406_v36, %v4403_v35  ;;  %v2871_v50 = vld [vmem:[%s4227_s30 + $0x8] sm:$0xff]  ;;  %v2892_v22 = vld [vmem:[%s4225_s20 + $0xf8] sm:$0xff] }
  0x28   : > { %v2895_v24 = vld [vmem:[%s4227_s30 + $0xf8] sm:$0xff] }
  0x29   : > { %3751 = vrot.lane.b32.xlu0 %v3740_v34, %s4129_s29  ;;  %3756 = vrot.lane.b32.xlu1 %v3755_v43, %s4128_s28  ;;  %v3865_v34 = vpack.i.bf16 %v2844_v6, %v2841_v4  ;;  %v2880_v4 = vld [vmem:[%s4225_s20 + $0x80] sm:$0xff] }
  0x2a   : > { %v2883_v6 = vld [vmem:[%s4227_s30 + $0x80] sm:$0xff] }
  0x2b   : > { %v3010_v32 = vld [vmem:[%s4227_s30 + $0xfe] sm:$0xff] }
  0x2d   : > { %3761 = vrot.lane.b32.xlu0 %v3760_v45, %s4128_s28  ;;  %3766 = vrot.lane.b32.xlu1 %v3755_v43, %s4129_s29  ;;  %v4417_v43 = vld [vmem:[%s4210_s12 + $0x8] sm:$0xff] }
  0x2e   : > { %v4420_v45 = vld [vmem:[%s4212_s13 + $0x8] sm:$0xff] }
  0x31   : > { %3771 = vrot.lane.b32.xlu0 %v3770_v52, %s4128_s28  ;;  %3776 = vrot.lane.b32.xlu1 %v3775_v53, %s4128_s28  ;;  %v3890_v53 = vpack.i.bf16 %v4420_v45, %v4417_v43 }
  0x35   : > { %3781 = vrot.lane.b32.xlu0 %v3770_v52, %s4129_s29  ;;  %3786 = vrot.lane.b32.xlu1 %v3785_v56, %s4128_s28  ;;  %v4424_v52 = vpack.c.bf16 %v2871_v50, %v2868_v49 }
  0x39   : > { %3791 = vrot.lane.b32.xlu0 %v3790_v58, %s4128_s28  ;;  %3796 = vrot.lane.b32.xlu1 %v3785_v56, %s4129_s29  ;;  %v3895_v56 = vpack.i.bf16 %v2871_v50, %v2868_v49  ;;  %v4434_v58 = vld [vmem:[%s4210_s12 + $0x80] sm:$0xff]  ;;  %v2906_v49 = vld [vmem:[%s4225_s20 + $0xa] sm:$0xff] }
  0x3a   : > { %v2909_v50 = vld [vmem:[%s4227_s30 + $0xa] sm:$0xff] }
  0x3d   : > { %3801 = vrot.lane.b32.xlu0 %v3800_v62, %s4128_s28  ;;  %3806 = vrot.lane.b32.xlu1 %v3805_v63, %s4128_s28 }
  0x41   : > { %3811 = vrot.lane.b32.xlu0 %v3800_v62, %s4129_s29  ;;  %3816 = vrot.lane.b32.xlu1 %v3815_v8, %s4128_s28  ;;  %v4437_v62 = vld [vmem:[%s4212_s13 + $0x80] sm:$0xff] }
  0x42   : > { %v3905_v63 = vpack.i.bf16 %v4437_v62, %v4434_v58 }
  0x45   : > { %3821 = vrot.lane.b32.xlu0 %v3820_v9, %s4128_s28  ;;  %3826 = vrot.lane.b32.xlu1 %v3815_v8, %s4129_s29  ;;  %v3910_v8 = vpack.i.bf16 %v2883_v6, %v2880_v4  ;;  %v4444_v9 = vpack.c.bf16 %v2883_v6, %v2880_v4 }
  0x49   : > { %3831 = vrot.lane.b32.xlu0 %v3830_v12, %s4128_s28  ;;  %3836 = vrot.lane.b32.xlu1 %v3835_v13, %s4128_s28  ;;  %v2889_v13 = vld [vmem:[%s4212_s13 + $0xf8] sm:$0xff] }
  0x4d   : > { %3841 = vrot.lane.b32.xlu0 %v3830_v12, %s4129_s29  ;;  %3846 = vrot.lane.b32.xlu1 %v3845_v21, %s4128_s28  ;;  %v2886_v12 = vld [vmem:[%s4210_s12 + $0xf8] sm:$0xff] }
  0x51   : > { %3851 = vrot.lane.b32.xlu0 %v3850_v27, %s4128_s28  ;;  %3856 = vrot.lane.b32.xlu1 %v3845_v21, %s4129_s29  ;;  %v3920_v21 = vpack.i.bf16 %v2889_v13, %v2886_v12  ;;  %v3925_v27 = vpack.i.bf16 %v2895_v24, %v2892_v22  ;;  %v2912_v13 = vld [vmem:[%s4210_s12 + $0x82] sm:$0xff] }
  0x55   : > { %3861 = vrot.lane.b32.xlu0 %v3860_v31, %s4128_s28  ;;  %3866 = vrot.lane.b32.xlu1 %v3865_v34, %s4128_s28  ;;  %v2900_v34 = vld [vmem:[%s4210_s12 + $0xa] sm:$0xff] }
  0x59   : > { %3871 = vrot.lane.b32.xlu0 %v3860_v31, %s4129_s29  ;;  %3876 = vrot.lane.b32.xlu1 %v3875_v37, %s4128_s28  ;;  %v4453_v31 = vpack.c.bf16 %v2895_v24, %v2892_v22 }
  0x5d   : > { %3881 = vrot.lane.b32.xlu0 %v3880_v41, %s4128_s28  ;;  %3886 = vrot.lane.b32.xlu1 %v3875_v37, %s4129_s29  ;;  %v2903_v37 = vld [vmem:[%s4212_s13 + $0xa] sm:$0xff] }
  0x5e   : > { %v3935_v41 = vpack.i.bf16 %v2903_v37, %v2900_v34 }
  0x61   : > { %3891 = vrot.lane.b32.xlu0 %v3890_v53, %s4128_s28  ;;  %3896 = vrot.lane.b32.xlu1 %v3895_v56, %s4128_s28  ;;  %v3940_v56 = vpack.i.bf16 %v2909_v50, %v2906_v49 }
  0x65   : > { %3901 = vrot.lane.b32.xlu0 %v3890_v53, %s4129_s29  ;;  %3906 = vrot.lane.b32.xlu1 %v3905_v63, %s4128_s28 }
  0x69   : > { %3911 = vrot.lane.b32.xlu0 %v3910_v8, %s4128_s28  ;;  %3916 = vrot.lane.b32.xlu1 %v3905_v63, %s4129_s29  ;;  %v4462_v8 = vpack.c.bf16 %v2909_v50, %v2906_v49 }
  0x6d   : > { %3921 = vrot.lane.b32.xlu0 %v3920_v21, %s4128_s28  ;;  %3926 = vrot.lane.b32.xlu1 %v3925_v27, %s4128_s28 }
  0x71   : > { %3931 = vrot.lane.b32.xlu0 %v3920_v21, %s4129_s29  ;;  %3936 = vrot.lane.b32.xlu1 %v3935_v41, %s4128_s28  ;;  %v2915_v21 = vld [vmem:[%s4212_s13 + $0x82] sm:$0xff] }
  0x72   : > { %v3950_v24 = vpack.i.bf16 %v2915_v21, %v2912_v13  ;;  %v2918_v13 = vld [vmem:[%s4225_s20 + $0x82] sm:$0xff] }
  0x73   : > { %v2921_v21 = vld [vmem:[%s4227_s30 + $0x82] sm:$0xff] }
  0x75   : > { %3941 = vrot.lane.b32.xlu0 %v3940_v56, %s4128_s28  ;;  %3946 = vrot.lane.b32.xlu1 %v3935_v41, %s4129_s29  ;;  %v2930_v56 = vld [vmem:[%s4225_s20 + $0xfa] sm:$0xff] }
  0x79   : > { %3951 = vrot.lane.b32.xlu0 %v3950_v24, %s4128_s28 }
  0x7d   : > { %3961 = vrot.lane.b32.xlu0 %v3950_v24, %s4129_s29  ;;  %v3955_v24 = vpack.i.bf16 %v2921_v21, %v2918_v13 }
  0x7f   : > { %3956 = vrot.lane.b32.xlu1 %v3955_v24, %s4128_s28 }
  0x8b   : > { %v3712_v53 = vpop.permute.xlu0 %3711  ;;  %v3722_v6 = vpop.permute.xlu1 %3721 }
  0x8c   : > { %v3714_v63 = vunpack.i.h.bf16 %v3712_v53  ;;  %v3713_v4 = vunpack.i.l.bf16 %v3712_v53  ;;  %v3724_v37 = vunpack.i.h.bf16 %v3722_v6  ;;  %v3723_v40 = vunpack.i.l.bf16 %v3722_v6 }
  0x8e   : > { %v3095_v12 = vpack.c.bf16 %v3714_v63, %v3713_v4  ;;  %v3134_v50 = vpack.c.bf16 %v3724_v37, %v3723_v40  ;;  %v2933_v63 = vld [vmem:[%s4227_s30 + $0xfa] sm:$0xff]  ;;  %v4492_v37 = vpack.c.bf16 %v2921_v21, %v2918_v13 }
  0x8f   : > { %v3717_v22 = vpop.permute.xlu0 %3716  ;;  %v3727_v53 = vpop.permute.xlu1 %3726  ;;  %v3970_v4 = vpack.i.bf16 %v2933_v63, %v2930_v56  ;;  %v2924_v13 = vld [vmem:[%s4210_s12 + $0xfa] sm:$0xff] }
  0x90   : > { %v3719_v27 = vunpack.i.h.bf16 %v3717_v22  ;;  %v3718_v34 = vunpack.i.l.bf16 %v3717_v22  ;;  %3096 = vmatpush1.bf16.msra.mxu0 %v3095_v12  ;;  %3129 = vmatpush1.bf16.msra.mxu1 %v3095_v12  ;;  %v3729_v40 = vunpack.i.h.bf16 %v3727_v53  ;;  %v3728_v41 = vunpack.i.l.bf16 %v3727_v53  ;;  %v2939_v22 = vld [vmem:[%s4210_s12 + $0xc] sm:$0xff]  ;;  %v2927_v21 = vld [vmem:[%s4212_s13 + $0xfa] sm:$0xff] }
  0x91   : > { %3097 = vmatprep.subr.bf16.mxu0 %v4127_v0  ;;  %3130 = vmatprep.subr.bf16.mxu1 %v4127_v0  ;;  %v4481_v12 = vpack.c.bf16 %v2933_v63, %v2930_v56  ;;  %v2957_v56 = vld [vmem:[%s4225_s20 + $0x84] sm:$0xff]  ;;  %v3965_v24 = vpack.i.bf16 %v2927_v21, %v2924_v13 }
  0x92   : > { %v3098_v49 = vpack.c.bf16 %v3719_v27, %v3718_v34  ;;  %3971 = vrot.lane.b32.xlu0 %v3970_v4, %s4128_s28  ;;  %v2942_v27 = vld [vmem:[%s4212_s13 + $0xc] sm:$0xff]  ;;  %v3107_v34 = vpack.c.bf16 %v3729_v40, %v3728_v41  ;;  %v2960_v63 = vld [vmem:[%s4227_s30 + $0x84] sm:$0xff] }
  0x93   : > { %v3732_v6 = vpop.permute.xlu0 %3731  ;;  %v4000_v4 = vpack.i.bf16 %v2960_v63, %v2957_v56  ;;  %3966 = vrot.lane.b32.xlu1 %v3965_v24, %s4128_s28 }
  0x94   : > { %3099 = vmatpush1.bf16.msra.mxu0 %v3098_v49  ;;  %3132 = vmatpush1.bf16.msra.mxu1 %v3098_v49  ;;  %v3734_v3 = vunpack.i.h.bf16 %v3732_v6  ;;  %v3733_v5 = vunpack.i.l.bf16 %v3732_v6  ;;  %v3980_v49 = vpack.i.bf16 %v2942_v27, %v2939_v22  ;;  %v4503_v6 = vpack.c.bf16 %v2960_v63, %v2957_v56  ;;  %v2963_v22 = vld [vmem:[%s4210_s12 + $0xfc] sm:$0xff] }
  0x95   : > { %3100 = vmatprep.subr.bf16.mxu0 %v4127_v0  ;;  %3133 = vmatprep.subr.bf16.mxu1 %v4127_v0  ;;  %v2966_v27 = vld [vmem:[%s4212_s13 + $0xfc] sm:$0xff] }
  0x96   : > { %3981 = vrot.lane.b32.xlu0 %v3980_v49, %s4128_s28 }
  0x97   : > { %v3742_v41 = vpop.permute.xlu0 %3741  ;;  %3976 = vrot.lane.b32.xlu1 %v3965_v24, %s4129_s29 }
  0x98   : > { %3102 = vmatpush1.bf16.msra.mxu0 %v3101_v14  ;;  %3135 = vmatpush1.bf16.msra.mxu1 %v3134_v50  ;;  %v3737_v14 = vpop.permute.xlu1 %3736  ;;  %v3110_v50 = vpack.c.bf16 %v3734_v3, %v3733_v5  ;;  %v3743_v3 = vunpack.i.l.bf16 %v3742_v41 }
  0x99   : > { %3103 = vmatprep.subr.bf16.mxu0 %v4127_v0  ;;  %3136 = vmatprep.subr.bf16.mxu1 %v4127_v0  ;;  %v3738_v53 = vunpack.i.l.bf16 %v3737_v14 }
  0x9a   : > { %3991 = vrot.lane.b32.xlu0 %v3980_v49, %s4129_s29 }
  0x9c   : > { %3105 = vmatpush1.bf16.msra.mxu0 %v4242_v15  ;;  %3138 = vmatpush1.bf16.msra.mxu1 %v4242_v15  ;;  %v3739_v15 = vunpack.i.h.bf16 %v3737_v14  ;;  %v3747_v5 = vpop.permute.xlu1 %3746  ;;  %v4010_v14 = vpack.i.bf16 %v2966_v27, %v2963_v22  ;;  %v4535_v22 = vld [vmem:[%s4991_s4] sm:$0xff] }
  0x9d   : > { %3106 = vmatprep.subr.bf16.mxu0 %v4127_v0  ;;  %3139 = vmatprep.subr.bf16.mxu1 %v4127_v0  ;;  %v3749_v18 = vunpack.i.h.bf16 %v3747_v5  ;;  %v3748_v23 = vunpack.i.l.bf16 %v3747_v5  ;;  %v2945_v5 = vld [vmem:[%s4225_s20 + $0xc] sm:$0xff] }
  0x9e   : > { %v3146_v40 = vpack.c.bf16 %v3739_v15, %v3738_v53  ;;  %4001 = vrot.lane.b32.xlu0 %v4000_v4, %s4128_s28  ;;  %v2986_v15 = vld [vmem:[%s4227_s30 + $0xe] sm:$0xff] }
  0x9f   : > { %v3122_v56 = vpack.c.bf16 %v3749_v18, %v3748_v23 }
  0xa0   : > { %3108 = vmatpush1.bf16.msra.mxu0 %v3107_v34  ;;  %3141 = vmatpush1.bf16.msra.mxu1 %v3107_v34  ;;  %v3744_v34 = vunpack.i.h.bf16 %v3742_v41  ;;  %v2992_v41 = vld [vmem:[%s4212_s13 + $0x86] sm:$0xff]  ;;  %v3757_v24 = vpop.permute.xlu1 %3756 }
  0xa1   : > { %3109 = vmatprep.subr.bf16.mxu0 %v4127_v0  ;;  %3142 = vmatprep.subr.bf16.mxu1 %v4127_v0  ;;  %v3759_v27 = vunpack.i.h.bf16 %v3757_v24 }
  0xa2   : > { %4011 = vrot.lane.b32.xlu0 %v4010_v14, %s4128_s28  ;;  %v3119_v49 = vpack.c.bf16 %v3744_v34, %v3743_v3  ;;  %v3758_v34 = vunpack.i.l.bf16 %v3757_v24  ;;  %v4577_v24 = vld [vmem:[%s4212_s13 + $0x84] sm:$0xff] }
  0xa4   : > { %3111 = vmatpush1.bf16.msra.mxu0 %v3110_v50  ;;  %3144 = vmatpush1.bf16.msra.mxu1 %v3110_v50  ;;  %v2983_v50 = vld [vmem:[%s4225_s20 + $0xe] sm:$0xff]  ;;  %v3167_v38 = vpack.c.bf16 %v3759_v27, %v3758_v34 }
  0xa5   : > { %3112 = vmatprep.subr.bf16.mxu0 %v4127_v0  ;;  %3145 = vmatprep.subr.bf16.mxu1 %v4127_v0  ;;  %v4030_v53 = vpack.i.bf16 %v2986_v15, %v2983_v50 }
  0xa6   : > { %4021 = vrot.lane.b32.xlu0 %v4010_v14, %s4129_s29  ;;  %v2948_v14 = vld [vmem:[%s4227_s30 + $0xc] sm:$0xff] }
  0xa7   : > { %v3985_v18 = vpack.i.bf16 %v2948_v14, %v2945_v5 }
  0xa8   : > { %3114 = vmatpush1.bf16.msra.mxu0 %v3113_v44  ;;  %3147 = vmatpush1.bf16.msra.mxu1 %v3146_v40  ;;  %v3752_v44 = vpop.permute.xlu0 %3751  ;;  %v2989_v40 = vld [vmem:[%s4210_s12 + $0x86] sm:$0xff] }
  0xa9   : > { %3115 = vmatprep.subr.bf16.mxu0 %v4127_v0  ;;  %3148 = vmatprep.subr.bf16.mxu1 %v4127_v0  ;;  %v3754_v63 = vunpack.i.h.bf16 %v3752_v44  ;;  %v3753_v4 = vunpack.i.l.bf16 %v3752_v44  ;;  %v4040_v13 = vpack.i.bf16 %v2992_v41, %v2989_v40  ;;  %v3767_v44 = vpop.permute.xlu1 %3766  ;;  %v4130_v40 = vmov 0  }
  0xaa   : > { %4031 = vrot.lane.b32.xlu0 %v4030_v53, %s4128_s28  ;;  %3986 = vrot.lane.b32.xlu1 %v3985_v18, %s4128_s28 }
  0xab   : > { %v3158_v21 = vpack.c.bf16 %v3754_v63, %v3753_v4  ;;  %v3768_v63 = vunpack.i.l.bf16 %v3767_v44  ;;  %v337_v4 = vld [vmem:[%s4992_s5] sm:$0xff]  ;;  %4070 = vset.pattern.permute.xlu0 %v4130_v40 }
  0xac   : > { %3117 = vmatpush1.bf16.msra.mxu0 %v4299_v46  ;;  %3150 = vmatpush1.bf16.msra.mxu1 %v4299_v46  ;;  %v4526_v46 = vpack.c.bf16 %v2986_v15, %v2983_v50  ;;  %v3762_v3 = vpop.permute.xlu0 %3761  ;;  %v4558_v50 = vpack.c.bf16 %v2948_v14, %v2945_v5 }
  0xad   : > { %3118 = vmatprep.subr.bf16.mxu0 %v4127_v0  ;;  %3151 = vmatprep.subr.bf16.mxu1 %v4127_v0  ;;  %v3763_v23 = vunpack.i.l.bf16 %v3762_v3  ;;  %v3777_v5 = vpop.permute.xlu1 %3776 }
  0xae   : > { %4041 = vrot.lane.b32.xlu0 %v4040_v13, %s4128_s28  ;;  %v3778_v18 = vunpack.i.l.bf16 %v3777_v5 }
  0xb0   : > { %3120 = vmatpush1.bf16.msra.mxu0 %v3119_v49  ;;  %3153 = vmatpush1.bf16.msra.mxu1 %v3119_v49  ;;  %v3007_v49 = vld [vmem:[%s4225_s20 + $0xfe] sm:$0xff] }
  0xb1   : > { %3121 = vmatprep.subr.bf16.mxu0 %v4127_v0  ;;  %3154 = vmatprep.subr.bf16.mxu1 %v4127_v0  ;;  %v4060_v15 = vpack.i.bf16 %v3010_v32, %v3007_v49  ;;  %v4560_v53 = vpack.c.bf16 %v3010_v32, %v3007_v49  ;;  %v3779_v49 = vunpack.i.h.bf16 %v3777_v5 }
  0xb2   : > { %4051 = vrot.lane.b32.xlu0 %v4040_v13, %s4129_s29  ;;  %v3772_v13 = vpop.permute.xlu0 %3771 }
  0xb3   : > { %v3774_v34 = vunpack.i.h.bf16 %v3772_v13  ;;  %v3182_v48 = vpack.c.bf16 %v3779_v49, %v3778_v18  ;;  %v4620_v49 = vld [vmem:[%s4212_s13 + $0xe] sm:$0xff] }
  0xb4   : > { %3123 = vmatpush1.bf16.msra.mxu0 %v3122_v56  ;;  %3156 = vmatpush1.bf16.msra.mxu1 %v3122_v56  ;;  %v3769_v56 = vunpack.i.h.bf16 %v3767_v44 }
  0xb5   : > { %3157 = vmatprep.subr.bf16.mxu1 %v4127_v0  ;;  %3160 = vmatprep.subr.bf16.mxu0 %v4127_v0 }
  0xb6   : > { %4061 = vrot.lane.b32.xlu0 %v4060_v15, %s4128_s28  ;;  %v3206_v41 = vpack.c.bf16 %v3769_v56, %v3768_v63  ;;  %v3782_v47 = vpop.permute.xlu0 %3781  ;;  %v2972_v56 = vld [vmem:[%s4227_s30 + $0xfc] sm:$0xff] }
  0xb7   : > { %482 = vmatmul.mubr.f32.vlgmr.msra.gmra.mrb[0].mxu0 %v4535_v22  ;;  %v3783_v32 = vunpack.i.l.bf16 %v3782_v47 }
  0xb8   : > { %3159 = vmatpush1.bf16.msra.mxu1 %v3158_v21  ;;  %3162 = vmatpush1.bf16.msra.mxu0 %v3161_v61  ;;  %v3764_v61 = vunpack.i.h.bf16 %v3762_v3  ;;  %v4574_v21 = vld [vmem:[%s4210_s12 + $0x84] sm:$0xff]  ;;  %v3773_v3 = vunpack.i.l.bf16 %v3772_v13 }
  0xb9   : > { %3163 = vmatprep.subr.bf16.mxu0 %v4127_v0  ;;  %3196 = vmatprep.subr.bf16.mxu1 %v4127_v0  ;;  %v3995_v27 = vpack.i.bf16 %v4577_v24, %v4574_v21 }
  0xba   : > { %2781 = vmatprep.mubr.msk.f32.mxu0 %vm413_vm0, %v4328_v57  ;;  %813 = vperm.xlu0 %4070, %v337_v4   ;;  %v3179_v14 = vpack.c.bf16 %v3774_v34, %v3773_v3  ;;  %v3792_v15 = vpop.permute.xlu0 %3791  ;;  %v3233_v3 = vpack.c.bf16 %v4336_v60, %v4333_v59 }
  0xbb   : > { %570 = vmatmul.mubr.f32.vlgmr.msra.gmra.mrb[0].mxu1 %v4535_v22  ;;  %3996 = vrot.lane.b32.xlu1 %v3995_v27, %s4128_s28  ;;  %v3794_v40 = vunpack.i.h.bf16 %v3792_v15 }
  0xbc   : > { %3165 = vmatpush1.bf16.msra.mxu0 %v4250_v19  ;;  %3198 = vmatpush1.bf16.msra.mxu1 %v4250_v19  ;;  %v3170_v19 = vpack.c.bf16 %v3764_v61, %v3763_v23  ;;  %v4994_v61 = vpack.c.bf16 %v4319_v55, %v4316_v54 }
  0xbd   : > { %3166 = vmatprep.subr.bf16.mxu0 %v4127_v0  ;;  %3199 = vmatprep.subr.bf16.mxu1 %v4127_v0 }
  0xbe   : > { %2782 = vmatprep.mubr.msk.f32.mxu1 %vm413_vm0, %v4328_v57  ;;  %v3802_v5 = vpop.permute.xlu0 %3801 }
  0xbf   : > { %4006 = vrot.lane.b32.xlu1 %v3995_v27, %s4129_s29 }
  0xc0   : > { %3168 = vmatpush1.bf16.msra.mxu0 %v3167_v38  ;;  %3201 = vmatpush1.bf16.msra.mxu1 %v3167_v38  ;;  %v3787_v38 = vpop.permute.xlu1 %3786 }
  0xc1   : > { %3169 = vmatprep.subr.bf16.mxu0 %v4127_v0  ;;  %3202 = vmatprep.subr.bf16.mxu1 %v4127_v0  ;;  %v3789_v23 = vunpack.i.h.bf16 %v3787_v38  ;;  %v3788_v44 = vunpack.i.l.bf16 %v3787_v38 }
  0xc3   : > { %v3191_v4 = vpack.c.bf16 %v3789_v23, %v3788_v44  ;;  %v3245_v44 = vpack.c.bf16 %v4352_v2, %v4349_v1 }
  0xc4   : > { %3171 = vmatpush1.bf16.msra.mxu0 %v3170_v19  ;;  %3204 = vmatpush1.bf16.msra.mxu1 %v3170_v19  ;;  %v2969_v19 = vld [vmem:[%s4225_s20 + $0xfc] sm:$0xff]  ;;  %v3797_v55 = vpop.permute.xlu1 %3796 }
  0xc5   : > { %3172 = vmatprep.subr.bf16.mxu0 %v4127_v0  ;;  %3205 = vmatprep.subr.bf16.mxu1 %v4127_v0  ;;  %v4015_v63 = vpack.i.bf16 %v2972_v56, %v2969_v19  ;;  %v4605_v54 = vpack.c.bf16 %v2972_v56, %v2969_v19  ;;  %v3799_v27 = vunpack.i.h.bf16 %v3797_v55  ;;  %v3798_v34 = vunpack.i.l.bf16 %v3797_v55 }
  0xc7   : > { %4016 = vrot.lane.b32.xlu1 %v4015_v63, %s4128_s28 }
  0xc8   : > { %3174 = vmatpush1.bf16.msra.mxu0 %v3173_v16  ;;  %3207 = vmatpush1.bf16.msra.mxu1 %v3206_v41  ;;  %v3784_v16 = vunpack.i.h.bf16 %v3782_v47  ;;  %v3793_v41 = vunpack.i.l.bf16 %v3792_v15  ;;  %v3804_v47 = vunpack.i.h.bf16 %v3802_v5  ;;  %v3807_v59 = vpop.permute.xlu1 %3806 }
  0xc9   : > { %3175 = vmatprep.subr.bf16.mxu0 %v4127_v0  ;;  %3208 = vmatprep.subr.bf16.mxu1 %v4127_v0 }
  0xca   : > { %v3194_v13 = vpack.c.bf16 %v3794_v40, %v3793_v41  ;;  %v2998_v40 = vld [vmem:[%s4227_s30 + $0x86] sm:$0xff] }
  0xcc   : > { %3177 = vmatpush1.bf16.msra.mxu0 %v4261_v25  ;;  %3210 = vmatpush1.bf16.msra.mxu1 %v4261_v25  ;;  %v3218_v25 = vpack.c.bf16 %v3784_v16, %v3783_v32  ;;  %v3809_v16 = vunpack.i.h.bf16 %v3807_v59  ;;  %v3808_v32 = vunpack.i.l.bf16 %v3807_v59  ;;  %v3817_v15 = vpop.permute.xlu1 %3816 }
  0xcd   : > { %3178 = vmatprep.subr.bf16.mxu0 %v4127_v0  ;;  %3211 = vmatprep.subr.bf16.mxu1 %v4127_v0  ;;  %v3819_v19 = vunpack.i.h.bf16 %v3817_v15  ;;  %v3818_v56 = vunpack.i.l.bf16 %v3817_v15 }
  0xce   : > { %v3242_v38 = vpack.c.bf16 %v3809_v16, %v3808_v32 }
  0xcf   : > { %v3251_v55 = vpack.c.bf16 %v3819_v19, %v3818_v56 }
  0xd0   : > { %3180 = vmatpush1.bf16.msra.mxu0 %v3179_v14  ;;  %3213 = vmatpush1.bf16.msra.mxu1 %v3179_v14  ;;  %v4617_v14 = vld [vmem:[%s4210_s12 + $0xe] sm:$0xff] }
  0xd1   : > { %3181 = vmatprep.subr.bf16.mxu0 %v4127_v0  ;;  %3214 = vmatprep.subr.bf16.mxu1 %v4127_v0  ;;  %v4025_v18 = vpack.i.bf16 %v4620_v49, %v4617_v14 }
  0xd3   : > { %4026 = vrot.lane.b32.xlu1 %v4025_v18, %s4128_s28 }
  0xd4   : > { %3183 = vmatpush1.bf16.msra.mxu0 %v3182_v48  ;;  %3216 = vmatpush1.bf16.msra.mxu1 %v3182_v48  ;;  %v3803_v48 = vunpack.i.l.bf16 %v3802_v5  ;;  %v3257_v5 = vpack.c.bf16 %v4368_v11, %v4365_v10 }
  0xd5   : > { %3184 = vmatprep.subr.bf16.mxu0 %v4127_v0  ;;  %3217 = vmatprep.subr.bf16.mxu1 %v4127_v0 }
  0xd6   : > { %v3239_v60 = vpack.c.bf16 %v3804_v47, %v3803_v48  ;;  %v4662_v47 = vld [vmem:[%s4210_s12 + $0xfe] sm:$0xff] }
  0xd7   : > { %4036 = vrot.lane.b32.xlu1 %v4025_v18, %s4129_s29  ;;  %v4665_v48 = vld [vmem:[%s4212_s13 + $0xfe] sm:$0xff] }
  0xd8   : > { %3186 = vmatpush1.bf16.msra.mxu0 %v4994_v61  ;;  %3219 = vmatpush1.bf16.msra.mxu1 %v3218_v25  ;;  %v3812_v25 = vpop.permute.xlu0 %3811  ;;  %v4055_v59 = vpack.i.bf16 %v4665_v48, %v4662_v47 }
  0xd9   : > { %3187 = vmatprep.subr.bf16.mxu0 %v4127_v0  ;;  %3220 = vmatprep.subr.bf16.mxu1 %v4127_v0  ;;  %v3814_v61 = vunpack.i.h.bf16 %v3812_v25  ;;  %v3813_v23 = vunpack.i.l.bf16 %v3812_v25 }
  0xdc   : > { %3189 = vmatpush1.bf16.msra.mxu0 %v4266_v29  ;;  %3222 = vmatpush1.bf16.msra.mxu1 %v4266_v29  ;;  %v3230_v29 = vpack.c.bf16 %v3799_v27, %v3798_v34  ;;  %v3822_v63 = vpop.permute.xlu0 %3821  ;;  %v3827_v27 = vpop.permute.xlu1 %3826 }
  0xdd   : > { %3190 = vmatprep.subr.bf16.mxu0 %v4127_v0  ;;  %3223 = vmatprep.subr.bf16.mxu1 %v4127_v0  ;;  %v3824_v1 = vunpack.i.h.bf16 %v3822_v63  ;;  %v3823_v2 = vunpack.i.l.bf16 %v3822_v63 }
  0xdf   : > { %v3254_v34 = vpack.c.bf16 %v3824_v1, %v3823_v2  ;;  %v3317_v2 = vpack.c.bf16 %v4396_v30, %v4393_v28 }
  0xe0   : > { %3192 = vmatpush1.bf16.msra.mxu0 %v3191_v4  ;;  %3225 = vmatpush1.bf16.msra.mxu1 %v3191_v4  ;;  %v2995_v4 = vld [vmem:[%s4225_s20 + $0x86] sm:$0xff]  ;;  %v3832_v18 = vpop.permute.xlu0 %3831  ;;  %v3837_v10 = vpop.permute.xlu1 %3836  ;;  %s3665_s20 = smul.u32 28, %s5006_s22 }
  0xe1   : > { %3193 = vmatprep.subr.bf16.mxu0 %v4127_v0  ;;  %3226 = vmatprep.subr.bf16.mxu1 %v4127_v0  ;;  %v4045_v41 = vpack.i.bf16 %v2998_v40, %v2995_v4  ;;  %v3833_v16 = vunpack.i.l.bf16 %v3832_v18  ;;  %v3839_v32 = vunpack.i.h.bf16 %v3837_v10  ;;  %v3838_v25 = vunpack.i.l.bf16 %v3837_v10 }
  0xe2   : > { %s331_s21 = sadd.s32 %s3665_s20, %s5008_s19 }
  0xe3   : > { %4046 = vrot.lane.b32.xlu1 %v4045_v41, %s4128_s28  ;;  %s2737_s22 = sshll.u32 %s331_s21, 3 }
  0xe4   : > { %3195 = vmatpush1.bf16.msra.mxu0 %v3194_v13  ;;  %3228 = vmatpush1.bf16.msra.mxu1 %v3194_v13  ;;  %v4650_v13 = vpack.c.bf16 %v2998_v40, %v2995_v4  ;;  %v3847_v15 = vpop.permute.xlu1 %3846 }
  0xe5   : > { %3229 = vmatprep.subr.bf16.mxu1 %v4127_v0  ;;  %3232 = vmatprep.subr.bf16.mxu0 %v4127_v0  ;;  %v3849_v19 = vunpack.i.h.bf16 %v3847_v15  ;;  %v3848_v56 = vunpack.i.l.bf16 %v3847_v15 }
  0xe7   : > { %716 = vmatmul.mubr.f32.vlgmr.msra.gmra.mrb[2].mxu0 %v4535_v22  ;;  %4056 = vrot.lane.b32.xlu1 %v4055_v59, %s4128_s28 }
  0xe8   : > { %3231 = vmatpush1.bf16.msra.mxu1 %v3230_v29  ;;  %3234 = vmatpush1.bf16.msra.mxu0 %v3233_v3  ;;  %v3829_v29 = vunpack.i.h.bf16 %v3827_v27  ;;  %v3828_v3 = vunpack.i.l.bf16 %v3827_v27  ;;  %v3857_v40 = vpop.permute.xlu1 %3856 }
  0xe9   : > { %3235 = vmatprep.subr.bf16.mxu0 %v4127_v0  ;;  %3268 = vmatprep.subr.bf16.mxu1 %v4127_v0  ;;  %v3858_v1 = vunpack.i.l.bf16 %v3857_v40 }
  0xea   : > { %2819 = vmatprep.mubr.msk.f32.mxu0 %vm413_vm0, %v4328_v57 }
  0xeb   : > { %805 = vmatmul.mubr.f32.vlgmr.msra.gmra.mrb[2].mxu1 %v4535_v22  ;;  %4066 = vrot.lane.b32.xlu1 %v4055_v59, %s4129_s29  ;;  %s4890_s29 = scalar_lea.vmem %s4993_s6, %s2737_s22 }
  0xec   : > { %3237 = vmatpush1.bf16.msra.mxu0 %v4274_v33  ;;  %3270 = vmatpush1.bf16.msra.mxu1 %v4274_v33  ;;  %v3278_v33 = vpack.c.bf16 %v3814_v61, %v3813_v23  ;;  %v3266_v61 = vpack.c.bf16 %v3839_v32, %v3838_v25 }
  0xed   : > { %3238 = vmatprep.subr.bf16.mxu0 %v4127_v0  ;;  %3271 = vmatprep.subr.bf16.mxu1 %v4127_v0 }
  0xee   : > { %2820 = vmatprep.mubr.msk.f32.mxu1 %vm413_vm0, %v4328_v57 }
  0xf0   : > { %3240 = vmatpush1.bf16.msra.mxu0 %v3239_v60  ;;  %3273 = vmatpush1.bf16.msra.mxu1 %v3239_v60  ;;  %v3834_v60 = vunpack.i.h.bf16 %v3832_v18 }
  0xf1   : > { %3241 = vmatprep.subr.bf16.mxu0 %v4127_v0  ;;  %3274 = vmatprep.subr.bf16.mxu1 %v4127_v0 }
  0xf2   : > { %v3263_v11 = vpack.c.bf16 %v3834_v60, %v3833_v16 }
  0xf4   : > { %3243 = vmatpush1.bf16.msra.mxu0 %v3242_v38  ;;  %3276 = vmatpush1.bf16.msra.mxu1 %v3242_v38  ;;  %v3842_v38 = vpop.permute.xlu0 %3841 }
  0xf5   : > { %3244 = vmatprep.subr.bf16.mxu0 %v4127_v0  ;;  %3277 = vmatprep.subr.bf16.mxu1 %v4127_v0  ;;  %v3844_v23 = vunpack.i.h.bf16 %v3842_v38 }
  0xf8   : > { %3246 = vmatpush1.bf16.msra.mxu0 %v3245_v44  ;;  %3279 = vmatpush1.bf16.msra.mxu1 %v3278_v33  ;;  %v3843_v33 = vunpack.i.l.bf16 %v3842_v38  ;;  %v3852_v63 = vpop.permute.xlu0 %3851 }
  0xf9   : > { %3247 = vmatprep.subr.bf16.mxu0 %v4127_v0  ;;  %3280 = vmatprep.subr.bf16.mxu1 %v4127_v0  ;;  %v3853_v4 = vunpack.i.l.bf16 %v3852_v63 }
  0xfa   : > { %v3302_v44 = vpack.c.bf16 %v3844_v23, %v3843_v33 }
  0xfc   : > { %3249 = vmatpush1.bf16.msra.mxu0 %v4285_v39  ;;  %3282 = vmatpush1.bf16.msra.mxu1 %v4285_v39  ;;  %v3290_v39 = vpack.c.bf16 %v3829_v29, %v3828_v3  ;;  %v3867_v29 = vpop.permute.xlu1 %3866 }
  0xfd   : > { %3250 = vmatprep.subr.bf16.mxu0 %v4127_v0  ;;  %3283 = vmatprep.subr.bf16.mxu1 %v4127_v0  ;;  %v3869_v28 = vunpack.i.h.bf16 %v3867_v29  ;;  %v3868_v30 = vunpack.i.l.bf16 %v3867_v29 }
 0x100   : > { %3252 = vmatpush1.bf16.msra.mxu0 %v3251_v55  ;;  %3285 = vmatpush1.bf16.msra.mxu1 %v3251_v55  ;;  %v3859_v55 = vunpack.i.h.bf16 %v3857_v40  ;;  %v3877_v16 = vpop.permute.xlu1 %3876 }
 0x101   : > { %3253 = vmatprep.subr.bf16.mxu0 %v4127_v0  ;;  %3286 = vmatprep.subr.bf16.mxu1 %v4127_v0  ;;  %v3879_v10 = vunpack.i.h.bf16 %v3877_v16 }
 0x104   : > { %3255 = vmatpush1.bf16.msra.mxu0 %v3254_v34  ;;  %3288 = vmatpush1.bf16.msra.mxu1 %v3254_v34  ;;  %v3887_v38 = vpop.permute.xlu1 %3886 }
 0x105   : > { %3256 = vmatprep.subr.bf16.mxu0 %v4127_v0  ;;  %3289 = vmatprep.subr.bf16.mxu1 %v4127_v0  ;;  %v3889_v23 = vunpack.i.h.bf16 %v3887_v38  ;;  %v3888_v33 = vunpack.i.l.bf16 %v3887_v38 }
 0x108   : > { %3258 = vmatpush1.bf16.msra.mxu0 %v3257_v5  ;;  %3291 = vmatpush1.bf16.msra.mxu1 %v3290_v39  ;;  %v3326_v5 = vpack.c.bf16 %v3869_v28, %v3868_v30 }
 0x109   : > { %3259 = vmatprep.subr.bf16.mxu0 %v4127_v0  ;;  %3292 = vmatprep.subr.bf16.mxu1 %v4127_v0 }
 0x10c   : > { %3261 = vmatpush1.bf16.msra.mxu0 %v4289_v42  ;;  %3294 = vmatpush1.bf16.msra.mxu1 %v4289_v42  ;;  %v3305_v42 = vpack.c.bf16 %v4380_v20, %v4377_v17  ;;  %v3311_v17 = vpack.c.bf16 %v3849_v19, %v3848_v56  ;;  %v3854_v20 = vunpack.i.h.bf16 %v3852_v63  ;;  %v3897_v56 = vpop.permute.xlu1 %3896 }
 0x10d   : > { %3262 = vmatprep.subr.bf16.mxu0 %v4127_v0  ;;  %3295 = vmatprep.subr.bf16.mxu1 %v4127_v0  ;;  %v3899_v63 = vunpack.i.h.bf16 %v3897_v56 }
 0x10e   : > { %v3314_v41 = vpack.c.bf16 %v3854_v20, %v3853_v4 }
 0x110   : > { %3264 = vmatpush1.bf16.msra.mxu0 %v3263_v11  ;;  %3297 = vmatpush1.bf16.msra.mxu1 %v3263_v11  ;;  %v3878_v11 = vunpack.i.l.bf16 %v3877_v16 }
 0x111   : > { %3265 = vmatprep.subr.bf16.mxu0 %v4127_v0  ;;  %3298 = vmatprep.subr.bf16.mxu1 %v4127_v0 }
 0x112   : > { %v3335_v25 = vpack.c.bf16 %v3879_v10, %v3878_v11 }
 0x114   : > { %3267 = vmatpush1.bf16.msra.mxu0 %v3266_v61  ;;  %3300 = vmatpush1.bf16.msra.mxu1 %v3266_v61 }
 0x115   : > { %3301 = vmatprep.subr.bf16.mxu1 %v4127_v0  ;;  %3304 = vmatprep.subr.bf16.mxu0 %v4127_v0 }
 0x117   : > { %964 = vmatmul.mubr.f32.vlgmr.msra.gmra.mrb[4].mxu0 %v4535_v22 }
 0x118   : > { %3303 = vmatpush1.bf16.msra.mxu1 %v3302_v44  ;;  %3306 = vmatpush1.bf16.msra.mxu0 %v3305_v42  ;;  %v3374_v44 = vpack.c.bf16 %v3889_v23, %v3888_v33 }
 0x119   : > { %3307 = vmatprep.subr.bf16.mxu0 %v4127_v0  ;;  %3340 = vmatprep.subr.bf16.mxu1 %v4127_v0 }
 0x11a   : > { %2857 = vmatprep.mubr.msk.f32.mxu0 %vm413_vm0, %v4328_v57 }
 0x11b   : > { %1052 = vmatmul.mubr.f32.vlgmr.msra.gmra.mrb[4].mxu1 %v4535_v22 }
 0x11c   : > { %3309 = vmatpush1.bf16.msra.mxu0 %v4309_v51  ;;  %3342 = vmatpush1.bf16.msra.mxu1 %v4309_v51  ;;  %v3350_v51 = vpack.c.bf16 %v3859_v55, %v3858_v1  ;;  %v3389_v55 = vpack.c.bf16 %v4437_v62, %v4434_v58  ;;  %v3907_v1 = vpop.permute.xlu1 %3906 }
 0x11d   : > { %3310 = vmatprep.subr.bf16.mxu0 %v4127_v0  ;;  %3343 = vmatprep.subr.bf16.mxu1 %v4127_v0 }
 0x11e   : > { %2858 = vmatprep.mubr.msk.f32.mxu1 %vm413_vm0, %v4328_v57  ;;  %v3862_v57 = vpop.permute.xlu0 %3861 }
 0x11f   : > { %v3864_v27 = vunpack.i.h.bf16 %v3862_v57  ;;  %v3863_v34 = vunpack.i.l.bf16 %v3862_v57 }
 0x120   : > { %3312 = vmatpush1.bf16.msra.mxu0 %v3311_v17  ;;  %3345 = vmatpush1.bf16.msra.mxu1 %v3311_v17  ;;  %v3898_v17 = vunpack.i.l.bf16 %v3897_v56 }
 0x121   : > { %3313 = vmatprep.subr.bf16.mxu0 %v4127_v0  ;;  %3346 = vmatprep.subr.bf16.mxu1 %v4127_v0  ;;  %v3323_v3 = vpack.c.bf16 %v3864_v27, %v3863_v34  ;;  %v3917_v34 = vpop.permute.xlu1 %3916 }
 0x122   : > { %v3872_v39 = vpop.permute.xlu0 %3871  ;;  %v3386_v4 = vpack.c.bf16 %v3899_v63, %v3898_v17  ;;  %v3918_v28 = vunpack.i.l.bf16 %v3917_v34 }
 0x123   : > { %v3874_v18 = vunpack.i.h.bf16 %v3872_v39  ;;  %v3873_v59 = vunpack.i.l.bf16 %v3872_v39  ;;  %v4073_v39 = vld [vmem:[%s4212_s13 + $0xf8] sm:$0xff] }
 0x124   : > { %3315 = vmatpush1.bf16.msra.mxu0 %v3314_v41  ;;  %3348 = vmatpush1.bf16.msra.mxu1 %v3314_v41 }
 0x125   : > { %3316 = vmatprep.subr.bf16.mxu0 %v4127_v0  ;;  %3349 = vmatprep.subr.bf16.mxu1 %v4127_v0  ;;  %v3362_v60 = vpack.c.bf16 %v3874_v18, %v3873_v59 }
 0x126   : > { %v3882_v32 = vpop.permute.xlu0 %3881 }
 0x128   : > { %3318 = vmatpush1.bf16.msra.mxu0 %v3317_v2  ;;  %3351 = vmatpush1.bf16.msra.mxu1 %v3350_v51  ;;  %v3909_v51 = vunpack.i.h.bf16 %v3907_v1  ;;  %v3908_v2 = vunpack.i.l.bf16 %v3907_v1 }
 0x129   : > { %3319 = vmatprep.subr.bf16.mxu0 %v4127_v0  ;;  %3352 = vmatprep.subr.bf16.mxu1 %v4127_v0 }
 0x12a   : > { %v3892_v42 = vpop.permute.xlu0 %3891  ;;  %v3395_v27 = vpack.c.bf16 %v3909_v51, %v3908_v2 }
 0x12b   : > { %v3894_v15 = vunpack.i.h.bf16 %v3892_v42  ;;  %v3893_v19 = vunpack.i.l.bf16 %v3892_v42 }
 0x12c   : > { %3321 = vmatpush1.bf16.msra.mxu0 %v4356_v7  ;;  %3354 = vmatpush1.bf16.msra.mxu1 %v4356_v7  ;;  %v3329_v7 = vpack.c.bf16 %v4406_v36, %v4403_v35  ;;  %v3884_v35 = vunpack.i.h.bf16 %v3882_v32  ;;  %v3883_v36 = vunpack.i.l.bf16 %v3882_v32 }
 0x12d   : > { %3322 = vmatprep.subr.bf16.mxu0 %v4127_v0  ;;  %3355 = vmatprep.subr.bf16.mxu1 %v4127_v0 }
 0x12e   : > { %v3338_v61 = vpack.c.bf16 %v3884_v35, %v3883_v36  ;;  %v3902_v20 = vpop.permute.xlu0 %3901 }
 0x12f   : > { %v3904_v40 = vunpack.i.h.bf16 %v3902_v20  ;;  %v3903_v41 = vunpack.i.l.bf16 %v3902_v20 }
 0x130   : > { %3324 = vmatpush1.bf16.msra.mxu0 %v3323_v3  ;;  %3357 = vmatpush1.bf16.msra.mxu1 %v3323_v3  ;;  %v3919_v3 = vunpack.i.h.bf16 %v3917_v34 }
 0x131   : > { %3325 = vmatprep.subr.bf16.mxu0 %v4127_v0  ;;  %3358 = vmatprep.subr.bf16.mxu1 %v4127_v0 }
 0x132   : > { %v3912_v57 = vpop.permute.xlu0 %3911  ;;  %v3434_v30 = vpack.c.bf16 %v3919_v3, %v3918_v28 }
 0x133   : > { %v3914_v58 = vunpack.i.h.bf16 %v3912_v57  ;;  %v3913_v62 = vunpack.i.l.bf16 %v3912_v57 }
 0x134   : > { %3327 = vmatpush1.bf16.msra.mxu0 %v3326_v5  ;;  %3360 = vmatpush1.bf16.msra.mxu1 %v3326_v5 }
 0x135   : > { %3328 = vmatprep.subr.bf16.mxu0 %v4127_v0  ;;  %3361 = vmatprep.subr.bf16.mxu1 %v4127_v0  ;;  %v3398_v29 = vpack.c.bf16 %v3914_v58, %v3913_v62 }
 0x136   : > { %v3922_v18 = vpop.permute.xlu0 %3921 }
 0x137   : > { %v3924_v59 = vunpack.i.h.bf16 %v3922_v18 }
 0x138   : > { %3330 = vmatpush1.bf16.msra.mxu0 %v3329_v7  ;;  %3363 = vmatpush1.bf16.msra.mxu1 %v3362_v60  ;;  %v3923_v60 = vunpack.i.l.bf16 %v3922_v18  ;;  %v3927_v7 = vpop.permute.xlu1 %3926 }
 0x139   : > { %3331 = vmatprep.subr.bf16.mxu0 %v4127_v0  ;;  %3364 = vmatprep.subr.bf16.mxu1 %v4127_v0  ;;  %v3929_v10 = vunpack.i.h.bf16 %v3927_v7  ;;  %v3928_v11 = vunpack.i.l.bf16 %v3927_v7 }
 0x13a   : > { %v3407_v16 = vpack.c.bf16 %v3924_v59, %v3923_v60  ;;  %v3932_v32 = vpop.permute.xlu0 %3931  ;;  %v4078_v59 = vld [vmem:[%s4210_s12 + $0xfa] sm:$0xff] }
 0x13b   : > { %v3934_v35 = vunpack.i.h.bf16 %v3932_v32  ;;  %v3933_v36 = vunpack.i.l.bf16 %v3932_v32  ;;  %v4079_v60 = vld [vmem:[%s4212_s13 + $0xfa] sm:$0xff] }
 0x13c   : > { %3333 = vmatpush1.bf16.msra.mxu0 %v4388_v26  ;;  %3366 = vmatpush1.bf16.msra.mxu1 %v4388_v26  ;;  %v3377_v26 = vpack.c.bf16 %v4420_v45, %v4417_v43  ;;  %v4731_v43 = vld [vmem:[%s4991_s4 + $0x8] sm:$0xff]  ;;  %v3383_v45 = vpack.c.bf16 %v3894_v15, %v3893_v19  ;;  %v3473_v7 = vpack.c.bf16 %v4079_v60, %v4078_v59 }
 0x13d   : > { %3334 = vmatprep.subr.bf16.mxu0 %v4127_v0  ;;  %3367 = vmatprep.subr.bf16.mxu1 %v4127_v0  ;;  %v3446_v38 = vpack.c.bf16 %v3934_v35, %v3933_v36 }
 0x13e   : > { %v3942_v33 = vpop.permute.xlu0 %3941 }
 0x13f   : > { %v3944_v56 = vunpack.i.h.bf16 %v3942_v33 }
 0x140   : > { %3336 = vmatpush1.bf16.msra.mxu0 %v3335_v25  ;;  %3369 = vmatpush1.bf16.msra.mxu1 %v3335_v25  ;;  %v3410_v25 = vpack.c.bf16 %v3929_v10, %v3928_v11 }
 0x141   : > { %3337 = vmatprep.subr.bf16.mxu0 %v4127_v0  ;;  %3370 = vmatprep.subr.bf16.mxu1 %v4127_v0 }
 0x142   : > { %v3952_v15 = vpop.permute.xlu0 %3951 }
 0x143   : > { %v3954_v1 = vunpack.i.h.bf16 %v3952_v15  ;;  %v3953_v51 = vunpack.i.l.bf16 %v3952_v15 }
 0x144   : > { %3339 = vmatpush1.bf16.msra.mxu0 %v3338_v61  ;;  %3372 = vmatpush1.bf16.msra.mxu1 %v3338_v61  ;;  %v4075_v61 = vld [vmem:[%s4212_s13 + $0xa] sm:$0xff] }
 0x145   : > { %3373 = vmatprep.subr.bf16.mxu1 %v4127_v0  ;;  %3376 = vmatprep.subr.bf16.mxu0 %v4127_v0  ;;  %v3467_v62 = vpack.c.bf16 %v3954_v1, %v3953_v51  ;;  %v3533_v1 = vpack.c.bf16 %v4577_v24, %v4574_v21 }
 0x146   : > { %v3962_v63 = vpop.permute.xlu0 %3961 }
 0x147   : > { %1198 = vmatmul.mubr.f32.vlgmr.msra.gmra.mrb[6].mxu0 %v4535_v22 }
 0x148   : > { %3375 = vmatpush1.bf16.msra.mxu1 %v3374_v44  ;;  %3378 = vmatpush1.bf16.msra.mxu0 %v3377_v26  ;;  %v3937_v44 = vpop.permute.xlu1 %3936 }
 0x149   : > { %3379 = vmatprep.subr.bf16.mxu0 %v4127_v0  ;;  %3412 = vmatprep.subr.bf16.mxu1 %v4127_v0  ;;  %v3939_v26 = vunpack.i.h.bf16 %v3937_v44  ;;  %v3938_v42 = vunpack.i.l.bf16 %v3937_v44 }
 0x14a   : > { %2896 = vmatprep.mubr.msk.f32.mxu0 %vm413_vm0, %v4731_v43 }
 0x14b   : > { %1287 = vmatmul.mubr.f32.vlgmr.msra.gmra.mrb[6].mxu1 %v4535_v22  ;;  %v3455_v19 = vpack.c.bf16 %v3939_v26, %v3938_v42  ;;  %v4081_v42 = vld [vmem:[%s4212_s13 + $0xc] sm:$0xff] }
 0x14c   : > { %3381 = vmatpush1.bf16.msra.mxu0 %v4424_v52  ;;  %3414 = vmatpush1.bf16.msra.mxu1 %v4424_v52  ;;  %v3422_v52 = vpack.c.bf16 %v3904_v40, %v3903_v41  ;;  %v3947_v17 = vpop.permute.xlu1 %3946  ;;  %v4076_v41 = vld [vmem:[%s4210_s12 + $0x82] sm:$0xff] }
 0x14d   : > { %3382 = vmatprep.subr.bf16.mxu0 %v4127_v0  ;;  %3415 = vmatprep.subr.bf16.mxu1 %v4127_v0 }
 0x14e   : > { %2897 = vmatprep.mubr.msk.f32.mxu1 %vm413_vm0, %v4731_v43 }
 0x150   : > { %3384 = vmatpush1.bf16.msra.mxu0 %v3383_v45  ;;  %3417 = vmatpush1.bf16.msra.mxu1 %v3383_v45  ;;  %v3943_v45 = vunpack.i.l.bf16 %v3942_v33  ;;  %v3957_v57 = vpop.permute.xlu1 %3956 }
 0x151   : > { %3385 = vmatprep.subr.bf16.mxu0 %v4127_v0  ;;  %3418 = vmatprep.subr.bf16.mxu1 %v4127_v0  ;;  %v3959_v34 = vunpack.i.h.bf16 %v3957_v57 }
 0x152   : > { %v3458_v20 = vpack.c.bf16 %v3944_v56, %v3943_v45  ;;  %v4839_v56 = vld [vmem:[%s4991_s4] sm:$0xff] }
 0x154   : > { %3387 = vmatpush1.bf16.msra.mxu0 %v3386_v4  ;;  %3420 = vmatpush1.bf16.msra.mxu1 %v3386_v4  ;;  %v3948_v4 = vunpack.i.l.bf16 %v3947_v17  ;;  %v3967_v10 = vpop.permute.xlu1 %3966 }
 0x155   : > { %3388 = vmatprep.subr.bf16.mxu0 %v4127_v0  ;;  %3421 = vmatprep.subr.bf16.mxu1 %v4127_v0  ;;  %v3969_v11 = vunpack.i.h.bf16 %v3967_v10  ;;  %v3968_v32 = vunpack.i.l.bf16 %v3967_v10 }
 0x158   : > { %3390 = vmatpush1.bf16.msra.mxu0 %v3389_v55  ;;  %3423 = vmatpush1.bf16.msra.mxu1 %v3422_v52  ;;  %v4077_v52 = vld [vmem:[%s4212_s13 + $0x82] sm:$0xff] }
 0x159   : > { %3391 = vmatprep.subr.bf16.mxu0 %v4127_v0  ;;  %3424 = vmatprep.subr.bf16.mxu1 %v4127_v0  ;;  %v3461_v55 = vpack.c.bf16 %v4077_v52, %v4076_v41 }
 0x15c   : > { %3393 = vmatpush1.bf16.msra.mxu0 %v4444_v9  ;;  %3426 = vmatpush1.bf16.msra.mxu1 %v4444_v9  ;;  %v4072_v9 = vld [vmem:[%s4210_s12 + $0xf8] sm:$0xff] }
 0x15d   : > { %3394 = vmatprep.subr.bf16.mxu0 %v4127_v0  ;;  %3427 = vmatprep.subr.bf16.mxu1 %v4127_v0  ;;  %v3401_v5 = vpack.c.bf16 %v4073_v39, %v4072_v9 }
 0x160   : > { %3396 = vmatpush1.bf16.msra.mxu0 %v3395_v27  ;;  %3429 = vmatpush1.bf16.msra.mxu1 %v3395_v27 }
 0x161   : > { %3397 = vmatprep.subr.bf16.mxu0 %v4127_v0  ;;  %3430 = vmatprep.subr.bf16.mxu1 %v4127_v0 }
 0x164   : > { %3399 = vmatpush1.bf16.msra.mxu0 %v3398_v29  ;;  %3432 = vmatpush1.bf16.msra.mxu1 %v3398_v29  ;;  %v3958_v29 = vunpack.i.l.bf16 %v3957_v57 }
 0x165   : > { %3400 = vmatprep.subr.bf16.mxu0 %v4127_v0  ;;  %3433 = vmatprep.subr.bf16.mxu1 %v4127_v0 }
 0x166   : > { %v3470_v39 = vpack.c.bf16 %v3959_v34, %v3958_v29 }
 0x168   : > { %3402 = vmatpush1.bf16.msra.mxu0 %v3401_v5  ;;  %3435 = vmatpush1.bf16.msra.mxu1 %v3434_v30  ;;  %v3963_v5 = vunpack.i.l.bf16 %v3962_v63 }
 0x169   : > { %3403 = vmatprep.subr.bf16.mxu0 %v4127_v0  ;;  %3436 = vmatprep.subr.bf16.mxu1 %v4127_v0 }
 0x16c   : > { %3405 = vmatpush1.bf16.msra.mxu0 %v4453_v31  ;;  %3438 = vmatpush1.bf16.msra.mxu1 %v4453_v31  ;;  %v4074_v31 = vld [vmem:[%s4210_s12 + $0xa] sm:$0xff] }
 0x16d   : > { %3406 = vmatprep.subr.bf16.mxu0 %v4127_v0  ;;  %3439 = vmatprep.subr.bf16.mxu1 %v4127_v0  ;;  %v3449_v23 = vpack.c.bf16 %v4075_v61, %v4074_v31  ;;  %v3977_v31 = vpop.permute.xlu1 %3976 }
 0x16e   : > { %v3978_v33 = vunpack.i.l.bf16 %v3977_v31 }
 0x170   : > { %3408 = vmatpush1.bf16.msra.mxu0 %v3407_v16  ;;  %3441 = vmatpush1.bf16.msra.mxu1 %v3407_v16 }
 0x171   : > { %3409 = vmatprep.subr.bf16.mxu0 %v4127_v0  ;;  %3442 = vmatprep.subr.bf16.mxu1 %v4127_v0 }
 0x174   : > { %3411 = vmatpush1.bf16.msra.mxu0 %v3410_v25  ;;  %3444 = vmatpush1.bf16.msra.mxu1 %v3410_v25 }
 0x175   : > { %3445 = vmatprep.subr.bf16.mxu1 %v4127_v0  ;;  %3448 = vmatprep.subr.bf16.mxu0 %v4127_v0 }
 0x177   : > { %1440 = vmatmul.mubr.f32.vlgmr.msra.gmra.mrb[8].mxu0 %v4535_v22 }
 0x178   : > { %3447 = vmatpush1.bf16.msra.mxu1 %v3446_v38  ;;  %3450 = vmatpush1.bf16.msra.mxu0 %v3449_v23  ;;  %v3479_v38 = vpack.c.bf16 %v3969_v11, %v3968_v32  ;;  %v3979_v23 = vunpack.i.h.bf16 %v3977_v31 }
 0x179   : > { %3451 = vmatprep.subr.bf16.mxu0 %v4127_v0  ;;  %3484 = vmatprep.subr.bf16.mxu1 %v4127_v0 }
 0x17a   : > { %2934 = vmatprep.mubr.msk.f32.mxu0 %vm413_vm0, %v4731_v43  ;;  %v3518_v26 = vpack.c.bf16 %v3979_v23, %v3978_v33 }
 0x17b   : > { %1528 = vmatmul.mubr.f32.vlgmr.msra.gmra.mrb[8].mxu1 %v4535_v22  ;;  %v3949_v22 = vunpack.i.h.bf16 %v3947_v17  ;;  %v3987_v17 = vpop.permute.xlu1 %3986 }
 0x17c   : > { %3453 = vmatpush1.bf16.msra.mxu0 %v4462_v8  ;;  %3486 = vmatpush1.bf16.msra.mxu1 %v4462_v8  ;;  %v4786_v8 = vpop.permute.xlu0 %3971 }
 0x17d   : > { %3454 = vmatprep.subr.bf16.mxu0 %v4127_v0  ;;  %3487 = vmatprep.subr.bf16.mxu1 %v4127_v0  ;;  %v3494_v40 = vpack.c.bf16 %v3949_v22, %v3948_v4  ;;  %v3974_v35 = vunpack.i.h.bf16 %v4786_v8  ;;  %v3973_v36 = vunpack.i.l.bf16 %v4786_v8  ;;  %v3989_v22 = vunpack.i.h.bf16 %v3987_v17 }
 0x17e   : > { %2935 = vmatprep.mubr.msk.f32.mxu1 %vm413_vm0, %v4731_v43  ;;  %v3988_v4 = vunpack.i.l.bf16 %v3987_v17 }
 0x17f   : > { %v3482_v61 = vpack.c.bf16 %v3974_v35, %v3973_v36  ;;  %v3997_v51 = vpop.permute.xlu1 %3996 }
 0x180   : > { %3456 = vmatpush1.bf16.msra.mxu0 %v3455_v19  ;;  %3489 = vmatpush1.bf16.msra.mxu1 %v3455_v19  ;;  %v4792_v2 = vpop.permute.xlu0 %3981  ;;  %v3530_v52 = vpack.c.bf16 %v3989_v22, %v3988_v4  ;;  %v3998_v57 = vunpack.i.l.bf16 %v3997_v51  ;;  %v4086_v22 = vld [vmem:[%s4212_s13 + $0x86] sm:$0xff] }
 0x181   : > { %3457 = vmatprep.subr.bf16.mxu0 %v4127_v0  ;;  %3490 = vmatprep.subr.bf16.mxu1 %v4127_v0  ;;  %v3984_v45 = vunpack.i.h.bf16 %v4792_v2 }
 0x184   : > { %3459 = vmatpush1.bf16.msra.mxu0 %v3458_v20  ;;  %3492 = vmatpush1.bf16.msra.mxu1 %v3458_v20  ;;  %v4804_v28 = vpop.permute.xlu0 %3991 }
 0x185   : > { %3460 = vmatprep.subr.bf16.mxu0 %v4127_v0  ;;  %3493 = vmatprep.subr.bf16.mxu1 %v4127_v0  ;;  %v3993_v41 = vunpack.i.l.bf16 %v4804_v28 }
 0x188   : > { %3462 = vmatpush1.bf16.msra.mxu0 %v3461_v55  ;;  %3495 = vmatpush1.bf16.msra.mxu1 %v3494_v40  ;;  %v4812_v16 = vpop.permute.xlu0 %4001  ;;  %v3994_v40 = vunpack.i.h.bf16 %v4804_v28 }
 0x189   : > { %3463 = vmatprep.subr.bf16.mxu0 %v4127_v0  ;;  %3496 = vmatprep.subr.bf16.mxu1 %v4127_v0  ;;  %v4004_v34 = vunpack.i.h.bf16 %v4812_v16  ;;  %v4003_v29 = vunpack.i.l.bf16 %v4812_v16  ;;  %v4084_v16 = vld [vmem:[%s4212_s13 + $0xfc] sm:$0xff] }
 0x18a   : > { %v4796_v27 = vpop.f32.mrb[0].mxu0  ;;  %v3566_v55 = vpack.c.bf16 %v3994_v40, %v3993_v41 }
 0x18b   : > { %v485_v58 = vpop.f32.mrb[1].mxu0 }
 0x18c   : > { %3465 = vmatpush1.bf16.msra.mxu0 %v4492_v37  ;;  %3498 = vmatpush1.bf16.msra.mxu1 %v4492_v37  ;;  %v3964_v37 = vunpack.i.h.bf16 %v3962_v63  ;;  %v4818_v25 = vpop.permute.xlu0 %4011  ;;  %v3983_v63 = vunpack.i.l.bf16 %v4792_v2  ;;  %v3999_v2 = vunpack.i.h.bf16 %v3997_v51 }
 0x18d   : > { %3466 = vmatprep.subr.bf16.mxu0 %v4127_v0  ;;  %3499 = vmatprep.subr.bf16.mxu1 %v4127_v0  ;;  %v4014_v32 = vunpack.i.h.bf16 %v4818_v25  ;;  %v4013_v35 = vunpack.i.l.bf16 %v4818_v25 }
 0x18e   : > { %v4802_v3 = vpop.f32.mrb[0].mxu1  ;;  %v3506_v18 = vpack.c.bf16 %v3964_v37, %v3963_v5  ;;  %v3527_v20 = vpack.c.bf16 %v3984_v45, %v3983_v63  ;;  %v3539_v28 = vpack.c.bf16 %v3999_v2, %v3998_v57 }
 0x18f   : > { %v575_v30 = vmax.f32 %v4796_v27, %v4802_v3  ;;  %v573_v9 = vpop.f32.mrb[1].mxu1 }
 0x190   : > { %3468 = vmatpush1.bf16.msra.mxu0 %v3467_v62  ;;  %3501 = vmatpush1.bf16.msra.mxu1 %v3467_v62  ;;  %v4826_v44 = vpop.permute.xlu0 %4021  ;;  %v4007_v9 = vpop.permute.xlu1 %4006 }
 0x191   : > { %3469 = vmatprep.subr.bf16.mxu0 %v4127_v0  ;;  %3502 = vmatprep.subr.bf16.mxu1 %v4127_v0  ;;  %v4009_v5 = vunpack.i.h.bf16 %v4007_v9  ;;  %v4024_v25 = vunpack.i.h.bf16 %v4826_v44  ;;  %v4023_v23 = vunpack.i.l.bf16 %v4826_v44 }
 0x194   : > { %3471 = vmatpush1.bf16.msra.mxu0 %v3470_v39  ;;  %3504 = vmatpush1.bf16.msra.mxu1 %v3470_v39  ;;  %v4834_v19 = vpop.permute.xlu0 %4031  ;;  %v4017_v36 = vpop.permute.xlu1 %4016 }
 0x195   : > { %3472 = vmatprep.subr.bf16.mxu0 %v4127_v0  ;;  %3505 = vmatprep.subr.bf16.mxu1 %v4127_v0  ;;  %v4019_v31 = vunpack.i.h.bf16 %v4017_v36 }
 0x198   : > { %3474 = vmatpush1.bf16.msra.mxu0 %v3473_v7  ;;  %3507 = vmatpush1.bf16.msra.mxu1 %v3506_v18  ;;  %v4851_v8 = vpop.permute.xlu0 %4041  ;;  %v4008_v18 = vunpack.i.l.bf16 %v4007_v9  ;;  %v4083_v7 = vld [vmem:[%s4210_s12 + $0xfc] sm:$0xff] }
 0x199   : > { %3475 = vmatprep.subr.bf16.mxu0 %v4127_v0  ;;  %3508 = vmatprep.subr.bf16.mxu1 %v4127_v0  ;;  %v3545_v10 = vpack.c.bf16 %v4084_v16, %v4083_v7  ;;  %v4043_v40 = vunpack.i.l.bf16 %v4851_v8 }
 0x19a   : > { %v3578_v60 = vpack.c.bf16 %v4009_v5, %v4008_v18 }
 0x19c   : > { %3477 = vmatpush1.bf16.msra.mxu0 %v4481_v12  ;;  %3510 = vmatpush1.bf16.msra.mxu1 %v4481_v12  ;;  %v4080_v12 = vld [vmem:[%s4210_s12 + $0xc] sm:$0xff] }
 0x19d   : > { %3478 = vmatprep.subr.bf16.mxu0 %v4127_v0  ;;  %3511 = vmatprep.subr.bf16.mxu1 %v4127_v0  ;;  %v3521_v15 = vpack.c.bf16 %v4081_v42, %v4080_v12  ;;  %v4027_v12 = vpop.permute.xlu1 %4026 }
 0x19e   : > { %v4029_v44 = vunpack.i.h.bf16 %v4027_v12  ;;  %v4028_v42 = vunpack.i.l.bf16 %v4027_v12 }
 0x1a0   : > { %3480 = vmatpush1.bf16.msra.mxu0 %v3479_v38  ;;  %3513 = vmatpush1.bf16.msra.mxu1 %v3479_v38  ;;  %v3551_v38 = vpack.c.bf16 %v4014_v32, %v4013_v35 }
 0x1a1   : > { %3481 = vmatprep.subr.bf16.mxu0 %v4127_v0  ;;  %3514 = vmatprep.subr.bf16.mxu1 %v4127_v0  ;;  %v4037_v45 = vpop.permute.xlu1 %4036 }
 0x1a2   : > { %v4039_v17 = vunpack.i.h.bf16 %v4037_v45 }
 0x1a4   : > { %3483 = vmatpush1.bf16.msra.mxu0 %v3482_v61  ;;  %3516 = vmatpush1.bf16.msra.mxu1 %v3482_v61  ;;  %v4018_v61 = vunpack.i.l.bf16 %v4017_v36 }
 0x1a5   : > { %3517 = vmatprep.subr.bf16.mxu1 %v4127_v0  ;;  %3520 = vmatprep.subr.bf16.mxu0 %v4127_v0  ;;  %v4047_v41 = vpop.permute.xlu1 %4046 }
 0x1a6   : > { %v3554_v33 = vpack.c.bf16 %v4019_v31, %v4018_v61  ;;  %v4049_v51 = vunpack.i.h.bf16 %v4047_v41  ;;  %v4048_v2 = vunpack.i.l.bf16 %v4047_v41 }
 0x1a7   : > { %1674 = vmatmul.mubr.f32.vlgmr.msra.gmra.mrb[10].mxu0 %v4839_v56 }
 0x1a8   : > { %3519 = vmatpush1.bf16.msra.mxu1 %v3518_v26  ;;  %3522 = vmatpush1.bf16.msra.mxu0 %v3521_v15  ;;  %v3590_v26 = vpack.c.bf16 %v4024_v25, %v4023_v23  ;;  %v3599_v15 = vpack.c.bf16 %v4029_v44, %v4028_v42 }
 0x1a9   : > { %3523 = vmatprep.subr.bf16.mxu0 %v4127_v0  ;;  %3556 = vmatprep.subr.bf16.mxu1 %v4127_v0 }
 0x1aa   : > { %2973 = vmatprep.mubr.msk.f32.mxu0 %vm413_vm0, %v4731_v43 }
 0x1ab   : > { %1763 = vmatmul.mubr.f32.vlgmr.msra.gmra.mrb[10].mxu1 %v4839_v56 }
 0x1ac   : > { %3525 = vmatpush1.bf16.msra.mxu0 %v4558_v50  ;;  %3558 = vmatpush1.bf16.msra.mxu1 %v4558_v50  ;;  %v4861_v50 = vpop.permute.xlu0 %4051 }
 0x1ad   : > { %3526 = vmatprep.subr.bf16.mxu0 %v4127_v0  ;;  %3559 = vmatprep.subr.bf16.mxu1 %v4127_v0 }
 0x1ae   : > { %2974 = vmatprep.mubr.msk.f32.mxu1 %vm413_vm0, %v4731_v43 }
 0x1b0   : > { %3528 = vmatpush1.bf16.msra.mxu0 %v3527_v20  ;;  %3561 = vmatpush1.bf16.msra.mxu1 %v3527_v20  ;;  %v4868_v58 = vpop.permute.xlu0 %4061 }
 0x1b1   : > { %3529 = vmatprep.subr.bf16.mxu0 %v4127_v0  ;;  %3562 = vmatprep.subr.bf16.mxu1 %v4127_v0 }
 0x1b4   : > { %3531 = vmatpush1.bf16.msra.mxu0 %v3530_v52  ;;  %3564 = vmatpush1.bf16.msra.mxu1 %v3530_v52  ;;  %v4882_v37 = vpop.permute.xlu0 %813 }
 0x1b5   : > { %3532 = vmatprep.subr.bf16.mxu0 %v4127_v0  ;;  %3565 = vmatprep.subr.bf16.mxu1 %v4127_v0 }
 0x1b8   : > { %3534 = vmatpush1.bf16.msra.mxu0 %v3533_v1  ;;  %3567 = vmatpush1.bf16.msra.mxu1 %v3566_v55 }
 0x1b9   : > { %3535 = vmatprep.subr.bf16.mxu0 %v4127_v0  ;;  %3568 = vmatprep.subr.bf16.mxu1 %v4127_v0 }
 0x1ba   : > { %v717_v62 = vpop.f32.mrb[2].mxu0 }
 0x1bb   : > { %v721_v21 = vmax.f32 %v575_v30, %v717_v62  ;;  %v719_v24 = vpop.f32.mrb[3].mxu0  ;;  %v3542_v30 = vpack.c.bf16 %v4004_v34, %v4003_v29  ;;  %v3614_v34 = vpack.c.bf16 %v4049_v51, %v4048_v2  ;;  %v3617_v29 = vpack.c.bf16 %v4665_v48, %v4662_v47 }
 0x1bc   : > { %3537 = vmatpush1.bf16.msra.mxu0 %v4503_v6  ;;  %3570 = vmatpush1.bf16.msra.mxu1 %v4503_v6  ;;  %v4053_v24 = vunpack.i.l.bf16 %v4861_v50 }
 0x1bd   : > { %3538 = vmatprep.subr.bf16.mxu0 %v4127_v0  ;;  %3571 = vmatprep.subr.bf16.mxu1 %v4127_v0 }
 0x1be   : > { %v806_v39 = vpop.f32.mrb[2].mxu1 }
 0x1bf   : > { %v810_v27 = vmax.f32 %v721_v21, %v806_v39  ;;  %v808_v3 = vpop.f32.mrb[3].mxu1  ;;  %v4054_v21 = vunpack.i.h.bf16 %v4861_v50  ;;  %v4064_v39 = vunpack.i.h.bf16 %v4868_v58 }
 0x1c0   : > { %3540 = vmatpush1.bf16.msra.mxu0 %v3539_v28  ;;  %3573 = vmatpush1.bf16.msra.mxu1 %v3539_v28  ;;  %v4057_v28 = vpop.permute.xlu1 %4056 }
 0x1c1   : > { %v816_v6 = vadd.f32 %v4882_v37, %v810_v27  ;;  %3541 = vmatprep.subr.bf16.mxu0 %v4127_v0  ;;  %3574 = vmatprep.subr.bf16.mxu1 %v4127_v0  ;;  %v4059_v50 = vunpack.i.h.bf16 %v4057_v28  ;;  %v4058_v9 = vunpack.i.l.bf16 %v4057_v28  ;;  %v4063_v27 = vunpack.i.l.bf16 %v4868_v58 }
 0x1c3   : > { %vm817_vm2 = vcmp.ge.f32.partialorder %v816_v6, 0.0  ;;  %v818_v59 = vmul.f32 0.01, %v816_v6  ;;  %v3623_v3 = vpack.c.bf16 %v4059_v50, %v4058_v9  ;;  %v3626_v48 = vpack.c.bf16 %v4064_v39, %v4063_v27 }
 0x1c4   : > { %3543 = vmatpush1.bf16.msra.mxu0 %v3542_v30  ;;  %3576 = vmatpush1.bf16.msra.mxu1 %v3542_v30  ;;  %v4067_v47 = vpop.permute.xlu1 %4066 }
 0x1c5   : > { %v819_v11 = vsel %vm817_vm2, %v816_v6, %v818_v59  ;;  %3544 = vmatprep.subr.bf16.mxu0 %v4127_v0  ;;  %3577 = vmatprep.subr.bf16.mxu1 %v4127_v0  ;;  %v4069_v30 = vunpack.i.h.bf16 %v4067_v47  ;;  %v4068_v5 = vunpack.i.l.bf16 %v4067_v47 }
 0x1c6   : > { %821 = vst.msk [vmem:[%s4890_s29] sm:$0x3f] %vm820_vm1, %v819_v11 }
 0x1c7   : > { %v3662_v58 = vpack.c.bf16 %v4069_v30, %v4068_v5 }
 0x1c8   : > { %3546 = vmatpush1.bf16.msra.mxu0 %v3545_v10  ;;  %3579 = vmatpush1.bf16.msra.mxu1 %v3578_v60 }
 0x1c9   : > { %3547 = vmatprep.subr.bf16.mxu0 %v4127_v0  ;;  %3580 = vmatprep.subr.bf16.mxu1 %v4127_v0 }
 0x1cc   : > { %3549 = vmatpush1.bf16.msra.mxu0 %v4605_v54  ;;  %3582 = vmatpush1.bf16.msra.mxu1 %v4605_v54  ;;  %v3593_v54 = vpack.c.bf16 %v4620_v49, %v4617_v14  ;;  %v4034_v14 = vunpack.i.h.bf16 %v4834_v19  ;;  %v4033_v49 = vunpack.i.l.bf16 %v4834_v19  ;;  %v4038_v19 = vunpack.i.l.bf16 %v4037_v45 }
 0x1cd   : > { %3550 = vmatprep.subr.bf16.mxu0 %v4127_v0  ;;  %3583 = vmatprep.subr.bf16.mxu1 %v4127_v0 }
 0x1ce   : > { %v3602_v63 = vpack.c.bf16 %v4034_v14, %v4033_v49  ;;  %v3638_v20 = vpack.c.bf16 %v4039_v17, %v4038_v19 }
 0x1d0   : > { %3552 = vmatpush1.bf16.msra.mxu0 %v3551_v38  ;;  %3585 = vmatpush1.bf16.msra.mxu1 %v3551_v38 }
 0x1d1   : > { %3553 = vmatprep.subr.bf16.mxu0 %v4127_v0  ;;  %3586 = vmatprep.subr.bf16.mxu1 %v4127_v0 }
 0x1d4   : > { %3555 = vmatpush1.bf16.msra.mxu0 %v3554_v33  ;;  %3588 = vmatpush1.bf16.msra.mxu1 %v3554_v33 }
 0x1d5   : > { %3589 = vmatprep.subr.bf16.mxu1 %v4127_v0  ;;  %3592 = vmatprep.subr.bf16.mxu0 %v4127_v0 }
 0x1d7   : > { %1916 = vmatmul.mubr.f32.vlgmr.msra.gmra.mrb[12].mxu0 %v4839_v56 }
 0x1d8   : > { %3591 = vmatpush1.bf16.msra.mxu1 %v3590_v26  ;;  %3594 = vmatpush1.bf16.msra.mxu0 %v3593_v54 }
 0x1d9   : > { %3595 = vmatprep.subr.bf16.mxu0 %v4127_v0  ;;  %3628 = vmatprep.subr.bf16.mxu1 %v4127_v0 }
 0x1da   : > { %3011 = vmatprep.mubr.msk.f32.mxu0 %vm413_vm0, %v4731_v43 }
 0x1db   : > { %2004 = vmatmul.mubr.f32.vlgmr.msra.gmra.mrb[12].mxu1 %v4839_v56 }
 0x1dc   : > { %3597 = vmatpush1.bf16.msra.mxu0 %v4526_v46  ;;  %3630 = vmatpush1.bf16.msra.mxu1 %v4526_v46  ;;  %v4085_v46 = vld [vmem:[%s4210_s12 + $0x86] sm:$0xff] }
 0x1dd   : > { %3598 = vmatprep.subr.bf16.mxu0 %v4127_v0  ;;  %3631 = vmatprep.subr.bf16.mxu1 %v4127_v0  ;;  %v3605_v4 = vpack.c.bf16 %v4086_v22, %v4085_v46 }
 0x1de   : > { %3012 = vmatprep.mubr.msk.f32.mxu1 %vm413_vm0, %v4731_v43  ;;  %v4044_v43 = vunpack.i.h.bf16 %v4851_v8 }
 0x1e0   : > { %3600 = vmatpush1.bf16.msra.mxu0 %v3599_v15  ;;  %3633 = vmatpush1.bf16.msra.mxu1 %v3599_v15  ;;  %v3611_v1 = vpack.c.bf16 %v4044_v43, %v4043_v40 }
 0x1e1   : > { %3601 = vmatprep.subr.bf16.mxu0 %v4127_v0  ;;  %3634 = vmatprep.subr.bf16.mxu1 %v4127_v0 }
 0x1e4   : > { %3603 = vmatpush1.bf16.msra.mxu0 %v3602_v63  ;;  %3636 = vmatpush1.bf16.msra.mxu1 %v3602_v63 }
 0x1e5   : > { %3604 = vmatprep.subr.bf16.mxu0 %v4127_v0  ;;  %3637 = vmatprep.subr.bf16.mxu1 %v4127_v0 }
 0x1e8   : > { %3606 = vmatpush1.bf16.msra.mxu0 %v3605_v4  ;;  %3639 = vmatpush1.bf16.msra.mxu1 %v3638_v20 }
 0x1e9   : > { %3607 = vmatprep.subr.bf16.mxu0 %v4127_v0  ;;  %3640 = vmatprep.subr.bf16.mxu1 %v4127_v0 }
 0x1ea   : > { %v965_v52 = vpop.f32.mrb[4].mxu0 }
 0x1eb   : > { %v967_v55 = vpop.f32.mrb[5].mxu0 }
 0x1ec   : > { %3609 = vmatpush1.bf16.msra.mxu0 %v4650_v13  ;;  %3642 = vmatpush1.bf16.msra.mxu1 %v4650_v13  ;;  %v3650_v13 = vpack.c.bf16 %v4054_v21, %v4053_v24 }
 0x1ed   : > { %3610 = vmatprep.subr.bf16.mxu0 %v4127_v0  ;;  %3643 = vmatprep.subr.bf16.mxu1 %v4127_v0 }
 0x1ee   : > { %v1053_v8 = vpop.f32.mrb[4].mxu1 }
 0x1ef   : > { %v1057_v57 = vmax.f32 %v965_v52, %v1053_v8  ;;  %v1055_v62 = vpop.f32.mrb[5].mxu1 }
 0x1f0   : > { %3612 = vmatpush1.bf16.msra.mxu0 %v3611_v1  ;;  %3645 = vmatpush1.bf16.msra.mxu1 %v3611_v1 }
 0x1f1   : > { %3613 = vmatprep.subr.bf16.mxu0 %v4127_v0  ;;  %3646 = vmatprep.subr.bf16.mxu1 %v4127_v0 }
 0x1f4   : > { %3615 = vmatpush1.bf16.msra.mxu0 %v3614_v34  ;;  %3648 = vmatpush1.bf16.msra.mxu1 %v3614_v34 }
 0x1f5   : > { %3616 = vmatprep.subr.bf16.mxu0 %v4127_v0  ;;  %3649 = vmatprep.subr.bf16.mxu1 %v4127_v0 }
 0x1f8   : > { %3618 = vmatpush1.bf16.msra.mxu0 %v3617_v29  ;;  %3651 = vmatpush1.bf16.msra.mxu1 %v3650_v13 }
 0x1f9   : > { %3619 = vmatprep.subr.bf16.mxu0 %v4127_v0  ;;  %3652 = vmatprep.subr.bf16.mxu1 %v4127_v0 }
 0x1fc   : > { %3621 = vmatpush1.bf16.msra.mxu0 %v4560_v53  ;;  %3654 = vmatpush1.bf16.msra.mxu1 %v4560_v53 }
 0x1fd   : > { %3622 = vmatprep.subr.bf16.mxu0 %v4127_v0  ;;  %3655 = vmatprep.subr.bf16.mxu1 %v4127_v0 }
 0x200   : > { %3624 = vmatpush1.bf16.msra.mxu0 %v3623_v3  ;;  %3657 = vmatpush1.bf16.msra.mxu1 %v3623_v3 }
 0x201   : > { %3625 = vmatprep.subr.bf16.mxu0 %v4127_v0  ;;  %3658 = vmatprep.subr.bf16.mxu1 %v4127_v0 }
 0x204   : > { %3627 = vmatpush1.bf16.msra.mxu0 %v3626_v48  ;;  %3660 = vmatpush1.bf16.msra.mxu1 %v3626_v48 }
 0x205   : > { %3661 = vmatprep.subr.bf16.mxu1 %v4127_v0 }
 0x207   : > { %2150 = vmatmul.mubr.f32.vlgmr.msra.gmra.mrb[14].mxu0 %v4839_v56 }
 0x208   : > { %3663 = vmatpush1.bf16.msra.mxu1 %v3662_v58 }
 0x20b   : > { %2239 = vmatmul.mubr.f32.vlgmr.msra.gmra.mrb[14].mxu1 %v4839_v56 }
 0x21a   : > { %v1199_v53 = vpop.f32.mrb[6].mxu0 }
 0x21b   : > { %v1203_v18 = vmax.f32 %v1057_v57, %v1199_v53  ;;  %v1201_v6 = vpop.f32.mrb[7].mxu0 }
 0x21e   : > { %v1288_v59 = vpop.f32.mrb[6].mxu1 }
 0x21f   : > { %v1292_v60 = vmax.f32 %v1203_v18, %v1288_v59  ;;  %v1290_v7 = vpop.f32.mrb[7].mxu1 }
 0x221   : > { %v1293_v16 = vadd.f32 %v1292_v60, %v4882_v37 }
 0x223   : > { %vm1294_vm3 = vcmp.ge.f32.partialorder %v1293_v16, 0.0  ;;  %v1295_v10 = vmul.f32 0.01, %v1293_v16 }
 0x225   : > { %v1296_v11 = vsel %vm1294_vm3, %v1293_v16, %v1295_v10 }
 0x226   : > { %2859 = vst.msk [vmem:[%s4890_s29 + $0x8] sm:$0x3f] %vm820_vm1, %v1296_v11 }
 0x24a   : > { %v1441_v0 = vpop.f32.mrb[8].mxu0 }
 0x24b   : > { %v1443_v32 = vpop.f32.mrb[9].mxu0 }
 0x24e   : > { %v1529_v35 = vpop.f32.mrb[8].mxu1 }
 0x24f   : > { %v1533_v36 = vmax.f32 %v1441_v0, %v1529_v35  ;;  %v1531_v38 = vpop.f32.mrb[9].mxu1 }
 0x27a   : > { %v1675_v56 = vpop.f32.mrb[10].mxu0 }
 0x27b   : > { %v1679_v31 = vmax.f32 %v1533_v36, %v1675_v56  ;;  %v1677_v61 = vpop.f32.mrb[11].mxu0 }
 0x27e   : > { %v1764_v25 = vpop.f32.mrb[10].mxu1 }
 0x27f   : > { %v1768_v23 = vmax.f32 %v1679_v31, %v1764_v25  ;;  %v1766_v33 = vpop.f32.mrb[11].mxu1 }
 0x281   : > { %v1769_v26 = vadd.f32 %v1768_v23, %v4882_v37 }
 0x283   : > { %vm1770_vm4 = vcmp.ge.f32.partialorder %v1769_v26, 0.0  ;;  %v1771_v54 = vmul.f32 0.01, %v1769_v26 }
 0x285   : > { %v1772_v12 = vsel %vm1770_vm4, %v1769_v26, %v1771_v54 }
 0x286   : > { %2936 = vst.msk [vmem:[%s4890_s29 + $0x10] sm:$0x3f] %vm820_vm1, %v1772_v12 }
 0x2aa   : > { %v1917_v44 = vpop.f32.mrb[12].mxu0 }
 0x2ab   : > { %v1919_v42 = vpop.f32.mrb[13].mxu0 }
 0x2ae   : > { %v2005_v14 = vpop.f32.mrb[12].mxu1 }
 0x2af   : > { %v2009_v49 = vmax.f32 %v1917_v44, %v2005_v14  ;;  %v2007_v15 = vpop.f32.mrb[13].mxu1 }
 0x2da   : > { %v2151_v45 = vpop.f32.mrb[14].mxu0 }
 0x2db   : > { %v2155_v63 = vmax.f32 %v2009_v49, %v2151_v45  ;;  %v2153_v17 = vpop.f32.mrb[15].mxu0 }
 0x2de   : > { %v2240_v19 = vpop.f32.mrb[14].mxu1 }
 0x2df   : > { %v2244_v20 = vmax.f32 %v2155_v63, %v2240_v19  ;;  %v2242_v46 = vpop.f32.mrb[15].mxu1 }
 0x2e1   : > { %v2245_v22 = vadd.f32 %v2244_v20, %v4882_v37 }
 0x2e3   : > { %vm2246_vm5 = vcmp.ge.f32.partialorder %v2245_v22, 0.0  ;;  %v2247_v4 = vmul.f32 0.01, %v2245_v22 }
 0x2e5   : > { %v2248_v43 = vsel %vm2246_vm5, %v2245_v22, %v2247_v4 }
 0x2e6   : > { %3013 = vst.msk [vmem:[%s4890_s29 + $0x18] sm:$0x3f] %vm820_vm1, %v2248_v43 }
 0x2e7 PF: > { %s16_s25 = sadd.s32 1, %s4125_s25   ;;  %s4995_s21 = smov %s4117_s23 }
 0x2e8   : > { %p13_p7 = scmp.ge.s32.totalorder %s16_s25, 16   ;;  %s4996_s22 = smov %s4121_s24 }
 0x2e9   : > { %s4997_s23 = smov %s5000_s26  ;;  %s4998_s24 = smov %s5004_s27 }
 0x2ea   :  { %15 = sbr.rel (!%p13_p7) target bundleno = 3 (0x3), region = 182 }

// kernel: classifyer_cnn_forward.4
= control target key start
LH: loop header
LB: loop body
LE: loop exit
PB: predicated region body
PF: predicated region fallthrough
CT: control target
= control target key end

     0   :  { %s2630_s21 = smov 0   ;;  %s2632_s22 = smov 0   ;;  %s3117_s0 = inlined_call_operand.vmem [shape: f32[2,6,28,7], index: 0, kind: input, shape index: {}]   ;;  %s3118_s1 = inlined_call_operand.vmem [shape: f32[2,6,28,7], index: 1, kind: input, shape index: {}]   ;;  %s3119_s2 = inlined_call_operand.vmem [shape: f32[2,6,28,7], index: 2, kind: input, shape index: {}]   ;;  %s3120_s3 = inlined_call_operand.vmem [shape: f32[2,6,28,7], index: 3, kind: input, shape index: {}]   ;;  %s3121_s4 = inlined_call_operand.vmem [shape: f32[16,384], index: 4, kind: input, shape index: {}]   ;;  %s3122_s5 = inlined_call_operand.vmem [shape: f32[16,1], index: 5, kind: input, shape index: {}]   ;;  %s3123_s6 = inlined_call_operand.vmem [shape: f32[2,5,16,5], index: 6, kind: output, shape index: {}]  }
   0x1   :  { %s2634_s23 = smov 0   ;;  %s2636_s24 = smov 0  }
   0x2   :  { %s2638_s25 = smov 0  }
   0x3 LB: > { %s25_s26 = sadd.s32 1, %s2582_s23  ;;  %s28_s27 = sadd.s32 1, %s2586_s24  ;;  %s2590_s25 = sphi %s2638_s25, %s16_s25   ;;  %s2586_s24 = sphi %s2636_s24, %s3127_s24   ;;  %s2582_s23 = sphi %s2634_s23, %s3126_s23   ;;  %s2578_s22 = sphi %s2632_s22, %s3125_s22   ;;  %s2574_s21 = sphi %s2630_s21, %s3124_s21  }
   0x4   : > { %p26_p0 = scmp.ge.s32.totalorder %s25_s26, 5  ;;  %p1607_p1 = scmp.ge.s32.totalorder %s2590_s25, 1 }
   0x5   : > { %p256_p2 = scmp.lt.s32.totalorder %s2590_s25, 11 }
   0x6   : > { %s3129_s26 = smov (%p26_p0, %s25_s26), 0  ;;  %s3131_s27 = smov (!%p26_p0, %s28_s27), %s2586_s24 }
   0x7   : > { %p257_p3 = pnand %p1607_p1, %p256_p2  ;;  %p30_p4 = scmp.ge.s32.totalorder %s3131_s27, 2 }
   0x8   : > { %p305_p5 = scmp.lt.s32.totalorder (!%p257_p3), %s2578_s22, 1  ;;  %s1614_s29 = sshll.u32 (!%p257_p3), %s2574_s21, 2  ;;  %v2790_v59 = vld [vmem:[%s3121_s4 + $0x8] sm:$0xff] (!%p257_p3)  ;;  %v2798_v61 = vld [vmem:[%s3121_s4 + $0x10] sm:$0xff] (!%p257_p3)  ;;  %vm1338_vm0 = vcmask (!%p257_p3), 39936  }
   0x9   : > { %s3133_s27 = smov (%p30_p4, %s3131_s27), 0  ;;  %260 = sbr.rel (%p257_p3) target bundleno = 497 (0x1f1), region = 44 }
   0xa   : > { %556 = vmatprep.mubr.f32.mxu0 (!%p257_p3), %v2790_v59  ;;  %1961 = vmatprep.mubr.f32.mxu1 (!%p257_p3), %v2798_v61  ;;  %s2593_s10 = smov (!%p257_p3), 126   ;;  %p327_p6 = scmp.lt.s32.totalorder (!%p257_p3), %s2574_s21, 4 }
  0x10   : > { %s3135_s22 = smov (!%p305_p5, %s2578_s22), 1  ;;  %s3137_s21 = smov (!%p327_p6, %s2574_s21), 4 }
  0x11   : > { %s2325_s28 = smul.u32 192, %s3135_s22  ;;  %s1612_s7 = sshll.u32 %s3137_s21, 1 }
  0x13   : > { %s309_s8 = scalar_lea.vmem %s3117_s0, %s2325_s28  ;;  %s314_s11 = scalar_lea.vmem %s3118_s1, %s2325_s28 }
  0x14   : > { %s2672_s12 = scalar_lea.vmem %s309_s8, %s1614_s29  ;;  %s2674_s13 = scalar_lea.vmem %s314_s11, %s1614_s29 }
  0x15   : > { %v1624_v0 = vld [vmem:[%s2672_s12 + $0x40] sm:$0xff]  ;;  %s319_s16 = scalar_lea.vmem %s3119_s2, %s2325_s28  ;;  %s324_s19 = scalar_lea.vmem %s3120_s3, %s2325_s28 }
  0x16   : > { %v1626_v1 = vld [vmem:[%s2674_s13 + $0x40] sm:$0xff]  ;;  %s2687_s20 = scalar_lea.vmem %s319_s16, %s1614_s29  ;;  %s2689_s30 = scalar_lea.vmem %s324_s19, %s1614_s29 }
  0x17   : > { %v344_v2 = vld [vmem:[%s2672_s12] sm:$0xff]  ;;  %v2685_v3 = vpack.i.bf16 %v1626_v1, %v1624_v0  ;;  %v2069_v5 = vpack.c.bf16 %v1626_v1, %v1624_v0  ;;  %s2592_s28 = smov 127   ;;  %s2326_s29 = smul.u32 10, %s3135_s22 }
  0x18   : > { %v346_v4 = vld [vmem:[%s2674_s13] sm:$0xff] }
  0x19   : > { %v1628_v6 = vld [vmem:[%s2687_s20 + $0x40] sm:$0xff]  ;;  %v2694_v8 = vpack.i.bf16 %v346_v4, %v344_v2  ;;  %2371 = vrot.lane.b32.xlu0 %v2685_v3, %s2592_s28  ;;  %2070 = vmatprep.subr.bf16.mxu0 %v2069_v5  ;;  %v2071_v14 = vpack.c.bf16 %v346_v4, %v344_v2  ;;  %s331_s8 = sadd.s32 %s2326_s29, %s1612_s7 }
  0x1a   : > { %v1630_v7 = vld [vmem:[%s2689_s30 + $0x40] sm:$0xff]  ;;  %s1613_s9 = sshll.u32 %s331_s8, 3 }
  0x1b   : > { %v348_v9 = vld [vmem:[%s2687_s20] sm:$0xff]  ;;  %v2380_v10 = vpack.i.bf16 %v1630_v7, %v1628_v6  ;;  %v2699_v11 = vpack.c.bf16 %v1630_v7, %v1628_v6  ;;  %2072 = vmatpush3.bf16.msra.mxu0 %v2071_v14  ;;  %s333_s22 = scalar_lea.vmem %s3123_s6, %s1613_s9 }
  0x1c   : > { %v350_v12 = vld [vmem:[%s2689_s30] sm:$0xff] }
  0x1d   : > { %v1640_v13 = vld [vmem:[%s2672_s12 + $0x80] sm:$0xff]  ;;  %2381 = vrot.lane.b32.xlu1 %v2380_v10, %s2592_s28  ;;  %v2385_v18 = vpack.i.bf16 %v350_v12, %v348_v9  ;;  %v2716_v22 = vpack.c.bf16 %v350_v12, %v348_v9  ;;  %2074 = vmatprep.subr.bf16.mxu0 %v2699_v11 }
  0x1e   : > { %v1642_v15 = vld [vmem:[%s2674_s13 + $0x80] sm:$0xff]  ;;  %2376 = vrot.lane.b32.xlu0 %v2694_v8, %s2592_s28 }
  0x1f   : > { %v1644_v16 = vld [vmem:[%s2687_s20 + $0x80] sm:$0xff]  ;;  %v2101_v23 = vpack.c.bf16 %v1642_v15, %v1640_v13  ;;  %v2390_v29 = vpack.i.bf16 %v1642_v15, %v1640_v13  ;;  %2076 = vmatpush3.bf16.msra.mxu0 %v2716_v22 }
  0x20   : > { %v1646_v17 = vld [vmem:[%s2689_s30 + $0x80] sm:$0xff] }
  0x21   : > { %v2708_v19 = vld [vmem:[%s2672_s12 + $0x60] sm:$0xff]  ;;  %v2718_v24 = vpack.c.bf16 %v1646_v17, %v1644_v16  ;;  %2102 = vmatprep.subr.bf16.mxu1 %v2101_v23  ;;  %2386 = vrot.lane.b32.xlu1 %v2385_v18, %s2592_s28  ;;  %v2395_v37 = vpack.i.bf16 %v1646_v17, %v1644_v16 }
  0x22   : > { %v2711_v20 = vld [vmem:[%s2674_s13 + $0x60] sm:$0xff]  ;;  %2104 = vmatpush3.bf16.msra.mxu1 %v2101_v23  ;;  %2391 = vrot.lane.b32.xlu0 %v2390_v29, %s2592_s28 }
  0x23   : > { %v2714_v21 = vld [vmem:[%s2672_s12 + $0x20] sm:$0xff]  ;;  %v2085_v28 = vpack.c.bf16 %v2711_v20, %v2708_v19  ;;  %2106 = vmatprep.subr.bf16.mxu1 %v2718_v24  ;;  %v2400_v44 = vpack.i.bf16 %v2711_v20, %v2708_v19 }
  0x24   : > { %v2721_v25 = vld [vmem:[%s2674_s13 + $0x20] sm:$0xff] }
  0x25   : > { %v1636_v26 = vld [vmem:[%s2687_s20 + $0x60] sm:$0xff]  ;;  %v2087_v32 = vpack.c.bf16 %v2721_v25, %v2714_v21  ;;  %2396 = vrot.lane.b32.xlu1 %v2395_v37, %s2592_s28  ;;  %v2405_v49 = vpack.i.bf16 %v2721_v25, %v2714_v21 }
  0x26   : > { %v1638_v27 = vld [vmem:[%s2689_s30 + $0x60] sm:$0xff]  ;;  %2108 = vmatpush3.bf16.msra.mxu1 %v2718_v24  ;;  %2401 = vrot.lane.b32.xlu0 %v2400_v44, %s2592_s28 }
  0x27   : > { %v1652_v30 = vld [vmem:[%s2687_s20 + $0xa0] sm:$0xff]  ;;  %v2734_v33 = vpack.c.bf16 %v1638_v27, %v1636_v26  ;;  %v2410_v52 = vpack.i.bf16 %v1638_v27, %v1636_v26 }
  0x28   : > { %v1654_v31 = vld [vmem:[%s2689_s30 + $0xa0] sm:$0xff] }
  0x29   : > { %v1620_v34 = vld [vmem:[%s2687_s20 + $0x20] sm:$0xff]  ;;  %v2738_v36 = vpack.c.bf16 %v1654_v31, %v1652_v30  ;;  %2406 = vrot.lane.b32.xlu1 %v2405_v49, %s2592_s28  ;;  %v2425_v60 = vpack.i.bf16 %v1654_v31, %v1652_v30 }
  0x2a   : > { %v1622_v35 = vld [vmem:[%s2689_s30 + $0x20] sm:$0xff]  ;;  %2411 = vrot.lane.b32.xlu0 %v2410_v52, %s2592_s28 }
  0x2b   : > { %v1648_v38 = vld [vmem:[%s2672_s12 + $0xa0] sm:$0xff]  ;;  %v2744_v40 = vpack.c.bf16 %v1622_v35, %v1620_v34  ;;  %v2415_v57 = vpack.i.bf16 %v1622_v35, %v1620_v34 }
  0x2c   : > { %v1650_v39 = vld [vmem:[%s2674_s13 + $0xa0] sm:$0xff] }
  0x2d   : > { %v1660_v41 = vld [vmem:[%s2687_s20 + $0x2] sm:$0xff]  ;;  %v2749_v43 = vpack.c.bf16 %v1650_v39, %v1648_v38  ;;  %v2420_v58 = vpack.i.bf16 %v1650_v39, %v1648_v38  ;;  %2416 = vrot.lane.b32.xlu1 %v2415_v57, %s2592_s28 }
  0x2e   : > { %v1662_v42 = vld [vmem:[%s2689_s30 + $0x2] sm:$0xff] }
  0x2f   : > { %v2754_v45 = vpack.c.bf16 %v1662_v42, %v1660_v41  ;;  %v1692_v46 = vld [vmem:[%s2687_s20 + $0x82] sm:$0xff]  ;;  %2421 = vrot.lane.b32.xlu0 %v2420_v58, %s2592_s28  ;;  %v2475_v9 = vpack.i.bf16 %v1662_v42, %v1660_v41 }
  0x30   : > { %v1694_v47 = vld [vmem:[%s2689_s30 + $0x82] sm:$0xff] }
  0x31   : > { %v2758_v48 = vpack.c.bf16 %v1694_v47, %v1692_v46  ;;  %v2765_v50 = vld [vmem:[%s2687_s20 + $0x22] sm:$0xff]  ;;  %2426 = vrot.lane.b32.xlu1 %v2425_v60, %s2592_s28  ;;  %v2485_v14 = vpack.i.bf16 %v1694_v47, %v1692_v46 }
  0x32   : > { %v2768_v51 = vld [vmem:[%s2689_s30 + $0x22] sm:$0xff] }
  0x33   : > { %v2773_v53 = vpack.c.bf16 %v2768_v51, %v2765_v50  ;;  %v2776_v54 = vld [vmem:[%s2687_s20 + $0xa2] sm:$0xff]  ;;  %2431 = vrot.lane.b32.xlu0 %v2685_v3, %s2593_s10  ;;  %v2505_v35 = vpack.i.bf16 %v2768_v51, %v2765_v50 }
  0x34   : > { %v2779_v55 = vld [vmem:[%s2689_s30 + $0xa2] sm:$0xff] }
  0x35   : > { %v2783_v56 = vpack.c.bf16 %v2779_v55, %v2776_v54  ;;  %2436 = vrot.lane.b32.xlu1 %v2694_v8, %s2593_s10  ;;  %v2808_v62 = vld [vmem:[%s2672_s12 + $0x42] sm:$0xff]  ;;  %v2515_v41 = vpack.i.bf16 %v2779_v55, %v2776_v54 }
  0x36   : > { %v2811_v63 = vld [vmem:[%s2674_s13 + $0x42] sm:$0xff] }
  0x37   : > { %2441 = vrot.lane.b32.xlu0 %v2390_v29, %s2593_s10  ;;  %v2815_v0 = vld [vmem:[%s2672_s12 + $0x2] sm:$0xff]  ;;  %v2460_v2 = vpack.i.bf16 %v2811_v63, %v2808_v62  ;;  %v2197_v29 = vpack.c.bf16 %v2811_v63, %v2808_v62 }
  0x38   : > { %v2818_v1 = vld [vmem:[%s2674_s13 + $0x2] sm:$0xff] }
  0x39   : > { %2446 = vrot.lane.b32.xlu1 %v2400_v44, %s2593_s10  ;;  %v1676_v3 = vld [vmem:[%s2687_s20 + $0x42] sm:$0xff]  ;;  %v2465_v5 = vpack.i.bf16 %v2818_v1, %v2815_v0  ;;  %v2199_v34 = vpack.c.bf16 %v2818_v1, %v2815_v0 }
  0x3a   : > { %v1678_v4 = vld [vmem:[%s2689_s30 + $0x42] sm:$0xff] }
  0x3b   : > { %2451 = vrot.lane.b32.xlu0 %v2405_v49, %s2593_s10  ;;  %v2470_v6 = vpack.i.bf16 %v1678_v4, %v1676_v3  ;;  %v1688_v7 = vld [vmem:[%s2672_s12 + $0x82] sm:$0xff]  ;;  %v2865_v38 = vpack.c.bf16 %v1678_v4, %v1676_v3 }
  0x3c   : > { %v1690_v8 = vld [vmem:[%s2674_s13 + $0x82] sm:$0xff] }
  0x3d   : > { %2456 = vrot.lane.b32.xlu1 %v2420_v58, %s2593_s10  ;;  %v2480_v10 = vpack.i.bf16 %v1690_v8, %v1688_v7  ;;  %v2834_v12 = vld [vmem:[%s2672_s12 + $0x62] sm:$0xff]  ;;  %v2867_v39 = vpack.c.bf16 %v1690_v8, %v1688_v7  ;;  %v2594_v7 = vmov 0  }
  0x3e   : > { %v2837_v13 = vld [vmem:[%s2674_s13 + $0x62] sm:$0xff]  ;;  %2550 = vset.pattern.permute.xlu0 %v2594_v7  ;;  %2551 = vset.pattern.permute.xlu1 %v2594_v7 }
  0x3f   : > { %2461 = vrot.lane.b32.xlu0 %v2460_v2, %s2592_s28  ;;  %v2841_v15 = vld [vmem:[%s2672_s12 + $0x22] sm:$0xff]  ;;  %v2490_v17 = vpack.i.bf16 %v2837_v13, %v2834_v12  ;;  %v2213_v42 = vpack.c.bf16 %v2837_v13, %v2834_v12 }
  0x40   : > { %v2844_v16 = vld [vmem:[%s2674_s13 + $0x22] sm:$0xff] }
  0x41   : > { %2466 = vrot.lane.b32.xlu1 %v2465_v5, %s2592_s28  ;;  %v1684_v18 = vld [vmem:[%s2687_s20 + $0x62] sm:$0xff]  ;;  %v2495_v26 = vpack.i.bf16 %v2844_v16, %v2841_v15  ;;  %v2215_v44 = vpack.c.bf16 %v2844_v16, %v2841_v15 }
  0x42   : > { %v1686_v23 = vld [vmem:[%s2689_s30 + $0x62] sm:$0xff] }
  0x43   : > { %2471 = vrot.lane.b32.xlu0 %v2470_v6, %s2592_s28  ;;  %v2500_v27 = vpack.i.bf16 %v1686_v23, %v1684_v18  ;;  %v1696_v30 = vld [vmem:[%s2672_s12 + $0xa2] sm:$0xff]  ;;  %v2883_v46 = vpack.c.bf16 %v1686_v23, %v1684_v18 }
  0x44   : > { %v1698_v31 = vld [vmem:[%s2674_s13 + $0xa2] sm:$0xff] }
  0x45   : > { %2476 = vrot.lane.b32.xlu1 %v2475_v9, %s2592_s28  ;;  %v2510_v37 = vpack.i.bf16 %v1698_v31, %v1696_v30  ;;  %v2885_v47 = vpack.c.bf16 %v1698_v31, %v1696_v30  ;;  %v340_v3 = vld [vmem:[%s3122_s5] sm:$0xff]  ;;  %v341_v4 = vld [vmem:[%s3122_s5 + $0x8] sm:$0xff] }
  0x47   : > { %2481 = vrot.lane.b32.xlu0 %v2480_v10, %s2592_s28 }
  0x49   : > { %2486 = vrot.lane.b32.xlu1 %v2485_v14, %s2592_s28 }
  0x4b   : > { %2491 = vrot.lane.b32.xlu0 %v2490_v17, %s2592_s28 }
  0x4d   : > { %2496 = vrot.lane.b32.xlu1 %v2495_v26, %s2592_s28 }
  0x4f   : > { %2501 = vrot.lane.b32.xlu0 %v2500_v27, %s2592_s28 }
  0x51   : > { %2506 = vrot.lane.b32.xlu1 %v2505_v35, %s2592_s28 }
  0x53   : > { %2511 = vrot.lane.b32.xlu0 %v2510_v37, %s2592_s28 }
  0x55   : > { %2516 = vrot.lane.b32.xlu1 %v2515_v41, %s2592_s28 }
  0x57   : > { %2521 = vrot.lane.b32.xlu0 %v2460_v2, %s2593_s10 }
  0x59   : > { %2526 = vrot.lane.b32.xlu1 %v2465_v5, %s2593_s10 }
  0x5b   : > { %2531 = vrot.lane.b32.xlu0 %v2480_v10, %s2593_s10 }
  0x5d   : > { %2536 = vrot.lane.b32.xlu1 %v2490_v17, %s2593_s10 }
  0x5f   : > { %2541 = vrot.lane.b32.xlu0 %v2495_v26, %s2593_s10 }
  0x61   : > { %2546 = vrot.lane.b32.xlu1 %v2510_v37, %s2593_s10 }
  0x63   : > { %1322 = vperm.xlu0 %2550, %v340_v3  }
  0x65   : > { %1327 = vperm.xlu1 %2551, %v341_v4  }
  0x8b   : > { %v2372_v49 = vpop.permute.xlu0 %2371 }
  0x8c   : > { %v2374_v50 = vunpack.i.h.bf16 %v2372_v49  ;;  %v2373_v51 = vunpack.i.l.bf16 %v2372_v49 }
  0x8e   : > { %v2888_v54 = vpack.c.bf16 %v2374_v50, %v2373_v51 }
  0x8f   : > { %v2382_v52 = vpop.permute.xlu1 %2381 }
  0x90   : > { %v2384_v55 = vunpack.i.h.bf16 %v2382_v52  ;;  %v2383_v57 = vunpack.i.l.bf16 %v2382_v52  ;;  %v2377_v58 = vpop.permute.xlu0 %2376  ;;  %2078 = vmatprep.subr.bf16.mxu0 %v2888_v54 }
  0x91   : > { %v2379_v60 = vunpack.i.h.bf16 %v2377_v58  ;;  %v2378_v2 = vunpack.i.l.bf16 %v2377_v58 }
  0x92   : > { %v2897_v5 = vpack.c.bf16 %v2384_v55, %v2383_v57 }
  0x93   : > { %v2387_v6 = vpop.permute.xlu1 %2386  ;;  %v2899_v8 = vpack.c.bf16 %v2379_v60, %v2378_v2 }
  0x94   : > { %v2389_v9 = vunpack.i.h.bf16 %v2387_v6  ;;  %v2388_v10 = vunpack.i.l.bf16 %v2387_v6  ;;  %v2392_v14 = vpop.permute.xlu0 %2391 }
  0x95   : > { %v2394_v18 = vunpack.i.h.bf16 %v2392_v14  ;;  %v2393_v23 = vunpack.i.l.bf16 %v2392_v14  ;;  %2080 = vmatpush3.bf16.msra.mxu0 %v2899_v8 }
  0x96   : > { %v2901_v17 = vpack.c.bf16 %v2389_v9, %v2388_v10  ;;  %2082 = vmatprep.subr.bf16.mxu0 %v2897_v5 }
  0x97   : > { %v2397_v26 = vpop.permute.xlu1 %2396  ;;  %v2905_v27 = vpack.c.bf16 %v2394_v18, %v2393_v23  ;;  %v2953_v18 = vld [vmem:[%s3121_s4 + $0x20] sm:$0xff] }
  0x98   : > { %v2399_v30 = vunpack.i.h.bf16 %v2397_v26  ;;  %v2398_v31 = vunpack.i.l.bf16 %v2397_v26  ;;  %v2402_v35 = vpop.permute.xlu0 %2401  ;;  %v2962_v26 = vld [vmem:[%s3121_s4 + $0x18] sm:$0xff] }
  0x99   : > { %2084 = vmatpush3.bf16.msra.mxu0 %v2901_v17  ;;  %2110 = vmatprep.subr.bf16.mxu1 %v2905_v27  ;;  %v2404_v41 = vunpack.i.h.bf16 %v2402_v35  ;;  %v2403_v49 = vunpack.i.l.bf16 %v2402_v35 }
  0x9a   : > { %v2907_v37 = vpack.c.bf16 %v2399_v30, %v2398_v31  ;;  %2112 = vmatpush3.bf16.msra.mxu1 %v2905_v27  ;;  %2086 = vmatprep.subr.bf16.mxu0 %v2085_v28 }
  0x9b   : > { %v2407_v50 = vpop.permute.xlu1 %2406  ;;  %v2919_v57 = vpack.c.bf16 %v2404_v41, %v2403_v49 }
  0x9c   : > { %2114 = vmatprep.subr.bf16.mxu1 %v2907_v37  ;;  %v2409_v51 = vunpack.i.h.bf16 %v2407_v50  ;;  %v2408_v52 = vunpack.i.l.bf16 %v2407_v50  ;;  %v2412_v55 = vpop.permute.xlu0 %2411 }
  0x9d   : > { %2088 = vmatpush3.bf16.msra.mxu0 %v2087_v32  ;;  %v2414_v58 = vunpack.i.h.bf16 %v2412_v55  ;;  %v2413_v60 = vunpack.i.l.bf16 %v2412_v55 }
  0x9e   : > { %2116 = vmatpush3.bf16.msra.mxu1 %v2907_v37  ;;  %2090 = vmatprep.subr.bf16.mxu0 %v2734_v33  ;;  %v2924_v20 = vpack.c.bf16 %v2409_v51, %v2408_v52 }
  0x9f   : > { %v2417_v19 = vpop.permute.xlu1 %2416  ;;  %2118 = vmatprep.subr.bf16.mxu1 %v2749_v43  ;;  %v2927_v32 = vpack.c.bf16 %v2414_v58, %v2413_v60 }
  0xa0   : > { %v2419_v2 = vunpack.i.h.bf16 %v2417_v19  ;;  %v2418_v3 = vunpack.i.l.bf16 %v2417_v19 }
  0xa1   : > { %v2422_v28 = vpop.permute.xlu0 %2421  ;;  %2092 = vmatpush3.bf16.msra.mxu0 %v2744_v40 }
  0xa2   : > { %v2424_v21 = vunpack.i.h.bf16 %v2422_v28  ;;  %v2423_v25 = vunpack.i.l.bf16 %v2422_v28  ;;  %2094 = vmatprep.subr.bf16.mxu0 %v2919_v57  ;;  %2120 = vmatpush3.bf16.msra.mxu1 %v2749_v43  ;;  %v2934_v10 = vpack.c.bf16 %v2419_v2, %v2418_v3  ;;  %v2946_v43 = vld [vmem:[%s3121_s4] sm:$0xff] }
  0xa3   : > { %v2427_v4 = vpop.permute.xlu1 %2426  ;;  %2122 = vmatprep.subr.bf16.mxu1 %v2738_v36 }
  0xa4   : > { %v2931_v6 = vpack.c.bf16 %v2424_v21, %v2423_v25  ;;  %v2429_v7 = vunpack.i.h.bf16 %v2427_v4  ;;  %v2428_v9 = vunpack.i.l.bf16 %v2427_v4 }
  0xa5   : > { %2096 = vmatpush3.bf16.msra.mxu0 %v2924_v20  ;;  %v2432_v23 = vpop.permute.xlu0 %2431 }
  0xa6   : > { %2098 = vmatprep.subr.bf16.mxu0 %v2927_v32  ;;  %2124 = vmatpush3.bf16.msra.mxu1 %v2738_v36  ;;  %v2939_v14 = vpack.c.bf16 %v2429_v7, %v2428_v9  ;;  %v2434_v30 = vunpack.i.h.bf16 %v2432_v23  ;;  %v2433_v31 = vunpack.i.l.bf16 %v2432_v23 }
  0xa7   : > { %2126 = vmatprep.subr.bf16.mxu1 %v2931_v6  ;;  %v2437_v35 = vpop.permute.xlu1 %2436 }
  0xa8   : > { %v2439_v41 = vunpack.i.h.bf16 %v2437_v35  ;;  %v2438_v49 = vunpack.i.l.bf16 %v2437_v35 }
  0xa9   : > { %2100 = vmatpush3.bf16.msra.mxu0 %v2934_v10 }
  0xaa   : > { %2128 = vmatpush3.bf16.msra.mxu1 %v2931_v6  ;;  %2134 = vmatprep.subr.bf16.mxu0 %v2699_v11  ;;  %v2969_v11 = vld [vmem:[%s3121_s4 + $0x28] sm:$0xff]  ;;  %v2147_v52 = vpack.c.bf16 %v2439_v41, %v2438_v49 }
  0xab   : > { %2130 = vmatprep.subr.bf16.mxu1 %v2939_v14 }
  0xac   : > { %557 = vmatmul.mubr.f32.vlgmr.msra.gmra.mrb[0].mxu0 %v2946_v43 }
  0xad   : > { %2136 = vmatpush3.bf16.msra.mxu0 %v2716_v22  ;;  %561 = vmatprep.mubr.f32.mxu0 %v2953_v18  ;;  %v2442_v22 = vpop.permute.xlu0 %2441 }
  0xae   : > { %2132 = vmatpush3.bf16.msra.mxu1 %v2939_v14  ;;  %2138 = vmatprep.subr.bf16.mxu0 %v2888_v54  ;;  %v2145_v54 = vpack.c.bf16 %v2434_v30, %v2433_v31  ;;  %v2444_v50 = vunpack.i.h.bf16 %v2442_v22  ;;  %v2443_v51 = vunpack.i.l.bf16 %v2442_v22 }
  0xaf   : > { %2166 = vmatprep.subr.bf16.mxu1 %v2718_v24 }
  0xb0   : > { %562 = vmatmul.mubr.f32.gmra.mrb[2].mxu0 %v2962_v26 }
  0xb1   : > { %1962 = vmatmul.mubr.f32.vlgmr.msra.gmra.mrb[0].mxu1 %v2969_v11  ;;  %2140 = vmatpush3.bf16.msra.mxu0 %v2899_v8  ;;  %v2452_v8 = vpop.permute.xlu0 %2451 }
  0xb2   : > { %2142 = vmatprep.subr.bf16.mxu0 %v2897_v5  ;;  %2168 = vmatpush3.bf16.msra.mxu1 %v2718_v24  ;;  %v2177_v5 = vpack.c.bf16 %v2444_v50, %v2443_v51  ;;  %v2447_v24 = vpop.permute.xlu1 %2446  ;;  %v2454_v60 = vunpack.i.h.bf16 %v2452_v8 }
  0xb3   : > { %2170 = vmatprep.subr.bf16.mxu1 %v2905_v27  ;;  %742 = vmatprep.mubr.f32.mxu0 %v2790_v59  ;;  %v2448_v55 = vunpack.i.l.bf16 %v2447_v24 }
  0xb4   : > { %1996 = vmatprep.mubr.f32.mxu1 %v2798_v61 }
  0xb5   : > { %2144 = vmatpush3.bf16.msra.mxu0 %v2901_v17  ;;  %v2449_v17 = vunpack.i.h.bf16 %v2447_v24  ;;  %v2462_v58 = vpop.permute.xlu0 %2461 }
  0xb6   : > { %2172 = vmatpush3.bf16.msra.mxu1 %v2905_v27  ;;  %2146 = vmatprep.subr.bf16.mxu0 %v2145_v54  ;;  %v2457_v27 = vpop.permute.xlu1 %2456  ;;  %v2463_v3 = vunpack.i.l.bf16 %v2462_v58 }
  0xb7   : > { %2174 = vmatprep.subr.bf16.mxu1 %v2907_v37 }
  0xb9   : > { %2148 = vmatpush3.bf16.msra.mxu0 %v2147_v52  ;;  %v2472_v2 = vpop.permute.xlu0 %2471 }
  0xba   : > { %2176 = vmatpush3.bf16.msra.mxu1 %v2907_v37  ;;  %2150 = vmatprep.subr.bf16.mxu0 %v2734_v33  ;;  %v2453_v37 = vunpack.i.l.bf16 %v2452_v8  ;;  %v2161_v33 = vpack.c.bf16 %v2449_v17, %v2448_v55  ;;  %v2467_v19 = vpop.permute.xlu1 %2466  ;;  %v2474_v7 = vunpack.i.h.bf16 %v2472_v2  ;;  %v2473_v9 = vunpack.i.l.bf16 %v2472_v2 }
  0xbb   : > { %2178 = vmatprep.subr.bf16.mxu1 %v2177_v5  ;;  %v2468_v4 = vunpack.i.l.bf16 %v2467_v19 }
  0xbc   : > { %v2163_v28 = vpack.c.bf16 %v2454_v60, %v2453_v37 }
  0xbd   : > { %2152 = vmatpush3.bf16.msra.mxu0 %v2744_v40  ;;  %v2459_v40 = vunpack.i.h.bf16 %v2457_v27  ;;  %v2482_v25 = vpop.permute.xlu0 %2481 }
  0xbe   : > { %2154 = vmatprep.subr.bf16.mxu0 %v2919_v57  ;;  %2180 = vmatpush3.bf16.msra.mxu1 %v2177_v5  ;;  %v2458_v57 = vunpack.i.l.bf16 %v2457_v27  ;;  %v2477_v21 = vpop.permute.xlu1 %2476  ;;  %v2484_v62 = vunpack.i.h.bf16 %v2482_v25  ;;  %v2483_v63 = vunpack.i.l.bf16 %v2482_v25 }
  0xbf   : > { %2182 = vmatprep.subr.bf16.mxu1 %v2738_v36 }
  0xc0   : > { %v3017_v23 = vpack.c.bf16 %v2484_v62, %v2483_v63 }
  0xc1   : > { %2156 = vmatpush3.bf16.msra.mxu0 %v2924_v20  ;;  %v2193_v20 = vpack.c.bf16 %v2459_v40, %v2458_v57  ;;  %v2492_v0 = vpop.permute.xlu0 %2491 }
  0xc2   : > { %2158 = vmatprep.subr.bf16.mxu0 %v2927_v32  ;;  %2184 = vmatpush3.bf16.msra.mxu1 %v2738_v36  ;;  %v2464_v36 = vunpack.i.h.bf16 %v2462_v58  ;;  %v2469_v32 = vunpack.i.h.bf16 %v2467_v19  ;;  %v2494_v49 = vunpack.i.h.bf16 %v2492_v0  ;;  %v2493_v54 = vunpack.i.l.bf16 %v2492_v0 }
  0xc3   : > { %2186 = vmatprep.subr.bf16.mxu1 %v2931_v6 }
  0xc4   : > { %v3009_v1 = vpack.c.bf16 %v2469_v32, %v2468_v4  ;;  %v3039_v24 = vpack.c.bf16 %v2494_v49, %v2493_v54 }
  0xc5   : > { %2160 = vmatpush3.bf16.msra.mxu0 %v2934_v10  ;;  %v2478_v10 = vunpack.i.l.bf16 %v2477_v21 }
  0xc6   : > { %2188 = vmatpush3.bf16.msra.mxu1 %v2931_v6  ;;  %2162 = vmatprep.subr.bf16.mxu0 %v2161_v33  ;;  %v3004_v6 = vpack.c.bf16 %v2464_v36, %v2463_v3 }
  0xc7   : > { %2190 = vmatprep.subr.bf16.mxu1 %v2939_v14 }
  0xc9   : > { %2164 = vmatpush3.bf16.msra.mxu0 %v2163_v28 }
  0xca   : > { %2192 = vmatpush3.bf16.msra.mxu1 %v2939_v14  ;;  %2198 = vmatprep.subr.bf16.mxu0 %v2197_v29  ;;  %v2487_v29 = vpop.permute.xlu1 %2486  ;;  %v3013_v14 = vpack.c.bf16 %v2474_v7, %v2473_v9 }
  0xcb   : > { %2194 = vmatprep.subr.bf16.mxu1 %v2193_v20  ;;  %v2489_v30 = vunpack.i.h.bf16 %v2487_v29  ;;  %v2488_v31 = vunpack.i.l.bf16 %v2487_v29 }
  0xcc   : > { %743 = vmatmul.mubr.f32.vlgmr.msra.gmra.mrb[4].mxu0 %v2946_v43 }
  0xcd   : > { %2200 = vmatpush3.bf16.msra.mxu0 %v2199_v34  ;;  %747 = vmatprep.mubr.f32.mxu0 %v2953_v18  ;;  %v2479_v34 = vunpack.i.h.bf16 %v2477_v21  ;;  %v3027_v41 = vpack.c.bf16 %v2489_v30, %v2488_v31 }
  0xce   : > { %2196 = vmatpush3.bf16.msra.mxu1 %v2193_v20  ;;  %2202 = vmatprep.subr.bf16.mxu0 %v2865_v38  ;;  %v2497_v35 = vpop.permute.xlu1 %2496 }
  0xcf   : > { %2230 = vmatprep.subr.bf16.mxu1 %v2867_v39  ;;  %v3022_v22 = vpack.c.bf16 %v2479_v34, %v2478_v10  ;;  %v2499_v52 = vunpack.i.h.bf16 %v2497_v35  ;;  %v2498_v5 = vunpack.i.l.bf16 %v2497_v35 }
  0xd0   : > { %748 = vmatmul.mubr.f32.gmra.mrb[6].mxu0 %v2962_v26 }
  0xd1   : > { %1997 = vmatmul.mubr.f32.vlgmr.msra.gmra.mrb[2].mxu1 %v2969_v11  ;;  %2204 = vmatpush3.bf16.msra.mxu0 %v2754_v45  ;;  %v3044_v55 = vpack.c.bf16 %v2499_v52, %v2498_v5 }
  0xd2   : > { %2206 = vmatprep.subr.bf16.mxu0 %v3004_v6  ;;  %2232 = vmatpush3.bf16.msra.mxu1 %v2867_v39  ;;  %v2502_v39 = vpop.permute.xlu0 %2501  ;;  %v2507_v50 = vpop.permute.xlu1 %2506 }
  0xd3   : > { %2234 = vmatprep.subr.bf16.mxu1 %v2758_v48  ;;  %1044 = vmatprep.mubr.f32.mxu0 %v2790_v59  ;;  %v2504_v8 = vunpack.i.h.bf16 %v2502_v39  ;;  %v2503_v17 = vunpack.i.l.bf16 %v2502_v39  ;;  %v2509_v15 = vunpack.i.h.bf16 %v2507_v50  ;;  %v2508_v16 = vunpack.i.l.bf16 %v2507_v50 }
  0xd4   : > { %2031 = vmatprep.mubr.f32.mxu1 %v2798_v61 }
  0xd5   : > { %2208 = vmatpush3.bf16.msra.mxu0 %v3009_v1  ;;  %v3052_v37 = vpack.c.bf16 %v2509_v15, %v2508_v16 }
  0xd6   : > { %2210 = vmatprep.subr.bf16.mxu0 %v3013_v14  ;;  %2236 = vmatpush3.bf16.msra.mxu1 %v2758_v48  ;;  %v2512_v51 = vpop.permute.xlu0 %2511 }
  0xd7   : > { %2238 = vmatprep.subr.bf16.mxu1 %v3017_v23  ;;  %v2514_v12 = vunpack.i.h.bf16 %v2512_v51  ;;  %v2513_v13 = vunpack.i.l.bf16 %v2512_v51 }
  0xd9   : > { %2212 = vmatpush3.bf16.msra.mxu0 %v3022_v22  ;;  %v3049_v27 = vpack.c.bf16 %v2514_v12, %v2513_v13 }
  0xda   : > { %2240 = vmatpush3.bf16.msra.mxu1 %v3017_v23  ;;  %2214 = vmatprep.subr.bf16.mxu0 %v2213_v42  ;;  %v2517_v42 = vpop.permute.xlu1 %2516 }
  0xdb   : > { %2242 = vmatprep.subr.bf16.mxu1 %v3027_v41  ;;  %v2519_v58 = vunpack.i.h.bf16 %v2517_v42  ;;  %v2518_v60 = vunpack.i.l.bf16 %v2517_v42 }
  0xdd   : > { %2216 = vmatpush3.bf16.msra.mxu0 %v2215_v44  ;;  %v2225_v44 = vpack.c.bf16 %v2504_v8, %v2503_v17  ;;  %v3056_v33 = vpack.c.bf16 %v2519_v58, %v2518_v60 }
  0xde   : > { %2244 = vmatpush3.bf16.msra.mxu1 %v3027_v41  ;;  %2218 = vmatprep.subr.bf16.mxu0 %v2883_v46  ;;  %v2527_v19 = vpop.permute.xlu1 %2526 }
  0xdf   : > { %2246 = vmatprep.subr.bf16.mxu1 %v2885_v47  ;;  %v2529_v28 = vunpack.i.h.bf16 %v2527_v19 }
  0xe1   : > { %2220 = vmatpush3.bf16.msra.mxu0 %v2773_v53 }
  0xe2   : > { %2222 = vmatprep.subr.bf16.mxu0 %v3039_v24  ;;  %2248 = vmatpush3.bf16.msra.mxu1 %v2885_v47  ;;  %v2522_v47 = vpop.permute.xlu0 %2521 }
  0xe3   : > { %2250 = vmatprep.subr.bf16.mxu1 %v2783_v56  ;;  %v2524_v40 = vunpack.i.h.bf16 %v2522_v47  ;;  %v2523_v57 = vunpack.i.l.bf16 %v2522_v47 }
  0xe5   : > { %2224 = vmatpush3.bf16.msra.mxu0 %v3044_v55  ;;  %v2273_v2 = vpack.c.bf16 %v2524_v40, %v2523_v57 }
  0xe6   : > { %2226 = vmatprep.subr.bf16.mxu0 %v2225_v44  ;;  %2252 = vmatpush3.bf16.msra.mxu1 %v2783_v56 }
  0xe7   : > { %2254 = vmatprep.subr.bf16.mxu1 %v3049_v27 }
  0xe9   : > { %2228 = vmatpush3.bf16.msra.mxu0 %v3052_v37 }
  0xea   : > { %2256 = vmatpush3.bf16.msra.mxu1 %v3049_v27  ;;  %2262 = vmatprep.subr.bf16.mxu0 %v2865_v38  ;;  %v2532_v38 = vpop.permute.xlu0 %2531 }
  0xeb   : > { %2258 = vmatprep.subr.bf16.mxu1 %v3056_v33  ;;  %v2534_v20 = vunpack.i.h.bf16 %v2532_v38  ;;  %v2533_v36 = vunpack.i.l.bf16 %v2532_v38 }
  0xec   : > { %1045 = vmatmul.mubr.f32.vlgmr.msra.gmra.mrb[8].mxu0 %v2946_v43 }
  0xed   : > { %2264 = vmatpush3.bf16.msra.mxu0 %v2754_v45  ;;  %1049 = vmatprep.mubr.f32.mxu0 %v2953_v18  ;;  %v2528_v45 = vunpack.i.l.bf16 %v2527_v19  ;;  %v2305_v21 = vpack.c.bf16 %v2534_v20, %v2533_v36 }
  0xee   : > { %2260 = vmatpush3.bf16.msra.mxu1 %v3056_v33  ;;  %2266 = vmatprep.subr.bf16.mxu0 %v3004_v6  ;;  %v2542_v25 = vpop.permute.xlu0 %2541 }
  0xef   : > { %2294 = vmatprep.subr.bf16.mxu1 %v2758_v48  ;;  %v2275_v3 = vpack.c.bf16 %v2529_v28, %v2528_v45  ;;  %v2544_v4 = vunpack.i.h.bf16 %v2542_v25  ;;  %v2543_v6 = vunpack.i.l.bf16 %v2542_v25 }
  0xf0   : > { %1050 = vmatmul.mubr.f32.gmra.mrb[10].mxu0 %v2962_v26 }
  0xf1   : > { %2032 = vmatmul.mubr.f32.vlgmr.msra.gmra.mrb[4].mxu1 %v2969_v11  ;;  %2268 = vmatpush3.bf16.msra.mxu0 %v3009_v1  ;;  %v2291_v9 = vpack.c.bf16 %v2544_v4, %v2543_v6 }
  0xf2   : > { %2270 = vmatprep.subr.bf16.mxu0 %v3013_v14  ;;  %2296 = vmatpush3.bf16.msra.mxu1 %v2758_v48  ;;  %v2537_v48 = vpop.permute.xlu1 %2536  ;;  %v1323_v38 = vpop.permute.xlu0 %1322 }
  0xf3   : > { %2298 = vmatprep.subr.bf16.mxu1 %v3017_v23  ;;  %1232 = vmatprep.mubr.f32.mxu0 %v2790_v59  ;;  %v2539_v59 = vunpack.i.h.bf16 %v2537_v48 }
  0xf4   : > { %2066 = vmatprep.mubr.f32.mxu1 %v2798_v61  ;;  %v2538_v61 = vunpack.i.l.bf16 %v2537_v48 }
  0xf5   : > { %2272 = vmatpush3.bf16.msra.mxu0 %v3022_v22 }
  0xf6   : > { %2300 = vmatpush3.bf16.msra.mxu1 %v3017_v23  ;;  %2274 = vmatprep.subr.bf16.mxu0 %v2273_v2  ;;  %v2547_v32 = vpop.permute.xlu1 %2546 }
  0xf7   : > { %2302 = vmatprep.subr.bf16.mxu1 %v3027_v41  ;;  %v2548_v7 = vunpack.i.l.bf16 %v2547_v32 }
  0xf9   : > { %2276 = vmatpush3.bf16.msra.mxu0 %v2275_v3 }
  0xfa   : > { %2304 = vmatpush3.bf16.msra.mxu1 %v3027_v41  ;;  %2278 = vmatprep.subr.bf16.mxu0 %v2883_v46  ;;  %v2289_v46 = vpack.c.bf16 %v2539_v59, %v2538_v61  ;;  %v1328_v45 = vpop.permute.xlu1 %1327 }
  0xfb   : > { %2306 = vmatprep.subr.bf16.mxu1 %v2305_v21 }
  0xfd   : > { %2280 = vmatpush3.bf16.msra.mxu0 %v2773_v53  ;;  %v2549_v53 = vunpack.i.h.bf16 %v2547_v32 }
  0xfe   : > { %2282 = vmatprep.subr.bf16.mxu0 %v3039_v24  ;;  %2308 = vmatpush3.bf16.msra.mxu1 %v2305_v21 }
  0xff   : > { %2310 = vmatprep.subr.bf16.mxu1 %v2783_v56  ;;  %v2321_v62 = vpack.c.bf16 %v2549_v53, %v2548_v7 }
 0x101   : > { %2284 = vmatpush3.bf16.msra.mxu0 %v3044_v55 }
 0x102   : > { %2286 = vmatprep.subr.bf16.mxu0 %v2225_v44  ;;  %2312 = vmatpush3.bf16.msra.mxu1 %v2783_v56 }
 0x103   : > { %2314 = vmatprep.subr.bf16.mxu1 %v3049_v27 }
 0x105   : > { %2288 = vmatpush3.bf16.msra.mxu0 %v3052_v37 }
 0x106   : > { %2316 = vmatpush3.bf16.msra.mxu1 %v3049_v27  ;;  %2290 = vmatprep.subr.bf16.mxu0 %v2289_v46 }
 0x107   : > { %2318 = vmatprep.subr.bf16.mxu1 %v3056_v33 }
 0x109   : > { %2292 = vmatpush3.bf16.msra.mxu0 %v2291_v9 }
 0x10a   : > { %2320 = vmatpush3.bf16.msra.mxu1 %v3056_v33 }
 0x10b   : > { %2322 = vmatprep.subr.bf16.mxu1 %v2321_v62 }
 0x10c   : > { %1233 = vmatmul.mubr.f32.vlgmr.msra.gmra.mrb[12].mxu0 %v2946_v43 }
 0x10d   : > { %1237 = vmatprep.mubr.f32.mxu0 %v2953_v18 }
 0x10e   : > { %2324 = vmatpush3.bf16.msra.mxu1 %v2321_v62 }
 0x110   : > { %1238 = vmatmul.mubr.f32.gmra.mrb[14].mxu0 %v2962_v26 }
 0x111   : > { %2067 = vmatmul.mubr.f32.vlgmr.msra.gmra.mrb[6].mxu1 %v2969_v11 }
 0x17f   : > { %v1737_v56 = vpop.f32.mrb[0].mxu0 }
 0x180   : > { %v1738_v63 = vpop.f32.mrb[1].mxu0 }
 0x181   : > { %v1739_v29 = vadd.f32 %v1738_v63, %v1737_v56 }
 0x183   : > { %v1740_v0 = vpop.f32.mrb[2].mxu0 }
 0x184   : > { %v1741_v1 = vpop.f32.mrb[3].mxu0  ;;  %v1963_v34 = vpop.f32.mrb[0].mxu1 }
 0x185   : > { %v1742_v10 = vadd.f32 %v1741_v1, %v1740_v0  ;;  %v633_v14 = vpop.f32.mrb[1].mxu1 }
 0x186   : > { %v634_v23 = vadd.f32 %v1739_v29, %v633_v14 }
 0x187   : > { %v639_v30 = vadd.f32 %v1963_v34, %v1742_v10 }
 0x19f   : > { %v1793_v31 = vpop.f32.mrb[4].mxu0 }
 0x1a0   : > { %v1794_v35 = vpop.f32.mrb[5].mxu0 }
 0x1a1   : > { %v1795_v43 = vadd.f32 %v1794_v35, %v1793_v31 }
 0x1a3   : > { %v1796_v22 = vpop.f32.mrb[6].mxu0 }
 0x1a4   : > { %v1797_v18 = vpop.f32.mrb[7].mxu0  ;;  %v1998_v39 = vpop.f32.mrb[2].mxu1 }
 0x1a5   : > { %v1798_v41 = vadd.f32 %v1797_v18, %v1796_v22  ;;  %v819_v26 = vpop.f32.mrb[3].mxu1 }
 0x1a6   : > { %v820_v49 = vadd.f32 %v1795_v43, %v819_v26 }
 0x1a7   : > { %v825_v11 = vadd.f32 %v1998_v39, %v1798_v41 }
 0x1a8   : > { %v828_v54 = vmax.f32 %v634_v23, %v820_v49 }
 0x1a9   : > { %v829_v50 = vmax.f32 %v639_v30, %v825_v11 }
 0x1bf   : > { %v1849_v51 = vpop.f32.mrb[8].mxu0 }
 0x1c0   : > { %v1850_v52 = vpop.f32.mrb[9].mxu0 }
 0x1c1   : > { %v1851_v5 = vadd.f32 %v1850_v52, %v1849_v51 }
 0x1c3   : > { %v1852_v24 = vpop.f32.mrb[10].mxu0 }
 0x1c4   : > { %v1853_v8 = vpop.f32.mrb[11].mxu0  ;;  %v2033_v17 = vpop.f32.mrb[4].mxu1 }
 0x1c5   : > { %v1854_v12 = vadd.f32 %v1853_v8, %v1852_v24  ;;  %v1121_v13 = vpop.f32.mrb[5].mxu1 }
 0x1c6   : > { %v1122_v42 = vadd.f32 %v1851_v5, %v1121_v13 }
 0x1c7   : > { %v1127_v55 = vadd.f32 %v2033_v17, %v1854_v12 }
 0x1c8   : > { %v1130_v15 = vmax.f32 %v828_v54, %v1122_v42 }
 0x1c9   : > { %v1131_v16 = vmax.f32 %v829_v50, %v1127_v55 }
 0x1df   : > { %v1905_v44 = vpop.f32.mrb[12].mxu0 }
 0x1e0   : > { %v1906_v27 = vpop.f32.mrb[13].mxu0 }
 0x1e1   : > { %v1907_v58 = vadd.f32 %v1906_v27, %v1905_v44 }
 0x1e3   : > { %v1908_v60 = vpop.f32.mrb[14].mxu0 }
 0x1e4   : > { %v1909_v37 = vpop.f32.mrb[15].mxu0  ;;  %v2068_v33 = vpop.f32.mrb[6].mxu1 }
 0x1e5   : > { %v1910_v47 = vadd.f32 %v1909_v37, %v1908_v60  ;;  %v1309_v40 = vpop.f32.mrb[7].mxu1 }
 0x1e6   : > { %v1310_v57 = vadd.f32 %v1907_v58, %v1309_v40 }
 0x1e7   : > { %v1315_v19 = vadd.f32 %v2068_v33, %v1910_v47 }
 0x1e8   : > { %v1318_v28 = vmax.f32 %v1130_v15, %v1310_v57 }
 0x1e9   : > { %v1319_v2 = vmax.f32 %v1131_v16, %v1315_v19 }
 0x1ea   : > { %v1330_v20 = vadd.f32 %v1323_v38, %v1318_v28 }
 0x1eb   : > { %v1331_v36 = vadd.f32 %v1328_v45, %v1319_v2 }
 0x1ec   : > { %vm1332_vm1 = vcmp.ge.f32.partialorder %v1330_v20, 0.0  ;;  %v1334_v3 = vmul.f32 0.01, %v1330_v20 }
 0x1ed   : > { %vm1333_vm2 = vcmp.ge.f32.partialorder %v1331_v36, 0.0  ;;  %v1335_v21 = vmul.f32 0.01, %v1331_v36 }
 0x1ee   : > { %v1336_v48 = vsel %vm1332_vm1, %v1330_v20, %v1334_v3 }
 0x1ef   : > { %1339 = vst.msk [vmem:[%s333_s22] sm:$0xff] %vm1338_vm0, %v1336_v48  ;;  %v1337_v59 = vsel %vm1333_vm2, %v1331_v36, %v1335_v21 }
 0x1f0   : > { %1340 = vst.msk [vmem:[%s333_s22 + $0x8] sm:$0xff] %vm1338_vm0, %v1337_v59 }
 0x1f1 PF: > { %s16_s25 = sadd.s32 1, %s2590_s25   ;;  %s3124_s21 = smov %s2582_s23 }
 0x1f2   : > { %p13_p7 = scmp.ge.s32.totalorder %s16_s25, 12   ;;  %s3125_s22 = smov %s2586_s24 }
 0x1f3   : > { %s3126_s23 = smov %s3129_s26  ;;  %s3127_s24 = smov %s3133_s27 }
 0x1f4   :  { %15 = sbr.rel (!%p13_p7) target bundleno = 3 (0x3), region = 131 }

</bundles_post_ra>
